<compile_context>
chip_gen: v6e
topology: v6e:2x2x1
jax: 0.10.0
libtpu: 0.0.40
codegen_flags: <defaults>
</compile_context>

<pallas_src>
import jax
import jax.numpy as jnp
from jax.experimental import pallas as pl
from jax.experimental.pallas import tpu as pltpu

_BF16 = jnp.bfloat16


def _derive_vmem_limit():
    # Per-generation VMEM budget (review item): 3/4 of physical capacity.
    try:
        return int(pltpu.get_tpu_info().vmem_capacity_bytes) * 3 // 4
    except Exception:
        return 32 * 1024 * 1024


_VMEM_LIMIT = _derive_vmem_limit()


# ----------------------------- small helpers -----------------------------

def _fold_bn(bn, eps=1e-5):
    gamma, beta, mean, var = bn
    scale = gamma / jnp.sqrt(var + eps)
    shift = beta - mean * scale
    return scale, shift


def _space_to_depth(x_nhwc):
    """(n, h, w, c) -> (n, h/2, w/2, 4c); channel order = (row-phase, col-phase, c)."""
    n, h, w, c = x_nhwc.shape
    x = x_nhwc.reshape(n, h // 2, 2, w // 2, 2, c)
    x = jnp.transpose(x, (0, 1, 3, 2, 4, 5))
    return x.reshape(n, h // 2, w // 2, 4 * c)


# ----------------------------- stem (conv1 + BN + ReLU) -----------------------------

def run_stem(x_nhwc, w_oihw, bn):
    """7x7 stride-2 pad-3 conv + folded BN + ReLU as ONE Pallas kernel.

    The padded input is space-to-depth'd on the host (one dense transform, no
    strided HBM copies); inside the kernel the conv is a single
    (M, taps*4*cin) @ (taps*4*cin, cout) matmul built from contiguous windows.
    """
    cout, cin, kh, kw = w_oihw.shape
    n, h, w, _ = x_nhwc.shape
    pad, stride = 3, 2
    ho = (h + 2 * pad - kh) // stride + 1
    wo = (w + 2 * pad - kw) // stride + 1

    xp = jnp.pad(x_nhwc, ((0, 0), (pad, pad), (pad, pad), (0, 0)))
    xs = _space_to_depth(xp).astype(_BF16)              # (n, hb, wb, 4*cin)
    hb, wb, cph = xs.shape[1], xs.shape[2], xs.shape[3]

    t_blocks = (kh + 1) // 2                             # 4 block taps per axis
    ws = jnp.zeros((t_blocks, t_blocks, 2, 2, cin, cout), jnp.float32)
    for dy in range(kh):
        bi, py = divmod(dy, 2)
        for dx in range(kw):
            bj, px = divmod(dx, 2)
            ws = ws.at[bi, bj, py, px].set(w_oihw[:, :, dy, dx].T)
    wk = ws.reshape(t_blocks * t_blocks * 4 * cin, cout).astype(_BF16)

    scale, shift = _fold_bn(bn)
    sc = scale.reshape(1, cout).astype(jnp.float32)
    sh = shift.reshape(1, cout).astype(jnp.float32)

    taps = tuple((bi, bj) for bi in range(t_blocks) for bj in range(t_blocks))
    m = ho * wo

    def kernel(xs_ref, w_ref, s_ref, c_ref, o_ref, a_ref):
        xv = xs_ref[0]                                   # (hb, wb, cph)
        for t, (bi, bj) in enumerate(taps):
            a_ref[:, t * cph:(t + 1) * cph] = (
                xv[bi:bi + ho, bj:bj + wo, :].reshape(m, cph))
        y = jnp.dot(a_ref[...], w_ref[...], preferred_element_type=jnp.float32)
        o_ref[0] = jnp.maximum(y * s_ref[...] + c_ref[...], 0.0).astype(o_ref.dtype)

    out = pl.pallas_call(
        kernel,
        out_shape=jax.ShapeDtypeStruct((n, m, cout), _BF16),
        grid=(n,),
        in_specs=[pl.BlockSpec((1, hb, wb, cph), lambda b: (b, 0, 0, 0)),
                  pl.BlockSpec(wk.shape, lambda b: (0, 0)),
                  pl.BlockSpec(sc.shape, lambda b: (0, 0)),
                  pl.BlockSpec(sh.shape, lambda b: (0, 0))],
        out_specs=pl.BlockSpec((1, m, cout), lambda b: (b, 0, 0)),
        scratch_shapes=[pltpu.VMEM((m, len(taps) * cph), _BF16)],
        compiler_params=pltpu.CompilerParams(
            dimension_semantics=("parallel",), vmem_limit_bytes=_VMEM_LIMIT),
    )(xs, wk, sc, sh)
    return out.reshape(n, ho, wo, cout)


def maxpool_3x3_s2_p1(x):
    # Elementwise max of 9 shifted stride-2 slices; XLA fuses it (per review,
    # a Pallas launch would cost more than the compute here).
    xp = jnp.pad(x, ((0, 0), (1, 1), (1, 1), (0, 0)), constant_values=-jnp.inf)
    n, hp, wp, c = xp.shape
    ho = (hp - 3) // 2 + 1
    wo = (wp - 3) // 2 + 1
    out = None
    for dy in range(3):
        for dx in range(3):
            win = xp[:, dy:dy + 2 * ho:2, dx:dx + 2 * wo:2, :]
            out = win if out is None else jnp.maximum(out, win)
    return out


# ----------------------------- fused bottleneck -----------------------------

def run_bottleneck(x_flat, blk, *, h, w, stride):
    """One pallas_call per bottleneck: conv1(1x1)+BN+ReLU -> conv2(3x3,stride)
    +BN+ReLU -> conv3(1x1)+BN + residual/downsample + ReLU, all VMEM-resident.

    x_flat: (n, h*w, cin) bf16.  Returns (n, ho*wo, cout) bf16.
    """
    cin = blk['w1'].shape[1]
    planes = blk['w1'].shape[0]
    cout = blk['w3'].shape[0]
    has_down = 'wd' in blk

    s1, c1 = _fold_bn(blk['bn1'])
    s2, c2 = _fold_bn(blk['bn2'])
    s3, c3 = _fold_bn(blk['bn3'])
    sd = cd = None
    if has_down:
        sd, cd = _fold_bn(blk['bnd'])

    w1m = blk['w1'][:, :, 0, 0].T                          # (cin, planes)
    w3m = blk['w3'][:, :, 0, 0].T                          # (planes, cout)
    wdm = blk['wd'][:, :, 0, 0].T if has_down else None    # (cin, cout)

    if stride == 1:
        gh, gw = h, w
        x_in = x_flat
        w1k, s1v, c1v = w1m, s1, c1
        cy = planes
        w2k = jnp.transpose(blk['w2'], (2, 3, 1, 0)).reshape(9 * planes, planes)
        taps = tuple((dy, dx) for dy in range(3) for dx in range(3))
        pad_t = pad_l = pad_b = pad_r = 1
        down_cin = cin
    else:
        # Exact space-to-depth reformulation of the stride-2 path:
        #   conv1 (1x1)    -> block-diagonal weights on the s2d input,
        #   conv2 (3x3,s2) -> stride-1 2x2 conv with rearranged weights,
        #   downsample     -> contiguous lane slice (phase (0,0)) of the s2d input.
        gh, gw = h // 2, w // 2
        x_in = _space_to_depth(x_flat.reshape(-1, h, w, cin)).reshape(
            -1, gh * gw, 4 * cin)
        w1k = jnp.kron(jnp.eye(4, dtype=jnp.float32), w1m)   # (4cin, 4planes)
        s1v, c1v = jnp.tile(s1, 4), jnp.tile(c1, 4)
        cy = 4 * planes
        w2s = jnp.zeros((2, 2, 2, 2, planes, planes), jnp.float32)
        for dy in range(3):
            bi, py = divmod(dy + 1, 2)
            for dx in range(3):
                bj, px = divmod(dx + 1, 2)
                w2s = w2s.at[bi, bj, py, px].set(blk['w2'][:, :, dy, dx].T)
        w2k = w2s.reshape(16 * planes, planes)
        taps = tuple((bi, bj) for bi in range(2) for bj in range(2))
        pad_t = pad_l = 1
        pad_b = pad_r = 0
        down_cin = cin

    n = x_in.shape[0]
    m = gh * gw
    cx = x_in.shape[-1]

    inputs = [x_in.astype(_BF16), w1k.astype(_BF16), w2k.astype(_BF16),
              w3m.astype(_BF16)]
    specs = [pl.BlockSpec((1, m, cx), lambda b: (b, 0, 0)),
             pl.BlockSpec(w1k.shape, lambda b: (0, 0)),
             pl.BlockSpec(w2k.shape, lambda b: (0, 0)),
             pl.BlockSpec(w3m.shape, lambda b: (0, 0))]
    if has_down:
        inputs.append(wdm.astype(_BF16))
        specs.append(pl.BlockSpec(wdm.shape, lambda b: (0, 0)))
    vecs = [s1v, c1v, s2, c2, s3, c3] + ([sd, cd] if has_down else [])
    n_vec = len(vecs)
    for v in vecs:
        v2 = v.reshape(1, -1).astype(jnp.float32)
        inputs.append(v2)
        specs.append(pl.BlockSpec(v2.shape, lambda b: (0, 0)))
    n_w = 5 if has_down else 4

    def kernel(*refs):
        x_ref = refs[0]
        w1_ref, w2_ref, w3_ref = refs[1], refs[2], refs[3]
        wd_ref = refs[4] if has_down else None
        vec_refs = refs[n_w:n_w + n_vec]
        s1_ref, c1_ref, s2_ref, c2_ref, s3_ref, c3_ref = vec_refs[:6]
        o_ref = refs[-3]
        y1p_ref, a2_ref = refs[-2], refs[-1]

        x = x_ref[0]                                       # (m, cx) bf16
        # conv1 + BN1 + ReLU (f32 accumulate)
        y1 = jnp.dot(x, w1_ref[...], preferred_element_type=jnp.float32)
        y1 = jnp.maximum(y1 * s1_ref[...] + c1_ref[...], 0.0)
        # zero-pad into VMEM scratch, then concatenate tap windows in VMEM.
        y1p_ref[...] = jnp.zeros_like(y1p_ref)
        y1p_ref[pad_t:pad_t + gh, pad_l:pad_l + gw, :] = y1.reshape(gh, gw, cy)
        for t, (dy, dx) in enumerate(taps):
            win = y1p_ref[dy:dy + gh, dx:dx + gw, :]
            a2_ref[:, t * cy:(t + 1) * cy] = win.reshape(m, cy).astype(_BF16)
        # conv2 (single K = taps*cy matmul) + BN2 + ReLU
        y2 = jnp.dot(a2_ref[...], w2_ref[...], preferred_element_type=jnp.float32)
        y2 = jnp.maximum(y2 * s2_ref[...] + c2_ref[...], 0.0).astype(_BF16)
        # conv3 + BN3
        y3 = jnp.dot(y2, w3_ref[...], preferred_element_type=jnp.float32)
        y3 = y3 * s3_ref[...] + c3_ref[...]
        # identity / downsample (stride folded: lane slice of the s2d input)
        if has_down:
            sd_ref, cd_ref = vec_refs[6], vec_refs[7]
            idn = jnp.dot(x[:, :down_cin], wd_ref[...],
                          preferred_element_type=jnp.float32)
            idn = idn * sd_ref[...] + cd_ref[...]
        else:
            idn = x.astype(jnp.float32)
        o_ref[0] = jnp.maximum(y3 + idn, 0.0).astype(o_ref.dtype)

    return pl.pallas_call(
        kernel,
        out_shape=jax.ShapeDtypeStruct((n, m, cout), _BF16),
        grid=(n,),
        in_specs=specs,
        out_specs=pl.BlockSpec((1, m, cout), lambda b: (b, 0, 0)),
        scratch_shapes=[
            pltpu.VMEM((gh + pad_t + pad_b, gw + pad_l + pad_r, cy), jnp.float32),
            pltpu.VMEM((m, len(taps) * cy), _BF16)],
        compiler_params=pltpu.CompilerParams(
            dimension_semantics=("parallel",), vmem_limit_bytes=_VMEM_LIMIT),
    )(*inputs)


# ----------------------------- fused Gram + attention + mean -----------------------------

def run_gram_attention(stage_feats, attn_params, g):
    """Pooled Gram tokens for every stage + single-head attention + sequence
    mean, all in ONE pallas_call.  stage_feats: list of (B, HW_s, C_s) bf16."""
    wq, wk, wv, bq, bk, bv, wo, bo = attn_params
    e = g * g
    nb = stage_feats[0].shape[0]
    n_stage = len(stage_feats)
    hws = [int(f.shape[1]) for f in stage_feats]
    cs = [int(f.shape[2]) for f in stage_feats]
    scale = 1.0 / float(e) ** 0.5

    # PyTorch Linear: y = x @ W^T + b.  Fused QKV weights, passed once.
    w_qkv = jnp.concatenate([wq.T, wk.T, wv.T], axis=1).astype(_BF16)   # (e, 3e)
    b_qkv = jnp.concatenate([bq, bk, bv]).reshape(1, 3 * e).astype(jnp.float32)
    wo_t = wo.T.astype(_BF16)
    bo_v = bo.reshape(1, e).astype(jnp.float32)

    pools = []
    for c in cs:
        # TODO(synk): exact block-mean pooling of the Gram (== adaptive_avg_pool2d)
        # requires c % gram_matrix_size == 0 (true for ResNet50 stage widths).
        grp = c // g
        p = (jnp.arange(c)[:, None] // grp == jnp.arange(g)[None, :])
        pools.append((p.astype(jnp.float32) / grp).astype(_BF16))        # (c, g)

    def kernel(*refs):
        feat_refs = refs[:n_stage]
        pool_refs = refs[n_stage:2 * n_stage]
        wqkv_ref, bqkv_ref, wo_ref, bo_ref = refs[2 * n_stage:2 * n_stage + 4]
        o_ref = refs[2 * n_stage + 4]
        tok_refs = refs[2 * n_stage + 5:]

        # Pooled Gram, re-associated: G_pool = (F P)^T (F P) / HW.
        # Rows are built on the VPU (broadcast-multiply + sublane reduce).
        for si in range(n_stage):
            hw, c = hws[si], cs[si]
            x = feat_refs[si][...].reshape(nb * hw, c)
            fp = jnp.dot(x, pool_refs[si][...],
                         preferred_element_type=jnp.float32)             # (nb*hw, g)
            for bi in range(nb):
                fb = fp[bi * hw:(bi + 1) * hw, :]
                for i in range(g):
                    row = jnp.sum(fb * fb[:, i:i + 1], axis=0,
                                  keepdims=True) * (1.0 / hw)             # (1, g)
                    tok_refs[si][bi:bi + 1, i * g:(i + 1) * g] = row

        # Single-head attention over the stage sequence + mean (exact softmax).
        toks = [tok_refs[si][...].astype(_BF16) for si in range(n_stage)]
        qkv = [jnp.dot(t, wqkv_ref[...], preferred_element_type=jnp.float32)
               + bqkv_ref[...] for t in toks]
        qs = [a[:, :e] for a in qkv]
        ks = [a[:, e:2 * e] for a in qkv]
        vs = [a[:, 2 * e:] for a in qkv]
        ctx_sum = None
        for i in range(n_stage):
            scores = [jnp.sum(qs[i] * ks[j], axis=1, keepdims=True) * scale
                      for j in range(n_stage)]
            mx = scores[0]
            for s_ in scores[1:]:
                mx = jnp.maximum(mx, s_)
            exps = [jnp.exp(s_ - mx) for s_ in scores]
            den = exps[0]
            for ex in exps[1:]:
                den = den + ex
            ctx = (exps[0] / den) * vs[0]
            for j in range(1, n_stage):
                ctx = ctx + (exps[j] / den) * vs[j]
            ctx_sum = ctx if ctx_sum is None else ctx_sum + ctx
        ctx_mean = (ctx_sum * (1.0 / n_stage)).astype(_BF16)
        out = jnp.dot(ctx_mean, wo_ref[...],
                      preferred_element_type=jnp.float32) + bo_ref[...]
        o_ref[...] = out

    vspec = pl.BlockSpec(memory_space=pltpu.MemorySpace.VMEM)
    return pl.pallas_call(
        kernel,
        out_shape=jax.ShapeDtypeStruct((nb, e), jnp.float32),
        in_specs=[vspec] * (2 * n_stage + 4),
        out_specs=vspec,
        scratch_shapes=[pltpu.VMEM((nb, e), jnp.float32) for _ in range(n_stage)],
        compiler_params=pltpu.CompilerParams(vmem_limit_bytes=_VMEM_LIMIT),
    )(*stage_feats, *pools, w_qkv, b_qkv, wo_t, bo_v)


# ----------------------------- full forward -----------------------------

def truncated_resnet50_forward(x_nchw, params):
    g = params['gram_matrix_size']
    x = jnp.transpose(x_nchw, (0, 2, 3, 1)).astype(jnp.float32)   # NCHW -> NHWC
    n = x.shape[0]

    # children[0..3]: conv1 (7x7/2) + bn1 + relu (one Pallas kernel), maxpool (XLA).
    x = run_stem(x, params['conv1_w'], params['bn1'])             # (n, 16, 16, 8)
    x = maxpool_3x3_s2_p1(x)                                      # (n, 8, 8, 8)

    h, w = x.shape[1], x.shape[2]
    cur = x.reshape(n, h * w, x.shape[3])
    feats = []
    for layer_blocks, stride in zip(params['layers'], params['layer_strides']):
        for i, blk in enumerate(layer_blocks):
            s = stride if i == 0 else 1
            cur = run_bottleneck(cur, blk, h=h, w=w, stride=s)
            if s == 2:
                h //= 2
                w //= 2
        feats.append(cur)                                         # (n, h*w, cout)

    emb = run_gram_attention(feats, params['attn'], g)            # (n, g*g)
    # 5-wide classifier tail: plain JAX (lane-sparse; launch overhead > compute).
    logits = emb @ params['fc_w'].T + params['fc_b']
    return emb, logits


# ----------------------------- parameters -----------------------------

def make_params(seed=42, gram_matrix_size=8, num_classes=5):
    keys = iter(jax.random.split(jax.random.PRNGKey(seed), 128))

    def nrm(shape, s=0.1):
        return (s * jax.random.normal(next(keys), shape)).astype(jnp.float32)

    def bn(c):
        gamma = 1.0 + nrm((c,))
        beta = nrm((c,))
        mean = nrm((c,))
        var = 0.9 + 0.2 * jax.random.uniform(next(keys), (c,), jnp.float32)
        return (gamma, beta, mean, var)

    def bottleneck_params(cin, planes, cout, downsample):
        p = {'w1': nrm((planes, cin, 1, 1)), 'bn1': bn(planes),
             'w2': nrm((planes, planes, 3, 3)), 'bn2': bn(planes),
             'w3': nrm((cout, planes, 1, 1)), 'bn3': bn(cout)}
        if downsample:
            p['wd'] = nrm((cout, cin, 1, 1))
            p['bnd'] = bn(cout)
        return p

    e = gram_matrix_size * gram_matrix_size
    # Small ResNet50-like encoder truncated after layer2 (2 gram layers).
    params = {
        'conv1_w': nrm((8, 3, 7, 7)), 'bn1': bn(8),
        'layers': [
            [bottleneck_params(8, 8, 32, True)],    # "layer1" (stride 1)
            [bottleneck_params(32, 16, 64, True)],  # "layer2" (stride 2)
        ],
        'layer_strides': [1, 2],
        'gram_matrix_size': gram_matrix_size,
        'attn': (nrm((e, e)), nrm((e, e)), nrm((e, e)),
                 nrm((e,)), nrm((e,)), nrm((e,)),
                 nrm((e, e)), nrm((e,))),
        'fc_w': nrm((num_classes, e)), 'fc_b': nrm((num_classes,)),
    }
    return params


if __name__ == "__main__":
    params = make_params()
    x = jax.random.normal(jax.random.PRNGKey(0), (2, 3, 32, 32), jnp.float32)

    fwd = jax.jit(lambda inp: truncated_resnet50_forward(inp, params))
    emb, logits = fwd(x)
    jax.block_until_ready((emb, logits))

    assert emb.shape == (2, 64), emb.shape
    assert logits.shape == (2, 5), logits.shape
    assert bool(jnp.all(jnp.isfinite(emb))) and bool(jnp.all(jnp.isfinite(logits)))
    print("KERNEL_OK")
</pallas_src>

<mosaic_0001>
module attributes {stable_mosaic.version = 11 : i64} {
  func.func @kernel(%arg0: i32, %arg1: memref<1x19x19x12xbf16, #tpu.memory_space<vmem>>, %arg2: memref<192x8xbf16, #tpu.memory_space<vmem>>, %arg3: memref<1x8xf32, #tpu.memory_space<vmem>>, %arg4: memref<1x8xf32, #tpu.memory_space<vmem>>, %arg5: memref<1x256x8xbf16, #tpu.memory_space<vmem>>, %arg6: memref<256x192xbf16, #tpu.memory_space<vmem>>) attributes {dimension_semantics = [#tpu.dimension_semantics<parallel>], iteration_bounds = array<i64: 2>, scalar_prefetch = 0 : i64, scratch_operands = 1 : i64, tpu.core_type = #tpu.core_type<tc>, window_params = [{transform_indices = @transform_0, window_bounds = array<i64: 1, 19, 19, 12>}, {pipeline_mode = #tpu.pipeline_mode<synchronous>, transform_indices = @transform_1, window_bounds = array<i64: 192, 8>}, {pipeline_mode = #tpu.pipeline_mode<synchronous>, transform_indices = @transform_2, window_bounds = array<i64: 1, 8>}, {pipeline_mode = #tpu.pipeline_mode<synchronous>, transform_indices = @transform_3, window_bounds = array<i64: 1, 8>}, {transform_indices = @transform_4, window_bounds = array<i64: 1, 256, 8>}]} {
    %c0 = arith.constant 0 : index
    %c0_0 = arith.constant 0 : index
    %c0_1 = arith.constant 0 : index
    %c0_2 = arith.constant 0 : index
    %0 = vector.load %arg1[%c0, %c0_0, %c0_1, %c0_2] : memref<1x19x19x12xbf16, #tpu.memory_space<vmem>>, vector<1x19x19x12xbf16>
    %1 = vector.shape_cast %0 : vector<1x19x19x12xbf16> to vector<19x19x12xbf16>
    %2 = vector.extract_strided_slice %1 {offsets = [0, 0, 0], sizes = [16, 16, 12], strides = [1, 1, 1]} : vector<19x19x12xbf16> to vector<16x16x12xbf16>
    %3 = vector.shape_cast %2 : vector<16x16x12xbf16> to vector<256x12xbf16>
    %c0_3 = arith.constant 0 : index
    %c0_4 = arith.constant 0 : index
    %4 = vector.load %arg6[%c0_3, %c0_4] : memref<256x192xbf16, #tpu.memory_space<vmem>>, vector<256x12xbf16>
    tpu.vector_store %arg6[%c0_3, %c0_4], %3 {strides = array<i32>} : memref<256x192xbf16, #tpu.memory_space<vmem>>, vector<256x12xbf16>,
    %5 = vector.extract_strided_slice %1 {offsets = [0, 1, 0], sizes = [16, 16, 12], strides = [1, 1, 1]} : vector<19x19x12xbf16> to vector<16x16x12xbf16>
    %6 = vector.shape_cast %5 : vector<16x16x12xbf16> to vector<256x12xbf16>
    %c0_5 = arith.constant 0 : index
    %c12 = arith.constant 12 : index
    %7 = vector.load %arg6[%c0_5, %c12] : memref<256x192xbf16, #tpu.memory_space<vmem>>, vector<256x12xbf16>
    tpu.vector_store %arg6[%c0_5, %c12], %6 {strides = array<i32>} : memref<256x192xbf16, #tpu.memory_space<vmem>>, vector<256x12xbf16>,
    %8 = vector.extract_strided_slice %1 {offsets = [0, 2, 0], sizes = [16, 16, 12], strides = [1, 1, 1]} : vector<19x19x12xbf16> to vector<16x16x12xbf16>
    %9 = vector.shape_cast %8 : vector<16x16x12xbf16> to vector<256x12xbf16>
    %c0_6 = arith.constant 0 : index
    %c24 = arith.constant 24 : index
    %10 = vector.load %arg6[%c0_6, %c24] : memref<256x192xbf16, #tpu.memory_space<vmem>>, vector<256x12xbf16>
    tpu.vector_store %arg6[%c0_6, %c24], %9 {strides = array<i32>} : memref<256x192xbf16, #tpu.memory_space<vmem>>, vector<256x12xbf16>,
    %11 = vector.extract_strided_slice %1 {offsets = [0, 3, 0], sizes = [16, 16, 12], strides = [1, 1, 1]} : vector<19x19x12xbf16> to vector<16x16x12xbf16>
    %12 = vector.shape_cast %11 : vector<16x16x12xbf16> to vector<256x12xbf16>
    %c0_7 = arith.constant 0 : index
    %c36 = arith.constant 36 : index
    %13 = vector.load %arg6[%c0_7, %c36] : memref<256x192xbf16, #tpu.memory_space<vmem>>, vector<256x12xbf16>
    tpu.vector_store %arg6[%c0_7, %c36], %12 {strides = array<i32>} : memref<256x192xbf16, #tpu.memory_space<vmem>>, vector<256x12xbf16>,
    %14 = vector.extract_strided_slice %1 {offsets = [1, 0, 0], sizes = [16, 16, 12], strides = [1, 1, 1]} : vector<19x19x12xbf16> to vector<16x16x12xbf16>
    %15 = vector.shape_cast %14 : vector<16x16x12xbf16> to vector<256x12xbf16>
    %c0_8 = arith.constant 0 : index
    %c48 = arith.constant 48 : index
    %16 = vector.load %arg6[%c0_8, %c48] : memref<256x192xbf16, #tpu.memory_space<vmem>>, vector<256x12xbf16>
    tpu.vector_store %arg6[%c0_8, %c48], %15 {strides = array<i32>} : memref<256x192xbf16, #tpu.memory_space<vmem>>, vector<256x12xbf16>,
    %17 = vector.extract_strided_slice %1 {offsets = [1, 1, 0], sizes = [16, 16, 12], strides = [1, 1, 1]} : vector<19x19x12xbf16> to vector<16x16x12xbf16>
    %18 = vector.shape_cast %17 : vector<16x16x12xbf16> to vector<256x12xbf16>
    %c0_9 = arith.constant 0 : index
    %c60 = arith.constant 60 : index
    %19 = vector.load %arg6[%c0_9, %c60] : memref<256x192xbf16, #tpu.memory_space<vmem>>, vector<256x12xbf16>
    tpu.vector_store %arg6[%c0_9, %c60], %18 {strides = array<i32>} : memref<256x192xbf16, #tpu.memory_space<vmem>>, vector<256x12xbf16>,
    %20 = vector.extract_strided_slice %1 {offsets = [1, 2, 0], sizes = [16, 16, 12], strides = [1, 1, 1]} : vector<19x19x12xbf16> to vector<16x16x12xbf16>
    %21 = vector.shape_cast %20 : vector<16x16x12xbf16> to vector<256x12xbf16>
    %c0_10 = arith.constant 0 : index
    %c72 = arith.constant 72 : index
    %22 = vector.load %arg6[%c0_10, %c72] : memref<256x192xbf16, #tpu.memory_space<vmem>>, vector<256x12xbf16>
    tpu.vector_store %arg6[%c0_10, %c72], %21 {strides = array<i32>} : memref<256x192xbf16, #tpu.memory_space<vmem>>, vector<256x12xbf16>,
    %23 = vector.extract_strided_slice %1 {offsets = [1, 3, 0], sizes = [16, 16, 12], strides = [1, 1, 1]} : vector<19x19x12xbf16> to vector<16x16x12xbf16>
    %24 = vector.shape_cast %23 : vector<16x16x12xbf16> to vector<256x12xbf16>
    %c0_11 = arith.constant 0 : index
    %c84 = arith.constant 84 : index
    %25 = vector.load %arg6[%c0_11, %c84] : memref<256x192xbf16, #tpu.memory_space<vmem>>, vector<256x12xbf16>
    tpu.vector_store %arg6[%c0_11, %c84], %24 {strides = array<i32>} : memref<256x192xbf16, #tpu.memory_space<vmem>>, vector<256x12xbf16>,
    %26 = vector.extract_strided_slice %1 {offsets = [2, 0, 0], sizes = [16, 16, 12], strides = [1, 1, 1]} : vector<19x19x12xbf16> to vector<16x16x12xbf16>
    %27 = vector.shape_cast %26 : vector<16x16x12xbf16> to vector<256x12xbf16>
    %c0_12 = arith.constant 0 : index
    %c96 = arith.constant 96 : index
    %28 = vector.load %arg6[%c0_12, %c96] : memref<256x192xbf16, #tpu.memory_space<vmem>>, vector<256x12xbf16>
    tpu.vector_store %arg6[%c0_12, %c96], %27 {strides = array<i32>} : memref<256x192xbf16, #tpu.memory_space<vmem>>, vector<256x12xbf16>,
    %29 = vector.extract_strided_slice %1 {offsets = [2, 1, 0], sizes = [16, 16, 12], strides = [1, 1, 1]} : vector<19x19x12xbf16> to vector<16x16x12xbf16>
    %30 = vector.shape_cast %29 : vector<16x16x12xbf16> to vector<256x12xbf16>
    %c0_13 = arith.constant 0 : index
    %c108 = arith.constant 108 : index
    %31 = vector.load %arg6[%c0_13, %c108] : memref<256x192xbf16, #tpu.memory_space<vmem>>, vector<256x12xbf16>
    tpu.vector_store %arg6[%c0_13, %c108], %30 {strides = array<i32>} : memref<256x192xbf16, #tpu.memory_space<vmem>>, vector<256x12xbf16>,
    %32 = vector.extract_strided_slice %1 {offsets = [2, 2, 0], sizes = [16, 16, 12], strides = [1, 1, 1]} : vector<19x19x12xbf16> to vector<16x16x12xbf16>
    %33 = vector.shape_cast %32 : vector<16x16x12xbf16> to vector<256x12xbf16>
    %c0_14 = arith.constant 0 : index
    %c120 = arith.constant 120 : index
    %34 = vector.load %arg6[%c0_14, %c120] : memref<256x192xbf16, #tpu.memory_space<vmem>>, vector<256x12xbf16>
    tpu.vector_store %arg6[%c0_14, %c120], %33 {strides = array<i32>} : memref<256x192xbf16, #tpu.memory_space<vmem>>, vector<256x12xbf16>,
    %35 = vector.extract_strided_slice %1 {offsets = [2, 3, 0], sizes = [16, 16, 12], strides = [1, 1, 1]} : vector<19x19x12xbf16> to vector<16x16x12xbf16>
    %36 = vector.shape_cast %35 : vector<16x16x12xbf16> to vector<256x12xbf16>
    %c0_15 = arith.constant 0 : index
    %c132 = arith.constant 132 : index
    %37 = vector.load %arg6[%c0_15, %c132] : memref<256x192xbf16, #tpu.memory_space<vmem>>, vector<256x12xbf16>
    tpu.vector_store %arg6[%c0_15, %c132], %36 {strides = array<i32>} : memref<256x192xbf16, #tpu.memory_space<vmem>>, vector<256x12xbf16>,
    %38 = vector.extract_strided_slice %1 {offsets = [3, 0, 0], sizes = [16, 16, 12], strides = [1, 1, 1]} : vector<19x19x12xbf16> to vector<16x16x12xbf16>
    %39 = vector.shape_cast %38 : vector<16x16x12xbf16> to vector<256x12xbf16>
    %c0_16 = arith.constant 0 : index
    %c144 = arith.constant 144 : index
    %40 = vector.load %arg6[%c0_16, %c144] : memref<256x192xbf16, #tpu.memory_space<vmem>>, vector<256x12xbf16>
    tpu.vector_store %arg6[%c0_16, %c144], %39 {strides = array<i32>} : memref<256x192xbf16, #tpu.memory_space<vmem>>, vector<256x12xbf16>,
    %41 = vector.extract_strided_slice %1 {offsets = [3, 1, 0], sizes = [16, 16, 12], strides = [1, 1, 1]} : vector<19x19x12xbf16> to vector<16x16x12xbf16>
    %42 = vector.shape_cast %41 : vector<16x16x12xbf16> to vector<256x12xbf16>
    %c0_17 = arith.constant 0 : index
    %c156 = arith.constant 156 : index
    %43 = vector.load %arg6[%c0_17, %c156] : memref<256x192xbf16, #tpu.memory_space<vmem>>, vector<256x12xbf16>
    tpu.vector_store %arg6[%c0_17, %c156], %42 {strides = array<i32>} : memref<256x192xbf16, #tpu.memory_space<vmem>>, vector<256x12xbf16>,
    %44 = vector.extract_strided_slice %1 {offsets = [3, 2, 0], sizes = [16, 16, 12], strides = [1, 1, 1]} : vector<19x19x12xbf16> to vector<16x16x12xbf16>
    %45 = vector.shape_cast %44 : vector<16x16x12xbf16> to vector<256x12xbf16>
    %c0_18 = arith.constant 0 : index
    %c168 = arith.constant 168 : index
    %46 = vector.load %arg6[%c0_18, %c168] : memref<256x192xbf16, #tpu.memory_space<vmem>>, vector<256x12xbf16>
    tpu.vector_store %arg6[%c0_18, %c168], %45 {strides = array<i32>} : memref<256x192xbf16, #tpu.memory_space<vmem>>, vector<256x12xbf16>,
    %47 = vector.extract_strided_slice %1 {offsets = [3, 3, 0], sizes = [16, 16, 12], strides = [1, 1, 1]} : vector<19x19x12xbf16> to vector<16x16x12xbf16>
    %48 = vector.shape_cast %47 : vector<16x16x12xbf16> to vector<256x12xbf16>
    %c0_19 = arith.constant 0 : index
    %c180 = arith.constant 180 : index
    %49 = vector.load %arg6[%c0_19, %c180] : memref<256x192xbf16, #tpu.memory_space<vmem>>, vector<256x12xbf16>
    tpu.vector_store %arg6[%c0_19, %c180], %48 {strides = array<i32>} : memref<256x192xbf16, #tpu.memory_space<vmem>>, vector<256x12xbf16>,
    %c0_20 = arith.constant 0 : index
    %c0_21 = arith.constant 0 : index
    %50 = vector.load %arg6[%c0_20, %c0_21] : memref<256x192xbf16, #tpu.memory_space<vmem>>, vector<256x192xbf16>
    %c0_22 = arith.constant 0 : index
    %c0_23 = arith.constant 0 : index
    %51 = vector.load %arg2[%c0_22, %c0_23] : memref<192x8xbf16, #tpu.memory_space<vmem>>, vector<192x8xbf16>
    %cst = arith.constant dense<0.000000e+00> : vector<256x8xf32>
    %52 = tpu.matmul %50, %51, %cst {dimension_numbers = #tpu.dot_dimension_numbers<[1], [0], [0], [1], [0, 0, 1, 1], [], []>} : vector<256x192xbf16>, vector<192x8xbf16>, vector<256x8xf32> -> vector<256x8xf32>
    %c0_24 = arith.constant 0 : index
    %c0_25 = arith.constant 0 : index
    %53 = vector.load %arg3[%c0_24, %c0_25] : memref<1x8xf32, #tpu.memory_space<vmem>>, vector<1x8xf32>
    %54 = vector.broadcast %53 : vector<1x8xf32> to vector<256x8xf32>
    %55 = arith.mulf %52, %54 : vector<256x8xf32>
    %c0_26 = arith.constant 0 : index
    %c0_27 = arith.constant 0 : index
    %56 = vector.load %arg4[%c0_26, %c0_27] : memref<1x8xf32, #tpu.memory_space<vmem>>, vector<1x8xf32>
    %57 = vector.broadcast %56 : vector<1x8xf32> to vector<256x8xf32>
    %58 = arith.addf %55, %57 : vector<256x8xf32>
    %cst_28 = arith.constant 0.000000e+00 : f32
    %59 = vector.broadcast %cst_28 : f32 to vector<256x8xf32>
    %60 = arith.maximumf %58, %59 : vector<256x8xf32>
    %61 = arith.truncf %60 : vector<256x8xf32> to vector<256x8xbf16>
    %c0_29 = arith.constant 0 : index
    %c0_30 = arith.constant 0 : index
    %c0_31 = arith.constant 0 : index
    %62 = vector.load %arg5[%c0_29, %c0_30, %c0_31] : memref<1x256x8xbf16, #tpu.memory_space<vmem>>, vector<1x256x8xbf16>
    %63 = vector.shape_cast %62 : vector<1x256x8xbf16> to vector<256x8xbf16>
    %64 = vector.shape_cast %61 : vector<256x8xbf16> to vector<1x256x8xbf16>
    tpu.vector_store %arg5[%c0_29, %c0_30, %c0_31], %64 {strides = array<i32>} : memref<1x256x8xbf16, #tpu.memory_space<vmem>>, vector<1x256x8xbf16>,
    return
  }
  func.func @transform_0(%arg0: i32) -> (i32, i32, i32, i32) {
    %c0_i32 = arith.constant 0 : i32
    %c0_i32_0 = arith.constant 0 : i32
    %c0_i32_1 = arith.constant 0 : i32
    %c0_i32_2 = arith.constant 0 : i32
    return %arg0, %c0_i32, %c0_i32_0, %c0_i32_1 : i32, i32, i32, i32
  }
  func.func @transform_1(%arg0: i32) -> (i32, i32) {
    %c0_i32 = arith.constant 0 : i32
    %c0_i32_0 = arith.constant 0 : i32
    %c0_i32_1 = arith.constant 0 : i32
    return %c0_i32, %c0_i32_0 : i32, i32
  }
  func.func @transform_2(%arg0: i32) -> (i32, i32) {
    %c0_i32 = arith.constant 0 : i32
    %c0_i32_0 = arith.constant 0 : i32
    %c0_i32_1 = arith.constant 0 : i32
    return %c0_i32, %c0_i32_0 : i32, i32
  }
  func.func @transform_3(%arg0: i32) -> (i32, i32) {
    %c0_i32 = arith.constant 0 : i32
    %c0_i32_0 = arith.constant 0 : i32
    %c0_i32_1 = arith.constant 0 : i32
    return %c0_i32, %c0_i32_0 : i32, i32
  }
  func.func @transform_4(%arg0: i32) -> (i32, i32, i32) {
    %c0_i32 = arith.constant 0 : i32
    %c0_i32_0 = arith.constant 0 : i32
    %c0_i32_1 = arith.constant 0 : i32
    return %arg0, %c0_i32, %c0_i32_0 : i32, i32, i32
  }
}

module attributes {stable_mosaic.version = 11 : i64} {
  func.func @kernel(%arg0: i32, %arg1: memref<1x64x8xbf16, #tpu.memory_space<vmem>>, %arg2: memref<8x8xbf16, #tpu.memory_space<vmem>>, %arg3: memref<72x8xbf16, #tpu.memory_space<vmem>>, %arg4: memref<8x32xbf16, #tpu.memory_space<vmem>>, %arg5: memref<8x32xbf16, #tpu.memory_space<vmem>>, %arg6: memref<1x8xf32, #tpu.memory_space<vmem>>, %arg7: memref<1x8xf32, #tpu.memory_space<vmem>>, %arg8: memref<1x8xf32, #tpu.memory_space<vmem>>, %arg9: memref<1x8xf32, #tpu.memory_space<vmem>>, %arg10: memref<1x32xf32, #tpu.memory_space<vmem>>, %arg11: memref<1x32xf32, #tpu.memory_space<vmem>>, %arg12: memref<1x32xf32, #tpu.memory_space<vmem>>, %arg13: memref<1x32xf32, #tpu.memory_space<vmem>>, %arg14: memref<1x64x32xbf16, #tpu.memory_space<vmem>>, %arg15: memref<10x10x8xf32, #tpu.memory_space<vmem>>, %arg16: memref<64x72xbf16, #tpu.memory_space<vmem>>) attributes {dimension_semantics = [#tpu.dimension_semantics<parallel>], iteration_bounds = array<i64: 2>, scalar_prefetch = 0 : i64, scratch_operands = 2 : i64, tpu.core_type = #tpu.core_type<tc>, window_params = [{transform_indices = @transform_0, window_bounds = array<i64: 1, 64, 8>}, {pipeline_mode = #tpu.pipeline_mode<synchronous>, transform_indices = @transform_1, window_bounds = array<i64: 8, 8>}, {pipeline_mode = #tpu.pipeline_mode<synchronous>, transform_indices = @transform_2, window_bounds = array<i64: 72, 8>}, {pipeline_mode = #tpu.pipeline_mode<synchronous>, transform_indices = @transform_3, window_bounds = array<i64: 8, 32>}, {pipeline_mode = #tpu.pipeline_mode<synchronous>, transform_indices = @transform_4, window_bounds = array<i64: 8, 32>}, {pipeline_mode = #tpu.pipeline_mode<synchronous>, transform_indices = @transform_5, window_bounds = array<i64: 1, 8>}, {pipeline_mode = #tpu.pipeline_mode<synchronous>, transform_indices = @transform_6, window_bounds = array<i64: 1, 8>}, {pipeline_mode = #tpu.pipeline_mode<synchronous>, transform_indices = @transform_7, window_bounds = array<i64: 1, 8>}, {pipeline_mode = #tpu.pipeline_mode<synchronous>, transform_indices = @transform_8, window_bounds = array<i64: 1, 8>}, {pipeline_mode = #tpu.pipeline_mode<synchronous>, transform_indices = @transform_9, window_bounds = array<i64: 1, 32>}, {pipeline_mode = #tpu.pipeline_mode<synchronous>, transform_indices = @transform_10, window_bounds = array<i64: 1, 32>}, {pipeline_mode = #tpu.pipeline_mode<synchronous>, transform_indices = @transform_11, window_bounds = array<i64: 1, 32>}, {pipeline_mode = #tpu.pipeline_mode<synchronous>, transform_indices = @transform_12, window_bounds = array<i64: 1, 32>}, {transform_indices = @transform_13, window_bounds = array<i64: 1, 64, 32>}]} {
    %c0 = arith.constant 0 : index
    %c0_0 = arith.constant 0 : index
    %c0_1 = arith.constant 0 : index
    %0 = vector.load %arg1[%c0, %c0_0, %c0_1] : memref<1x64x8xbf16, #tpu.memory_space<vmem>>, vector<1x64x8xbf16>
    %1 = vector.shape_cast %0 : vector<1x64x8xbf16> to vector<64x8xbf16>
    %c0_2 = arith.constant 0 : index
    %c0_3 = arith.constant 0 : index
    %2 = vector.load %arg2[%c0_2, %c0_3] : memref<8x8xbf16, #tpu.memory_space<vmem>>, vector<8x8xbf16>
    %cst = arith.constant dense<0.000000e+00> : vector<64x8xf32>
    %3 = tpu.matmul %1, %2, %cst {dimension_numbers = #tpu.dot_dimension_numbers<[1], [0], [0], [1], [0, 0, 1, 1], [], []>} : vector<64x8xbf16>, vector<8x8xbf16>, vector<64x8xf32> -> vector<64x8xf32>
    %c0_4 = arith.constant 0 : index
    %c0_5 = arith.constant 0 : index
    %4 = vector.load %arg6[%c0_4, %c0_5] : memref<1x8xf32, #tpu.memory_space<vmem>>, vector<1x8xf32>
    %5 = vector.broadcast %4 : vector<1x8xf32> to vector<64x8xf32>
    %6 = arith.mulf %3, %5 : vector<64x8xf32>
    %c0_6 = arith.constant 0 : index
    %c0_7 = arith.constant 0 : index
    %7 = vector.load %arg7[%c0_6, %c0_7] : memref<1x8xf32, #tpu.memory_space<vmem>>, vector<1x8xf32>
    %8 = vector.broadcast %7 : vector<1x8xf32> to vector<64x8xf32>
    %9 = arith.addf %6, %8 : vector<64x8xf32>
    %cst_8 = arith.constant 0.000000e+00 : f32
    %10 = vector.broadcast %cst_8 : f32 to vector<64x8xf32>
    %11 = arith.maximumf %9, %10 : vector<64x8xf32>
    %cst_9 = arith.constant 0.000000e+00 : f32
    %12 = vector.broadcast %cst_9 : f32 to vector<10x10x8xf32>
    %c0_10 = arith.constant 0 : index
    %c0_11 = arith.constant 0 : index
    %c0_12 = arith.constant 0 : index
    %13 = vector.load %arg15[%c0_10, %c0_11, %c0_12] : memref<10x10x8xf32, #tpu.memory_space<vmem>>, vector<10x10x8xf32>
    tpu.vector_store %arg15[%c0_10, %c0_11, %c0_12], %12 {strides = array<i32>} : memref<10x10x8xf32, #tpu.memory_space<vmem>>, vector<10x10x8xf32>,
    %14 = vector.shape_cast %11 : vector<64x8xf32> to vector<8x8x8xf32>
    %c1 = arith.constant 1 : index
    %c1_13 = arith.constant 1 : index
    %c0_14 = arith.constant 0 : index
    %15 = vector.load %arg15[%c1, %c1_13, %c0_14] : memref<10x10x8xf32, #tpu.memory_space<vmem>>, vector<8x8x8xf32>
    tpu.vector_store %arg15[%c1, %c1_13, %c0_14], %14 {strides = array<i32>} : memref<10x10x8xf32, #tpu.memory_space<vmem>>, vector<8x8x8xf32>,
    %c0_15 = arith.constant 0 : index
    %c0_16 = arith.constant 0 : index
    %c0_17 = arith.constant 0 : index
    %16 = vector.load %arg15[%c0_15, %c0_16, %c0_17] : memref<10x10x8xf32, #tpu.memory_space<vmem>>, vector<8x8x8xf32>
    %17 = vector.shape_cast %16 : vector<8x8x8xf32> to vector<64x8xf32>
    %18 = arith.truncf %17 : vector<64x8xf32> to vector<64x8xbf16>
    %c0_18 = arith.constant 0 : index
    %c0_19 = arith.constant 0 : index
    %19 = vector.load %arg16[%c0_18, %c0_19] : memref<64x72xbf16, #tpu.memory_space<vmem>>, vector<64x8xbf16>
    tpu.vector_store %arg16[%c0_18, %c0_19], %18 {strides = array<i32>} : memref<64x72xbf16, #tpu.memory_space<vmem>>, vector<64x8xbf16>,
    %c0_20 = arith.constant 0 : index
    %c1_21 = arith.constant 1 : index
    %c0_22 = arith.constant 0 : index
    %20 = vector.load %arg15[%c0_20, %c1_21, %c0_22] : memref<10x10x8xf32, #tpu.memory_space<vmem>>, vector<8x8x8xf32>
    %21 = vector.shape_cast %20 : vector<8x8x8xf32> to vector<64x8xf32>
    %22 = arith.truncf %21 : vector<64x8xf32> to vector<64x8xbf16>
    %c0_23 = arith.constant 0 : index
    %c8 = arith.constant 8 : index
    %23 = vector.load %arg16[%c0_23, %c8] : memref<64x72xbf16, #tpu.memory_space<vmem>>, vector<64x8xbf16>
    tpu.vector_store %arg16[%c0_23, %c8], %22 {strides = array<i32>} : memref<64x72xbf16, #tpu.memory_space<vmem>>, vector<64x8xbf16>,
    %c0_24 = arith.constant 0 : index
    %c2 = arith.constant 2 : index
    %c0_25 = arith.constant 0 : index
    %24 = vector.load %arg15[%c0_24, %c2, %c0_25] : memref<10x10x8xf32, #tpu.memory_space<vmem>>, vector<8x8x8xf32>
    %25 = vector.shape_cast %24 : vector<8x8x8xf32> to vector<64x8xf32>
    %26 = arith.truncf %25 : vector<64x8xf32> to vector<64x8xbf16>
    %c0_26 = arith.constant 0 : index
    %c16 = arith.constant 16 : index
    %27 = vector.load %arg16[%c0_26, %c16] : memref<64x72xbf16, #tpu.memory_space<vmem>>, vector<64x8xbf16>
    tpu.vector_store %arg16[%c0_26, %c16], %26 {strides = array<i32>} : memref<64x72xbf16, #tpu.memory_space<vmem>>, vector<64x8xbf16>,
    %c1_27 = arith.constant 1 : index
    %c0_28 = arith.constant 0 : index
    %c0_29 = arith.constant 0 : index
    %28 = vector.load %arg15[%c1_27, %c0_28, %c0_29] : memref<10x10x8xf32, #tpu.memory_space<vmem>>, vector<8x8x8xf32>
    %29 = vector.shape_cast %28 : vector<8x8x8xf32> to vector<64x8xf32>
    %30 = arith.truncf %29 : vector<64x8xf32> to vector<64x8xbf16>
    %c0_30 = arith.constant 0 : index
    %c24 = arith.constant 24 : index
    %31 = vector.load %arg16[%c0_30, %c24] : memref<64x72xbf16, #tpu.memory_space<vmem>>, vector<64x8xbf16>
    tpu.vector_store %arg16[%c0_30, %c24], %30 {strides = array<i32>} : memref<64x72xbf16, #tpu.memory_space<vmem>>, vector<64x8xbf16>,
    %c1_31 = arith.constant 1 : index
    %c1_32 = arith.constant 1 : index
    %c0_33 = arith.constant 0 : index
    %32 = vector.load %arg15[%c1_31, %c1_32, %c0_33] : memref<10x10x8xf32, #tpu.memory_space<vmem>>, vector<8x8x8xf32>
    %33 = vector.shape_cast %32 : vector<8x8x8xf32> to vector<64x8xf32>
    %34 = arith.truncf %33 : vector<64x8xf32> to vector<64x8xbf16>
    %c0_34 = arith.constant 0 : index
    %c32 = arith.constant 32 : index
    %35 = vector.load %arg16[%c0_34, %c32] : memref<64x72xbf16, #tpu.memory_space<vmem>>, vector<64x8xbf16>
    tpu.vector_store %arg16[%c0_34, %c32], %34 {strides = array<i32>} : memref<64x72xbf16, #tpu.memory_space<vmem>>, vector<64x8xbf16>,
    %c1_35 = arith.constant 1 : index
    %c2_36 = arith.constant 2 : index
    %c0_37 = arith.constant 0 : index
    %36 = vector.load %arg15[%c1_35, %c2_36, %c0_37] : memref<10x10x8xf32, #tpu.memory_space<vmem>>, vector<8x8x8xf32>
    %37 = vector.shape_cast %36 : vector<8x8x8xf32> to vector<64x8xf32>
    %38 = arith.truncf %37 : vector<64x8xf32> to vector<64x8xbf16>
    %c0_38 = arith.constant 0 : index
    %c40 = arith.constant 40 : index
    %39 = vector.load %arg16[%c0_38, %c40] : memref<64x72xbf16, #tpu.memory_space<vmem>>, vector<64x8xbf16>
    tpu.vector_store %arg16[%c0_38, %c40], %38 {strides = array<i32>} : memref<64x72xbf16, #tpu.memory_space<vmem>>, vector<64x8xbf16>,
    %c2_39 = arith.constant 2 : index
    %c0_40 = arith.constant 0 : index
    %c0_41 = arith.constant 0 : index
    %40 = vector.load %arg15[%c2_39, %c0_40, %c0_41] : memref<10x10x8xf32, #tpu.memory_space<vmem>>, vector<8x8x8xf32>
    %41 = vector.shape_cast %40 : vector<8x8x8xf32> to vector<64x8xf32>
    %42 = arith.truncf %41 : vector<64x8xf32> to vector<64x8xbf16>
    %c0_42 = arith.constant 0 : index
    %c48 = arith.constant 48 : index
    %43 = vector.load %arg16[%c0_42, %c48] : memref<64x72xbf16, #tpu.memory_space<vmem>>, vector<64x8xbf16>
    tpu.vector_store %arg16[%c0_42, %c48], %42 {strides = array<i32>} : memref<64x72xbf16, #tpu.memory_space<vmem>>, vector<64x8xbf16>,
    %c2_43 = arith.constant 2 : index
    %c1_44 = arith.constant 1 : index
    %c0_45 = arith.constant 0 : index
    %44 = vector.load %arg15[%c2_43, %c1_44, %c0_45] : memref<10x10x8xf32, #tpu.memory_space<vmem>>, vector<8x8x8xf32>
    %45 = vector.shape_cast %44 : vector<8x8x8xf32> to vector<64x8xf32>
    %46 = arith.truncf %45 : vector<64x8xf32> to vector<64x8xbf16>
    %c0_46 = arith.constant 0 : index
    %c56 = arith.constant 56 : index
    %47 = vector.load %arg16[%c0_46, %c56] : memref<64x72xbf16, #tpu.memory_space<vmem>>, vector<64x8xbf16>
    tpu.vector_store %arg16[%c0_46, %c56], %46 {strides = array<i32>} : memref<64x72xbf16, #tpu.memory_space<vmem>>, vector<64x8xbf16>,
    %c2_47 = arith.constant 2 : index
    %c2_48 = arith.constant 2 : index
    %c0_49 = arith.constant 0 : index
    %48 = vector.load %arg15[%c2_47, %c2_48, %c0_49] : memref<10x10x8xf32, #tpu.memory_space<vmem>>, vector<8x8x8xf32>
    %49 = vector.shape_cast %48 : vector<8x8x8xf32> to vector<64x8xf32>
    %50 = arith.truncf %49 : vector<64x8xf32> to vector<64x8xbf16>
    %c0_50 = arith.constant 0 : index
    %c64 = arith.constant 64 : index
    %51 = vector.load %arg16[%c0_50, %c64] : memref<64x72xbf16, #tpu.memory_space<vmem>>, vector<64x8xbf16>
    tpu.vector_store %arg16[%c0_50, %c64], %50 {strides = array<i32>} : memref<64x72xbf16, #tpu.memory_space<vmem>>, vector<64x8xbf16>,
    %c0_51 = arith.constant 0 : index
    %c0_52 = arith.constant 0 : index
    %52 = vector.load %arg16[%c0_51, %c0_52] : memref<64x72xbf16, #tpu.memory_space<vmem>>, vector<64x72xbf16>
    %c0_53 = arith.constant 0 : index
    %c0_54 = arith.constant 0 : index
    %53 = vector.load %arg3[%c0_53, %c0_54] : memref<72x8xbf16, #tpu.memory_space<vmem>>, vector<72x8xbf16>
    %cst_55 = arith.constant dense<0.000000e+00> : vector<64x8xf32>
    %54 = tpu.matmul %52, %53, %cst_55 {dimension_numbers = #tpu.dot_dimension_numbers<[1], [0], [0], [1], [0, 0, 1, 1], [], []>} : vector<64x72xbf16>, vector<72x8xbf16>, vector<64x8xf32> -> vector<64x8xf32>
    %c0_56 = arith.constant 0 : index
    %c0_57 = arith.constant 0 : index
    %55 = vector.load %arg8[%c0_56, %c0_57] : memref<1x8xf32, #tpu.memory_space<vmem>>, vector<1x8xf32>
    %56 = vector.broadcast %55 : vector<1x8xf32> to vector<64x8xf32>
    %57 = arith.mulf %54, %56 : vector<64x8xf32>
    %c0_58 = arith.constant 0 : index
    %c0_59 = arith.constant 0 : index
    %58 = vector.load %arg9[%c0_58, %c0_59] : memref<1x8xf32, #tpu.memory_space<vmem>>, vector<1x8xf32>
    %59 = vector.broadcast %58 : vector<1x8xf32> to vector<64x8xf32>
    %60 = arith.addf %57, %59 : vector<64x8xf32>
    %cst_60 = arith.constant 0.000000e+00 : f32
    %61 = vector.broadcast %cst_60 : f32 to vector<64x8xf32>
    %62 = arith.maximumf %60, %61 : vector<64x8xf32>
    %63 = arith.truncf %62 : vector<64x8xf32> to vector<64x8xbf16>
    %c0_61 = arith.constant 0 : index
    %c0_62 = arith.constant 0 : index
    %64 = vector.load %arg4[%c0_61, %c0_62] : memref<8x32xbf16, #tpu.memory_space<vmem>>, vector<8x32xbf16>
    %cst_63 = arith.constant dense<0.000000e+00> : vector<64x32xf32>
    %65 = tpu.matmul %63, %64, %cst_63 {dimension_numbers = #tpu.dot_dimension_numbers<[1], [0], [0], [1], [0, 0, 1, 1], [], []>} : vector<64x8xbf16>, vector<8x32xbf16>, vector<64x32xf32> -> vector<64x32xf32>
    %c0_64 = arith.constant 0 : index
    %c0_65 = arith.constant 0 : index
    %66 = vector.load %arg10[%c0_64, %c0_65] : memref<1x32xf32, #tpu.memory_space<vmem>>, vector<1x32xf32>
    %67 = vector.broadcast %66 : vector<1x32xf32> to vector<64x32xf32>
    %68 = arith.mulf %65, %67 : vector<64x32xf32>
    %c0_66 = arith.constant 0 : index
    %c0_67 = arith.constant 0 : index
    %69 = vector.load %arg11[%c0_66, %c0_67] : memref<1x32xf32, #tpu.memory_space<vmem>>, vector<1x32xf32>
    %70 = vector.broadcast %69 : vector<1x32xf32> to vector<64x32xf32>
    %71 = arith.addf %68, %70 : vector<64x32xf32>
    %c0_68 = arith.constant 0 : index
    %c0_69 = arith.constant 0 : index
    %72 = vector.load %arg5[%c0_68, %c0_69] : memref<8x32xbf16, #tpu.memory_space<vmem>>, vector<8x32xbf16>
    %cst_70 = arith.constant dense<0.000000e+00> : vector<64x32xf32>
    %73 = tpu.matmul %1, %72, %cst_70 {dimension_numbers = #tpu.dot_dimension_numbers<[1], [0], [0], [1], [0, 0, 1, 1], [], []>} : vector<64x8xbf16>, vector<8x32xbf16>, vector<64x32xf32> -> vector<64x32xf32>
    %c0_71 = arith.constant 0 : index
    %c0_72 = arith.constant 0 : index
    %74 = vector.load %arg12[%c0_71, %c0_72] : memref<1x32xf32, #tpu.memory_space<vmem>>, vector<1x32xf32>
    %75 = vector.broadcast %74 : vector<1x32xf32> to vector<64x32xf32>
    %76 = arith.mulf %73, %75 : vector<64x32xf32>
    %c0_73 = arith.constant 0 : index
    %c0_74 = arith.constant 0 : index
    %77 = vector.load %arg13[%c0_73, %c0_74] : memref<1x32xf32, #tpu.memory_space<vmem>>, vector<1x32xf32>
    %78 = vector.broadcast %77 : vector<1x32xf32> to vector<64x32xf32>
    %79 = arith.addf %76, %78 : vector<64x32xf32>
    %80 = arith.addf %71, %79 : vector<64x32xf32>
    %cst_75 = arith.constant 0.000000e+00 : f32
    %81 = vector.broadcast %cst_75 : f32 to vector<64x32xf32>
    %82 = arith.maximumf %80, %81 : vector<64x32xf32>
    %83 = arith.truncf %82 : vector<64x32xf32> to vector<64x32xbf16>
    %c0_76 = arith.constant 0 : index
    %c0_77 = arith.constant 0 : index
    %c0_78 = arith.constant 0 : index
    %84 = vector.load %arg14[%c0_76, %c0_77, %c0_78] : memref<1x64x32xbf16, #tpu.memory_space<vmem>>, vector<1x64x32xbf16>
    %85 = vector.shape_cast %84 : vector<1x64x32xbf16> to vector<64x32xbf16>
    %86 = vector.shape_cast %83 : vector<64x32xbf16> to vector<1x64x32xbf16>
    tpu.vector_store %arg14[%c0_76, %c0_77, %c0_78], %86 {strides = array<i32>} : memref<1x64x32xbf16, #tpu.memory_space<vmem>>, vector<1x64x32xbf16>,
    return
  }
  func.func @transform_0(%arg0: i32) -> (i32, i32, i32) {
    %c0_i32 = arith.constant 0 : i32
    %c0_i32_0 = arith.constant 0 : i32
    %c0_i32_1 = arith.constant 0 : i32
    return %arg0, %c0_i32, %c0_i32_0 : i32, i32, i32
  }
  func.func @transform_1(%arg0: i32) -> (i32, i32) {
    %c0_i32 = arith.constant 0 : i32
    %c0_i32_0 = arith.constant 0 : i32
    %c0_i32_1 = arith.constant 0 : i32
    return %c0_i32, %c0_i32_0 : i32, i32
  }
  func.func @transform_2(%arg0: i32) -> (i32, i32) {
    %c0_i32 = arith.constant 0 : i32
    %c0_i32_0 = arith.constant 0 : i32
    %c0_i32_1 = arith.constant 0 : i32
    return %c0_i32, %c0_i32_0 : i32, i32
  }
  func.func @transform_3(%arg0: i32) -> (i32, i32) {
    %c0_i32 = arith.constant 0 : i32
    %c0_i32_0 = arith.constant 0 : i32
    %c0_i32_1 = arith.constant 0 : i32
    return %c0_i32, %c0_i32_0 : i32, i32
  }
  func.func @transform_4(%arg0: i32) -> (i32, i32) {
    %c0_i32 = arith.constant 0 : i32
    %c0_i32_0 = arith.constant 0 : i32
    %c0_i32_1 = arith.constant 0 : i32
    return %c0_i32, %c0_i32_0 : i32, i32
  }
  func.func @transform_5(%arg0: i32) -> (i32, i32) {
    %c0_i32 = arith.constant 0 : i32
    %c0_i32_0 = arith.constant 0 : i32
    %c0_i32_1 = arith.constant 0 : i32
    return %c0_i32, %c0_i32_0 : i32, i32
  }
  func.func @transform_6(%arg0: i32) -> (i32, i32) {
    %c0_i32 = arith.constant 0 : i32
    %c0_i32_0 = arith.constant 0 : i32
    %c0_i32_1 = arith.constant 0 : i32
    return %c0_i32, %c0_i32_0 : i32, i32
  }
  func.func @transform_7(%arg0: i32) -> (i32, i32) {
    %c0_i32 = arith.constant 0 : i32
    %c0_i32_0 = arith.constant 0 : i32
    %c0_i32_1 = arith.constant 0 : i32
    return %c0_i32, %c0_i32_0 : i32, i32
  }
  func.func @transform_8(%arg0: i32) -> (i32, i32) {
    %c0_i32 = arith.constant 0 : i32
    %c0_i32_0 = arith.constant 0 : i32
    %c0_i32_1 = arith.constant 0 : i32
    return %c0_i32, %c0_i32_0 : i32, i32
  }
  func.func @transform_9(%arg0: i32) -> (i32, i32) {
    %c0_i32 = arith.constant 0 : i32
    %c0_i32_0 = arith.constant 0 : i32
    %c0_i32_1 = arith.constant 0 : i32
    return %c0_i32, %c0_i32_0 : i32, i32
  }
  func.func @transform_10(%arg0: i32) -> (i32, i32) {
    %c0_i32 = arith.constant 0 : i32
    %c0_i32_0 = arith.constant 0 : i32
    %c0_i32_1 = arith.constant 0 : i32
    return %c0_i32, %c0_i32_0 : i32, i32
  }
  func.func @transform_11(%arg0: i32) -> (i32, i32) {
    %c0_i32 = arith.constant 0 : i32
    %c0_i32_0 = arith.constant 0 : i32
    %c0_i32_1 = arith.constant 0 : i32
    return %c0_i32, %c0_i32_0 : i32, i32
  }
  func.func @transform_12(%arg0: i32) -> (i32, i32) {
    %c0_i32 = arith.constant 0 : i32
    %c0_i32_0 = arith.constant 0 : i32
    %c0_i32_1 = arith.constant 0 : i32
    return %c0_i32, %c0_i32_0 : i32, i32
  }
  func.func @transform_13(%arg0: i32) -> (i32, i32, i32) {
    %c0_i32 = arith.constant 0 : i32
    %c0_i32_0 = arith.constant 0 : i32
    %c0_i32_1 = arith.constant 0 : i32
    return %arg0, %c0_i32, %c0_i32_0 : i32, i32, i32
  }
}

module attributes {stable_mosaic.version = 11 : i64} {
  func.func @kernel(%arg0: i32, %arg1: memref<1x16x128xbf16, #tpu.memory_space<vmem>>, %arg2: memref<128x64xbf16, #tpu.memory_space<vmem>>, %arg3: memref<256x16xbf16, #tpu.memory_space<vmem>>, %arg4: memref<16x64xbf16, #tpu.memory_space<vmem>>, %arg5: memref<32x64xbf16, #tpu.memory_space<vmem>>, %arg6: memref<1x64xf32, #tpu.memory_space<vmem>>, %arg7: memref<1x64xf32, #tpu.memory_space<vmem>>, %arg8: memref<1x16xf32, #tpu.memory_space<vmem>>, %arg9: memref<1x16xf32, #tpu.memory_space<vmem>>, %arg10: memref<1x64xf32, #tpu.memory_space<vmem>>, %arg11: memref<1x64xf32, #tpu.memory_space<vmem>>, %arg12: memref<1x64xf32, #tpu.memory_space<vmem>>, %arg13: memref<1x64xf32, #tpu.memory_space<vmem>>, %arg14: memref<1x16x64xbf16, #tpu.memory_space<vmem>>, %arg15: memref<5x5x64xf32, #tpu.memory_space<vmem>>, %arg16: memref<16x256xbf16, #tpu.memory_space<vmem>>) attributes {dimension_semantics = [#tpu.dimension_semantics<parallel>], iteration_bounds = array<i64: 2>, scalar_prefetch = 0 : i64, scratch_operands = 2 : i64, tpu.core_type = #tpu.core_type<tc>, window_params = [{transform_indices = @transform_0, window_bounds = array<i64: 1, 16, 128>}, {pipeline_mode = #tpu.pipeline_mode<synchronous>, transform_indices = @transform_1, window_bounds = array<i64: 128, 64>}, {pipeline_mode = #tpu.pipeline_mode<synchronous>, transform_indices = @transform_2, window_bounds = array<i64: 256, 16>}, {pipeline_mode = #tpu.pipeline_mode<synchronous>, transform_indices = @transform_3, window_bounds = array<i64: 16, 64>}, {pipeline_mode = #tpu.pipeline_mode<synchronous>, transform_indices = @transform_4, window_bounds = array<i64: 32, 64>}, {pipeline_mode = #tpu.pipeline_mode<synchronous>, transform_indices = @transform_5, window_bounds = array<i64: 1, 64>}, {pipeline_mode = #tpu.pipeline_mode<synchronous>, transform_indices = @transform_6, window_bounds = array<i64: 1, 64>}, {pipeline_mode = #tpu.pipeline_mode<synchronous>, transform_indices = @transform_7, window_bounds = array<i64: 1, 16>}, {pipeline_mode = #tpu.pipeline_mode<synchronous>, transform_indices = @transform_8, window_bounds = array<i64: 1, 16>}, {pipeline_mode = #tpu.pipeline_mode<synchronous>, transform_indices = @transform_9, window_bounds = array<i64: 1, 64>}, {pipeline_mode = #tpu.pipeline_mode<synchronous>, transform_indices = @transform_10, window_bounds = array<i64: 1, 64>}, {pipeline_mode = #tpu.pipeline_mode<synchronous>, transform_indices = @transform_11, window_bounds = array<i64: 1, 64>}, {pipeline_mode = #tpu.pipeline_mode<synchronous>, transform_indices = @transform_12, window_bounds = array<i64: 1, 64>}, {transform_indices = @transform_13, window_bounds = array<i64: 1, 16, 64>}]} {
    %c0 = arith.constant 0 : index
    %c0_0 = arith.constant 0 : index
    %c0_1 = arith.constant 0 : index
    %0 = vector.load %arg1[%c0, %c0_0, %c0_1] : memref<1x16x128xbf16, #tpu.memory_space<vmem>>, vector<1x16x128xbf16>
    %1 = vector.shape_cast %0 : vector<1x16x128xbf16> to vector<16x128xbf16>
    %c0_2 = arith.constant 0 : index
    %c0_3 = arith.constant 0 : index
    %2 = vector.load %arg2[%c0_2, %c0_3] : memref<128x64xbf16, #tpu.memory_space<vmem>>, vector<128x64xbf16>
    %cst = arith.constant dense<0.000000e+00> : vector<16x64xf32>
    %3 = tpu.matmul %1, %2, %cst {dimension_numbers = #tpu.dot_dimension_numbers<[1], [0], [0], [1], [0, 0, 1, 1], [], []>} : vector<16x128xbf16>, vector<128x64xbf16>, vector<16x64xf32> -> vector<16x64xf32>
    %c0_4 = arith.constant 0 : index
    %c0_5 = arith.constant 0 : index
    %4 = vector.load %arg6[%c0_4, %c0_5] : memref<1x64xf32, #tpu.memory_space<vmem>>, vector<1x64xf32>
    %5 = vector.broadcast %4 : vector<1x64xf32> to vector<16x64xf32>
    %6 = arith.mulf %3, %5 : vector<16x64xf32>
    %c0_6 = arith.constant 0 : index
    %c0_7 = arith.constant 0 : index
    %7 = vector.load %arg7[%c0_6, %c0_7] : memref<1x64xf32, #tpu.memory_space<vmem>>, vector<1x64xf32>
    %8 = vector.broadcast %7 : vector<1x64xf32> to vector<16x64xf32>
    %9 = arith.addf %6, %8 : vector<16x64xf32>
    %cst_8 = arith.constant 0.000000e+00 : f32
    %10 = vector.broadcast %cst_8 : f32 to vector<16x64xf32>
    %11 = arith.maximumf %9, %10 : vector<16x64xf32>
    %cst_9 = arith.constant 0.000000e+00 : f32
    %12 = vector.broadcast %cst_9 : f32 to vector<5x5x64xf32>
    %c0_10 = arith.constant 0 : index
    %c0_11 = arith.constant 0 : index
    %c0_12 = arith.constant 0 : index
    %13 = vector.load %arg15[%c0_10, %c0_11, %c0_12] : memref<5x5x64xf32, #tpu.memory_space<vmem>>, vector<5x5x64xf32>
    tpu.vector_store %arg15[%c0_10, %c0_11, %c0_12], %12 {strides = array<i32>} : memref<5x5x64xf32, #tpu.memory_space<vmem>>, vector<5x5x64xf32>,
    %14 = vector.shape_cast %11 : vector<16x64xf32> to vector<4x4x64xf32>
    %c1 = arith.constant 1 : index
    %c1_13 = arith.constant 1 : index
    %c0_14 = arith.constant 0 : index
    %15 = vector.load %arg15[%c1, %c1_13, %c0_14] : memref<5x5x64xf32, #tpu.memory_space<vmem>>, vector<4x4x64xf32>
    tpu.vector_store %arg15[%c1, %c1_13, %c0_14], %14 {strides = array<i32>} : memref<5x5x64xf32, #tpu.memory_space<vmem>>, vector<4x4x64xf32>,
    %c0_15 = arith.constant 0 : index
    %c0_16 = arith.constant 0 : index
    %c0_17 = arith.constant 0 : index
    %16 = vector.load %arg15[%c0_15, %c0_16, %c0_17] : memref<5x5x64xf32, #tpu.memory_space<vmem>>, vector<4x4x64xf32>
    %17 = vector.shape_cast %16 : vector<4x4x64xf32> to vector<16x64xf32>
    %18 = arith.truncf %17 : vector<16x64xf32> to vector<16x64xbf16>
    %c0_18 = arith.constant 0 : index
    %c0_19 = arith.constant 0 : index
    %19 = vector.load %arg16[%c0_18, %c0_19] : memref<16x256xbf16, #tpu.memory_space<vmem>>, vector<16x64xbf16>
    tpu.vector_store %arg16[%c0_18, %c0_19], %18 {strides = array<i32>} : memref<16x256xbf16, #tpu.memory_space<vmem>>, vector<16x64xbf16>,
    %c0_20 = arith.constant 0 : index
    %c1_21 = arith.constant 1 : index
    %c0_22 = arith.constant 0 : index
    %20 = vector.load %arg15[%c0_20, %c1_21, %c0_22] : memref<5x5x64xf32, #tpu.memory_space<vmem>>, vector<4x4x64xf32>
    %21 = vector.shape_cast %20 : vector<4x4x64xf32> to vector<16x64xf32>
    %22 = arith.truncf %21 : vector<16x64xf32> to vector<16x64xbf16>
    %c0_23 = arith.constant 0 : index
    %c64 = arith.constant 64 : index
    %23 = vector.load %arg16[%c0_23, %c64] : memref<16x256xbf16, #tpu.memory_space<vmem>>, vector<16x64xbf16>
    tpu.vector_store %arg16[%c0_23, %c64], %22 {strides = array<i32>} : memref<16x256xbf16, #tpu.memory_space<vmem>>, vector<16x64xbf16>,
    %c1_24 = arith.constant 1 : index
    %c0_25 = arith.constant 0 : index
    %c0_26 = arith.constant 0 : index
    %24 = vector.load %arg15[%c1_24, %c0_25, %c0_26] : memref<5x5x64xf32, #tpu.memory_space<vmem>>, vector<4x4x64xf32>
    %25 = vector.shape_cast %24 : vector<4x4x64xf32> to vector<16x64xf32>
    %26 = arith.truncf %25 : vector<16x64xf32> to vector<16x64xbf16>
    %c0_27 = arith.constant 0 : index
    %c128 = arith.constant 128 : index
    %27 = vector.load %arg16[%c0_27, %c128] : memref<16x256xbf16, #tpu.memory_space<vmem>>, vector<16x64xbf16>
    tpu.vector_store %arg16[%c0_27, %c128], %26 {strides = array<i32>} : memref<16x256xbf16, #tpu.memory_space<vmem>>, vector<16x64xbf16>,
    %c1_28 = arith.constant 1 : index
    %c1_29 = arith.constant 1 : index
    %c0_30 = arith.constant 0 : index
    %28 = vector.load %arg15[%c1_28, %c1_29, %c0_30] : memref<5x5x64xf32, #tpu.memory_space<vmem>>, vector<4x4x64xf32>
    %29 = vector.shape_cast %28 : vector<4x4x64xf32> to vector<16x64xf32>
    %30 = arith.truncf %29 : vector<16x64xf32> to vector<16x64xbf16>
    %c0_31 = arith.constant 0 : index
    %c192 = arith.constant 192 : index
    %31 = vector.load %arg16[%c0_31, %c192] : memref<16x256xbf16, #tpu.memory_space<vmem>>, vector<16x64xbf16>
    tpu.vector_store %arg16[%c0_31, %c192], %30 {strides = array<i32>} : memref<16x256xbf16, #tpu.memory_space<vmem>>, vector<16x64xbf16>,
    %c0_32 = arith.constant 0 : index
    %c0_33 = arith.constant 0 : index
    %32 = vector.load %arg16[%c0_32, %c0_33] : memref<16x256xbf16, #tpu.memory_space<vmem>>, vector<16x256xbf16>
    %c0_34 = arith.constant 0 : index
    %c0_35 = arith.constant 0 : index
    %33 = vector.load %arg3[%c0_34, %c0_35] : memref<256x16xbf16, #tpu.memory_space<vmem>>, vector<256x16xbf16>
    %cst_36 = arith.constant dense<0.000000e+00> : vector<16x16xf32>
    %34 = tpu.matmul %32, %33, %cst_36 {dimension_numbers = #tpu.dot_dimension_numbers<[1], [0], [0], [1], [0, 0, 1, 1], [], []>} : vector<16x256xbf16>, vector<256x16xbf16>, vector<16x16xf32> -> vector<16x16xf32>
    %c0_37 = arith.constant 0 : index
    %c0_38 = arith.constant 0 : index
    %35 = vector.load %arg8[%c0_37, %c0_38] : memref<1x16xf32, #tpu.memory_space<vmem>>, vector<1x16xf32>
    %36 = vector.broadcast %35 : vector<1x16xf32> to vector<16x16xf32>
    %37 = arith.mulf %34, %36 : vector<16x16xf32>
    %c0_39 = arith.constant 0 : index
    %c0_40 = arith.constant 0 : index
    %38 = vector.load %arg9[%c0_39, %c0_40] : memref<1x16xf32, #tpu.memory_space<vmem>>, vector<1x16xf32>
    %39 = vector.broadcast %38 : vector<1x16xf32> to vector<16x16xf32>
    %40 = arith.addf %37, %39 : vector<16x16xf32>
    %cst_41 = arith.constant 0.000000e+00 : f32
    %41 = vector.broadcast %cst_41 : f32 to vector<16x16xf32>
    %42 = arith.maximumf %40, %41 : vector<16x16xf32>
    %43 = arith.truncf %42 : vector<16x16xf32> to vector<16x16xbf16>
    %c0_42 = arith.constant 0 : index
    %c0_43 = arith.constant 0 : index
    %44 = vector.load %arg4[%c0_42, %c0_43] : memref<16x64xbf16, #tpu.memory_space<vmem>>, vector<16x64xbf16>
    %cst_44 = arith.constant dense<0.000000e+00> : vector<16x64xf32>
    %45 = tpu.matmul %43, %44, %cst_44 {dimension_numbers = #tpu.dot_dimension_numbers<[1], [0], [0], [1], [0, 0, 1, 1], [], []>} : vector<16x16xbf16>, vector<16x64xbf16>, vector<16x64xf32> -> vector<16x64xf32>
    %c0_45 = arith.constant 0 : index
    %c0_46 = arith.constant 0 : index
    %46 = vector.load %arg10[%c0_45, %c0_46] : memref<1x64xf32, #tpu.memory_space<vmem>>, vector<1x64xf32>
    %47 = vector.broadcast %46 : vector<1x64xf32> to vector<16x64xf32>
    %48 = arith.mulf %45, %47 : vector<16x64xf32>
    %c0_47 = arith.constant 0 : index
    %c0_48 = arith.constant 0 : index
    %49 = vector.load %arg11[%c0_47, %c0_48] : memref<1x64xf32, #tpu.memory_space<vmem>>, vector<1x64xf32>
    %50 = vector.broadcast %49 : vector<1x64xf32> to vector<16x64xf32>
    %51 = arith.addf %48, %50 : vector<16x64xf32>
    %52 = vector.extract_strided_slice %1 {offsets = [0, 0], sizes = [16, 32], strides = [1, 1]} : vector<16x128xbf16> to vector<16x32xbf16>
    %c0_49 = arith.constant 0 : index
    %c0_50 = arith.constant 0 : index
    %53 = vector.load %arg5[%c0_49, %c0_50] : memref<32x64xbf16, #tpu.memory_space<vmem>>, vector<32x64xbf16>
    %cst_51 = arith.constant dense<0.000000e+00> : vector<16x64xf32>
    %54 = tpu.matmul %52, %53, %cst_51 {dimension_numbers = #tpu.dot_dimension_numbers<[1], [0], [0], [1], [0, 0, 1, 1], [], []>} : vector<16x32xbf16>, vector<32x64xbf16>, vector<16x64xf32> -> vector<16x64xf32>
    %c0_52 = arith.constant 0 : index
    %c0_53 = arith.constant 0 : index
    %55 = vector.load %arg12[%c0_52, %c0_53] : memref<1x64xf32, #tpu.memory_space<vmem>>, vector<1x64xf32>
    %56 = vector.broadcast %55 : vector<1x64xf32> to vector<16x64xf32>
    %57 = arith.mulf %54, %56 : vector<16x64xf32>
    %c0_54 = arith.constant 0 : index
    %c0_55 = arith.constant 0 : index
    %58 = vector.load %arg13[%c0_54, %c0_55] : memref<1x64xf32, #tpu.memory_space<vmem>>, vector<1x64xf32>
    %59 = vector.broadcast %58 : vector<1x64xf32> to vector<16x64xf32>
    %60 = arith.addf %57, %59 : vector<16x64xf32>
    %61 = arith.addf %51, %60 : vector<16x64xf32>
    %cst_56 = arith.constant 0.000000e+00 : f32
    %62 = vector.broadcast %cst_56 : f32 to vector<16x64xf32>
    %63 = arith.maximumf %61, %62 : vector<16x64xf32>
    %64 = arith.truncf %63 : vector<16x64xf32> to vector<16x64xbf16>
    %c0_57 = arith.constant 0 : index
    %c0_58 = arith.constant 0 : index
    %c0_59 = arith.constant 0 : index
    %65 = vector.load %arg14[%c0_57, %c0_58, %c0_59] : memref<1x16x64xbf16, #tpu.memory_space<vmem>>, vector<1x16x64xbf16>
    %66 = vector.shape_cast %65 : vector<1x16x64xbf16> to vector<16x64xbf16>
    %67 = vector.shape_cast %64 : vector<16x64xbf16> to vector<1x16x64xbf16>
    tpu.vector_store %arg14[%c0_57, %c0_58, %c0_59], %67 {strides = array<i32>} : memref<1x16x64xbf16, #tpu.memory_space<vmem>>, vector<1x16x64xbf16>,
    return
  }
  func.func @transform_0(%arg0: i32) -> (i32, i32, i32) {
    %c0_i32 = arith.constant 0 : i32
    %c0_i32_0 = arith.constant 0 : i32
    %c0_i32_1 = arith.constant 0 : i32
    return %arg0, %c0_i32, %c0_i32_0 : i32, i32, i32
  }
  func.func @transform_1(%arg0: i32) -> (i32, i32) {
    %c0_i32 = arith.constant 0 : i32
    %c0_i32_0 = arith.constant 0 : i32
    %c0_i32_1 = arith.constant 0 : i32
    return %c0_i32, %c0_i32_0 : i32, i32
  }
  func.func @transform_2(%arg0: i32) -> (i32, i32) {
    %c0_i32 = arith.constant 0 : i32
    %c0_i32_0 = arith.constant 0 : i32
    %c0_i32_1 = arith.constant 0 : i32
    return %c0_i32, %c0_i32_0 : i32, i32
  }
  func.func @transform_3(%arg0: i32) -> (i32, i32) {
    %c0_i32 = arith.constant 0 : i32
    %c0_i32_0 = arith.constant 0 : i32
    %c0_i32_1 = arith.constant 0 : i32
    return %c0_i32, %c0_i32_0 : i32, i32
  }
  func.func @transform_4(%arg0: i32) -> (i32, i32) {
    %c0_i32 = arith.constant 0 : i32
    %c0_i32_0 = arith.constant 0 : i32
    %c0_i32_1 = arith.constant 0 : i32
    return %c0_i32, %c0_i32_0 : i32, i32
  }
  func.func @transform_5(%arg0: i32) -> (i32, i32) {
    %c0_i32 = arith.constant 0 : i32
    %c0_i32_0 = arith.constant 0 : i32
    %c0_i32_1 = arith.constant 0 : i32
    return %c0_i32, %c0_i32_0 : i32, i32
  }
  func.func @transform_6(%arg0: i32) -> (i32, i32) {
    %c0_i32 = arith.constant 0 : i32
    %c0_i32_0 = arith.constant 0 : i32
    %c0_i32_1 = arith.constant 0 : i32
    return %c0_i32, %c0_i32_0 : i32, i32
  }
  func.func @transform_7(%arg0: i32) -> (i32, i32) {
    %c0_i32 = arith.constant 0 : i32
    %c0_i32_0 = arith.constant 0 : i32
    %c0_i32_1 = arith.constant 0 : i32
    return %c0_i32, %c0_i32_0 : i32, i32
  }
  func.func @transform_8(%arg0: i32) -> (i32, i32) {
    %c0_i32 = arith.constant 0 : i32
    %c0_i32_0 = arith.constant 0 : i32
    %c0_i32_1 = arith.constant 0 : i32
    return %c0_i32, %c0_i32_0 : i32, i32
  }
  func.func @transform_9(%arg0: i32) -> (i32, i32) {
    %c0_i32 = arith.constant 0 : i32
    %c0_i32_0 = arith.constant 0 : i32
    %c0_i32_1 = arith.constant 0 : i32
    return %c0_i32, %c0_i32_0 : i32, i32
  }
  func.func @transform_10(%arg0: i32) -> (i32, i32) {
    %c0_i32 = arith.constant 0 : i32
    %c0_i32_0 = arith.constant 0 : i32
    %c0_i32_1 = arith.constant 0 : i32
    return %c0_i32, %c0_i32_0 : i32, i32
  }
  func.func @transform_11(%arg0: i32) -> (i32, i32) {
    %c0_i32 = arith.constant 0 : i32
    %c0_i32_0 = arith.constant 0 : i32
    %c0_i32_1 = arith.constant 0 : i32
    return %c0_i32, %c0_i32_0 : i32, i32
  }
  func.func @transform_12(%arg0: i32) -> (i32, i32) {
    %c0_i32 = arith.constant 0 : i32
    %c0_i32_0 = arith.constant 0 : i32
    %c0_i32_1 = arith.constant 0 : i32
    return %c0_i32, %c0_i32_0 : i32, i32
  }
  func.func @transform_13(%arg0: i32) -> (i32, i32, i32) {
    %c0_i32 = arith.constant 0 : i32
    %c0_i32_0 = arith.constant 0 : i32
    %c0_i32_1 = arith.constant 0 : i32
    return %arg0, %c0_i32, %c0_i32_0 : i32, i32, i32
  }
}

module attributes {stable_mosaic.version = 11 : i64} {
  func.func @kernel(%arg0: memref<2x64x32xbf16, #tpu.memory_space<vmem>>, %arg1: memref<2x16x64xbf16, #tpu.memory_space<vmem>>, %arg2: memref<32x8xbf16, #tpu.memory_space<vmem>>, %arg3: memref<64x8xbf16, #tpu.memory_space<vmem>>, %arg4: memref<64x192xbf16, #tpu.memory_space<vmem>>, %arg5: memref<1x192xf32, #tpu.memory_space<vmem>>, %arg6: memref<64x64xbf16, #tpu.memory_space<vmem>>, %arg7: memref<1x64xf32, #tpu.memory_space<vmem>>, %arg8: memref<2x64xf32, #tpu.memory_space<vmem>>, %arg9: memref<2x64xf32, #tpu.memory_space<vmem>>, %arg10: memref<2x64xf32, #tpu.memory_space<vmem>>) attributes {dimension_semantics = [], scalar_prefetch = 0 : i64, scratch_operands = 2 : i64, tpu.core_type = #tpu.core_type<tc>} {
    %c0 = arith.constant 0 : index
    %c0_0 = arith.constant 0 : index
    %c0_1 = arith.constant 0 : index
    %0 = vector.load %arg0[%c0, %c0_0, %c0_1] : memref<2x64x32xbf16, #tpu.memory_space<vmem>>, vector<2x64x32xbf16>
    %1 = vector.shape_cast %0 : vector<2x64x32xbf16> to vector<128x32xbf16>
    %c0_2 = arith.constant 0 : index
    %c0_3 = arith.constant 0 : index
    %2 = vector.load %arg2[%c0_2, %c0_3] : memref<32x8xbf16, #tpu.memory_space<vmem>>, vector<32x8xbf16>
    %cst = arith.constant dense<0.000000e+00> : vector<128x8xf32>
    %3 = tpu.matmul %1, %2, %cst {dimension_numbers = #tpu.dot_dimension_numbers<[1], [0], [0], [1], [0, 0, 1, 1], [], []>} : vector<128x32xbf16>, vector<32x8xbf16>, vector<128x8xf32> -> vector<128x8xf32>
    %4 = vector.extract_strided_slice %3 {offsets = [0, 0], sizes = [64, 8], strides = [1, 1]} : vector<128x8xf32> to vector<64x8xf32>
    %5 = vector.extract_strided_slice %4 {offsets = [0, 0], sizes = [64, 1], strides = [1, 1]} : vector<64x8xf32> to vector<64x1xf32>
    %6 = vector.broadcast %5 : vector<64x1xf32> to vector<64x8xf32>
    %7 = arith.mulf %4, %6 : vector<64x8xf32>
    %cst_4 = arith.constant dense<0.000000e+00> : vector<8xf32>
    %8 = vector.multi_reduction <add>, %7, %cst_4 [0] : vector<64x8xf32> to vector<8xf32>
    %9 = vector.shape_cast %8 : vector<8xf32> to vector<1x8xf32>
    %cst_5 = arith.constant 1.562500e-02 : f32
    %10 = vector.broadcast %cst_5 : f32 to vector<1x8xf32>
    %11 = arith.mulf %9, %10 : vector<1x8xf32>
    %c0_6 = arith.constant 0 : index
    %c0_7 = arith.constant 0 : index
    %12 = vector.load %arg9[%c0_6, %c0_7] : memref<2x64xf32, #tpu.memory_space<vmem>>, vector<1x8xf32>
    tpu.vector_store %arg9[%c0_6, %c0_7], %11 {strides = array<i32>} : memref<2x64xf32, #tpu.memory_space<vmem>>, vector<1x8xf32>,
    %13 = vector.extract_strided_slice %4 {offsets = [0, 1], sizes = [64, 1], strides = [1, 1]} : vector<64x8xf32> to vector<64x1xf32>
    %14 = vector.broadcast %13 : vector<64x1xf32> to vector<64x8xf32>
    %15 = arith.mulf %4, %14 : vector<64x8xf32>
    %cst_8 = arith.constant dense<0.000000e+00> : vector<8xf32>
    %16 = vector.multi_reduction <add>, %15, %cst_8 [0] : vector<64x8xf32> to vector<8xf32>
    %17 = vector.shape_cast %16 : vector<8xf32> to vector<1x8xf32>
    %cst_9 = arith.constant 1.562500e-02 : f32
    %18 = vector.broadcast %cst_9 : f32 to vector<1x8xf32>
    %19 = arith.mulf %17, %18 : vector<1x8xf32>
    %c0_10 = arith.constant 0 : index
    %c8 = arith.constant 8 : index
    %20 = vector.load %arg9[%c0_10, %c8] : memref<2x64xf32, #tpu.memory_space<vmem>>, vector<1x8xf32>
    tpu.vector_store %arg9[%c0_10, %c8], %19 {strides = array<i32>} : memref<2x64xf32, #tpu.memory_space<vmem>>, vector<1x8xf32>,
    %21 = vector.extract_strided_slice %4 {offsets = [0, 2], sizes = [64, 1], strides = [1, 1]} : vector<64x8xf32> to vector<64x1xf32>
    %22 = vector.broadcast %21 : vector<64x1xf32> to vector<64x8xf32>
    %23 = arith.mulf %4, %22 : vector<64x8xf32>
    %cst_11 = arith.constant dense<0.000000e+00> : vector<8xf32>
    %24 = vector.multi_reduction <add>, %23, %cst_11 [0] : vector<64x8xf32> to vector<8xf32>
    %25 = vector.shape_cast %24 : vector<8xf32> to vector<1x8xf32>
    %cst_12 = arith.constant 1.562500e-02 : f32
    %26 = vector.broadcast %cst_12 : f32 to vector<1x8xf32>
    %27 = arith.mulf %25, %26 : vector<1x8xf32>
    %c0_13 = arith.constant 0 : index
    %c16 = arith.constant 16 : index
    %28 = vector.load %arg9[%c0_13, %c16] : memref<2x64xf32, #tpu.memory_space<vmem>>, vector<1x8xf32>
    tpu.vector_store %arg9[%c0_13, %c16], %27 {strides = array<i32>} : memref<2x64xf32, #tpu.memory_space<vmem>>, vector<1x8xf32>,
    %29 = vector.extract_strided_slice %4 {offsets = [0, 3], sizes = [64, 1], strides = [1, 1]} : vector<64x8xf32> to vector<64x1xf32>
    %30 = vector.broadcast %29 : vector<64x1xf32> to vector<64x8xf32>
    %31 = arith.mulf %4, %30 : vector<64x8xf32>
    %cst_14 = arith.constant dense<0.000000e+00> : vector<8xf32>
    %32 = vector.multi_reduction <add>, %31, %cst_14 [0] : vector<64x8xf32> to vector<8xf32>
    %33 = vector.shape_cast %32 : vector<8xf32> to vector<1x8xf32>
    %cst_15 = arith.constant 1.562500e-02 : f32
    %34 = vector.broadcast %cst_15 : f32 to vector<1x8xf32>
    %35 = arith.mulf %33, %34 : vector<1x8xf32>
    %c0_16 = arith.constant 0 : index
    %c24 = arith.constant 24 : index
    %36 = vector.load %arg9[%c0_16, %c24] : memref<2x64xf32, #tpu.memory_space<vmem>>, vector<1x8xf32>
    tpu.vector_store %arg9[%c0_16, %c24], %35 {strides = array<i32>} : memref<2x64xf32, #tpu.memory_space<vmem>>, vector<1x8xf32>,
    %37 = vector.extract_strided_slice %4 {offsets = [0, 4], sizes = [64, 1], strides = [1, 1]} : vector<64x8xf32> to vector<64x1xf32>
    %38 = vector.broadcast %37 : vector<64x1xf32> to vector<64x8xf32>
    %39 = arith.mulf %4, %38 : vector<64x8xf32>
    %cst_17 = arith.constant dense<0.000000e+00> : vector<8xf32>
    %40 = vector.multi_reduction <add>, %39, %cst_17 [0] : vector<64x8xf32> to vector<8xf32>
    %41 = vector.shape_cast %40 : vector<8xf32> to vector<1x8xf32>
    %cst_18 = arith.constant 1.562500e-02 : f32
    %42 = vector.broadcast %cst_18 : f32 to vector<1x8xf32>
    %43 = arith.mulf %41, %42 : vector<1x8xf32>
    %c0_19 = arith.constant 0 : index
    %c32 = arith.constant 32 : index
    %44 = vector.load %arg9[%c0_19, %c32] : memref<2x64xf32, #tpu.memory_space<vmem>>, vector<1x8xf32>
    tpu.vector_store %arg9[%c0_19, %c32], %43 {strides = array<i32>} : memref<2x64xf32, #tpu.memory_space<vmem>>, vector<1x8xf32>,
    %45 = vector.extract_strided_slice %4 {offsets = [0, 5], sizes = [64, 1], strides = [1, 1]} : vector<64x8xf32> to vector<64x1xf32>
    %46 = vector.broadcast %45 : vector<64x1xf32> to vector<64x8xf32>
    %47 = arith.mulf %4, %46 : vector<64x8xf32>
    %cst_20 = arith.constant dense<0.000000e+00> : vector<8xf32>
    %48 = vector.multi_reduction <add>, %47, %cst_20 [0] : vector<64x8xf32> to vector<8xf32>
    %49 = vector.shape_cast %48 : vector<8xf32> to vector<1x8xf32>
    %cst_21 = arith.constant 1.562500e-02 : f32
    %50 = vector.broadcast %cst_21 : f32 to vector<1x8xf32>
    %51 = arith.mulf %49, %50 : vector<1x8xf32>
    %c0_22 = arith.constant 0 : index
    %c40 = arith.constant 40 : index
    %52 = vector.load %arg9[%c0_22, %c40] : memref<2x64xf32, #tpu.memory_space<vmem>>, vector<1x8xf32>
    tpu.vector_store %arg9[%c0_22, %c40], %51 {strides = array<i32>} : memref<2x64xf32, #tpu.memory_space<vmem>>, vector<1x8xf32>,
    %53 = vector.extract_strided_slice %4 {offsets = [0, 6], sizes = [64, 1], strides = [1, 1]} : vector<64x8xf32> to vector<64x1xf32>
    %54 = vector.broadcast %53 : vector<64x1xf32> to vector<64x8xf32>
    %55 = arith.mulf %4, %54 : vector<64x8xf32>
    %cst_23 = arith.constant dense<0.000000e+00> : vector<8xf32>
    %56 = vector.multi_reduction <add>, %55, %cst_23 [0] : vector<64x8xf32> to vector<8xf32>
    %57 = vector.shape_cast %56 : vector<8xf32> to vector<1x8xf32>
    %cst_24 = arith.constant 1.562500e-02 : f32
    %58 = vector.broadcast %cst_24 : f32 to vector<1x8xf32>
    %59 = arith.mulf %57, %58 : vector<1x8xf32>
    %c0_25 = arith.constant 0 : index
    %c48 = arith.constant 48 : index
    %60 = vector.load %arg9[%c0_25, %c48] : memref<2x64xf32, #tpu.memory_space<vmem>>, vector<1x8xf32>
    tpu.vector_store %arg9[%c0_25, %c48], %59 {strides = array<i32>} : memref<2x64xf32, #tpu.memory_space<vmem>>, vector<1x8xf32>,
    %61 = vector.extract_strided_slice %4 {offsets = [0, 7], sizes = [64, 1], strides = [1, 1]} : vector<64x8xf32> to vector<64x1xf32>
    %62 = vector.broadcast %61 : vector<64x1xf32> to vector<64x8xf32>
    %63 = arith.mulf %4, %62 : vector<64x8xf32>
    %cst_26 = arith.constant dense<0.000000e+00> : vector<8xf32>
    %64 = vector.multi_reduction <add>, %63, %cst_26 [0] : vector<64x8xf32> to vector<8xf32>
    %65 = vector.shape_cast %64 : vector<8xf32> to vector<1x8xf32>
    %cst_27 = arith.constant 1.562500e-02 : f32
    %66 = vector.broadcast %cst_27 : f32 to vector<1x8xf32>
    %67 = arith.mulf %65, %66 : vector<1x8xf32>
    %c0_28 = arith.constant 0 : index
    %c56 = arith.constant 56 : index
    %68 = vector.load %arg9[%c0_28, %c56] : memref<2x64xf32, #tpu.memory_space<vmem>>, vector<1x8xf32>
    tpu.vector_store %arg9[%c0_28, %c56], %67 {strides = array<i32>} : memref<2x64xf32, #tpu.memory_space<vmem>>, vector<1x8xf32>,
    %69 = vector.extract_strided_slice %3 {offsets = [64, 0], sizes = [64, 8], strides = [1, 1]} : vector<128x8xf32> to vector<64x8xf32>
    %70 = vector.extract_strided_slice %69 {offsets = [0, 0], sizes = [64, 1], strides = [1, 1]} : vector<64x8xf32> to vector<64x1xf32>
    %71 = vector.broadcast %70 : vector<64x1xf32> to vector<64x8xf32>
    %72 = arith.mulf %69, %71 : vector<64x8xf32>
    %cst_29 = arith.constant dense<0.000000e+00> : vector<8xf32>
    %73 = vector.multi_reduction <add>, %72, %cst_29 [0] : vector<64x8xf32> to vector<8xf32>
    %74 = vector.shape_cast %73 : vector<8xf32> to vector<1x8xf32>
    %cst_30 = arith.constant 1.562500e-02 : f32
    %75 = vector.broadcast %cst_30 : f32 to vector<1x8xf32>
    %76 = arith.mulf %74, %75 : vector<1x8xf32>
    %c1 = arith.constant 1 : index
    %c0_31 = arith.constant 0 : index
    %77 = vector.load %arg9[%c1, %c0_31] : memref<2x64xf32, #tpu.memory_space<vmem>>, vector<1x8xf32>
    tpu.vector_store %arg9[%c1, %c0_31], %76 {strides = array<i32>} : memref<2x64xf32, #tpu.memory_space<vmem>>, vector<1x8xf32>,
    %78 = vector.extract_strided_slice %69 {offsets = [0, 1], sizes = [64, 1], strides = [1, 1]} : vector<64x8xf32> to vector<64x1xf32>
    %79 = vector.broadcast %78 : vector<64x1xf32> to vector<64x8xf32>
    %80 = arith.mulf %69, %79 : vector<64x8xf32>
    %cst_32 = arith.constant dense<0.000000e+00> : vector<8xf32>
    %81 = vector.multi_reduction <add>, %80, %cst_32 [0] : vector<64x8xf32> to vector<8xf32>
    %82 = vector.shape_cast %81 : vector<8xf32> to vector<1x8xf32>
    %cst_33 = arith.constant 1.562500e-02 : f32
    %83 = vector.broadcast %cst_33 : f32 to vector<1x8xf32>
    %84 = arith.mulf %82, %83 : vector<1x8xf32>
    %c1_34 = arith.constant 1 : index
    %c8_35 = arith.constant 8 : index
    %85 = vector.load %arg9[%c1_34, %c8_35] : memref<2x64xf32, #tpu.memory_space<vmem>>, vector<1x8xf32>
    tpu.vector_store %arg9[%c1_34, %c8_35], %84 {strides = array<i32>} : memref<2x64xf32, #tpu.memory_space<vmem>>, vector<1x8xf32>,
    %86 = vector.extract_strided_slice %69 {offsets = [0, 2], sizes = [64, 1], strides = [1, 1]} : vector<64x8xf32> to vector<64x1xf32>
    %87 = vector.broadcast %86 : vector<64x1xf32> to vector<64x8xf32>
    %88 = arith.mulf %69, %87 : vector<64x8xf32>
    %cst_36 = arith.constant dense<0.000000e+00> : vector<8xf32>
    %89 = vector.multi_reduction <add>, %88, %cst_36 [0] : vector<64x8xf32> to vector<8xf32>
    %90 = vector.shape_cast %89 : vector<8xf32> to vector<1x8xf32>
    %cst_37 = arith.constant 1.562500e-02 : f32
    %91 = vector.broadcast %cst_37 : f32 to vector<1x8xf32>
    %92 = arith.mulf %90, %91 : vector<1x8xf32>
    %c1_38 = arith.constant 1 : index
    %c16_39 = arith.constant 16 : index
    %93 = vector.load %arg9[%c1_38, %c16_39] : memref<2x64xf32, #tpu.memory_space<vmem>>, vector<1x8xf32>
    tpu.vector_store %arg9[%c1_38, %c16_39], %92 {strides = array<i32>} : memref<2x64xf32, #tpu.memory_space<vmem>>, vector<1x8xf32>,
    %94 = vector.extract_strided_slice %69 {offsets = [0, 3], sizes = [64, 1], strides = [1, 1]} : vector<64x8xf32> to vector<64x1xf32>
    %95 = vector.broadcast %94 : vector<64x1xf32> to vector<64x8xf32>
    %96 = arith.mulf %69, %95 : vector<64x8xf32>
    %cst_40 = arith.constant dense<0.000000e+00> : vector<8xf32>
    %97 = vector.multi_reduction <add>, %96, %cst_40 [0] : vector<64x8xf32> to vector<8xf32>
    %98 = vector.shape_cast %97 : vector<8xf32> to vector<1x8xf32>
    %cst_41 = arith.constant 1.562500e-02 : f32
    %99 = vector.broadcast %cst_41 : f32 to vector<1x8xf32>
    %100 = arith.mulf %98, %99 : vector<1x8xf32>
    %c1_42 = arith.constant 1 : index
    %c24_43 = arith.constant 24 : index
    %101 = vector.load %arg9[%c1_42, %c24_43] : memref<2x64xf32, #tpu.memory_space<vmem>>, vector<1x8xf32>
    tpu.vector_store %arg9[%c1_42, %c24_43], %100 {strides = array<i32>} : memref<2x64xf32, #tpu.memory_space<vmem>>, vector<1x8xf32>,
    %102 = vector.extract_strided_slice %69 {offsets = [0, 4], sizes = [64, 1], strides = [1, 1]} : vector<64x8xf32> to vector<64x1xf32>
    %103 = vector.broadcast %102 : vector<64x1xf32> to vector<64x8xf32>
    %104 = arith.mulf %69, %103 : vector<64x8xf32>
    %cst_44 = arith.constant dense<0.000000e+00> : vector<8xf32>
    %105 = vector.multi_reduction <add>, %104, %cst_44 [0] : vector<64x8xf32> to vector<8xf32>
    %106 = vector.shape_cast %105 : vector<8xf32> to vector<1x8xf32>
    %cst_45 = arith.constant 1.562500e-02 : f32
    %107 = vector.broadcast %cst_45 : f32 to vector<1x8xf32>
    %108 = arith.mulf %106, %107 : vector<1x8xf32>
    %c1_46 = arith.constant 1 : index
    %c32_47 = arith.constant 32 : index
    %109 = vector.load %arg9[%c1_46, %c32_47] : memref<2x64xf32, #tpu.memory_space<vmem>>, vector<1x8xf32>
    tpu.vector_store %arg9[%c1_46, %c32_47], %108 {strides = array<i32>} : memref<2x64xf32, #tpu.memory_space<vmem>>, vector<1x8xf32>,
    %110 = vector.extract_strided_slice %69 {offsets = [0, 5], sizes = [64, 1], strides = [1, 1]} : vector<64x8xf32> to vector<64x1xf32>
    %111 = vector.broadcast %110 : vector<64x1xf32> to vector<64x8xf32>
    %112 = arith.mulf %69, %111 : vector<64x8xf32>
    %cst_48 = arith.constant dense<0.000000e+00> : vector<8xf32>
    %113 = vector.multi_reduction <add>, %112, %cst_48 [0] : vector<64x8xf32> to vector<8xf32>
    %114 = vector.shape_cast %113 : vector<8xf32> to vector<1x8xf32>
    %cst_49 = arith.constant 1.562500e-02 : f32
    %115 = vector.broadcast %cst_49 : f32 to vector<1x8xf32>
    %116 = arith.mulf %114, %115 : vector<1x8xf32>
    %c1_50 = arith.constant 1 : index
    %c40_51 = arith.constant 40 : index
    %117 = vector.load %arg9[%c1_50, %c40_51] : memref<2x64xf32, #tpu.memory_space<vmem>>, vector<1x8xf32>
    tpu.vector_store %arg9[%c1_50, %c40_51], %116 {strides = array<i32>} : memref<2x64xf32, #tpu.memory_space<vmem>>, vector<1x8xf32>,
    %118 = vector.extract_strided_slice %69 {offsets = [0, 6], sizes = [64, 1], strides = [1, 1]} : vector<64x8xf32> to vector<64x1xf32>
    %119 = vector.broadcast %118 : vector<64x1xf32> to vector<64x8xf32>
    %120 = arith.mulf %69, %119 : vector<64x8xf32>
    %cst_52 = arith.constant dense<0.000000e+00> : vector<8xf32>
    %121 = vector.multi_reduction <add>, %120, %cst_52 [0] : vector<64x8xf32> to vector<8xf32>
    %122 = vector.shape_cast %121 : vector<8xf32> to vector<1x8xf32>
    %cst_53 = arith.constant 1.562500e-02 : f32
    %123 = vector.broadcast %cst_53 : f32 to vector<1x8xf32>
    %124 = arith.mulf %122, %123 : vector<1x8xf32>
    %c1_54 = arith.constant 1 : index
    %c48_55 = arith.constant 48 : index
    %125 = vector.load %arg9[%c1_54, %c48_55] : memref<2x64xf32, #tpu.memory_space<vmem>>, vector<1x8xf32>
    tpu.vector_store %arg9[%c1_54, %c48_55], %124 {strides = array<i32>} : memref<2x64xf32, #tpu.memory_space<vmem>>, vector<1x8xf32>,
    %126 = vector.extract_strided_slice %69 {offsets = [0, 7], sizes = [64, 1], strides = [1, 1]} : vector<64x8xf32> to vector<64x1xf32>
    %127 = vector.broadcast %126 : vector<64x1xf32> to vector<64x8xf32>
    %128 = arith.mulf %69, %127 : vector<64x8xf32>
    %cst_56 = arith.constant dense<0.000000e+00> : vector<8xf32>
    %129 = vector.multi_reduction <add>, %128, %cst_56 [0] : vector<64x8xf32> to vector<8xf32>
    %130 = vector.shape_cast %129 : vector<8xf32> to vector<1x8xf32>
    %cst_57 = arith.constant 1.562500e-02 : f32
    %131 = vector.broadcast %cst_57 : f32 to vector<1x8xf32>
    %132 = arith.mulf %130, %131 : vector<1x8xf32>
    %c1_58 = arith.constant 1 : index
    %c56_59 = arith.constant 56 : index
    %133 = vector.load %arg9[%c1_58, %c56_59] : memref<2x64xf32, #tpu.memory_space<vmem>>, vector<1x8xf32>
    tpu.vector_store %arg9[%c1_58, %c56_59], %132 {strides = array<i32>} : memref<2x64xf32, #tpu.memory_space<vmem>>, vector<1x8xf32>,
    %c0_60 = arith.constant 0 : index
    %c0_61 = arith.constant 0 : index
    %c0_62 = arith.constant 0 : index
    %134 = vector.load %arg1[%c0_60, %c0_61, %c0_62] : memref<2x16x64xbf16, #tpu.memory_space<vmem>>, vector<2x16x64xbf16>
    %135 = vector.shape_cast %134 : vector<2x16x64xbf16> to vector<32x64xbf16>
    %c0_63 = arith.constant 0 : index
    %c0_64 = arith.constant 0 : index
    %136 = vector.load %arg3[%c0_63, %c0_64] : memref<64x8xbf16, #tpu.memory_space<vmem>>, vector<64x8xbf16>
    %cst_65 = arith.constant dense<0.000000e+00> : vector<32x8xf32>
    %137 = tpu.matmul %135, %136, %cst_65 {dimension_numbers = #tpu.dot_dimension_numbers<[1], [0], [0], [1], [0, 0, 1, 1], [], []>} : vector<32x64xbf16>, vector<64x8xbf16>, vector<32x8xf32> -> vector<32x8xf32>
    %138 = vector.extract_strided_slice %137 {offsets = [0, 0], sizes = [16, 8], strides = [1, 1]} : vector<32x8xf32> to vector<16x8xf32>
    %139 = vector.extract_strided_slice %138 {offsets = [0, 0], sizes = [16, 1], strides = [1, 1]} : vector<16x8xf32> to vector<16x1xf32>
    %140 = vector.broadcast %139 : vector<16x1xf32> to vector<16x8xf32>
    %141 = arith.mulf %138, %140 : vector<16x8xf32>
    %cst_66 = arith.constant dense<0.000000e+00> : vector<8xf32>
    %142 = vector.multi_reduction <add>, %141, %cst_66 [0] : vector<16x8xf32> to vector<8xf32>
    %143 = vector.shape_cast %142 : vector<8xf32> to vector<1x8xf32>
    %cst_67 = arith.constant 6.250000e-02 : f32
    %144 = vector.broadcast %cst_67 : f32 to vector<1x8xf32>
    %145 = arith.mulf %143, %144 : vector<1x8xf32>
    %c0_68 = arith.constant 0 : index
    %c0_69 = arith.constant 0 : index
    %146 = vector.load %arg10[%c0_68, %c0_69] : memref<2x64xf32, #tpu.memory_space<vmem>>, vector<1x8xf32>
    tpu.vector_store %arg10[%c0_68, %c0_69], %145 {strides = array<i32>} : memref<2x64xf32, #tpu.memory_space<vmem>>, vector<1x8xf32>,
    %147 = vector.extract_strided_slice %138 {offsets = [0, 1], sizes = [16, 1], strides = [1, 1]} : vector<16x8xf32> to vector<16x1xf32>
    %148 = vector.broadcast %147 : vector<16x1xf32> to vector<16x8xf32>
    %149 = arith.mulf %138, %148 : vector<16x8xf32>
    %cst_70 = arith.constant dense<0.000000e+00> : vector<8xf32>
    %150 = vector.multi_reduction <add>, %149, %cst_70 [0] : vector<16x8xf32> to vector<8xf32>
    %151 = vector.shape_cast %150 : vector<8xf32> to vector<1x8xf32>
    %cst_71 = arith.constant 6.250000e-02 : f32
    %152 = vector.broadcast %cst_71 : f32 to vector<1x8xf32>
    %153 = arith.mulf %151, %152 : vector<1x8xf32>
    %c0_72 = arith.constant 0 : index
    %c8_73 = arith.constant 8 : index
    %154 = vector.load %arg10[%c0_72, %c8_73] : memref<2x64xf32, #tpu.memory_space<vmem>>, vector<1x8xf32>
    tpu.vector_store %arg10[%c0_72, %c8_73], %153 {strides = array<i32>} : memref<2x64xf32, #tpu.memory_space<vmem>>, vector<1x8xf32>,
    %155 = vector.extract_strided_slice %138 {offsets = [0, 2], sizes = [16, 1], strides = [1, 1]} : vector<16x8xf32> to vector<16x1xf32>
    %156 = vector.broadcast %155 : vector<16x1xf32> to vector<16x8xf32>
    %157 = arith.mulf %138, %156 : vector<16x8xf32>
    %cst_74 = arith.constant dense<0.000000e+00> : vector<8xf32>
    %158 = vector.multi_reduction <add>, %157, %cst_74 [0] : vector<16x8xf32> to vector<8xf32>
    %159 = vector.shape_cast %158 : vector<8xf32> to vector<1x8xf32>
    %cst_75 = arith.constant 6.250000e-02 : f32
    %160 = vector.broadcast %cst_75 : f32 to vector<1x8xf32>
    %161 = arith.mulf %159, %160 : vector<1x8xf32>
    %c0_76 = arith.constant 0 : index
    %c16_77 = arith.constant 16 : index
    %162 = vector.load %arg10[%c0_76, %c16_77] : memref<2x64xf32, #tpu.memory_space<vmem>>, vector<1x8xf32>
    tpu.vector_store %arg10[%c0_76, %c16_77], %161 {strides = array<i32>} : memref<2x64xf32, #tpu.memory_space<vmem>>, vector<1x8xf32>,
    %163 = vector.extract_strided_slice %138 {offsets = [0, 3], sizes = [16, 1], strides = [1, 1]} : vector<16x8xf32> to vector<16x1xf32>
    %164 = vector.broadcast %163 : vector<16x1xf32> to vector<16x8xf32>
    %165 = arith.mulf %138, %164 : vector<16x8xf32>
    %cst_78 = arith.constant dense<0.000000e+00> : vector<8xf32>
    %166 = vector.multi_reduction <add>, %165, %cst_78 [0] : vector<16x8xf32> to vector<8xf32>
    %167 = vector.shape_cast %166 : vector<8xf32> to vector<1x8xf32>
    %cst_79 = arith.constant 6.250000e-02 : f32
    %168 = vector.broadcast %cst_79 : f32 to vector<1x8xf32>
    %169 = arith.mulf %167, %168 : vector<1x8xf32>
    %c0_80 = arith.constant 0 : index
    %c24_81 = arith.constant 24 : index
    %170 = vector.load %arg10[%c0_80, %c24_81] : memref<2x64xf32, #tpu.memory_space<vmem>>, vector<1x8xf32>
    tpu.vector_store %arg10[%c0_80, %c24_81], %169 {strides = array<i32>} : memref<2x64xf32, #tpu.memory_space<vmem>>, vector<1x8xf32>,
    %171 = vector.extract_strided_slice %138 {offsets = [0, 4], sizes = [16, 1], strides = [1, 1]} : vector<16x8xf32> to vector<16x1xf32>
    %172 = vector.broadcast %171 : vector<16x1xf32> to vector<16x8xf32>
    %173 = arith.mulf %138, %172 : vector<16x8xf32>
    %cst_82 = arith.constant dense<0.000000e+00> : vector<8xf32>
    %174 = vector.multi_reduction <add>, %173, %cst_82 [0] : vector<16x8xf32> to vector<8xf32>
    %175 = vector.shape_cast %174 : vector<8xf32> to vector<1x8xf32>
    %cst_83 = arith.constant 6.250000e-02 : f32
    %176 = vector.broadcast %cst_83 : f32 to vector<1x8xf32>
    %177 = arith.mulf %175, %176 : vector<1x8xf32>
    %c0_84 = arith.constant 0 : index
    %c32_85 = arith.constant 32 : index
    %178 = vector.load %arg10[%c0_84, %c32_85] : memref<2x64xf32, #tpu.memory_space<vmem>>, vector<1x8xf32>
    tpu.vector_store %arg10[%c0_84, %c32_85], %177 {strides = array<i32>} : memref<2x64xf32, #tpu.memory_space<vmem>>, vector<1x8xf32>,
    %179 = vector.extract_strided_slice %138 {offsets = [0, 5], sizes = [16, 1], strides = [1, 1]} : vector<16x8xf32> to vector<16x1xf32>
    %180 = vector.broadcast %179 : vector<16x1xf32> to vector<16x8xf32>
    %181 = arith.mulf %138, %180 : vector<16x8xf32>
    %cst_86 = arith.constant dense<0.000000e+00> : vector<8xf32>
    %182 = vector.multi_reduction <add>, %181, %cst_86 [0] : vector<16x8xf32> to vector<8xf32>
    %183 = vector.shape_cast %182 : vector<8xf32> to vector<1x8xf32>
    %cst_87 = arith.constant 6.250000e-02 : f32
    %184 = vector.broadcast %cst_87 : f32 to vector<1x8xf32>
    %185 = arith.mulf %183, %184 : vector<1x8xf32>
    %c0_88 = arith.constant 0 : index
    %c40_89 = arith.constant 40 : index
    %186 = vector.load %arg10[%c0_88, %c40_89] : memref<2x64xf32, #tpu.memory_space<vmem>>, vector<1x8xf32>
    tpu.vector_store %arg10[%c0_88, %c40_89], %185 {strides = array<i32>} : memref<2x64xf32, #tpu.memory_space<vmem>>, vector<1x8xf32>,
    %187 = vector.extract_strided_slice %138 {offsets = [0, 6], sizes = [16, 1], strides = [1, 1]} : vector<16x8xf32> to vector<16x1xf32>
    %188 = vector.broadcast %187 : vector<16x1xf32> to vector<16x8xf32>
    %189 = arith.mulf %138, %188 : vector<16x8xf32>
    %cst_90 = arith.constant dense<0.000000e+00> : vector<8xf32>
    %190 = vector.multi_reduction <add>, %189, %cst_90 [0] : vector<16x8xf32> to vector<8xf32>
    %191 = vector.shape_cast %190 : vector<8xf32> to vector<1x8xf32>
    %cst_91 = arith.constant 6.250000e-02 : f32
    %192 = vector.broadcast %cst_91 : f32 to vector<1x8xf32>
    %193 = arith.mulf %191, %192 : vector<1x8xf32>
    %c0_92 = arith.constant 0 : index
    %c48_93 = arith.constant 48 : index
    %194 = vector.load %arg10[%c0_92, %c48_93] : memref<2x64xf32, #tpu.memory_space<vmem>>, vector<1x8xf32>
    tpu.vector_store %arg10[%c0_92, %c48_93], %193 {strides = array<i32>} : memref<2x64xf32, #tpu.memory_space<vmem>>, vector<1x8xf32>,
    %195 = vector.extract_strided_slice %138 {offsets = [0, 7], sizes = [16, 1], strides = [1, 1]} : vector<16x8xf32> to vector<16x1xf32>
    %196 = vector.broadcast %195 : vector<16x1xf32> to vector<16x8xf32>
    %197 = arith.mulf %138, %196 : vector<16x8xf32>
    %cst_94 = arith.constant dense<0.000000e+00> : vector<8xf32>
    %198 = vector.multi_reduction <add>, %197, %cst_94 [0] : vector<16x8xf32> to vector<8xf32>
    %199 = vector.shape_cast %198 : vector<8xf32> to vector<1x8xf32>
    %cst_95 = arith.constant 6.250000e-02 : f32
    %200 = vector.broadcast %cst_95 : f32 to vector<1x8xf32>
    %201 = arith.mulf %199, %200 : vector<1x8xf32>
    %c0_96 = arith.constant 0 : index
    %c56_97 = arith.constant 56 : index
    %202 = vector.load %arg10[%c0_96, %c56_97] : memref<2x64xf32, #tpu.memory_space<vmem>>, vector<1x8xf32>
    tpu.vector_store %arg10[%c0_96, %c56_97], %201 {strides = array<i32>} : memref<2x64xf32, #tpu.memory_space<vmem>>, vector<1x8xf32>,
    %203 = vector.extract_strided_slice %137 {offsets = [16, 0], sizes = [16, 8], strides = [1, 1]} : vector<32x8xf32> to vector<16x8xf32>
    %204 = vector.extract_strided_slice %203 {offsets = [0, 0], sizes = [16, 1], strides = [1, 1]} : vector<16x8xf32> to vector<16x1xf32>
    %205 = vector.broadcast %204 : vector<16x1xf32> to vector<16x8xf32>
    %206 = arith.mulf %203, %205 : vector<16x8xf32>
    %cst_98 = arith.constant dense<0.000000e+00> : vector<8xf32>
    %207 = vector.multi_reduction <add>, %206, %cst_98 [0] : vector<16x8xf32> to vector<8xf32>
    %208 = vector.shape_cast %207 : vector<8xf32> to vector<1x8xf32>
    %cst_99 = arith.constant 6.250000e-02 : f32
    %209 = vector.broadcast %cst_99 : f32 to vector<1x8xf32>
    %210 = arith.mulf %208, %209 : vector<1x8xf32>
    %c1_100 = arith.constant 1 : index
    %c0_101 = arith.constant 0 : index
    %211 = vector.load %arg10[%c1_100, %c0_101] : memref<2x64xf32, #tpu.memory_space<vmem>>, vector<1x8xf32>
    tpu.vector_store %arg10[%c1_100, %c0_101], %210 {strides = array<i32>} : memref<2x64xf32, #tpu.memory_space<vmem>>, vector<1x8xf32>,
    %212 = vector.extract_strided_slice %203 {offsets = [0, 1], sizes = [16, 1], strides = [1, 1]} : vector<16x8xf32> to vector<16x1xf32>
    %213 = vector.broadcast %212 : vector<16x1xf32> to vector<16x8xf32>
    %214 = arith.mulf %203, %213 : vector<16x8xf32>
    %cst_102 = arith.constant dense<0.000000e+00> : vector<8xf32>
    %215 = vector.multi_reduction <add>, %214, %cst_102 [0] : vector<16x8xf32> to vector<8xf32>
    %216 = vector.shape_cast %215 : vector<8xf32> to vector<1x8xf32>
    %cst_103 = arith.constant 6.250000e-02 : f32
    %217 = vector.broadcast %cst_103 : f32 to vector<1x8xf32>
    %218 = arith.mulf %216, %217 : vector<1x8xf32>
    %c1_104 = arith.constant 1 : index
    %c8_105 = arith.constant 8 : index
    %219 = vector.load %arg10[%c1_104, %c8_105] : memref<2x64xf32, #tpu.memory_space<vmem>>, vector<1x8xf32>
    tpu.vector_store %arg10[%c1_104, %c8_105], %218 {strides = array<i32>} : memref<2x64xf32, #tpu.memory_space<vmem>>, vector<1x8xf32>,
    %220 = vector.extract_strided_slice %203 {offsets = [0, 2], sizes = [16, 1], strides = [1, 1]} : vector<16x8xf32> to vector<16x1xf32>
    %221 = vector.broadcast %220 : vector<16x1xf32> to vector<16x8xf32>
    %222 = arith.mulf %203, %221 : vector<16x8xf32>
    %cst_106 = arith.constant dense<0.000000e+00> : vector<8xf32>
    %223 = vector.multi_reduction <add>, %222, %cst_106 [0] : vector<16x8xf32> to vector<8xf32>
    %224 = vector.shape_cast %223 : vector<8xf32> to vector<1x8xf32>
    %cst_107 = arith.constant 6.250000e-02 : f32
    %225 = vector.broadcast %cst_107 : f32 to vector<1x8xf32>
    %226 = arith.mulf %224, %225 : vector<1x8xf32>
    %c1_108 = arith.constant 1 : index
    %c16_109 = arith.constant 16 : index
    %227 = vector.load %arg10[%c1_108, %c16_109] : memref<2x64xf32, #tpu.memory_space<vmem>>, vector<1x8xf32>
    tpu.vector_store %arg10[%c1_108, %c16_109], %226 {strides = array<i32>} : memref<2x64xf32, #tpu.memory_space<vmem>>, vector<1x8xf32>,
    %228 = vector.extract_strided_slice %203 {offsets = [0, 3], sizes = [16, 1], strides = [1, 1]} : vector<16x8xf32> to vector<16x1xf32>
    %229 = vector.broadcast %228 : vector<16x1xf32> to vector<16x8xf32>
    %230 = arith.mulf %203, %229 : vector<16x8xf32>
    %cst_110 = arith.constant dense<0.000000e+00> : vector<8xf32>
    %231 = vector.multi_reduction <add>, %230, %cst_110 [0] : vector<16x8xf32> to vector<8xf32>
    %232 = vector.shape_cast %231 : vector<8xf32> to vector<1x8xf32>
    %cst_111 = arith.constant 6.250000e-02 : f32
    %233 = vector.broadcast %cst_111 : f32 to vector<1x8xf32>
    %234 = arith.mulf %232, %233 : vector<1x8xf32>
    %c1_112 = arith.constant 1 : index
    %c24_113 = arith.constant 24 : index
    %235 = vector.load %arg10[%c1_112, %c24_113] : memref<2x64xf32, #tpu.memory_space<vmem>>, vector<1x8xf32>
    tpu.vector_store %arg10[%c1_112, %c24_113], %234 {strides = array<i32>} : memref<2x64xf32, #tpu.memory_space<vmem>>, vector<1x8xf32>,
    %236 = vector.extract_strided_slice %203 {offsets = [0, 4], sizes = [16, 1], strides = [1, 1]} : vector<16x8xf32> to vector<16x1xf32>
    %237 = vector.broadcast %236 : vector<16x1xf32> to vector<16x8xf32>
    %238 = arith.mulf %203, %237 : vector<16x8xf32>
    %cst_114 = arith.constant dense<0.000000e+00> : vector<8xf32>
    %239 = vector.multi_reduction <add>, %238, %cst_114 [0] : vector<16x8xf32> to vector<8xf32>
    %240 = vector.shape_cast %239 : vector<8xf32> to vector<1x8xf32>
    %cst_115 = arith.constant 6.250000e-02 : f32
    %241 = vector.broadcast %cst_115 : f32 to vector<1x8xf32>
    %242 = arith.mulf %240, %241 : vector<1x8xf32>
    %c1_116 = arith.constant 1 : index
    %c32_117 = arith.constant 32 : index
    %243 = vector.load %arg10[%c1_116, %c32_117] : memref<2x64xf32, #tpu.memory_space<vmem>>, vector<1x8xf32>
    tpu.vector_store %arg10[%c1_116, %c32_117], %242 {strides = array<i32>} : memref<2x64xf32, #tpu.memory_space<vmem>>, vector<1x8xf32>,
    %244 = vector.extract_strided_slice %203 {offsets = [0, 5], sizes = [16, 1], strides = [1, 1]} : vector<16x8xf32> to vector<16x1xf32>
    %245 = vector.broadcast %244 : vector<16x1xf32> to vector<16x8xf32>
    %246 = arith.mulf %203, %245 : vector<16x8xf32>
    %cst_118 = arith.constant dense<0.000000e+00> : vector<8xf32>
    %247 = vector.multi_reduction <add>, %246, %cst_118 [0] : vector<16x8xf32> to vector<8xf32>
    %248 = vector.shape_cast %247 : vector<8xf32> to vector<1x8xf32>
    %cst_119 = arith.constant 6.250000e-02 : f32
    %249 = vector.broadcast %cst_119 : f32 to vector<1x8xf32>
    %250 = arith.mulf %248, %249 : vector<1x8xf32>
    %c1_120 = arith.constant 1 : index
    %c40_121 = arith.constant 40 : index
    %251 = vector.load %arg10[%c1_120, %c40_121] : memref<2x64xf32, #tpu.memory_space<vmem>>, vector<1x8xf32>
    tpu.vector_store %arg10[%c1_120, %c40_121], %250 {strides = array<i32>} : memref<2x64xf32, #tpu.memory_space<vmem>>, vector<1x8xf32>,
    %252 = vector.extract_strided_slice %203 {offsets = [0, 6], sizes = [16, 1], strides = [1, 1]} : vector<16x8xf32> to vector<16x1xf32>
    %253 = vector.broadcast %252 : vector<16x1xf32> to vector<16x8xf32>
    %254 = arith.mulf %203, %253 : vector<16x8xf32>
    %cst_122 = arith.constant dense<0.000000e+00> : vector<8xf32>
    %255 = vector.multi_reduction <add>, %254, %cst_122 [0] : vector<16x8xf32> to vector<8xf32>
    %256 = vector.shape_cast %255 : vector<8xf32> to vector<1x8xf32>
    %cst_123 = arith.constant 6.250000e-02 : f32
    %257 = vector.broadcast %cst_123 : f32 to vector<1x8xf32>
    %258 = arith.mulf %256, %257 : vector<1x8xf32>
    %c1_124 = arith.constant 1 : index
    %c48_125 = arith.constant 48 : index
    %259 = vector.load %arg10[%c1_124, %c48_125] : memref<2x64xf32, #tpu.memory_space<vmem>>, vector<1x8xf32>
    tpu.vector_store %arg10[%c1_124, %c48_125], %258 {strides = array<i32>} : memref<2x64xf32, #tpu.memory_space<vmem>>, vector<1x8xf32>,
    %260 = vector.extract_strided_slice %203 {offsets = [0, 7], sizes = [16, 1], strides = [1, 1]} : vector<16x8xf32> to vector<16x1xf32>
    %261 = vector.broadcast %260 : vector<16x1xf32> to vector<16x8xf32>
    %262 = arith.mulf %203, %261 : vector<16x8xf32>
    %cst_126 = arith.constant dense<0.000000e+00> : vector<8xf32>
    %263 = vector.multi_reduction <add>, %262, %cst_126 [0] : vector<16x8xf32> to vector<8xf32>
    %264 = vector.shape_cast %263 : vector<8xf32> to vector<1x8xf32>
    %cst_127 = arith.constant 6.250000e-02 : f32
    %265 = vector.broadcast %cst_127 : f32 to vector<1x8xf32>
    %266 = arith.mulf %264, %265 : vector<1x8xf32>
    %c1_128 = arith.constant 1 : index
    %c56_129 = arith.constant 56 : index
    %267 = vector.load %arg10[%c1_128, %c56_129] : memref<2x64xf32, #tpu.memory_space<vmem>>, vector<1x8xf32>
    tpu.vector_store %arg10[%c1_128, %c56_129], %266 {strides = array<i32>} : memref<2x64xf32, #tpu.memory_space<vmem>>, vector<1x8xf32>,
    %c0_130 = arith.constant 0 : index
    %c0_131 = arith.constant 0 : index
    %268 = vector.load %arg9[%c0_130, %c0_131] : memref<2x64xf32, #tpu.memory_space<vmem>>, vector<2x64xf32>
    %269 = arith.truncf %268 : vector<2x64xf32> to vector<2x64xbf16>
    %c0_132 = arith.constant 0 : index
    %c0_133 = arith.constant 0 : index
    %270 = vector.load %arg10[%c0_132, %c0_133] : memref<2x64xf32, #tpu.memory_space<vmem>>, vector<2x64xf32>
    %271 = arith.truncf %270 : vector<2x64xf32> to vector<2x64xbf16>
    %c0_134 = arith.constant 0 : index
    %c0_135 = arith.constant 0 : index
    %272 = vector.load %arg4[%c0_134, %c0_135] : memref<64x192xbf16, #tpu.memory_space<vmem>>, vector<64x192xbf16>
    %cst_136 = arith.constant dense<0.000000e+00> : vector<2x192xf32>
    %273 = tpu.matmul %269, %272, %cst_136 {dimension_numbers = #tpu.dot_dimension_numbers<[1], [0], [0], [1], [0, 0, 1, 1], [], []>} : vector<2x64xbf16>, vector<64x192xbf16>, vector<2x192xf32> -> vector<2x192xf32>
    %c0_137 = arith.constant 0 : index
    %c0_138 = arith.constant 0 : index
    %274 = vector.load %arg5[%c0_137, %c0_138] : memref<1x192xf32, #tpu.memory_space<vmem>>, vector<1x192xf32>
    %275 = vector.broadcast %274 : vector<1x192xf32> to vector<2x192xf32>
    %276 = arith.addf %273, %275 : vector<2x192xf32>
    %c0_139 = arith.constant 0 : index
    %c0_140 = arith.constant 0 : index
    %277 = vector.load %arg4[%c0_139, %c0_140] : memref<64x192xbf16, #tpu.memory_space<vmem>>, vector<64x192xbf16>
    %cst_141 = arith.constant dense<0.000000e+00> : vector<2x192xf32>
    %278 = tpu.matmul %271, %277, %cst_141 {dimension_numbers = #tpu.dot_dimension_numbers<[1], [0], [0], [1], [0, 0, 1, 1], [], []>} : vector<2x64xbf16>, vector<64x192xbf16>, vector<2x192xf32> -> vector<2x192xf32>
    %c0_142 = arith.constant 0 : index
    %c0_143 = arith.constant 0 : index
    %279 = vector.load %arg5[%c0_142, %c0_143] : memref<1x192xf32, #tpu.memory_space<vmem>>, vector<1x192xf32>
    %280 = vector.broadcast %279 : vector<1x192xf32> to vector<2x192xf32>
    %281 = arith.addf %278, %280 : vector<2x192xf32>
    %282 = vector.extract_strided_slice %276 {offsets = [0, 0], sizes = [2, 64], strides = [1, 1]} : vector<2x192xf32> to vector<2x64xf32>
    %283 = vector.extract_strided_slice %281 {offsets = [0, 0], sizes = [2, 64], strides = [1, 1]} : vector<2x192xf32> to vector<2x64xf32>
    %284 = vector.extract_strided_slice %276 {offsets = [0, 64], sizes = [2, 64], strides = [1, 1]} : vector<2x192xf32> to vector<2x64xf32>
    %285 = vector.extract_strided_slice %281 {offsets = [0, 64], sizes = [2, 64], strides = [1, 1]} : vector<2x192xf32> to vector<2x64xf32>
    %286 = vector.extract_strided_slice %276 {offsets = [0, 128], sizes = [2, 64], strides = [1, 1]} : vector<2x192xf32> to vector<2x64xf32>
    %287 = vector.extract_strided_slice %281 {offsets = [0, 128], sizes = [2, 64], strides = [1, 1]} : vector<2x192xf32> to vector<2x64xf32>
    %288 = arith.mulf %282, %284 : vector<2x64xf32>
    %cst_144 = arith.constant dense<0.000000e+00> : vector<2xf32>
    %289 = vector.multi_reduction <add>, %288, %cst_144 [1] : vector<2x64xf32> to vector<2xf32>
    %290 = vector.shape_cast %289 : vector<2xf32> to vector<2x1xf32>
    %cst_145 = arith.constant 1.250000e-01 : f32
    %291 = vector.broadcast %cst_145 : f32 to vector<2x1xf32>
    %292 = arith.mulf %290, %291 : vector<2x1xf32>
    %293 = arith.mulf %282, %285 : vector<2x64xf32>
    %cst_146 = arith.constant dense<0.000000e+00> : vector<2xf32>
    %294 = vector.multi_reduction <add>, %293, %cst_146 [1] : vector<2x64xf32> to vector<2xf32>
    %295 = vector.shape_cast %294 : vector<2xf32> to vector<2x1xf32>
    %cst_147 = arith.constant 1.250000e-01 : f32
    %296 = vector.broadcast %cst_147 : f32 to vector<2x1xf32>
    %297 = arith.mulf %295, %296 : vector<2x1xf32>
    %298 = arith.maximumf %292, %297 : vector<2x1xf32>
    %299 = arith.subf %292, %298 : vector<2x1xf32>
    %300 = math.exp %299 : vector<2x1xf32>
    %301 = arith.subf %297, %298 : vector<2x1xf32>
    %302 = math.exp %301 : vector<2x1xf32>
    %303 = arith.addf %300, %302 : vector<2x1xf32>
    %304 = arith.divf %300, %303 : vector<2x1xf32>
    %305 = vector.broadcast %304 : vector<2x1xf32> to vector<2x64xf32>
    %306 = arith.mulf %305, %286 : vector<2x64xf32>
    %307 = arith.divf %302, %303 : vector<2x1xf32>
    %308 = vector.broadcast %307 : vector<2x1xf32> to vector<2x64xf32>
    %309 = arith.mulf %308, %287 : vector<2x64xf32>
    %310 = arith.addf %306, %309 : vector<2x64xf32>
    %311 = arith.mulf %283, %284 : vector<2x64xf32>
    %cst_148 = arith.constant dense<0.000000e+00> : vector<2xf32>
    %312 = vector.multi_reduction <add>, %311, %cst_148 [1] : vector<2x64xf32> to vector<2xf32>
    %313 = vector.shape_cast %312 : vector<2xf32> to vector<2x1xf32>
    %cst_149 = arith.constant 1.250000e-01 : f32
    %314 = vector.broadcast %cst_149 : f32 to vector<2x1xf32>
    %315 = arith.mulf %313, %314 : vector<2x1xf32>
    %316 = arith.mulf %283, %285 : vector<2x64xf32>
    %cst_150 = arith.constant dense<0.000000e+00> : vector<2xf32>
    %317 = vector.multi_reduction <add>, %316, %cst_150 [1] : vector<2x64xf32> to vector<2xf32>
    %318 = vector.shape_cast %317 : vector<2xf32> to vector<2x1xf32>
    %cst_151 = arith.constant 1.250000e-01 : f32
    %319 = vector.broadcast %cst_151 : f32 to vector<2x1xf32>
    %320 = arith.mulf %318, %319 : vector<2x1xf32>
    %321 = arith.maximumf %315, %320 : vector<2x1xf32>
    %322 = arith.subf %315, %321 : vector<2x1xf32>
    %323 = math.exp %322 : vector<2x1xf32>
    %324 = arith.subf %320, %321 : vector<2x1xf32>
    %325 = math.exp %324 : vector<2x1xf32>
    %326 = arith.addf %323, %325 : vector<2x1xf32>
    %327 = arith.divf %323, %326 : vector<2x1xf32>
    %328 = vector.broadcast %327 : vector<2x1xf32> to vector<2x64xf32>
    %329 = arith.mulf %328, %286 : vector<2x64xf32>
    %330 = arith.divf %325, %326 : vector<2x1xf32>
    %331 = vector.broadcast %330 : vector<2x1xf32> to vector<2x64xf32>
    %332 = arith.mulf %331, %287 : vector<2x64xf32>
    %333 = arith.addf %329, %332 : vector<2x64xf32>
    %334 = arith.addf %310, %333 : vector<2x64xf32>
    %cst_152 = arith.constant 5.000000e-01 : f32
    %335 = vector.broadcast %cst_152 : f32 to vector<2x64xf32>
    %336 = arith.mulf %334, %335 : vector<2x64xf32>
    %337 = arith.truncf %336 : vector<2x64xf32> to vector<2x64xbf16>
    %c0_153 = arith.constant 0 : index
    %c0_154 = arith.constant 0 : index
    %338 = vector.load %arg6[%c0_153, %c0_154] : memref<64x64xbf16, #tpu.memory_space<vmem>>, vector<64x64xbf16>
    %cst_155 = arith.constant dense<0.000000e+00> : vector<2x64xf32>
    %339 = tpu.matmul %337, %338, %cst_155 {dimension_numbers = #tpu.dot_dimension_numbers<[1], [0], [0], [1], [0, 0, 1, 1], [], []>} : vector<2x64xbf16>, vector<64x64xbf16>, vector<2x64xf32> -> vector<2x64xf32>
    %c0_156 = arith.constant 0 : index
    %c0_157 = arith.constant 0 : index
    %340 = vector.load %arg7[%c0_156, %c0_157] : memref<1x64xf32, #tpu.memory_space<vmem>>, vector<1x64xf32>
    %341 = vector.broadcast %340 : vector<1x64xf32> to vector<2x64xf32>
    %342 = arith.addf %339, %341 : vector<2x64xf32>
    %c0_158 = arith.constant 0 : index
    %c0_159 = arith.constant 0 : index
    %343 = vector.load %arg8[%c0_158, %c0_159] : memref<2x64xf32, #tpu.memory_space<vmem>>, vector<2x64xf32>
    tpu.vector_store %arg8[%c0_158, %c0_159], %342 {strides = array<i32>} : memref<2x64xf32, #tpu.memory_space<vmem>>, vector<2x64xf32>,
    return
  }
}

</mosaic_0001>

<bundles_post_ra>
// kernel: tile.10
= control target key start
LH: loop header
LB: loop body
LE: loop exit
PB: predicated region body
PF: predicated region fallthrough
CT: control target
= control target key end

     0   :  { %s22_s0 = inlined_call_operand.vmem [shape: f32[16], index: 0, kind: input, shape index: {}]   ;;  %s23_s1 = inlined_call_operand.vmem [shape: f32[4,16], index: 1, kind: output, shape index: {}]  }
   0x1   :  { %v4_v0 = vld [vmem:[%s22_s0] ss:$0 sm:$0xff] }
   0x2   :  { %5 = vst [vmem:[%s23_s1] sm:$0xf] %v4_v0 }

// kernel: tile.14
= control target key start
LH: loop header
LB: loop body
LE: loop exit
PB: predicated region body
PF: predicated region fallthrough
CT: control target
= control target key end

     0   :  { %vm8_vm0 = vcmask 130048   ;;  %s40_s8 = smov 16   ;;  %s41_s9 = smov 32   ;;  %vm14_vm1 = vcmask 523648   ;;  %vm20_vm2 = vcmask 392448   ;;  %vm26_vm3 = vcmask 261248   ;;  %s58_s0 = inlined_call_operand.vmem [shape: f32[4,16], index: 0, kind: input, shape index: {}]   ;;  %s59_s1 = inlined_call_operand.vmem [shape: f32[1,64], index: 1, kind: output, shape index: {}]  }
   0x1   :  { %v5_v0 = vld [vmem:[%s58_s0] sm:$0xf]  ;;  %s39_s0 = smov 48  }
   0x2   :  { %6 = vst [vmem:[#allocation1] sm:$0xf] %v5_v0 }
   0x9   :  { %v11_v1 = vld [vmem:[#allocation1 + $0x3] sm:$0x1]   ;;  %v23_v2 = vld [vmem:[#allocation1 + $0x1] sm:$0x1]   ;;  %v7_v3 = vld [vmem:[#allocation1] sm:$0x1]  }
   0xa   :  { %12 = vrot.lane.b32.xlu0 %v11_v1, %s39_s0  ;;  %24 = vrot.lane.b32.xlu1 %v23_v2, %s40_s8  ;;  %v17_v4 = vld [vmem:[#allocation1 + $0x2] sm:$0x1]   ;;  %9 = vst.msk [vmem:[#allocation0] sm:$0x1] %vm8_vm0, %v7_v3  }
   0xe   :  { %18 = vrot.lane.b32.xlu0 %v17_v4, %s41_s9 }
  0x7c   :  { %v13_v5 = vpop.permute.xlu0 %12   ;;  %v25_v6 = vpop.permute.xlu1 %24  }
  0x7d   :  { %15 = vst.msk [vmem:[#allocation0] sm:$0x1] %vm14_vm1, %v13_v5  }
  0x80   :  { %v19_v7 = vpop.permute.xlu0 %18  }
  0x81   :  { %21 = vst.msk [vmem:[#allocation0] sm:$0x1] %vm20_vm2, %v19_v7  }
  0x82   :  { %27 = vst.msk [vmem:[#allocation0] sm:$0x1] %vm26_vm3, %v25_v6  }
  0x89   :  { %v32_v8 = vld [vmem:[#allocation0] sm:$0x1] }
  0x8a   :  { %35 = vst [vmem:[%s59_s1] sm:$0x1] %v32_v8 }

// kernel: _lambda_.5
= control target key start
LH: loop header
LB: loop body
LE: loop exit
PB: predicated region body
PF: predicated region fallthrough
CT: control target
= control target key end

     0   :  { %s2103_s25 = smov 0   ;;  %s2413_s0 = inlined_call_operand.vmem [shape: bf16[2,64,8], index: 0, kind: input, shape index: {}]   ;;  %s2414_s1 = inlined_call_operand.vmem [shape: bf16[8,8], index: 1, kind: input, shape index: {}]   ;;  %s2415_s2 = inlined_call_operand.vmem [shape: bf16[72,8], index: 2, kind: input, shape index: {}]   ;;  %s2416_s3 = inlined_call_operand.vmem [shape: bf16[8,32], index: 3, kind: input, shape index: {}]   ;;  %s2417_s4 = inlined_call_operand.vmem [shape: bf16[8,32], index: 4, kind: input, shape index: {}]   ;;  %s2418_s5 = inlined_call_operand.vmem [shape: f32[1,8], index: 5, kind: input, shape index: {}]   ;;  %s2419_s6 = inlined_call_operand.vmem [shape: f32[1,8], index: 6, kind: input, shape index: {}]   ;;  %s2420_s7 = inlined_call_operand.vmem [shape: f32[1,8], index: 7, kind: input, shape index: {}]   ;;  %s2421_s8 = inlined_call_operand.vmem [shape: f32[1,8], index: 8, kind: input, shape index: {}]   ;;  %s2422_s9 = inlined_call_operand.vmem [shape: f32[1,32], index: 9, kind: input, shape index: {}]   ;;  %s2423_s10 = inlined_call_operand.vmem [shape: f32[1,32], index: 10, kind: input, shape index: {}]   ;;  %s2424_s11 = inlined_call_operand.vmem [shape: f32[1,32], index: 11, kind: input, shape index: {}]   ;;  %s2425_s12 = inlined_call_operand.vmem [shape: f32[1,32], index: 12, kind: input, shape index: {}]   ;;  %s2426_s13 = inlined_call_operand.vmem [shape: bf16[2,64,32], index: 13, kind: output, shape index: {}]  }
   0x1 LB: > { %s1700_s26 = sadd.s32 4294967295, %s2022_s25   ;;  %p1704_p0 = scmp.ge.s32.totalorder %s2022_s25, 1  ;;  %s2022_s25 = sphi %s2103_s25, %s23_s25  }
   0x2   : > { %p387_p1 = scmp.lt.s32.totalorder %s2022_s25, 3 }
   0x4   : > { %p388_p2 = pnand %p1704_p0, %p387_p1 }
   0x5   : > { %p431_p3 = scmp.lt.s32.totalorder (!%p388_p2), %s1700_s26, 1  ;;  %s2025_s16 = smov (!%p388_p2), 48  }
   0x6   : > { %391 = sbr.rel (%p388_p2) target bundleno = 899 (0x383), region = 72  ;;  %s2026_s17 = smov (!%p388_p2), 8  }
   0x7   : > { %s2027_s18 = smov (!%p388_p2), 56   ;;  %s2028_s19 = smov (!%p388_p2), 16  }
   0x8   : > { %s2029_s24 = smov (!%p388_p2), 24   ;;  %s2030_s27 = smov (!%p388_p2), 32  }
   0x9   : > { %s2031_s28 = smov (!%p388_p2), 40   ;;  %s2032_s30 = smov (!%p388_p2), 64  }
   0xb   : > { %v450_v0 = vld [vmem:[%s2414_s1] sm:$0xf]  ;;  %vm484_vm0 = vcmask 1043456   ;;  %s2428_s26 = smov (!%p431_p3, %s1700_s26), 1  ;;  %vm471_vm1 = vcmask 64512   ;;  %vm592_vm2 = vcmask 58368  }
   0xc   : > { %1982 = vmatprep.subr.msk.bf16.mxu1 %vm484_vm0, %v450_v0  ;;  %v486_v1 = vsel %vm484_vm0, %v450_v0, 0  ;;  %s1828_s29 = sshll.u32 %s2428_s26, 5  ;;  %v2024_v6 = vmov 0.0   ;;  %vm726_vm3 = vcmask 126016   ;;  %vm661_vm4 = vcmask 60416  }
   0xd   : > { %1935 = vmatpush3.bf16.msra.mxu1 %v486_v1  ;;  %s435_s15 = scalar_lea.vmem %s2413_s0, %s1828_s29  ;;  %598 = vst.msk [vmem:[#allocation2 + $0x30] sm:$0xff] %vm471_vm1, %v2024_v6  ;;  %591 = vst.msk [vmem:[#allocation2] sm:$0xff] %vm471_vm1, %v2024_v6  ;;  %vm791_vm5 = vcmask 191616   ;;  %v1717_v18 = vld [vmem:[%s2418_s5] ss:$0 sm:$0xff]  ;;  %vm856_vm6 = vcmask 257216  }
   0xe   : > { %v2124_v2 = vld [vmem:[%s435_s15] sm:$0xff]   ;;  %v2126_v3 = vld [vmem:[%s435_s15 + $0x8] sm:$0xff]   ;;  %v2130_v4 = vld [vmem:[%s435_s15 + $0x10] sm:$0xff]   ;;  %599 = vst.msk [vmem:[#allocation2 + $0x38] sm:$0x3] %vm592_vm2, %v2024_v6  ;;  %vm921_vm7 = vcmask 322816  }
   0xf   : > { %1936 = vmatprep.mubr.msk.bf16.mxu1 %vm471_vm1, %v2124_v2  ;;  %v2136_v5 = vld [vmem:[%s435_s15 + $0x18] sm:$0xff]   ;;  %593 = vst.msk [vmem:[#allocation2 + $0x8] sm:$0x3] %vm592_vm2, %v2024_v6  ;;  %595 = vst.msk [vmem:[#allocation2 + $0x18] sm:$0x3] %vm592_vm2, %v2024_v6  ;;  %vm986_vm8 = vcmask 388416  }
  0x10   : > { %1937 = vmatmul.mubr.msk.bf16.vlgmr.msra.gmra.mxu1 %vm471_vm1, %v2126_v3  ;;  %594 = vst.msk [vmem:[#allocation2 + $0x10] sm:$0xff] %vm471_vm1, %v2024_v6  ;;  %596 = vst.msk [vmem:[#allocation2 + $0x20] sm:$0xff] %vm471_vm1, %v2024_v6  ;;  %v1718_v21 = vld [vmem:[%s2419_s6] ss:$0 sm:$0xff]  ;;  %vm1052_vm9 = vcmask 454016   ;;  %vm1117_vm10 = vcmask 519616  }
  0x11   : > { %1940 = vmatprep.mubr.msk.bf16.mxu1 %vm471_vm1, %v2130_v4  ;;  %597 = vst.msk [vmem:[#allocation2 + $0x28] sm:$0x3] %vm592_vm2, %v2024_v6  ;;  %601 = vst.msk [vmem:[#allocation2 + $0x48] sm:$0x3] %vm592_vm2, %v2024_v6  ;;  %vm1182_vm11 = vcmask 585216   ;;  %vm1255_vm12 = vcmask 588800  }
  0x12   : > { %600 = vst.msk [vmem:[#allocation2 + $0x40] sm:$0xff] %vm471_vm1, %v2024_v6  ;;  %602 = vst.msk [vmem:[#allocation2 + $0x50] sm:$0xff] %vm471_vm1, %v2024_v6  ;;  %vm1636_vm13 = vcmask 257024  }
  0x13   : > { %603 = vst.msk [vmem:[#allocation2 + $0x58] sm:$0x3] %vm592_vm2, %v2024_v6  ;;  %605 = vst.msk [vmem:[#allocation2 + $0x68] sm:$0x3] %vm592_vm2, %v2024_v6 }
  0x14   : > { %604 = vst.msk [vmem:[#allocation2 + $0x60] sm:$0xff] %vm471_vm1, %v2024_v6  ;;  %606 = vst.msk [vmem:[#allocation2 + $0x70] sm:$0xff] %vm471_vm1, %v2024_v6  ;;  %v621_v15 = vld [vmem:[#allocation2] sm:$0xff] }
  0x15   : > { %607 = vst.msk [vmem:[#allocation2 + $0x78] sm:$0x3] %vm592_vm2, %v2024_v6  ;;  %609 = vst.msk [vmem:[#allocation2 + $0x88] sm:$0x3] %vm592_vm2, %v2024_v6  ;;  %v1830_v16 = vpack.c.bf16 %v621_v15, %v621_v15 }
  0x16   : > { %608 = vst.msk [vmem:[#allocation2 + $0x80] sm:$0xff] %vm471_vm1, %v2024_v6  ;;  %610 = vst.msk [vmem:[#allocation2 + $0x90] sm:$0xff] %vm471_vm1, %v2024_v6  ;;  %v670_v8 = vld [vmem:[#allocation2 + $0x1] sm:$0xff] }
  0x17   : > { %611 = vst.msk [vmem:[#allocation2 + $0x98] sm:$0x3] %vm592_vm2, %v2024_v6  ;;  %v1838_v10 = vpack.c.bf16 %v670_v8, %v670_v8  ;;  %v735_v12 = vld [vmem:[#allocation2 + $0x2] sm:$0xff] }
  0x18   : > { %1941 = vmatmul.mubr.msk.bf16.gmra.mxu1 %vm471_vm1, %v2136_v5  ;;  %v1846_v14 = vpack.c.bf16 %v735_v12, %v735_v12  ;;  %662 = vst.msk [vmem:[#allocation3] sm:$0xf] %vm661_vm4, %v1830_v16 }
  0x19   : > { %702 = vrot.lane.b32.xlu0 %v1838_v10, %s2026_s17 }
  0x1d   : > { %v1003_v7 = vld [vmem:[#allocation2 + $0x90] sm:$0xff]  ;;  %767 = vrot.lane.b32.xlu0 %v1846_v14, %s2028_s19 }
  0x1e   : > { %v1885_v9 = vpack.c.bf16 %v1003_v7, %v1003_v7  ;;  %v1068_v11 = vld [vmem:[#allocation2 + $0x91] sm:$0xff] }
  0x1f   : > { %v1893_v13 = vpack.c.bf16 %v1068_v11, %v1068_v11 }
  0x20   : > { %1042 = vrot.lane.b32.xlu1 %v1885_v9, %s2025_s16 }
  0x24   : > { %1107 = vrot.lane.b32.xlu1 %v1893_v13, %s2027_s18 }
  0x8b   : > { %v703_v17 = vpop.permute.xlu0 %702 }
  0x8c   : > { %727 = vst.msk [vmem:[#allocation3] sm:$0xf] %vm726_vm3, %v703_v17 }
  0x8f   : > { %v768_v19 = vpop.permute.xlu0 %767 }
  0x90   : > { %792 = vst.msk [vmem:[#allocation3] sm:$0xf] %vm791_vm5, %v768_v19 }
  0xd0   : > { %v1938_v20 = vpop.f32.mrf.mxu1 }
  0xd1   : > { %v562_v22 = vmul.f32 %v1938_v20, %v1717_v18 }
  0xd2   : > { %v522_v23 = vpop.f32.mrf.mxu1 }
  0xd3   : > { %v577_v24 = vadd.f32 %v1718_v21, %v562_v22  ;;  %v560_v25 = vmul.f32 %v1717_v18, %v522_v23 }
  0xd4   : > { %v1939_v26 = vpop.f32.mrf.mxu1 }
  0xd5   : > { %v585_v27 = vmax.f32 %v577_v24, 0.0  ;;  %v575_v28 = vadd.f32 %v1718_v21, %v560_v25  ;;  %v563_v29 = vmul.f32 %v1939_v26, %v1717_v18 }
  0xd6   : > { %v525_v30 = vpop.f32.mrf.mxu1 }
  0xd7   : > { %615 = vst.msk [vmem:[#allocation2 + $0x31] sm:$0xff] %vm471_vm1, %v585_v27  ;;  %v583_v31 = vmax.f32 %v575_v28, 0.0  ;;  %v578_v32 = vadd.f32 %v1718_v21, %v563_v29  ;;  %v561_v33 = vmul.f32 %v1717_v18, %v525_v30  ;;  %v2008_v27 = vld [vmem:[%s2415_s2 + $0x20] ss:$0 sps:$4 sm:$0xff]   ;;  %v2009_v29 = vld [vmem:[%s2415_s2 + $0x18] sm:$0xff]   ;;  %v2010_v30 = vld [vmem:[%s2415_s2 + $0x10] sm:$0xff]  }
  0xd8   : > { %v1942_v34 = vpop.f32.mrf.mxu1  ;;  %v1269_v28 = vsel %vm484_vm0, %v2008_v27, 0  ;;  %1983 = vmatprep.subr.msk.bf16.mxu1 %vm484_vm0, %v2008_v27 }
  0xd9   : > { %613 = vst.msk [vmem:[#allocation2 + $0x11] sm:$0xff] %vm471_vm1, %v583_v31  ;;  %v586_v35 = vmax.f32 %v578_v32, 0.0  ;;  %v576_v36 = vadd.f32 %v1718_v21, %v561_v33  ;;  %v566_v37 = vmul.f32 %v1942_v34, %v1717_v18  ;;  %1945 = vmatpush3.bf16.msra.mxu1 %v1269_v28  ;;  %v2011_v31 = vld [vmem:[%s2415_s2 + $0x8] sm:$0xff]   ;;  %v2012_v34 = vld [vmem:[%s2415_s2] sm:$0xff]  }
  0xda   : > { %v538_v38 = vpop.f32.mrf.mxu1  ;;  %1946 = vmatprep.subr.bf16.mxu1 %v2009_v29 }
  0xdb   : > { %616 = vst.msk [vmem:[#allocation2 + $0x41] sm:$0xff] %vm471_vm1, %v586_v35  ;;  %v584_v39 = vmax.f32 %v576_v36, 0.0  ;;  %v581_v40 = vadd.f32 %v1718_v21, %v566_v37  ;;  %v564_v41 = vmul.f32 %v1717_v18, %v538_v38 }
  0xdc   : > { %v1943_v42 = vpop.f32.mrf.mxu1 }
  0xdd   : > { %614 = vst.msk [vmem:[#allocation2 + $0x21] sm:$0xff] %vm471_vm1, %v584_v39  ;;  %v589_v43 = vmax.f32 %v581_v40, 0.0  ;;  %v579_v44 = vadd.f32 %v1718_v21, %v564_v41  ;;  %v567_v45 = vmul.f32 %v1943_v42, %v1717_v18  ;;  %1947 = vmatpush3.bf16.msra.mxu1 %v2009_v29 }
  0xde   : > { %v802_v46 = vld [vmem:[#allocation2 + $0x30] sm:$0xff]  ;;  %v541_v48 = vpop.f32.mrf.mxu1  ;;  %1948 = vmatprep.subr.bf16.mxu1 %v2010_v30 }
  0xdf   : > { %v673_v47 = vld [vmem:[#allocation2 + $0x31] sm:$0xff]  ;;  %v1856_v49 = vpack.c.bf16 %v802_v46, %v802_v46  ;;  %619 = vst.msk [vmem:[#allocation2 + $0x71] sm:$0xff] %vm471_vm1, %v589_v43  ;;  %v587_v51 = vmax.f32 %v579_v44, 0.0  ;;  %v582_v54 = vadd.f32 %v1718_v21, %v567_v45  ;;  %v565_v55 = vmul.f32 %v1717_v18, %v541_v48 }
  0xe0   : > { %v1841_v50 = vpack.c.bf16 %v673_v47, %v673_v47  ;;  %v738_v52 = vld [vmem:[#allocation2 + $0x32] sm:$0xff]  ;;  %v2265_v47 = vpop.permute.xlu1 %1042 }
  0xe1   : > { %v800_v53 = vld [vmem:[#allocation2 + $0x10] sm:$0xff]  ;;  %836 = vrot.lane.b32.xlu0 %v1856_v49, %s2029_s24  ;;  %617 = vst.msk [vmem:[#allocation2 + $0x51] sm:$0xff] %vm471_vm1, %v587_v51  ;;  %v590_v58 = vmax.f32 %v582_v54, 0.0  ;;  %v580_v59 = vadd.f32 %v1718_v21, %v565_v55  ;;  %v1849_v60 = vpack.c.bf16 %v738_v52, %v738_v52  ;;  %1949 = vmatpush3.bf16.msra.mxu1 %v2010_v30 }
  0xe2   : > { %708 = vrot.lane.b32.xlu1 %v1841_v50, %s2026_s17  ;;  %v1854_v56 = vpack.c.bf16 %v800_v53, %v800_v53  ;;  %665 = vst.msk [vmem:[#allocation3 + $0xc] sm:$0xf] %vm661_vm4, %v1856_v49  ;;  %v803_v57 = vld [vmem:[#allocation2 + $0x40] sm:$0xff]  ;;  %v671_v7 = vld [vmem:[#allocation2 + $0x11] sm:$0xff]  ;;  %1950 = vmatprep.subr.bf16.mxu1 %v2011_v31 }
  0xe3   : > { %v1857_v61 = vpack.c.bf16 %v803_v57, %v803_v57  ;;  %620 = vst.msk [vmem:[#allocation2 + $0x81] sm:$0xff] %vm471_vm1, %v590_v58  ;;  %v588_v62 = vmax.f32 %v580_v59, 0.0  ;;  %v1839_v10 = vpack.c.bf16 %v671_v7, %v671_v7  ;;  %v736_v13 = vld [vmem:[#allocation2 + $0x12] sm:$0xff]  ;;  %v868_v15 = vld [vmem:[#allocation2 + $0x41] sm:$0xff] }
  0xe4   : > { %663 = vst.msk [vmem:[#allocation3 + $0x4] sm:$0xf] %vm661_vm4, %v1854_v56  ;;  %v801_v63 = vld [vmem:[#allocation2 + $0x20] sm:$0xff]  ;;  %v1847_v14 = vpack.c.bf16 %v736_v13, %v736_v13  ;;  %v1865_v16 = vpack.c.bf16 %v868_v15, %v868_v15  ;;  %v2273_v48 = vpop.permute.xlu1 %1107 }
  0xe5   : > { %901 = vrot.lane.b32.xlu0 %v1841_v50, %s2030_s27  ;;  %v1855_v0 = vpack.c.bf16 %v801_v63, %v801_v63  ;;  %666 = vst.msk [vmem:[#allocation3 + $0x10] sm:$0xf] %vm661_vm4, %v1857_v61  ;;  %v933_v17 = vld [vmem:[#allocation2 + $0x42] sm:$0xff]  ;;  %1951 = vmatpush3.bf16.msra.mxu1 %v2011_v31 }
  0xe6   : > { %773 = vrot.lane.b32.xlu1 %v1849_v60, %s2028_s19  ;;  %618 = vst.msk [vmem:[#allocation2 + $0x61] sm:$0xff] %vm471_vm1, %v588_v62  ;;  %v1001_v1 = vld [vmem:[#allocation2 + $0x70] sm:$0xff]  ;;  %v1873_v18 = vpack.c.bf16 %v933_v17, %v933_v17  ;;  %v672_v19 = vld [vmem:[#allocation2 + $0x21] sm:$0xff]  ;;  %1952 = vmatprep.subr.bf16.mxu1 %v2012_v34 }
  0xe7   : > { %v1883_v6 = vpack.c.bf16 %v1001_v1, %v1001_v1  ;;  %664 = vst.msk [vmem:[#allocation3 + $0x8] sm:$0xf] %vm661_vm4, %v1855_v0  ;;  %v1840_v20 = vpack.c.bf16 %v672_v19, %v672_v19  ;;  %v737_v21 = vld [vmem:[#allocation2 + $0x22] sm:$0xff]  ;;  %v677_v22 = vld [vmem:[#allocation2 + $0x71] sm:$0xff] }
  0xe8   : > { %v999_v8 = vld [vmem:[#allocation2 + $0x50] sm:$0xff]  ;;  %v1848_v23 = vpack.c.bf16 %v737_v21, %v737_v21  ;;  %v1845_v24 = vpack.c.bf16 %v677_v22, %v677_v22 }
  0xe9   : > { %966 = vrot.lane.b32.xlu0 %v1849_v60, %s2031_s28  ;;  %v2191_v9 = vpack.c.bf16 %v999_v8, %v999_v8  ;;  %669 = vst.msk [vmem:[#allocation3 + $0x1c] sm:$0xf] %vm661_vm4, %v1883_v6  ;;  %v742_v25 = vld [vmem:[#allocation2 + $0x72] sm:$0xff]  ;;  %1953 = vmatpush3.bf16.msra.mxu1 %v2012_v34 }
  0xea   : > { %1030 = vrot.lane.b32.xlu1 %v1856_v49, %s2025_s16  ;;  %v1853_v26 = vpack.c.bf16 %v742_v25, %v742_v25  ;;  %v1064_v32 = vld [vmem:[#allocation2 + $0x51] sm:$0xff]  ;;  %v1002_v37 = vld [vmem:[#allocation2 + $0x80] sm:$0xff] }
  0xeb   : > { %667 = vst.msk [vmem:[#allocation3 + $0x14] sm:$0xf] %vm661_vm4, %v2191_v9  ;;  %v1889_v33 = vpack.c.bf16 %v1064_v32, %v1064_v32  ;;  %v934_v35 = vld [vmem:[#allocation2 + $0x52] sm:$0xff]  ;;  %v1884_v38 = vpack.c.bf16 %v1002_v37, %v1002_v37  ;;  %v1067_v39 = vld [vmem:[#allocation2 + $0x81] sm:$0xff] }
  0xec   : > { %v1874_v36 = vpack.c.bf16 %v934_v35, %v934_v35  ;;  %v1892_v40 = vpack.c.bf16 %v1067_v39, %v1067_v39  ;;  %v937_v43 = vld [vmem:[#allocation2 + $0x82] sm:$0xff]  ;;  %v1133_v49 = vld [vmem:[#allocation2 + $0x92] sm:$0xff] }
  0xed   : > { %704 = vrot.lane.b32.xlu0 %v1839_v10, %s2026_s17  ;;  %v805_v11 = vld [vmem:[#allocation2 + $0x60] sm:$0xff]  ;;  %v1877_v45 = vpack.c.bf16 %v937_v43, %v937_v43 }
  0xee   : > { %1095 = vrot.lane.b32.xlu1 %v1841_v50, %s2027_s18  ;;  %v2198_v12 = vpack.c.bf16 %v805_v11, %v805_v11  ;;  %v676_v41 = vld [vmem:[#allocation2 + $0x61] sm:$0xff]  ;;  %v1901_v50 = vpack.c.bf16 %v1133_v49, %v1133_v49 }
  0xef   : > { %v1844_v42 = vpack.c.bf16 %v676_v41, %v676_v41  ;;  %v741_v44 = vld [vmem:[#allocation2 + $0x62] sm:$0xff] }
  0xf0   : > { %668 = vst.msk [vmem:[#allocation3 + $0x18] sm:$0xf] %vm661_vm4, %v2198_v12  ;;  %v1852_v46 = vpack.c.bf16 %v741_v44, %v741_v44 }
  0xf1   : > { %832 = vrot.lane.b32.xlu0 %v1854_v56, %s2029_s24 }
  0xf2   : > { %1160 = vrot.lane.b32.xlu1 %v1849_v60, %s2032_s30 }
  0xf5   : > { %897 = vrot.lane.b32.xlu0 %v1839_v10, %s2030_s27 }
  0xf6   : > { %769 = vrot.lane.b32.xlu1 %v1847_v14, %s2028_s19 }
  0xf9   : > { %962 = vrot.lane.b32.xlu0 %v1847_v14, %s2031_s28 }
  0xfa   : > { %838 = vrot.lane.b32.xlu1 %v1857_v61, %s2029_s24 }
  0xfd   : > { %1032 = vrot.lane.b32.xlu0 %v1857_v61, %s2025_s16 }
  0xfe   : > { %903 = vrot.lane.b32.xlu1 %v1865_v16, %s2030_s27 }
 0x101   : > { %1097 = vrot.lane.b32.xlu0 %v1865_v16, %s2027_s18 }
 0x102   : > { %968 = vrot.lane.b32.xlu1 %v1873_v18, %s2031_s28 }
 0x105   : > { %710 = vrot.lane.b32.xlu0 %v1865_v16, %s2026_s17 }
 0x106   : > { %706 = vrot.lane.b32.xlu1 %v1840_v20, %s2026_s17 }
 0x109   : > { %1162 = vrot.lane.b32.xlu0 %v1873_v18, %s2032_s30 }
 0x10a   : > { %834 = vrot.lane.b32.xlu1 %v1855_v0, %s2029_s24 }
 0x10d   : > { %775 = vrot.lane.b32.xlu0 %v1873_v18, %s2028_s19 }
 0x10e   : > { %899 = vrot.lane.b32.xlu1 %v1840_v20, %s2030_s27 }
 0x111   : > { %771 = vrot.lane.b32.xlu0 %v1848_v23, %s2028_s19 }
 0x112   : > { %964 = vrot.lane.b32.xlu1 %v1848_v23, %s2031_s28 }
 0x115   : > { %1028 = vrot.lane.b32.xlu0 %v1855_v0, %s2025_s16 }
 0x116   : > { %716 = vrot.lane.b32.xlu1 %v1845_v24, %s2026_s17 }
 0x119   : > { %1093 = vrot.lane.b32.xlu0 %v1840_v20, %s2027_s18 }
 0x11a   : > { %781 = vrot.lane.b32.xlu1 %v1853_v26, %s2028_s19 }
 0x11d   : > { %1158 = vrot.lane.b32.xlu0 %v1848_v23, %s2032_s30 }
 0x11e   : > { %1038 = vrot.lane.b32.xlu1 %v1883_v6, %s2025_s16 }
 0x121   : > { %844 = vrot.lane.b32.xlu0 %v1883_v6, %s2029_s24 }
 0x122   : > { %1103 = vrot.lane.b32.xlu1 %v1845_v24, %s2027_s18 }
 0x125   : > { %909 = vrot.lane.b32.xlu0 %v1845_v24, %s2030_s27 }
 0x126   : > { %1168 = vrot.lane.b32.xlu1 %v1853_v26, %s2032_s30 }
 0x129   : > { %974 = vrot.lane.b32.xlu0 %v1853_v26, %s2031_s28 }
 0x12a   : > { %1034 = vrot.lane.b32.xlu1 %v2191_v9, %s2025_s16 }
 0x12d   : > { %840 = vrot.lane.b32.xlu0 %v2191_v9, %s2029_s24 }
 0x12e   : > { %1099 = vrot.lane.b32.xlu1 %v1889_v33, %s2027_s18 }
 0x131   : > { %905 = vrot.lane.b32.xlu0 %v1889_v33, %s2030_s27 }
 0x132   : > { %712 = vrot.lane.b32.xlu1 %v1889_v33, %s2026_s17 }
 0x135   : > { %970 = vrot.lane.b32.xlu0 %v1874_v36, %s2031_s28 }
 0x136   : > { %1164 = vrot.lane.b32.xlu1 %v1874_v36, %s2032_s30 }
 0x139   : > { %1040 = vrot.lane.b32.xlu0 %v1884_v38, %s2025_s16 }
 0x13a   : > { %777 = vrot.lane.b32.xlu1 %v1874_v36, %s2028_s19 }
 0x13d   : > { %1105 = vrot.lane.b32.xlu0 %v1892_v40, %s2027_s18 }
 0x13e   : > { %846 = vrot.lane.b32.xlu1 %v1884_v38, %s2029_s24 }
 0x141   : > { %714 = vrot.lane.b32.xlu0 %v1844_v42, %s2026_s17 }
 0x142   : > { %911 = vrot.lane.b32.xlu1 %v1892_v40, %s2030_s27 }
 0x145   : > { %779 = vrot.lane.b32.xlu0 %v1852_v46, %s2028_s19 }
 0x146   : > { %976 = vrot.lane.b32.xlu1 %v1877_v45, %s2031_s28 }
 0x149   : > { %1036 = vrot.lane.b32.xlu0 %v2198_v12, %s2025_s16 }
 0x14a   : > { %842 = vrot.lane.b32.xlu1 %v2198_v12, %s2029_s24  ;;  %s2392_s24 = scalar_lea.vmem %s2426_s13, %s1828_s29 }
 0x14d   : > { %1101 = vrot.lane.b32.xlu0 %v1844_v42, %s2027_s18 }
 0x14e   : > { %907 = vrot.lane.b32.xlu1 %v1844_v42, %s2030_s27 }
 0x151   : > { %1166 = vrot.lane.b32.xlu0 %v1852_v46, %s2032_s30 }
 0x152   : > { %972 = vrot.lane.b32.xlu1 %v1852_v46, %s2031_s28 }
 0x153   : > { %v837_v51 = vpop.permute.xlu0 %836 }
 0x154   : > { %v709_v52 = vpop.permute.xlu1 %708 }
 0x155   : > { %730 = vst.msk [vmem:[#allocation3 + $0xc] sm:$0xf] %vm726_vm3, %v709_v52  ;;  %1170 = vrot.lane.b32.xlu0 %v1877_v45, %s2032_s30 }
 0x156   : > { %1172 = vrot.lane.b32.xlu1 %v1901_v50, %s2032_s30 }
 0x157   : > { %v902_v53 = vpop.permute.xlu0 %901 }
 0x158   : > { %v774_v54 = vpop.permute.xlu1 %773 }
 0x159   : > { %795 = vst.msk [vmem:[#allocation3 + $0xc] sm:$0xf] %vm791_vm5, %v774_v54 }
 0x15b   : > { %v967_v55 = vpop.permute.xlu0 %966 }
 0x15c   : > { %v1031_v56 = vpop.permute.xlu1 %1030 }
 0x15f   : > { %v705_v58 = vpop.permute.xlu0 %704 }
 0x160   : > { %v1096_v57 = vpop.permute.xlu1 %1095  ;;  %728 = vst.msk [vmem:[#allocation3 + $0x4] sm:$0xf] %vm726_vm3, %v705_v58 }
 0x163   : > { %v833_v60 = vpop.permute.xlu0 %832 }
 0x164   : > { %v1161_v59 = vpop.permute.xlu1 %1160  ;;  %857 = vst.msk [vmem:[#allocation3] sm:$0xf] %vm856_vm6, %v833_v60 }
 0x167   : > { %v898_v62 = vpop.permute.xlu0 %897 }
 0x168   : > { %v770_v61 = vpop.permute.xlu1 %769  ;;  %922 = vst.msk [vmem:[#allocation3] sm:$0xf] %vm921_vm7, %v898_v62 }
 0x169   : > { %793 = vst.msk [vmem:[#allocation3 + $0x4] sm:$0xf] %vm791_vm5, %v770_v61 }
 0x16b   : > { %v963_v63 = vpop.permute.xlu0 %962 }
 0x16c   : > { %v839_v0 = vpop.permute.xlu1 %838  ;;  %987 = vst.msk [vmem:[#allocation3] sm:$0xf] %vm986_vm8, %v963_v63 }
 0x16d   : > { %860 = vst.msk [vmem:[#allocation3 + $0xc] sm:$0xf] %vm856_vm6, %v839_v0  ;;  %v1805_v0 = vld [vmem:[%s2421_s8] ss:$0 sm:$0xff] }
 0x16f   : > { %v1033_v1 = vpop.permute.xlu0 %1032 }
 0x170   : > { %v904_v6 = vpop.permute.xlu1 %903 }
 0x171   : > { %925 = vst.msk [vmem:[#allocation3 + $0xc] sm:$0xf] %vm921_vm7, %v904_v6 }
 0x173   : > { %v1098_v7 = vpop.permute.xlu0 %1097 }
 0x174   : > { %v969_v8 = vpop.permute.xlu1 %968 }
 0x175   : > { %990 = vst.msk [vmem:[#allocation3 + $0xc] sm:$0xf] %vm986_vm8, %v969_v8 }
 0x177   : > { %v711_v9 = vpop.permute.xlu0 %710 }
 0x178   : > { %v707_v10 = vpop.permute.xlu1 %706  ;;  %731 = vst.msk [vmem:[#allocation3 + $0x10] sm:$0xf] %vm726_vm3, %v711_v9 }
 0x179   : > { %729 = vst.msk [vmem:[#allocation3 + $0x8] sm:$0xf] %vm726_vm3, %v707_v10 }
 0x17b   : > { %v1163_v11 = vpop.permute.xlu0 %1162 }
 0x17c   : > { %v835_v12 = vpop.permute.xlu1 %834 }
 0x17d   : > { %858 = vst.msk [vmem:[#allocation3 + $0x4] sm:$0xf] %vm856_vm6, %v835_v12 }
 0x17f   : > { %v776_v13 = vpop.permute.xlu0 %775 }
 0x180   : > { %v900_v14 = vpop.permute.xlu1 %899  ;;  %796 = vst.msk [vmem:[#allocation3 + $0x10] sm:$0xf] %vm791_vm5, %v776_v13 }
 0x181   : > { %923 = vst.msk [vmem:[#allocation3 + $0x4] sm:$0xf] %vm921_vm7, %v900_v14 }
 0x183   : > { %v772_v15 = vpop.permute.xlu0 %771 }
 0x184   : > { %v965_v16 = vpop.permute.xlu1 %964  ;;  %794 = vst.msk [vmem:[#allocation3 + $0x8] sm:$0xf] %vm791_vm5, %v772_v15 }
 0x185   : > { %988 = vst.msk [vmem:[#allocation3 + $0x4] sm:$0xf] %vm986_vm8, %v965_v16 }
 0x186   : > { %859 = vst.msk [vmem:[#allocation3 + $0x8] sm:$0xf] %vm856_vm6, %v837_v51 }
 0x187   : > { %1054 = vst.msk [vmem:[#allocation3 + $0x4] sm:$0xf] %vm1052_vm9, %v1031_v56  ;;  %v1029_v17 = vpop.permute.xlu0 %1028 }
 0x188   : > { %924 = vst.msk [vmem:[#allocation3 + $0x8] sm:$0xf] %vm921_vm7, %v902_v53  ;;  %v717_v18 = vpop.permute.xlu1 %716 }
 0x189   : > { %1119 = vst.msk [vmem:[#allocation3 + $0x4] sm:$0xf] %vm1117_vm10, %v1096_v57  ;;  %v1489_v57 = vld [vmem:[%s2417_s4] sm:$0xf] }
 0x18a   : > { %989 = vst.msk [vmem:[#allocation3 + $0x8] sm:$0xf] %vm986_vm8, %v967_v55  ;;  %v1378_v55 = vld [vmem:[%s2416_s3] sm:$0xf] }
 0x18b   : > { %1184 = vst.msk [vmem:[#allocation3 + $0x4] sm:$0xf] %vm1182_vm11, %v1161_v59  ;;  %v1094_v19 = vpop.permute.xlu0 %1093  ;;  %1984 = vmatprep.subr.msk.bf16.mxu0 %vm484_vm0, %v1378_v55  ;;  %v1392_v56 = vsel %vm484_vm0, %v1378_v55, 0  ;;  %v1804_v59 = vld [vmem:[%s2420_s7] ss:$0 sm:$0xff] }
 0x18c   : > { %1055 = vst.msk [vmem:[#allocation3 + $0x8] sm:$0xf] %vm1052_vm9, %v1033_v1  ;;  %1053 = vst.msk [vmem:[#allocation3] sm:$0xf] %vm1052_vm9, %v1029_v17  ;;  %v782_v20 = vpop.permute.xlu1 %781  ;;  %1963 = vmatpush3.bf16.msra.mxu0 %v1392_v56 }
 0x18d   : > { %734 = vst.msk [vmem:[#allocation3 + $0x1c] sm:$0xf] %vm726_vm3, %v717_v18  ;;  %1985 = vmatprep.subr.msk.bf16.mxu0 %vm484_vm0, %v1489_v57  ;;  %v1491_v18 = vsel %vm484_vm0, %v1489_v57, 0 }
 0x18e   : > { %1120 = vst.msk [vmem:[#allocation3 + $0x8] sm:$0xf] %vm1117_vm10, %v1098_v7  ;;  %1118 = vst.msk [vmem:[#allocation3] sm:$0xf] %vm1117_vm10, %v1094_v19 }
 0x18f   : > { %1185 = vst.msk [vmem:[#allocation3 + $0x8] sm:$0xf] %vm1182_vm11, %v1163_v11  ;;  %v1159_v21 = vpop.permute.xlu0 %1158 }
 0x190   : > { %799 = vst.msk [vmem:[#allocation3 + $0x1c] sm:$0xf] %vm791_vm5, %v782_v20  ;;  %v1039_v22 = vpop.permute.xlu1 %1038 }
 0x191   : > { %1183 = vst.msk [vmem:[#allocation3] sm:$0xf] %vm1182_vm11, %v1159_v21 }
 0x193   : > { %v845_v23 = vpop.permute.xlu0 %844 }
 0x194   : > { %v1104_v24 = vpop.permute.xlu1 %1103 }
 0x197   : > { %v910_v25 = vpop.permute.xlu0 %909 }
 0x198   : > { %v1169_v26 = vpop.permute.xlu1 %1168  ;;  %v2007_v27 = vld [vmem:[#allocation3] sm:$0xff]  }
 0x199   : > { %1954 = vmatprep.mubr.msk.bf16.mxu1 %vm1255_vm12, %v2007_v27 }
 0x19b   : > { %v975_v28 = vpop.permute.xlu0 %974 }
 0x19c   : > { %v1035_v29 = vpop.permute.xlu1 %1034 }
 0x19d   : > { %1056 = vst.msk [vmem:[#allocation3 + $0xc] sm:$0xf] %vm1052_vm9, %v1035_v29 }
 0x19f   : > { %v841_v31 = vpop.permute.xlu0 %840 }
 0x1a0   : > { %v1100_v30 = vpop.permute.xlu1 %1099  ;;  %861 = vst.msk [vmem:[#allocation3 + $0x10] sm:$0xf] %vm856_vm6, %v841_v31 }
 0x1a1   : > { %1121 = vst.msk [vmem:[#allocation3 + $0xc] sm:$0xf] %vm1117_vm10, %v1100_v30 }
 0x1a3   : > { %v906_v32 = vpop.permute.xlu0 %905 }
 0x1a4   : > { %v713_v33 = vpop.permute.xlu1 %712  ;;  %926 = vst.msk [vmem:[#allocation3 + $0x10] sm:$0xf] %vm921_vm7, %v906_v32 }
 0x1a5   : > { %732 = vst.msk [vmem:[#allocation3 + $0x14] sm:$0xf] %vm726_vm3, %v713_v33 }
 0x1a7   : > { %v971_v34 = vpop.permute.xlu0 %970 }
 0x1a8   : > { %v1165_v35 = vpop.permute.xlu1 %1164  ;;  %991 = vst.msk [vmem:[#allocation3 + $0x10] sm:$0xf] %vm986_vm8, %v971_v34 }
 0x1a9   : > { %1186 = vst.msk [vmem:[#allocation3 + $0xc] sm:$0xf] %vm1182_vm11, %v1165_v35 }
 0x1ab   : > { %v1041_v37 = vpop.permute.xlu0 %1040 }
 0x1ac   : > { %v778_v36 = vpop.permute.xlu1 %777 }
 0x1ad   : > { %797 = vst.msk [vmem:[#allocation3 + $0x14] sm:$0xf] %vm791_vm5, %v778_v36 }
 0x1af   : > { %v1106_v38 = vpop.permute.xlu0 %1105 }
 0x1b0   : > { %v847_v39 = vpop.permute.xlu1 %846  ;;  %v2013_v40 = vld [vmem:[#allocation3 + $0x8] sm:$0xff]  }
 0x1b1   : > { %864 = vst.msk [vmem:[#allocation3 + $0x1c] sm:$0xf] %vm856_vm6, %v847_v39  ;;  %1955 = vmatmul.mubr.msk.bf16.vlgmr.msra.gmra.mxu1 %vm1255_vm12, %v2013_v40 }
 0x1b3   : > { %v715_v42 = vpop.permute.xlu0 %714 }
 0x1b4   : > { %v912_v41 = vpop.permute.xlu1 %911  ;;  %733 = vst.msk [vmem:[#allocation3 + $0x18] sm:$0xf] %vm726_vm3, %v715_v42 }
 0x1b5   : > { %929 = vst.msk [vmem:[#allocation3 + $0x1c] sm:$0xf] %vm921_vm7, %v912_v41 }
 0x1b7   : > { %v780_v44 = vpop.permute.xlu0 %779 }
 0x1b8   : > { %v977_v43 = vpop.permute.xlu1 %976  ;;  %798 = vst.msk [vmem:[#allocation3 + $0x18] sm:$0xf] %vm791_vm5, %v780_v44 }
 0x1b9   : > { %994 = vst.msk [vmem:[#allocation3 + $0x1c] sm:$0xf] %vm986_vm8, %v977_v43  ;;  %v1810_v43 = vld [vmem:[%s2422_s9] ss:$0 sm:$0xff] }
 0x1ba   : > { %1060 = vst.msk [vmem:[#allocation3 + $0x1c] sm:$0xf] %vm1052_vm9, %v2265_v47 }
 0x1bb   : > { %863 = vst.msk [vmem:[#allocation3 + $0x18] sm:$0xf] %vm856_vm6, %v845_v23  ;;  %v1037_v46 = vpop.permute.xlu0 %1036 }
 0x1bc   : > { %1125 = vst.msk [vmem:[#allocation3 + $0x1c] sm:$0xf] %vm1117_vm10, %v2273_v48  ;;  %v843_v45 = vpop.permute.xlu1 %842 }
 0x1bd   : > { %928 = vst.msk [vmem:[#allocation3 + $0x18] sm:$0xf] %vm921_vm7, %v910_v25 }
 0x1be   : > { %993 = vst.msk [vmem:[#allocation3 + $0x18] sm:$0xf] %vm986_vm8, %v975_v28 }
 0x1bf   : > { %862 = vst.msk [vmem:[#allocation3 + $0x14] sm:$0xf] %vm856_vm6, %v843_v45  ;;  %v1102_v49 = vpop.permute.xlu0 %1101 }
 0x1c0   : > { %1059 = vst.msk [vmem:[#allocation3 + $0x18] sm:$0xf] %vm1052_vm9, %v1041_v37  ;;  %1057 = vst.msk [vmem:[#allocation3 + $0x10] sm:$0xf] %vm1052_vm9, %v1037_v46  ;;  %v908_v47 = vpop.permute.xlu1 %907  ;;  %v1817_v46 = vld [vmem:[%s2425_s12] ss:$0 sm:$0xff] }
 0x1c1   : > { %1124 = vst.msk [vmem:[#allocation3 + $0x18] sm:$0xf] %vm1117_vm10, %v1106_v38  ;;  %1122 = vst.msk [vmem:[#allocation3 + $0x10] sm:$0xf] %vm1117_vm10, %v1102_v49 }
 0x1c2   : > { %927 = vst.msk [vmem:[#allocation3 + $0x14] sm:$0xf] %vm921_vm7, %v908_v47 }
 0x1c3   : > { %v1167_v50 = vpop.permute.xlu0 %1166 }
 0x1c4   : > { %v973_v48 = vpop.permute.xlu1 %972  ;;  %1187 = vst.msk [vmem:[#allocation3 + $0x10] sm:$0xf] %vm1182_vm11, %v1167_v50 }
 0x1c5   : > { %992 = vst.msk [vmem:[#allocation3 + $0x14] sm:$0xf] %vm986_vm8, %v973_v48 }
 0x1c6   : > { %1058 = vst.msk [vmem:[#allocation3 + $0x14] sm:$0xf] %vm1052_vm9, %v1039_v22 }
 0x1c7   : > { %1123 = vst.msk [vmem:[#allocation3 + $0x14] sm:$0xf] %vm1117_vm10, %v1104_v24  ;;  %v1171_v52 = vpop.permute.xlu0 %1170 }
 0x1c8   : > { %1188 = vst.msk [vmem:[#allocation3 + $0x14] sm:$0xf] %vm1182_vm11, %v1169_v26  ;;  %v1173_v51 = vpop.permute.xlu1 %1172  ;;  %1189 = vst.msk [vmem:[#allocation3 + $0x18] sm:$0xf] %vm1182_vm11, %v1171_v52 }
 0x1c9   : > { %1190 = vst.msk [vmem:[#allocation3 + $0x1c] sm:$0xf] %vm1182_vm11, %v1173_v51 }
 0x1cf   : > { %v2014_v53 = vld [vmem:[#allocation3 + $0x10] sm:$0xff]  }
 0x1d0   : > { %v2015_v54 = vld [vmem:[#allocation3 + $0x18] sm:$0xff]   ;;  %1958 = vmatprep.mubr.msk.bf16.mxu1 %vm1255_vm12, %v2014_v53 }
 0x1d1   : > { %1959 = vmatmul.mubr.msk.bf16.gmra.mxu1 %vm1255_vm12, %v2015_v54 }
 0x271   : > { %v1956_v58 = vpop.f32.mrf.mxu1 }
 0x272   : > { %v1345_v62 = vmul.f32 %v1956_v58, %v1804_v59 }
 0x273   : > { %v1305_v60 = vpop.f32.mrf.mxu1 }
 0x274   : > { %v1343_v61 = vmul.f32 %v1804_v59, %v1305_v60  ;;  %v1360_v10 = vadd.f32 %v1805_v0, %v1345_v62 }
 0x275   : > { %v1957_v63 = vpop.f32.mrf.mxu1 }
 0x276   : > { %v1346_v1 = vmul.f32 %v1957_v63, %v1804_v59  ;;  %v1358_v7 = vadd.f32 %v1805_v0, %v1343_v61  ;;  %v1368_v15 = vmax.f32 %v1360_v10, 0.0 }
 0x277   : > { %v1308_v6 = vpop.f32.mrf.mxu1 }
 0x278   : > { %v1361_v8 = vadd.f32 %v1805_v0, %v1346_v1  ;;  %v1344_v9 = vmul.f32 %v1804_v59, %v1308_v6  ;;  %v1366_v13 = vmax.f32 %v1358_v7, 0.0 }
 0x27a   : > { %v1359_v11 = vadd.f32 %v1805_v0, %v1344_v9  ;;  %v1369_v12 = vmax.f32 %v1361_v8, 0.0 }
 0x27c   : > { %v1367_v14 = vmax.f32 %v1359_v11, 0.0  ;;  %v1375_v17 = vpack.c.bf16 %v1369_v12, %v1368_v15 }
 0x27e   : > { %v1374_v16 = vpack.c.bf16 %v1367_v14, %v1366_v13 }
 0x280   : > { %1964 = vmatprep.mubr.msk.bf16.mxu0 %vm471_vm1, %v1374_v16 }
 0x281   : > { %1965 = vmatmul.mubr.msk.bf16.vlgmr.msra.gmra.mxu0 %vm471_vm1, %v1375_v17 }
 0x282   : > { %1973 = vmatpush3.bf16.msra.mxu0 %v1491_v18 }
 0x291   : > { %v1960_v19 = vpop.f32.mrf.mxu1 }
 0x292   : > { %v1349_v22 = vmul.f32 %v1960_v19, %v1804_v59 }
 0x293   : > { %v1321_v20 = vpop.f32.mrf.mxu1 }
 0x294   : > { %v1347_v21 = vmul.f32 %v1804_v59, %v1321_v20  ;;  %v1364_v29 = vadd.f32 %v1805_v0, %v1349_v22 }
 0x295   : > { %v1961_v23 = vpop.f32.mrf.mxu1 }
 0x296   : > { %v1350_v24 = vmul.f32 %v1961_v23, %v1804_v59  ;;  %v1362_v26 = vadd.f32 %v1805_v0, %v1347_v21  ;;  %v1372_v34 = vmax.f32 %v1364_v29, 0.0 }
 0x297   : > { %v1324_v25 = vpop.f32.mrf.mxu1 }
 0x298   : > { %v1365_v27 = vadd.f32 %v1805_v0, %v1350_v24  ;;  %v1348_v28 = vmul.f32 %v1804_v59, %v1324_v25  ;;  %v1370_v32 = vmax.f32 %v1362_v26, 0.0 }
 0x29a   : > { %v1363_v30 = vadd.f32 %v1805_v0, %v1348_v28  ;;  %v1373_v31 = vmax.f32 %v1365_v27, 0.0 }
 0x29c   : > { %v1371_v33 = vmax.f32 %v1363_v30, 0.0  ;;  %v1377_v36 = vpack.c.bf16 %v1373_v31, %v1372_v34 }
 0x29e   : > { %v1376_v35 = vpack.c.bf16 %v1371_v33, %v1370_v32 }
 0x2a0   : > { %1968 = vmatprep.mubr.msk.bf16.mxu0 %vm471_vm1, %v1376_v35 }
 0x2a1   : > { %1969 = vmatmul.mubr.msk.bf16.gmra.mxu0 %vm471_vm1, %v1377_v36 }
 0x2a2   : > { %1974 = vmatprep.mubr.msk.bf16.mxu0 %vm471_vm1, %v2124_v2 }
 0x2a9   : > { %1975 = vmatmul.mubr.msk.bf16.vlgmr.msra.gmra.mxu0 %vm471_vm1, %v2126_v3  ;;  %v1816_v3 = vld [vmem:[%s2424_s11] ss:$0 sm:$0xff] }
 0x2aa   : > { %1978 = vmatprep.mubr.msk.bf16.mxu0 %vm471_vm1, %v2130_v4 }
 0x2b1   : > { %1979 = vmatmul.mubr.msk.bf16.gmra.mxu0 %vm471_vm1, %v2136_v5  ;;  %v1811_v5 = vld [vmem:[%s2423_s10] ss:$0 sm:$0xff] }
 0x341   : > { %v1966_v37 = vpop.f32.mrf.mxu0 }
 0x342   : > { %v1468_v4 = vmul.f32 %v1966_v37, %v1810_v43 }
 0x343   : > { %v1428_v38 = vpop.f32.mrf.mxu0 }
 0x344   : > { %v1466_v47 = vmul.f32 %v1810_v43, %v1428_v38  ;;  %v1483_v51 = vadd.f32 %v1811_v5, %v1468_v4 }
 0x345   : > { %v1967_v39 = vpop.f32.mrf.mxu0 }
 0x346   : > { %v1469_v48 = vmul.f32 %v1967_v39, %v1810_v43  ;;  %v1481_v56 = vadd.f32 %v1811_v5, %v1466_v47 }
 0x347   : > { %v1431_v40 = vpop.f32.mrf.mxu0 }
 0x348   : > { %v1467_v54 = vmul.f32 %v1810_v43, %v1431_v40  ;;  %v1484_v60 = vadd.f32 %v1811_v5, %v1469_v48 }
 0x34a   : > { %v1482_v6 = vadd.f32 %v1811_v5, %v1467_v54 }
 0x361   : > { %v1970_v41 = vpop.f32.mrf.mxu0 }
 0x362   : > { %v1472_v7 = vmul.f32 %v1970_v41, %v1810_v43 }
 0x363   : > { %v1444_v42 = vpop.f32.mrf.mxu0 }
 0x364   : > { %v1470_v8 = vmul.f32 %v1810_v43, %v1444_v42  ;;  %v1487_v21 = vadd.f32 %v1811_v5, %v1472_v7 }
 0x365   : > { %v1971_v2 = vpop.f32.mrf.mxu0 }
 0x366   : > { %v1473_v14 = vmul.f32 %v1971_v2, %v1810_v43  ;;  %v1485_v22 = vadd.f32 %v1811_v5, %v1470_v8 }
 0x367   : > { %v1447_v44 = vpop.f32.mrf.mxu0 }
 0x368   : > { %v1471_v23 = vmul.f32 %v1810_v43, %v1447_v44  ;;  %v1488_v30 = vadd.f32 %v1811_v5, %v1473_v14 }
 0x369   : > { %v1976_v45 = vpop.f32.mrf.mxu0 }
 0x36a   : > { %v1567_v49 = vmul.f32 %v1976_v45, %v1816_v3  ;;  %v1486_v38 = vadd.f32 %v1811_v5, %v1471_v23 }
 0x36b   : > { %v1527_v50 = vpop.f32.mrf.mxu0 }
 0x36c   : > { %v1582_v52 = vadd.f32 %v1817_v46, %v1567_v49  ;;  %v1565_v53 = vmul.f32 %v1816_v3, %v1527_v50 }
 0x36d   : > { %v1977_v55 = vpop.f32.mrf.mxu0 }
 0x36e   : > { %v1590_v57 = vadd.f32 %v1582_v52, %v1483_v51  ;;  %v1580_v58 = vadd.f32 %v1817_v46, %v1565_v53  ;;  %v1568_v59 = vmul.f32 %v1977_v55, %v1816_v3 }
 0x36f   : > { %v1530_v61 = vpop.f32.mrf.mxu0 }
 0x370   : > { %v1598_v62 = vmax.f32 %v1590_v57, 0.0  ;;  %v1588_v63 = vadd.f32 %v1580_v58, %v1481_v56  ;;  %v1583_v0 = vadd.f32 %v1817_v46, %v1568_v59  ;;  %v1566_v1 = vmul.f32 %v1816_v3, %v1530_v61 }
 0x371   : > { %v1980_v9 = vpop.f32.mrf.mxu0 }
 0x372   : > { %v1904_v10 = vpack.c.bf16 %v1598_v62, %v1598_v62  ;;  %v1596_v11 = vmax.f32 %v1588_v63, 0.0  ;;  %v1591_v12 = vadd.f32 %v1583_v0, %v1484_v60  ;;  %v1581_v13 = vadd.f32 %v1817_v46, %v1566_v1 }
 0x373   : > { %v1571_v15 = vmul.f32 %v1980_v9, %v1816_v3  ;;  %v1543_v16 = vpop.f32.mrf.mxu0 }
 0x374   : > { %1639 = vst.msk [vmem:[%s2392_s24 + $0x8] sm:$0xf] %vm1636_vm13, %v1904_v10  ;;  %v1902_v17 = vpack.c.bf16 %v1596_v11, %v1596_v11  ;;  %v1599_v18 = vmax.f32 %v1591_v12, 0.0  ;;  %v1589_v19 = vadd.f32 %v1581_v13, %v1482_v6  ;;  %v1569_v20 = vmul.f32 %v1816_v3, %v1543_v16 }
 0x375   : > { %v1586_v24 = vadd.f32 %v1817_v46, %v1571_v15  ;;  %v1981_v25 = vpop.f32.mrf.mxu0 }
 0x376   : > { %1637 = vst.msk [vmem:[%s2392_s24] sm:$0xf] %vm1636_vm13, %v1902_v17  ;;  %v1905_v26 = vpack.c.bf16 %v1599_v18, %v1599_v18  ;;  %v1597_v27 = vmax.f32 %v1589_v19, 0.0  ;;  %v1584_v28 = vadd.f32 %v1817_v46, %v1569_v20  ;;  %v1572_v29 = vmul.f32 %v1981_v25, %v1816_v3 }
 0x377   : > { %v1594_v31 = vadd.f32 %v1586_v24, %v1487_v21  ;;  %v1546_v32 = vpop.f32.mrf.mxu0 }
 0x378   : > { %1640 = vst.msk [vmem:[%s2392_s24 + $0xc] sm:$0xf] %vm1636_vm13, %v1905_v26  ;;  %v1903_v33 = vpack.c.bf16 %v1597_v27, %v1597_v27  ;;  %v1592_v34 = vadd.f32 %v1584_v28, %v1485_v22  ;;  %v1587_v35 = vadd.f32 %v1817_v46, %v1572_v29  ;;  %v1570_v36 = vmul.f32 %v1816_v3, %v1546_v32 }
 0x379   : > { %v1602_v37 = vmax.f32 %v1594_v31, 0.0 }
 0x37a   : > { %1638 = vst.msk [vmem:[%s2392_s24 + $0x4] sm:$0xf] %vm1636_vm13, %v1903_v33  ;;  %v1600_v39 = vmax.f32 %v1592_v34, 0.0  ;;  %v1595_v40 = vadd.f32 %v1587_v35, %v1488_v30  ;;  %v1585_v41 = vadd.f32 %v1817_v46, %v1570_v36 }
 0x37b   : > { %v1908_v42 = vpack.c.bf16 %v1602_v37, %v1602_v37 }
 0x37c   : > { %v1906_v43 = vpack.c.bf16 %v1600_v39, %v1600_v39  ;;  %v1603_v2 = vmax.f32 %v1595_v40, 0.0  ;;  %v1593_v44 = vadd.f32 %v1585_v41, %v1486_v38 }
 0x37d   : > { %1643 = vst.msk [vmem:[%s2392_s24 + $0x18] sm:$0xf] %vm1636_vm13, %v1908_v42 }
 0x37e   : > { %1641 = vst.msk [vmem:[%s2392_s24 + $0x10] sm:$0xf] %vm1636_vm13, %v1906_v43  ;;  %v1909_v4 = vpack.c.bf16 %v1603_v2, %v1603_v2  ;;  %v1601_v45 = vmax.f32 %v1593_v44, 0.0 }
 0x380   : > { %1644 = vst.msk [vmem:[%s2392_s24 + $0x1c] sm:$0xf] %vm1636_vm13, %v1909_v4  ;;  %v1907_v3 = vpack.c.bf16 %v1601_v45, %v1601_v45 }
 0x382   : > { %1642 = vst.msk [vmem:[%s2392_s24 + $0x14] sm:$0xf] %vm1636_vm13, %v1907_v3 }
 0x383 PF: > { %s23_s25 = sadd.s32 1, %s2022_s25  }
 0x384   : > { %p20_p4 = scmp.ge.s32.totalorder %s23_s25, 4  }
 0x386   :  { %22 = sbr.rel (!%p20_p4) target bundleno = 1 (0x1), region = 104 }

// kernel: _lambda_.4
= control target key start
LH: loop header
LB: loop body
LE: loop exit
PB: predicated region body
PF: predicated region fallthrough
CT: control target
= control target key end

     0   :  { %s4347_s15 = smov 0   ;;  %s7286_s0 = inlined_call_operand.vmem [shape: bf16[2,19,19,12], index: 0, kind: input, shape index: {}]   ;;  %s7287_s1 = inlined_call_operand.vmem [shape: bf16[192,8], index: 1, kind: input, shape index: {}]   ;;  %s7288_s2 = inlined_call_operand.vmem [shape: f32[1,8], index: 2, kind: input, shape index: {}]   ;;  %s7289_s3 = inlined_call_operand.vmem [shape: f32[1,8], index: 3, kind: input, shape index: {}]   ;;  %s7290_s4 = inlined_call_operand.vmem [shape: bf16[2,256,8], index: 4, kind: output, shape index: {}]  }
   0x1 LB: > { %s4039_s16 = sadd.s32 4294967295, %s4304_s15   ;;  %p4043_p0 = scmp.ge.s32.totalorder %s4304_s15, 1  ;;  %s4304_s15 = sphi %s4347_s15, %s14_s15  }
   0x2   : > { %p162_p1 = scmp.lt.s32.totalorder %s4304_s15, 3 }
   0x4   : > { %p163_p2 = pnand %p4043_p0, %p162_p1 }
   0x6   : > { %166 = sbr.rel (%p163_p2) target bundleno = 1331 (0x533), region = 36 }
   0xb   : > { %p188_p3 = scmp.lt.s32.totalorder %s4039_s16, 1  ;;  %vm289_vm0 = vsmask.f32 3328  ;;  %vm290_vm1 = vsmask.f32 7440  ;;  %vm256_vm2 = vcmask 93184  }
   0xc   : > { %vm4424_vm3 = vmor %vm289_vm0, %vm290_vm1  ;;  %v7599_v26 = vmov 0  ;;  %s4306_s21 = smov 12   ;;  %vm853_vm4 = vcmask 1042432   ;;  %vm854_vm5 = vcmask 1046532   ;;  %s4307_s22 = smov 24   ;;  %vm772_vm7 = vcmask 191584  }
   0xd   : > { %s8026_s16 = smov (!%p188_p3, %s4039_s16), 1  ;;  %v7600_v26 = vsel %vm4424_vm3, 4294967295, %v7599_v26  ;;  %vm4989_vm6 = vmor %vm853_vm4, %vm854_vm5  ;;  %vm1097_vm8 = vsmask.f32 2304  ;;  %vm1098_vm9 = vsmask.f32 6416 }
   0xe   : > { %s4219_s17 = smul.u32 228, %s8026_s16  ;;  %7601 = vst [vmem:[#allocation5_spill] sm:$0xff] %v7600_v26  ;;  %vm5278_vm10 = vmor %vm1097_vm8, %vm1098_vm9  ;;  %s4308_s23 = smov 36   ;;  %vm1064_vm11 = vcmask 289984   ;;  %vm1436_vm12 = vcmask 388384   ;;  %vm1567_vm13 = vcmask 486784  }
   0xf   : > { %s4309_s24 = smov 48   ;;  %s4310_s25 = smov 60   ;;  %vm1720_vm14 = vcmask 585184   ;;  %vm1857_vm15 = vcmask 683584   ;;  %vm2001_vm0 = vcmask 781984   ;;  %vm2132_vm1 = vcmask 880384  }
  0x10   : > { %s4361_s20 = scalar_lea.vmem %s7286_s0, %s4219_s17  ;;  %s4311_s26 = smov 72   ;;  %vm2487_vm4 = vcmask 1044416   ;;  %vm2488_vm5 = vcmask 31748   ;;  %vm2633_vm9 = vcmask 125984  }
  0x11   : > { %v4364_v0 = vld [vmem:[%s4361_s20 + $0xc] sm:$0xf]  ;;  %v4367_v1 = vld [vmem:[%s4361_s20 + $0x10] sm:$0xf]  ;;  %v4370_v2 = vld [vmem:[%s4361_s20] sm:$0xf] }
  0x12   : > { %7597 = vst [vmem:[#allocation3_spill] sm:$0xff] %v4364_v0  ;;  %7598 = vst [vmem:[#allocation4_spill] sm:$0xff] %v4367_v1  ;;  %v7316_v3 = vshrl.u32 %v4364_v0, 16  ;;  %v7315_v4 = vshll.u32 %v4364_v0, 16  ;;  %v7321_v5 = vshll.u32 %v4367_v1, 16  ;;  %v7323_v7 = vshrl.u32 %v4370_v2, 16 }
  0x13   : > { %v4376_v6 = vld [vmem:[%s4361_s20 + $0x4] sm:$0xf]  ;;  %259 = vst.msk [vmem:[#allocation2 + $0x10] sm:$0xf] %vm256_vm2, %v4364_v0  ;;  %257 = vst.msk [vmem:[#allocation2] sm:$0xf] %vm256_vm2, %v4370_v2 }
  0x14   : > { %260 = vst.msk [vmem:[#allocation2 + $0x18] sm:$0xf] %vm256_vm2, %v4367_v1  ;;  %v7322_v8 = vshll.u32 %v4370_v2, 16  ;;  %v7331_v9 = vshll.u32 %v4376_v6, 16  ;;  %v4388_v10 = vld [vmem:[%s4361_s20 + $0x14] sm:$0x3]  ;;  %vm6565_vm8 = vmor %vm2488_vm5, %vm2487_vm4 }
  0x15   : > { %v7320_v11 = vshrl.u32 %v4367_v1, 16  ;;  %v7327_v12 = vshrl.u32 %v4376_v6, 16  ;;  %258 = vst.msk [vmem:[#allocation2 + $0x8] sm:$0xf] %vm256_vm2, %v4376_v6  ;;  %v319_v13 = vrot.slane %v7316_v3, 4  ;;  %v322_v14 = vrot.slane %v7315_v4, 5 }
  0x16   : > { %v328_v15 = vrot.slane %v7321_v5, 5  ;;  %v4401_v16 = vld [vmem:[%s4361_s20 + $0x8] sm:$0x3]  ;;  %v295_v17 = vrot.slane %v7323_v7, 4  ;;  %v298_v18 = vrot.slane %v7322_v8, 5  ;;  %v304_v19 = vrot.slane %v7331_v9, 5 }
  0x17   : > { %v4410_v20 = vld [vmem:[%s4361_s20 + $0x1c] sm:$0xf]  ;;  %v323_v21 = vor.u32 %v322_v14, %v319_v13  ;;  %v332_v22 = vrot.slane %v7320_v11, 4  ;;  %v7312_v23 = vshll.u32 %v4388_v10, 16  ;;  %v308_v24 = vrot.slane %v7327_v12, 4  ;;  %s4312_s27 = smov 84  }
  0x18   : > { %v4418_v25 = vld [vmem:[%s4361_s20 + $0x20] sm:$0x3]  ;;  %262 = vst.msk [vmem:[#allocation2 + $0x28] sm:$0xf] %vm256_vm2, %v4410_v20  ;;  %v299_v27 = vor.u32 %v298_v18, %v295_v17  ;;  %v7318_v28 = vshll.u32 %v4401_v16, 16  ;;  %v7310_v29 = vshll.u32 %v4410_v20, 16 }
  0x19   : > { %v7311_v30 = vshrl.u32 %v4410_v20, 16  ;;  %v4432_v31 = vld [vmem:[%s4361_s20 + $0x18] sm:$0xf]  ;;  %v324_v32 = vrot.slane %v323_v21, 4  ;;  %v333_v33 = vor.u32 %v332_v22, %v328_v15  ;;  %v338_v34 = vrot.slane %v7312_v23, 5  ;;  %s4313_s28 = smov 96  }
  0x1a   : > { %v309_v35 = vor.u32 %v308_v24, %v304_v19  ;;  %v4437_v36 = vld [vmem:[%s4361_s20 + $0x28] sm:$0xf]  ;;  %261 = vst.msk [vmem:[#allocation2 + $0x20] sm:$0xf] %vm256_vm2, %v4432_v31  ;;  %v300_v37 = vrot.slane %v299_v27, 4  ;;  %v314_v38 = vrot.slane %v7318_v28, 5 }
  0x1b   : > { %v4445_v39 = vrot.slane %v7310_v29, 5  ;;  %v356_v40 = vrot.slane %v7311_v30, 4  ;;  %v4450_v41 = vld [vmem:[%s4361_s20 + $0x24] sm:$0xf]  ;;  %264 = vst.msk [vmem:[#allocation2 + $0x38] sm:$0xf] %vm256_vm2, %v4437_v36  ;;  %v4456_v42 = vsel %vm4424_vm3, %v324_v32, %v328_v15 }
  0x1c   : > { %7602 = vst [vmem:[#allocation6_spill] sm:$0xff] %v4450_v41  ;;  %7603 = vst [vmem:[#allocation7_spill] sm:$0xff] %v4456_v42  ;;  %v334_v43 = vrot.slane %v333_v33, 4  ;;  %v310_v44 = vrot.slane %v309_v35, 4  ;;  %v7304_v45 = vshll.u32 %v4418_v25, 16  ;;  %680 = vrot.lane.b32.xlu1 %v4456_v42, %s4306_s21  ;;  %v305_v47 = vsel %vm4424_vm3, %v300_v37, %v304_v19  ;;  %s4314_s29 = smov 108  }
  0x1d   : > { %v4460_v46 = vld [vmem:[%s4361_s20 + $0x34] sm:$0xf]  ;;  %263 = vst.msk [vmem:[#allocation2 + $0x30] sm:$0xf] %vm256_vm2, %v4450_v41  ;;  %v357_v48 = vor.u32 %v356_v40, %v4445_v39  ;;  %v7308_v49 = vshrl.u32 %v4432_v31, 16  ;;  %v7305_v50 = vshll.u32 %v4432_v31, 16  ;;  %676 = vrot.lane.b32.xlu0 %v305_v47, %s4306_s21 }
  0x1e   : > { %7604 = vst [vmem:[#allocation8_spill] sm:$0xff] %v4460_v46  ;;  %v4472_v51 = vld [vmem:[%s4361_s20 + $0x2c] sm:$0x3]  ;;  %v4475_v52 = vld [vmem:[%s4361_s20 + $0x30] sm:$0xf]  ;;  %v4482_v53 = vsel %vm4424_vm3, %v334_v43, %v338_v34  ;;  %v315_v54 = vsel %vm4424_vm3, %v310_v44, %v314_v38  ;;  %v362_v55 = vrot.slane %v7304_v45, 5 }
  0x1f   : > { %266 = vst.msk [vmem:[#allocation2 + $0x48] sm:$0xf] %vm256_vm2, %v4460_v46  ;;  %7605 = vst [vmem:[#allocation9_spill] sm:$0xff] %v4482_v53  ;;  %v7302_v56 = vshll.u32 %v4437_v36, 16  ;;  %v4490_v57 = vld [vmem:[%s4361_s20 + $0x38] sm:$0x3] }
  0x20   : > { %v4493_v58 = vld [vmem:[%s4361_s20 + $0x40] sm:$0xf]  ;;  %265 = vst.msk [vmem:[#allocation2 + $0x40] sm:$0xf] %vm256_vm2, %v4475_v52  ;;  %v358_v59 = vrot.slane %v357_v48, 4  ;;  %v343_v60 = vrot.slane %v7308_v49, 4  ;;  %682 = vrot.lane.b32.xlu1 %v4482_v53, %s4306_s21 }
  0x21   : > { %v346_v61 = vrot.slane %v7305_v50, 5  ;;  %v7303_v62 = vshrl.u32 %v4437_v36, 16  ;;  %v4503_v63 = vld [vmem:[%s4361_s20 + $0x3c] sm:$0xf]  ;;  %268 = vst.msk [vmem:[#allocation2 + $0x58] sm:$0xf] %vm256_vm2, %v4493_v58  ;;  %678 = vrot.lane.b32.xlu0 %v315_v54, %s4306_s21 }
  0x22   : > { %v376_v13 = vrot.slane %v7302_v56, 5  ;;  %v7291_v14 = vshll.u32 %v4472_v51, 16  ;;  %v7299_v15 = vshrl.u32 %v4450_v41, 16  ;;  %v7297_v17 = vshll.u32 %v4450_v41, 16  ;;  %v4513_v18 = vld [vmem:[%s4361_s20 + $0x4c] sm:$0xf] }
  0x23   : > { %267 = vst.msk [vmem:[#allocation2 + $0x50] sm:$0xf] %vm256_vm2, %v4503_v63  ;;  %v4521_v19 = vsel %vm4424_vm3, %v358_v59, %v362_v55  ;;  %v347_v21 = vor.u32 %v346_v61, %v343_v60  ;;  %v380_v22 = vrot.slane %v7303_v62, 4  ;;  %v7293_v24 = vshll.u32 %v4460_v46, 16  ;;  %v4527_v27 = vld [vmem:[%s4361_s20 + $0x48] sm:$0xf] }
  0x24   : > { %7606 = vst [vmem:[#allocation10_spill] sm:$0xff] %v4521_v19  ;;  %270 = vst.msk [vmem:[#allocation2 + $0x68] sm:$0xf] %vm256_vm2, %v4513_v18  ;;  %v386_v32 = vrot.slane %v7291_v14, 5  ;;  %v367_v33 = vrot.slane %v7299_v15, 4  ;;  %v370_v34 = vrot.slane %v7297_v17, 5  ;;  %686 = vrot.lane.b32.xlu1 %v4521_v19, %s4306_s21 }
  0x25   : > { %v7296_v35 = vshrl.u32 %v4460_v46, 16  ;;  %v4540_v37 = vld [vmem:[%s4361_s20 + $0x58] sm:$0xf]  ;;  %269 = vst.msk [vmem:[#allocation2 + $0x60] sm:$0xf] %vm256_vm2, %v4527_v27  ;;  %v348_v38 = vrot.slane %v347_v21, 4  ;;  %v381_v40 = vor.u32 %v380_v22, %v376_v13 }
  0x26   : > { %7607 = vst [vmem:[#allocation11_spill] sm:$0xff] %v4540_v37  ;;  %v400_v43 = vrot.slane %v7293_v24, 5  ;;  %v7292_v44 = vshll.u32 %v4490_v57, 16  ;;  %v4548_v47 = vld [vmem:[%s4361_s20 + $0x44] sm:$0x3]  ;;  %v371_v48 = vor.u32 %v370_v34, %v367_v33  ;;  %v7294_v55 = vshrl.u32 %v4475_v52, 16 }
  0x27   : > { %272 = vst.msk [vmem:[#allocation2 + $0x78] sm:$0xf] %vm256_vm2, %v4540_v37  ;;  %v404_v54 = vrot.slane %v7296_v35, 4  ;;  %v7295_v59 = vshll.u32 %v4475_v52, 16  ;;  %v4557_v60 = vld [vmem:[%s4361_s20 + $0x54] sm:$0xf]  ;;  %v4564_v61 = vsel %vm4424_vm3, %v348_v38, %v4445_v39 }
  0x28   : > { %7608 = vst [vmem:[#allocation12_spill] sm:$0xff] %v4557_v60  ;;  %7609 = vst [vmem:[#allocation13_spill] sm:$0xff] %v4564_v61  ;;  %v382_v21 = vrot.slane %v381_v40, 4  ;;  %v410_v22 = vrot.slane %v7292_v44, 5  ;;  %v7298_v33 = vshll.u32 %v4493_v58, 16  ;;  %684 = vrot.lane.b32.xlu0 %v4564_v61, %s4306_s21  ;;  %v372_v14 = vrot.slane %v371_v48, 4 }
  0x29   : > { %v4570_v34 = vld [vmem:[%s4361_s20 + $0x64] sm:$0xf]  ;;  %271 = vst.msk [vmem:[#allocation2 + $0x70] sm:$0xf] %vm256_vm2, %v4557_v60  ;;  %v405_v39 = vor.u32 %v404_v54, %v400_v43  ;;  %v391_v38 = vrot.slane %v7294_v55, 4  ;;  %v394_v40 = vrot.slane %v7295_v59, 5 }
  0x2a   : > { %7610 = vst [vmem:[#allocation14_spill] sm:$0xff] %v4570_v34  ;;  %274 = vst.msk [vmem:[#allocation2 + $0x88] sm:$0xf] %vm256_vm2, %v4570_v34  ;;  %v4584_v44 = vsel %vm4424_vm3, %v382_v21, %v386_v32  ;;  %v4588_v24 = vrot.slane %v7298_v33, 5  ;;  %v7300_v48 = vshrl.u32 %v4493_v58, 16  ;;  %v7301_v54 = vshll.u32 %v4548_v47, 16 }
  0x2b   : > { %7611 = vst [vmem:[#allocation15_spill] sm:$0xff] %v4584_v44  ;;  %v4593_v55 = vld [vmem:[%s4361_s20 + $0x60] sm:$0xf]  ;;  %v4597_v59 = vsel %vm4424_vm3, %v372_v14, %v376_v13  ;;  %v406_v35 = vrot.slane %v405_v39, 4  ;;  %v395_v17 = vor.u32 %v394_v40, %v391_v38  ;;  %v7306_v32 = vshrl.u32 %v4503_v63, 16  ;;  %690 = vrot.lane.b32.xlu1 %v4584_v44, %s4306_s21  ;;  %s4315_s30 = smov 120  }
  0x2c   : > { %7612 = vst [vmem:[#allocation16_spill] sm:$0xff] %v4593_v55  ;;  %7613 = vst [vmem:[#allocation17_spill] sm:$0xff] %v4597_v59  ;;  %v4601_v21 = vld [vmem:[%s4361_s20 + $0x50] sm:$0x3]  ;;  %v428_v15 = vrot.slane %v7300_v48, 4  ;;  %v434_v13 = vrot.slane %v7301_v54, 5  ;;  %688 = vrot.lane.b32.xlu0 %v4597_v59, %s4306_s21 }
  0x2d   : > { %v4604_v33 = vld [vmem:[%s4361_s20 + $0x70] sm:$0xf]  ;;  %273 = vst.msk [vmem:[#allocation2 + $0x80] sm:$0xf] %vm256_vm2, %v4593_v55  ;;  %v7307_v14 = vshll.u32 %v4503_v63, 16  ;;  %v7309_v39 = vshll.u32 %v4513_v18, 16  ;;  %v4625_v40 = vsel %vm4424_vm3, %v406_v35, %v410_v22 }
  0x2e   : > { %7614 = vst [vmem:[#allocation18_spill] sm:$0xff] %v4604_v33  ;;  %v4617_v38 = vld [vmem:[%s4361_s20 + $0x6c] sm:$0xf]  ;;  %276 = vst.msk [vmem:[#allocation2 + $0x98] sm:$0xf] %vm256_vm2, %v4604_v33  ;;  %v396_v48 = vrot.slane %v395_v17, 4  ;;  %v429_v45 = vor.u32 %v428_v15, %v4588_v24 }
  0x2f   : > { %7615 = vst [vmem:[#allocation19_spill] sm:$0xff] %v4617_v38  ;;  %7616 = vst [vmem:[#allocation20_spill] sm:$0xff] %v4625_v40  ;;  %v415_v54 = vrot.slane %v7306_v32, 4  ;;  %v7313_v56 = vshrl.u32 %v4513_v18, 16  ;;  %v4631_v62 = vld [vmem:[%s4361_s20 + $0x7c] sm:$0xf]  ;;  %694 = vrot.lane.b32.xlu1 %v4625_v40, %s4306_s21 }
  0x30   : > { %7617 = vst [vmem:[#allocation21_spill] sm:$0xff] %v4631_v62  ;;  %275 = vst.msk [vmem:[#allocation2 + $0x90] sm:$0xf] %vm256_vm2, %v4617_v38  ;;  %v418_v50 = vrot.slane %v7307_v14, 5  ;;  %v448_v35 = vrot.slane %v7309_v39, 5  ;;  %v7314_v17 = vshll.u32 %v4601_v21, 16  ;;  %v4648_v32 = vsel %vm4424_vm3, %v396_v48, %v400_v43 }
  0x31   : > { %v4642_v22 = vld [vmem:[%s4361_s20 + $0x5c] sm:$0x3]  ;;  %278 = vst.msk [vmem:[#allocation2 + $0xa8] sm:$0xf] %vm256_vm2, %v4631_v62  ;;  %7618 = vst [vmem:[#allocation22_spill] sm:$0xff] %v4648_v32  ;;  %v452_v15 = vrot.slane %v7313_v56, 4  ;;  %692 = vrot.lane.b32.xlu0 %v4648_v32, %s4306_s21 }
  0x32   : > { %v7317_v14 = vshrl.u32 %v4527_v27, 16  ;;  %v7319_v49 = vshll.u32 %v4527_v27, 16  ;;  %v4655_v39 = vld [vmem:[%s4361_s20 + $0x78] sm:$0xf]  ;;  %v430_v29 = vrot.slane %v429_v45, 4  ;;  %v419_v30 = vor.u32 %v418_v50, %v415_v54  ;;  %s4317_s13 = smov 4  }
  0x33   : > { %7619 = vst [vmem:[#allocation23_spill] sm:$0xff] %v4655_v39  ;;  %v458_v43 = vrot.slane %v7314_v17, 5  ;;  %v7325_v48 = vshll.u32 %v4540_v37, 16  ;;  %v4663_v23 = vld [vmem:[%s4361_s20 + $0x88] sm:$0xf]  ;;  %v453_v56 = vor.u32 %v452_v15, %v448_v35  ;;  %v7326_v54 = vshrl.u32 %v4540_v37, 16 }
  0x34   : > { %7620 = vst [vmem:[#allocation24_spill] sm:$0xff] %v4663_v23  ;;  %277 = vst.msk [vmem:[#allocation2 + $0xa0] sm:$0xf] %vm256_vm2, %v4655_v39  ;;  %v439_v45 = vrot.slane %v7317_v14, 4  ;;  %v442_v50 = vrot.slane %v7319_v49, 5  ;;  %v4681_v4 = vsel %vm4424_vm3, %v430_v29, %v434_v13  ;;  %v420_v3 = vrot.slane %v419_v30, 4 }
  0x35   : > { %v4675_v17 = vld [vmem:[%s4361_s20 + $0x68] sm:$0x3]  ;;  %280 = vst.msk [vmem:[#allocation2 + $0xb8] sm:$0xf] %vm256_vm2, %v4663_v23  ;;  %7621 = vst [vmem:[#allocation25_spill] sm:$0xff] %v4681_v4  ;;  %v472_v15 = vrot.slane %v7325_v48, 5  ;;  %698 = vrot.lane.b32.xlu1 %v4681_v4, %s4306_s21 }
  0x36   : > { %v7324_v14 = vshll.u32 %v4642_v22, 16  ;;  %v4687_v28 = vld [vmem:[%s4361_s20 + $0x84] sm:$0xf]  ;;  %v454_v49 = vrot.slane %v453_v56, 4  ;;  %v443_v11 = vor.u32 %v442_v50, %v439_v45  ;;  %v476_v5 = vrot.slane %v7326_v54, 4  ;;  %s4320_s6 = smov 40  }
  0x37   : > { %v7330_v8 = vshrl.u32 %v4557_v60, 16  ;;  %v4693_v7 = vld [vmem:[%s4361_s20 + $0x94] sm:$0xf]  ;;  %279 = vst.msk [vmem:[#allocation2 + $0xb0] sm:$0xf] %vm256_vm2, %v4687_v28  ;;  %v4702_v29 = vsel %vm4424_vm3, %v420_v3, %v4588_v24  ;;  %v7328_v56 = vshll.u32 %v4557_v60, 16 }
  0x38   : > { %7622 = vst [vmem:[#allocation26_spill] sm:$0xff] %v4702_v29  ;;  %v482_v30 = vrot.slane %v7324_v14, 5  ;;  %v7329_v13 = vshll.u32 %v4570_v34, 16  ;;  %282 = vst.msk [vmem:[#allocation2 + $0xc8] sm:$0xf] %vm256_vm2, %v4693_v7  ;;  %696 = vrot.lane.b32.xlu0 %v4702_v29, %s4306_s21  ;;  %v4714_v45 = vsel %vm4424_vm3, %v454_v49, %v458_v43  ;;  %v444_v3 = vrot.slane %v443_v11, 4 }
  0x39   : > { %7623 = vst [vmem:[#allocation27_spill] sm:$0xff] %v4714_v45  ;;  %v477_v24 = vor.u32 %v476_v5, %v472_v15  ;;  %v463_v50 = vrot.slane %v7330_v8, 4  ;;  %v4719_v14 = vld [vmem:[%s4361_s20 + $0x90] sm:$0xf]  ;;  %v4722_v48 = vld [vmem:[%s4361_s20 + $0xa0] sm:$0xf]  ;;  %702 = vrot.lane.b32.xlu1 %v4714_v45, %s4306_s21 }
  0x3a   : > { %7624 = vst [vmem:[#allocation28_spill] sm:$0xff] %v4719_v14  ;;  %7625 = vst [vmem:[#allocation29_spill] sm:$0xff] %v4722_v48  ;;  %v466_v54 = vrot.slane %v7328_v56, 5  ;;  %v496_v12 = vrot.slane %v7329_v13, 5  ;;  %v7336_v49 = vshrl.u32 %v4570_v34, 16  ;;  %v4739_v5 = vsel %vm4424_vm3, %v444_v3, %v448_v35  ;;  %s4321_s11 = smov 52  }
  0x3b   : > { %v4731_v43 = vld [vmem:[%s4361_s20 + $0x74] sm:$0x3]  ;;  %281 = vst.msk [vmem:[#allocation2 + $0xc0] sm:$0xf] %vm256_vm2, %v4719_v14  ;;  %284 = vst.msk [vmem:[#allocation2 + $0xd8] sm:$0xf] %vm256_vm2, %v4722_v48 }
  0x3c   : > { %7626 = vst [vmem:[#allocation30_spill] sm:$0xff] %v4739_v5  ;;  %v478_v56 = vrot.slane %v477_v24, 4  ;;  %v7345_v13 = vshrl.u32 %v4593_v55, 16  ;;  %v7346_v8 = vshll.u32 %v4593_v55, 16  ;;  %v4744_v9 = vld [vmem:[%s4361_s20 + $0x9c] sm:$0xf]  ;;  %v467_v11 = vor.u32 %v466_v54, %v463_v50  ;;  %700 = vrot.lane.b32.xlu0 %v4739_v5, %s4306_s21 }
  0x3d   : > { %7627 = vst [vmem:[#allocation31_spill] sm:$0xff] %v4744_v9  ;;  %v500_v29 = vrot.slane %v7336_v49, 4  ;;  %v7628_v4 = vshll.u32 %v4675_v17, 16  ;;  %v4754_v24 = vld [vmem:[%s4361_s20 + $0xac] sm:$0xf]  ;;  %v7353_v49 = vshrl.u32 %v4604_v33, 16 }
  0x3e   : > { %7629 = vst [vmem:[#allocation32_spill] sm:$0xff] %v4754_v24  ;;  %283 = vst.msk [vmem:[#allocation2 + $0xd0] sm:$0xf] %vm256_vm2, %v4744_v9  ;;  %v4762_v54 = vsel %vm4424_vm3, %v478_v56, %v482_v30  ;;  %v487_v50 = vrot.slane %v7345_v13, 4  ;;  %v4770_v3 = vld [vmem:[%s4361_s20 + $0x80] sm:$0x3] }
  0x3f   : > { %v506_v35 = vrot.slane %v7628_v4, 5  ;;  %7630 = vst [vmem:[#allocation33_spill] sm:$0xff] %v4762_v54  ;;  %v490_v4 = vrot.slane %v7346_v8, 5  ;;  %286 = vst.msk [vmem:[#allocation2 + $0xe8] sm:$0xf] %vm256_vm2, %v4754_v24  ;;  %v468_v45 = vrot.slane %v467_v11, 4  ;;  %v501_v5 = vor.u32 %v500_v29, %v496_v12  ;;  %706 = vrot.lane.b32.xlu1 %v4762_v54, %s4306_s21 }
  0x40   : > { %v7631_v32 = vshll.u32 %v4604_v33, 16  ;;  %v7356_v30 = vshll.u32 %v4731_v43, 16  ;;  %v4778_v56 = vld [vmem:[%s4361_s20 + $0xa8] sm:$0xf]  ;;  %v524_v8 = vrot.slane %v7353_v49, 4  ;;  %v7359_v59 = vshrl.u32 %v4617_v38, 16 }
  0x41   : > { %v491_v13 = vor.u32 %v490_v4, %v487_v50  ;;  %v4785_v61 = vld [vmem:[%s4361_s20 + $0xb8] sm:$0xf]  ;;  %285 = vst.msk [vmem:[#allocation2 + $0xe0] sm:$0xf] %vm256_vm2, %v4778_v56  ;;  %v502_v29 = vrot.slane %v501_v5, 4  ;;  %v7362_v50 = vshll.u32 %v4631_v62, 16 }
  0x42   : > { %v520_v40 = vrot.slane %v7631_v32, 5  ;;  %7632 = vst [vmem:[#allocation34_spill] sm:$0xff] %v4785_v61  ;;  %v4793_v32 = vsel %vm4424_vm3, %v468_v45, %v472_v15  ;;  %v530_v11 = vrot.slane %v7356_v30, 5  ;;  %288 = vst.msk [vmem:[#allocation2 + $0xf8] sm:$0xf] %vm256_vm2, %v4785_v61  ;;  %v511_v44 = vrot.slane %v7359_v59, 4 }
  0x43   : > { %7633 = vst [vmem:[#allocation35_spill] sm:$0xff] %v4793_v32  ;;  %704 = vrot.lane.b32.xlu0 %v4793_v32, %s4306_s21  ;;  %v492_v4 = vrot.slane %v491_v13, 4  ;;  %v7634_v15 = vshll.u32 %v4617_v38, 16  ;;  %v4807_v5 = vld [vmem:[%s4361_s20 + $0x8c] sm:$0x3]  ;;  %v4814_v30 = vsel %vm4424_vm3, %v502_v29, %v506_v35  ;;  %v544_v19 = vrot.slane %v7362_v50, 5 }
  0x44   : > { %v525_v49 = vor.u32 %v524_v8, %v520_v40  ;;  %v4810_v54 = vld [vmem:[%s4361_s20 + $0xb4] sm:$0xf]  ;;  %7636 = vst [vmem:[#allocation37_spill] sm:$0xff] %v4814_v30  ;;  %v7366_v13 = vshrl.u32 %v4631_v62, 16  ;;  %v7365_v8 = vshll.u32 %v4770_v3, 16  ;;  %v7372_v35 = vshrl.u32 %v4655_v39, 16  ;;  %710 = vrot.lane.b32.xlu1 %v4814_v30, %s4306_s21 }
  0x45   : > { %v514_v45 = vrot.slane %v7634_v15, 5  ;;  %7635 = vst [vmem:[#allocation36_spill] sm:$0xff] %v4810_v54  ;;  %287 = vst.msk [vmem:[#allocation2 + $0xf0] sm:$0xf] %vm256_vm2, %v4810_v54  ;;  %v4824_v15 = vsel %vm4424_vm3, %v492_v4, %v496_v12  ;;  %v7371_v42 = vshll.u32 %v4655_v39, 16  ;;  %v7373_v53 = vshll.u32 %v4663_v23, 16 }
  0x46   : > { %7637 = vst [vmem:[#allocation38_spill] sm:$0xff] %v4824_v15  ;;  %v526_v59 = vrot.slane %v525_v49, 4  ;;  %v548_v29 = vrot.slane %v7366_v13, 4  ;;  %v554_v50 = vrot.slane %v7365_v8, 5  ;;  %v535_v49 = vrot.slane %v7372_v35, 4  ;;  %s4162_s14 = sshll.u32 %s8026_s16, 7 }
  0x47   : > { %v515_v32 = vor.u32 %v514_v45, %v511_v44  ;;  %708 = vrot.lane.b32.xlu0 %v4824_v15, %s4306_s21  ;;  %v7376_v4 = vshrl.u32 %v4663_v23, 16  ;;  %v4845_v45 = vld [vmem:[%s4361_s20 + $0x98] sm:$0x3]  ;;  %v538_v13 = vrot.slane %v7371_v42, 5  ;;  %v568_v30 = vrot.slane %v7373_v53, 5  ;;  %s7101_s18 = scalar_lea.vmem %s7290_s4, %s4162_s14 }
  0x48   : > { %v4839_v12 = vsel %vm4424_vm3, %v526_v59, %v530_v11  ;;  %v549_v8 = vor.u32 %v548_v29, %v544_v19  ;;  %v7381_v15 = vshll.u32 %v4807_v5, 16  ;;  %v7384_v11 = vshrl.u32 %v4687_v28, 16 }
  0x49   : > { %7638 = vst [vmem:[#allocation39_spill] sm:$0xff] %v4839_v12  ;;  %v516_v44 = vrot.slane %v515_v32, 4  ;;  %v572_v32 = vrot.slane %v7376_v4, 4  ;;  %v7385_v29 = vshll.u32 %v4687_v28, 16  ;;  %714 = vrot.lane.b32.xlu1 %v4839_v12, %s4306_s21  ;;  %v539_v35 = vor.u32 %v538_v13, %v535_v49  ;;  %v4873_v12 = vld [vmem:[%s4361_s20 + $0xa4] sm:$0x3] }
  0x4a   : > { %v550_v42 = vrot.slane %v549_v8, 4  ;;  %v578_v53 = vrot.slane %v7381_v15, 5  ;;  %v7386_v39 = vshll.u32 %v4693_v7, 16  ;;  %v7388_v23 = vshrl.u32 %v4693_v7, 16  ;;  %7640 = vst [vmem:[#allocation41_spill] sm:$0xff] %v4873_v12 }
  0x4b   : > { %v4854_v59 = vsel %vm4424_vm3, %v516_v44, %v520_v40  ;;  %v573_v40 = vor.u32 %v572_v32, %v568_v30  ;;  %v559_v44 = vrot.slane %v7384_v11, 4  ;;  %v562_v4 = vrot.slane %v7385_v29, 5 }
  0x4c   : > { %7639 = vst [vmem:[#allocation40_spill] sm:$0xff] %v4854_v59  ;;  %712 = vrot.lane.b32.xlu0 %v4854_v59, %s4306_s21  ;;  %v4877_v13 = vsel %vm4424_vm3, %v550_v42, %v554_v50  ;;  %v540_v8 = vrot.slane %v539_v35, 4  ;;  %v592_v49 = vrot.slane %v7386_v39, 5  ;;  %v7387_v32 = vshll.u32 %v4845_v45, 16 }
  0x4d   : > { %7641 = vst [vmem:[#allocation42_spill] sm:$0xff] %v4877_v13  ;;  %v574_v15 = vrot.slane %v573_v40, 4  ;;  %v563_v59 = vor.u32 %v562_v4, %v559_v44  ;;  %v596_v11 = vrot.slane %v7388_v23, 4  ;;  %v7391_v29 = vshrl.u32 %v4719_v14, 16  ;;  %718 = vrot.lane.b32.xlu1 %v4877_v13, %s4306_s21 }
  0x4e   : > { %v4889_v42 = vsel %vm4424_vm3, %v540_v8, %v544_v19  ;;  %v602_v50 = vrot.slane %v7387_v32, 5  ;;  %v7393_v35 = vshll.u32 %v4719_v14, 16  ;;  %v7392_v40 = vshll.u32 %v4722_v48, 16  ;;  %v4944_v14 = vld [vmem:[%s4361_s20 + $0xbc] sm:$0x3] }
  0x4f   : > { %7642 = vst [vmem:[#allocation43_spill] sm:$0xff] %v4889_v42  ;;  %v4899_v4 = vsel %vm4424_vm3, %v574_v15, %v578_v53  ;;  %v564_v44 = vrot.slane %v563_v59, 4  ;;  %v597_v39 = vor.u32 %v596_v11, %v592_v49  ;;  %v583_v19 = vrot.slane %v7391_v29, 4  ;;  %v4916_v29 = vld [vmem:[%s4361_s20 + $0xb0] sm:$0x3] }
  0x50   : > { %716 = vrot.lane.b32.xlu0 %v4889_v42, %s4306_s21  ;;  %7643 = vst [vmem:[#allocation44_spill] sm:$0xff] %v4899_v4  ;;  %v586_v8 = vrot.slane %v7393_v35, 5  ;;  %v616_v32 = vrot.slane %v7392_v40, 5  ;;  %v7396_v23 = vshrl.u32 %v4722_v48, 16  ;;  %v7399_v13 = vshll.u32 %v4873_v12, 16  ;;  %7645 = vst [vmem:[#allocation46_spill] sm:$0xff] %v4916_v29 }
  0x51   : > { %v4911_v53 = vsel %vm4424_vm3, %v564_v44, %v568_v30  ;;  %v598_v15 = vrot.slane %v597_v39, 4  ;;  %v7404_v59 = vshrl.u32 %v4744_v9, 16  ;;  %v7409_v11 = vshll.u32 %v4744_v9, 16  ;;  %722 = vrot.lane.b32.xlu1 %v4899_v4, %s4306_s21 }
  0x52   : > { %7644 = vst [vmem:[#allocation45_spill] sm:$0xff] %v4911_v53  ;;  %v587_v40 = vor.u32 %v586_v8, %v583_v19  ;;  %v620_v35 = vrot.slane %v7396_v23, 4  ;;  %v626_v42 = vrot.slane %v7399_v13, 5  ;;  %v7407_v30 = vshll.u32 %v4754_v24, 16 }
  0x53   : > { %v4929_v39 = vsel %vm4424_vm3, %v598_v15, %v602_v50  ;;  %v607_v44 = vrot.slane %v7404_v59, 4  ;;  %v610_v19 = vrot.slane %v7409_v11, 5  ;;  %v7408_v8 = vshrl.u32 %v4754_v24, 16 }
  0x54   : > { %720 = vrot.lane.b32.xlu0 %v4911_v53, %s4306_s21  ;;  %7646 = vst [vmem:[#allocation47_spill] sm:$0xff] %v4929_v39  ;;  %v588_v23 = vrot.slane %v587_v40, 4  ;;  %v621_v4 = vor.u32 %v620_v35, %v616_v32  ;;  %v640_v13 = vrot.slane %v7407_v30, 5  ;;  %v7412_v12 = vshll.u32 %v4916_v29, 16 }
  0x55   : > { %v611_v53 = vor.u32 %v610_v19, %v607_v44  ;;  %v644_v50 = vrot.slane %v7408_v8, 4  ;;  %v7413_v15 = vshrl.u32 %v4778_v56, 16  ;;  %v7419_v59 = vshll.u32 %v4778_v56, 16  ;;  %726 = vrot.lane.b32.xlu1 %v4929_v39, %s4306_s21 }
  0x56   : > { %v4950_v35 = vsel %vm4424_vm3, %v588_v23, %v592_v49  ;;  %v622_v40 = vrot.slane %v621_v4, 4  ;;  %v650_v44 = vrot.slane %v7412_v12, 5  ;;  %v7416_v19 = vshll.u32 %v4785_v61, 16 }
  0x57   : > { %7647 = vst [vmem:[#allocation48_spill] sm:$0xff] %v4950_v35  ;;  %v612_v30 = vrot.slane %v611_v53, 4  ;;  %v645_v8 = vor.u32 %v644_v50, %v640_v13  ;;  %v631_v11 = vrot.slane %v7413_v15, 4  ;;  %v634_v39 = vrot.slane %v7419_v59, 5 }
  0x58   : > { %724 = vrot.lane.b32.xlu0 %v4950_v35, %s4306_s21  ;;  %v4963_v23 = vsel %vm4424_vm3, %v622_v40, %v626_v42  ;;  %v664_v49 = vrot.slane %v7416_v19, 5  ;;  %v7417_v4 = vshrl.u32 %v4785_v61, 16  ;;  %v7420_v12 = vshll.u32 %v4944_v14, 16 }
  0x59   : > { %7648 = vst [vmem:[#allocation49_spill] sm:$0xff] %v4963_v23  ;;  %v4971_v53 = vsel %vm4424_vm3, %v612_v30, %v616_v32  ;;  %v646_v50 = vrot.slane %v645_v8, 4  ;;  %v635_v15 = vor.u32 %v634_v39, %v631_v11  ;;  %v7418_v35 = vshrl.u32 %v4810_v54, 16  ;;  %730 = vrot.lane.b32.xlu1 %v4963_v23, %s4306_s21 }
  0x5a   : > { %7649 = vst [vmem:[#allocation50_spill] sm:$0xff] %v4971_v53  ;;  %v668_v42 = vrot.slane %v7417_v4, 4  ;;  %v7421_v40 = vshll.u32 %v4810_v54, 16  ;;  %v7651_v30 = vmov 0  ;;  %v858_v39 = vrot.slane %v4376_v6, 5 }
  0x5b   : > { %v4983_v19 = vsel %vm4424_vm3, %v646_v50, %v650_v44  ;;  %v636_v32 = vrot.slane %v635_v15, 4  ;;  %v655_v11 = vrot.slane %v7418_v35, 4  ;;  %v7652_v30 = vsel %vm4989_vm6, 4294967295, %v7651_v30 }
  0x5c   : > { %728 = vrot.lane.b32.xlu0 %v4971_v53, %s4306_s21  ;;  %7650 = vst [vmem:[#allocation51_spill] sm:$0xff] %v4983_v19  ;;  %7653 = vst [vmem:[#allocation52_spill] sm:$0xff] %v7652_v30  ;;  %v669_v8 = vor.u32 %v668_v42, %v664_v49  ;;  %v674_v4 = vrot.slane %v7420_v12, 5  ;;  %v658_v44 = vrot.slane %v7421_v40, 5  ;;  %v4047_v15 = vrot.slane %v4370_v2, 9 }
  0x5d   : > { %v5001_v50 = vsel %vm4424_vm3, %v636_v32, %v640_v13  ;;  %734 = vrot.lane.b32.xlu1 %v4983_v19, %s4306_s21  ;;  %v860_v12 = vrot.slane %v858_v39, 4  ;;  %v861_v40 = vrot.slane %v4401_v16, 5  ;;  %v865_v53 = vrot.slane %v4367_v1, 5 }
  0x5e   : > { %7654 = vst [vmem:[#allocation53_spill] sm:$0xff] %v5001_v50  ;;  %v670_v35 = vrot.slane %v669_v8, 4  ;;  %v659_v59 = vor.u32 %v658_v44, %v655_v11  ;;  %v859_v42 = vsel %vm4989_vm6, %v4047_v15, %v858_v39  ;;  %v868_v44 = vrot.slane %v4388_v10, 5 }
  0x5f   : > { %v862_v39 = vsel %vm4989_vm6, %v860_v12, %v861_v40  ;;  %v867_v8 = vrot.slane %v865_v53, 4  ;;  %v875_v15 = vrot.slane %v4418_v25, 5  ;;  %v879_v12 = vrot.slane %v4437_v36, 5 }
  0x60   : > { %732 = vrot.lane.b32.xlu0 %v5001_v50, %s4306_s21  ;;  %v5013_v13 = vsel %vm4424_vm3, %v670_v35, %v674_v4  ;;  %v660_v32 = vrot.slane %v659_v59, 4  ;;  %v872_v35 = vrot.slane %v4410_v20, 5  ;;  %v4048_v59 = vrot.slane %v4364_v0, 9 }
  0x61   : > { %7655 = vst [vmem:[#allocation54_spill] sm:$0xff] %v5013_v13  ;;  %738 = vrot.lane.b32.xlu1 %v5013_v13, %s4306_s21  ;;  %v956_v50 = vrot.slane %v4754_v24, 5  ;;  %v7689_v24 = vshrl.u32 %v4370_v2, 16  ;;  %v1154_v30 = vshrl.u32 %v4472_v51, 16  ;;  %vm2285_vm2 = vcmask 978784  }
  0x62   : > { %v5019_v11 = vsel %vm4424_vm3, %v660_v32, %v664_v49  ;;  %v5032_v49 = vsel %vm4989_vm6, %v867_v8, %v868_v44  ;;  %v874_v4 = vrot.slane %v872_v35, 4  ;;  %v5038_v40 = vsel %vm4989_vm6, %v4048_v59, %v865_v53 }
  0x63   : > { %7656 = vst [vmem:[#allocation55_spill] sm:$0xff] %v5019_v11  ;;  %7657 = vst [vmem:[#allocation56_spill] sm:$0xff] %v5032_v49  ;;  %v4049_v32 = vrot.slane %v4432_v31, 9  ;;  %v882_v8 = vrot.slane %v4472_v51, 5  ;;  %v886_v44 = vrot.slane %v4460_v46, 5  ;;  %v4050_v59 = vrot.slane %v4450_v41, 9 }
  0x64   : > { %736 = vrot.lane.b32.xlu0 %v5019_v11, %s4306_s21  ;;  %7658 = vst [vmem:[#allocation57_spill] sm:$0xff] %v5038_v40  ;;  %s4318_s21 = smov 16  }
  0x65   : > { %970 = vrot.lane.b32.xlu1 %v862_v39, %s4307_s22  ;;  %v881_v39 = vrot.slane %v879_v12, 4  ;;  %v5053_v53 = vsel %vm4989_vm6, %v4049_v32, %v872_v35  ;;  %v5068_v35 = vsel %vm4989_vm6, %v4050_v59, %v879_v12  ;;  %v4051_v32 = vrot.slane %v4475_v52, 9 }
  0x66   : > { %7660 = vst [vmem:[#allocation59_spill] sm:$0xff] %v5053_v53  ;;  %7662 = vst [vmem:[#allocation61_spill] sm:$0xff] %v5068_v35  ;;  %v4052_v59 = vrot.slane %v4503_v63, 9 }
  0x67   : > { %v5083_v12 = vsel %vm4989_vm6, %v4051_v32, %v886_v44  ;;  %v4053_v32 = vrot.slane %v4527_v27, 9 }
  0x68   : > { %968 = vrot.lane.b32.xlu0 %v859_v42, %s4307_s22  ;;  %v5047_v42 = vsel %vm4989_vm6, %v874_v4, %v875_v15  ;;  %v5062_v4 = vsel %vm4989_vm6, %v881_v39, %v882_v8  ;;  %v888_v15 = vrot.slane %v886_v44, 4  ;;  %7664 = vst [vmem:[#allocation63_spill] sm:$0xff] %v5083_v12 }
  0x69   : > { %974 = vrot.lane.b32.xlu1 %v5032_v49, %s4307_s22  ;;  %7659 = vst [vmem:[#allocation58_spill] sm:$0xff] %v5047_v42  ;;  %7661 = vst [vmem:[#allocation60_spill] sm:$0xff] %v5062_v4  ;;  %v893_v49 = vrot.slane %v4493_v58, 5 }
  0x6b   : > { %v895_v8 = vrot.slane %v893_v49, 4  ;;  %v5098_v44 = vsel %vm4989_vm6, %v4052_v59, %v893_v49  ;;  %v4054_v59 = vrot.slane %v4557_v60, 9 }
  0x6c   : > { %972 = vrot.lane.b32.xlu0 %v5038_v40, %s4307_s22  ;;  %v889_v40 = vrot.slane %v4490_v57, 5  ;;  %7666 = vst [vmem:[#allocation65_spill] sm:$0xff] %v5098_v44 }
  0x6d   : > { %978 = vrot.lane.b32.xlu1 %v5047_v42, %s4307_s22  ;;  %v900_v42 = vrot.slane %v4513_v18, 5 }
  0x6e   : > { %v5077_v39 = vsel %vm4989_vm6, %v888_v15, %v889_v40 }
  0x6f   : > { %7663 = vst [vmem:[#allocation62_spill] sm:$0xff] %v5077_v39  ;;  %v902_v15 = vrot.slane %v900_v42, 4  ;;  %v5113_v49 = vsel %vm4989_vm6, %v4053_v32, %v900_v42  ;;  %v4055_v32 = vrot.slane %v4593_v55, 9 }
  0x70   : > { %976 = vrot.lane.b32.xlu0 %v5053_v53, %s4307_s22  ;;  %v896_v53 = vrot.slane %v4548_v47, 5  ;;  %7668 = vst [vmem:[#allocation67_spill] sm:$0xff] %v5113_v49 }
  0x71   : > { %982 = vrot.lane.b32.xlu1 %v5062_v4, %s4307_s22  ;;  %v907_v4 = vrot.slane %v4540_v37, 5 }
  0x72   : > { %v5092_v40 = vsel %vm4989_vm6, %v895_v8, %v896_v53 }
  0x73   : > { %7665 = vst [vmem:[#allocation64_spill] sm:$0xff] %v5092_v40  ;;  %v909_v8 = vrot.slane %v907_v4, 4  ;;  %v5128_v42 = vsel %vm4989_vm6, %v4054_v59, %v907_v4  ;;  %v4056_v59 = vrot.slane %v4617_v38, 9 }
  0x74   : > { %980 = vrot.lane.b32.xlu0 %v5068_v35, %s4307_s22  ;;  %v903_v35 = vrot.slane %v4601_v21, 5  ;;  %7670 = vst [vmem:[#allocation69_spill] sm:$0xff] %v5128_v42 }
  0x75   : > { %986 = vrot.lane.b32.xlu1 %v5077_v39, %s4307_s22  ;;  %v914_v39 = vrot.slane %v4570_v34, 5 }
  0x76   : > { %v5107_v53 = vsel %vm4989_vm6, %v902_v15, %v903_v35 }
  0x77   : > { %7667 = vst [vmem:[#allocation66_spill] sm:$0xff] %v5107_v53  ;;  %v916_v15 = vrot.slane %v914_v39, 4  ;;  %v5143_v4 = vsel %vm4989_vm6, %v4055_v32, %v914_v39  ;;  %v7676_v32 = vld [vmem:[#allocation23_spill] sm:$0xff] }
  0x78   : > { %984 = vrot.lane.b32.xlu0 %v5083_v12, %s4307_s22  ;;  %v910_v12 = vrot.slane %v4642_v22, 5  ;;  %7672 = vst [vmem:[#allocation71_spill] sm:$0xff] %v5143_v4  ;;  %v4057_v11 = vrot.slane %v7676_v32, 9 }
  0x79   : > { %990 = vrot.lane.b32.xlu1 %v5092_v40, %s4307_s22  ;;  %v921_v40 = vrot.slane %v4604_v33, 5 }
  0x7a   : > { %v5122_v35 = vsel %vm4989_vm6, %v909_v8, %v910_v12 }
  0x7b   : > { %7669 = vst [vmem:[#allocation68_spill] sm:$0xff] %v5122_v35  ;;  %v923_v8 = vrot.slane %v921_v40, 4  ;;  %v5158_v39 = vsel %vm4989_vm6, %v4056_v59, %v921_v40  ;;  %v4058_v59 = vrot.slane %v4687_v28, 9 }
  0x7c   : > { %988 = vrot.lane.b32.xlu0 %v5098_v44, %s4307_s22  ;;  %v917_v44 = vrot.slane %v4675_v17, 5 }
  0x7d   : > { %994 = vrot.lane.b32.xlu1 %v5107_v53, %s4307_s22  ;;  %v928_v53 = vrot.slane %v4631_v62, 5 }
  0x7e   : > { %v5137_v12 = vsel %vm4989_vm6, %v916_v15, %v917_v44 }
  0x7f   : > { %7671 = vst [vmem:[#allocation70_spill] sm:$0xff] %v5137_v12  ;;  %v930_v15 = vrot.slane %v928_v53, 4  ;;  %v5173_v40 = vsel %vm4989_vm6, %v4057_v11, %v928_v53  ;;  %v7681_v53 = vld [vmem:[#allocation28_spill] sm:$0xff] }
  0x80   : > { %992 = vrot.lane.b32.xlu0 %v5113_v49, %s4307_s22  ;;  %v924_v49 = vrot.slane %v4731_v43, 5  ;;  %7678 = vst [vmem:[#allocation74_spill] sm:$0xff] %v5173_v40  ;;  %v4059_v13 = vrot.slane %v7681_v53, 9 }
  0x81   : > { %998 = vrot.lane.b32.xlu1 %v5122_v35, %s4307_s22  ;;  %v7674_v35 = vld [vmem:[#allocation24_spill] sm:$0xff] }
  0x82   : > { %v5152_v44 = vsel %vm4989_vm6, %v923_v8, %v924_v49  ;;  %v935_v26 = vrot.slane %v7674_v35, 5  ;;  %7675 = vst [vmem:[#allocation24_spill] sm:$0xff] %v5158_v39 }
  0x83   : > { %7673 = vst [vmem:[#allocation72_spill] sm:$0xff] %v5152_v44 }
  0x84   : > { %996 = vrot.lane.b32.xlu0 %v5128_v42, %s4307_s22  ;;  %v931_v42 = vrot.slane %v4770_v3, 5  ;;  %v937_v8 = vrot.slane %v935_v26, 4  ;;  %v5188_v11 = vsel %vm4989_vm6, %v4058_v59, %v935_v26  ;;  %v4060_v59 = vrot.slane %v4744_v9, 9 }
  0x85   : > { %1002 = vrot.lane.b32.xlu1 %v5137_v12, %s4307_s22  ;;  %v942_v12 = vrot.slane %v4693_v7, 5  ;;  %7680 = vst [vmem:[#allocation76_spill] sm:$0xff] %v5188_v11  ;;  %v1100_v9 = vrot.slane %v7689_v24, 5  ;;  %v7693_v24 = vshll.u32 %v4401_v16, 16 }
  0x86   : > { %v5167_v49 = vsel %vm4989_vm6, %v930_v15, %v931_v42 }
  0x87   : > { %7677 = vst [vmem:[#allocation73_spill] sm:$0xff] %v5167_v49  ;;  %v944_v15 = vrot.slane %v942_v12, 4  ;;  %v5203_v26 = vsel %vm4989_vm6, %v4059_v13, %v942_v12  ;;  %v958_v12 = vrot.slane %v956_v50, 4 }
  0x88   : > { %1000 = vrot.lane.b32.xlu0 %v5143_v4, %s4307_s22  ;;  %v938_v4 = vrot.slane %v4807_v5, 5  ;;  %7684 = vst [vmem:[#allocation77_spill] sm:$0xff] %v5203_v26 }
  0x89   : > { %1006 = vrot.lane.b32.xlu1 %v5152_v44, %s4307_s22  ;;  %v949_v44 = vrot.slane %v4722_v48, 5  ;;  %v7692_v48 = vshrl.u32 %v4367_v1, 16 }
  0x8a   : > { %v5182_v42 = vsel %vm4989_vm6, %v937_v8, %v938_v4 }
  0x8b   : > { %7679 = vst [vmem:[#allocation75_spill] sm:$0xff] %v5182_v42  ;;  %v951_v8 = vrot.slane %v949_v44, 4 }
  0x8c   : > { %1004 = vrot.lane.b32.xlu0 %v5158_v39, %s4307_s22  ;;  %v945_v39 = vrot.slane %v4845_v45, 5 }
  0x8d   : > { %1010 = vrot.lane.b32.xlu1 %v5167_v49, %s4307_s22 }
  0x8e   : > { %v5197_v4 = vsel %vm4989_vm6, %v944_v15, %v945_v39  ;;  %v1109_v39 = vshrl.u32 %v4401_v16, 16  ;;  %v959_v15 = vrot.slane %v4916_v29, 5 }
  0x8f   : > { %7682 = vst [vmem:[#allocation28_spill] sm:$0xff] %v5197_v4  ;;  %v677_v29 = vpop.permute.xlu0 %676 }
  0x90   : > { %1008 = vrot.lane.b32.xlu0 %v5173_v40, %s4307_s22  ;;  %v7683_v40 = vld [vmem:[#allocation41_spill] sm:$0xff]  ;;  %773 = vst.msk [vmem:[#allocation2] sm:$0xf] %vm772_vm7, %v677_v29 }
  0x91   : > { %1014 = vrot.lane.b32.xlu1 %v5182_v42, %s4307_s22  ;;  %v952_v49 = vrot.slane %v7683_v40, 5  ;;  %v7685_v42 = vshll.u32 %v4376_v6, 16 }
  0x93   : > { %v1105_v19 = vrot.slane %v7685_v42, 6  ;;  %v5217_v13 = vsel %vm4989_vm6, %v951_v8, %v952_v49  ;;  %v963_v42 = vrot.slane %v4785_v61, 5  ;;  %v7691_v49 = vshll.u32 %v4367_v1, 16 }
  0x94   : > { %1012 = vrot.lane.b32.xlu0 %v5188_v11, %s4307_s22  ;;  %v7686_v11 = vshrl.u32 %v4376_v6, 16  ;;  %7687 = vst [vmem:[#allocation78_spill] sm:$0xff] %v5217_v13  ;;  %v681_v6 = vpop.permute.xlu1 %680 }
  0x95   : > { %1018 = vrot.lane.b32.xlu1 %v5197_v4, %s4307_s22  ;;  %v4061_v4 = vrot.slane %v4778_v56, 9  ;;  %v1120_v8 = vrot.slane %v7691_v49, 6  ;;  %775 = vst.msk [vmem:[#allocation2 + $0x10] sm:$0xf] %vm772_vm7, %v681_v6  ;;  %v7694_v49 = vshrl.u32 %v4364_v0, 16  ;;  %v965_v29 = vrot.slane %v963_v42, 4 }
  0x96   : > { %v1104_v23 = vrot.slane %v7686_v11, 5  ;;  %v5223_v11 = vsel %vm4989_vm6, %v4060_v59, %v949_v44  ;;  %v1119_v44 = vrot.slane %v7692_v48, 5  ;;  %v1124_v59 = vshrl.u32 %v4388_v10, 16 }
  0x97   : > { %7688 = vst [vmem:[#allocation79_spill] sm:$0xff] %v5223_v11  ;;  %v1115_v6 = vrot.slane %v7694_v49, 5  ;;  %v5251_v48 = vsel %vm4989_vm6, %v958_v12, %v959_v15 }
  0x98   : > { %1016 = vrot.lane.b32.xlu0 %v5203_v26, %s4307_s22  ;;  %v7690_v26 = vshll.u32 %v4370_v2, 16  ;;  %v5233_v61 = vor.u32 %v1105_v19, %v1104_v23  ;;  %v1111_v2 = vrot.slane %v1109_v39, 5  ;;  %v7695_v19 = vshll.u32 %v4364_v0, 16  ;;  %7696 = vst [vmem:[#allocation80_spill] sm:$0xff] %v5251_v48  ;;  %v683_v16 = vpop.permute.xlu1 %682 }
  0x99   : > { %1022 = vrot.lane.b32.xlu1 %v5217_v13, %s4307_s22  ;;  %v966_v13 = vrot.slane %v4944_v14, 5  ;;  %v4062_v39 = vrot.slane %v4810_v54, 9  ;;  %776 = vst.msk [vmem:[#allocation2 + $0x18] sm:$0xf] %vm772_vm7, %v683_v16  ;;  %v1121_v15 = vor.u32 %v1120_v8, %v1119_v44  ;;  %v7698_v0 = vshll.u32 %v4388_v10, 16 }
  0x9a   : > { %v1101_v40 = vrot.slane %v7690_v26, 6  ;;  %v1112_v26 = vrot.slane %v7693_v24, 6  ;;  %v1116_v23 = vrot.slane %v7695_v19, 6  ;;  %v5257_v24 = vsel %vm4989_vm6, %v4061_v4, %v956_v50  ;;  %v679_v19 = vpop.permute.xlu0 %678  ;;  %v4292_v8 = vld [vmem:[%s4361_s20 + $0x20] sm:$0x3] }
  0x9b   : > { %7697 = vst [vmem:[#allocation81_spill] sm:$0xff] %v5257_v24  ;;  %v1108_v12 = vrot.slane %v5233_v61, 4  ;;  %v1127_v1 = vrot.slane %v7698_v0, 6  ;;  %774 = vst.msk [vmem:[#allocation2 + $0x8] sm:$0xf] %vm772_vm7, %v679_v19  ;;  %v7700_v16 = vshll.u32 %v4410_v20, 16  ;;  %v5274_v10 = vsel %vm4989_vm6, %v965_v29, %v966_v13 }
  0x9c   : > { %1020 = vrot.lane.b32.xlu0 %v5223_v11, %s4307_s22  ;;  %v1102_v49 = vor.u32 %v1101_v40, %v1100_v9  ;;  %v1126_v11 = vrot.slane %v1124_v59, 5  ;;  %v1113_v50 = vor.u32 %v1112_v26, %v1111_v2  ;;  %v1117_v4 = vor.u32 %v1116_v23, %v1115_v6  ;;  %7701 = vst [vmem:[#allocation82_spill] sm:$0xff] %v5274_v10  ;;  %v687_v59 = vpop.permute.xlu1 %686 }
  0x9d   : > { %1026 = vrot.lane.b32.xlu1 %v5251_v48, %s4307_s22  ;;  %v7699_v9 = vshrl.u32 %v4410_v20, 16  ;;  %v1135_v54 = vrot.slane %v7700_v16, 6  ;;  %v7702_v0 = vmov 0  ;;  %v1139_v44 = vshrl.u32 %v4292_v8, 16  ;;  %778 = vst.msk [vmem:[#allocation2 + $0x28] sm:$0xf] %vm772_vm7, %v687_v59 }
  0x9e   : > { %v7703_v0 = vsel %vm5278_vm10, 4294967295, %v7702_v0  ;;  %v5285_v2 = vsel %vm4989_vm6, %v4062_v39, %v963_v42  ;;  %v1103_v26 = vrot.slane %v1102_v49, 4  ;;  %v7706_v6 = vshrl.u32 %v4432_v31, 16  ;;  %v685_v19 = vpop.permute.xlu0 %684 }
  0x9f   : > { %v1134_v40 = vrot.slane %v7699_v9, 5  ;;  %7704 = vst [vmem:[#allocation83_spill] sm:$0xff] %v7703_v0  ;;  %7705 = vst [vmem:[#allocation84_spill] sm:$0xff] %v5285_v2  ;;  %v7707_v13 = vshll.u32 %v4432_v31, 16  ;;  %v1123_v9 = vrot.slane %v1121_v15, 4  ;;  %v1128_v16 = vor.u32 %v1127_v1, %v1126_v11 }
  0xa0   : > { %1024 = vrot.lane.b32.xlu0 %v5257_v24, %s4307_s22  ;;  %v1130_v23 = vrot.slane %v7706_v6, 5  ;;  %777 = vst.msk [vmem:[#allocation2 + $0x20] sm:$0xf] %vm772_vm7, %v685_v19  ;;  %v1114_v42 = vsel %vm5278_vm10, %v1108_v12, %v1113_v50  ;;  %v1118_v39 = vrot.slane %v1117_v4, 4  ;;  %v7708_v8 = vshll.u32 %v4418_v25, 16 }
  0xa1   : > { %v1131_v29 = vrot.slane %v7707_v13, 6  ;;  %1030 = vrot.lane.b32.xlu1 %v5274_v10, %s4307_s22  ;;  %v1136_v49 = vor.u32 %v1135_v54, %v1134_v40  ;;  %v1141_v59 = vrot.slane %v1139_v44, 5  ;;  %v7709_v13 = vshrl.u32 %v4437_v36, 16  ;;  %v691_v10 = vpop.permute.xlu1 %690 }
  0xa2   : > { %v1142_v6 = vrot.slane %v7708_v8, 6  ;;  %v7710_v11 = vshll.u32 %v4437_v36, 16  ;;  %v1107_v54 = vsel %vm5278_vm10, %v1103_v26, %v5233_v61  ;;  %v7711_v25 = vshrl.u32 %v4450_v41, 16  ;;  %780 = vst.msk [vmem:[#allocation2 + $0x38] sm:$0xf] %vm772_vm7, %v691_v10  ;;  %v689_v44 = vpop.permute.xlu0 %688 }
  0xa3   : > { %v1149_v1 = vrot.slane %v7709_v13, 5  ;;  %v1132_v12 = vor.u32 %v1131_v29, %v1130_v23  ;;  %v7712_v4 = vshll.u32 %v4450_v41, 16  ;;  %v7713_v8 = vshrl.u32 %v4460_v46, 16  ;;  %779 = vst.msk [vmem:[#allocation2 + $0x30] sm:$0xf] %vm772_vm7, %v689_v44 }
  0xa4   : > { %1028 = vrot.lane.b32.xlu0 %v5285_v2, %s4307_s22  ;;  %v1150_v19 = vrot.slane %v7710_v11, 6  ;;  %v1145_v50 = vrot.slane %v7711_v25, 5  ;;  %v7714_v11 = vshll.u32 %v4460_v46, 16  ;;  %v1169_v24 = vshrl.u32 %v4490_v57, 16 }
  0xa5   : > { %v1146_v40 = vrot.slane %v7712_v4, 6  ;;  %v1164_v13 = vrot.slane %v7713_v8, 5  ;;  %1342 = vrot.lane.b32.xlu1 %v1114_v42, %s4308_s23  ;;  %v5323_v61 = vsel %vm5278_vm10, %v1123_v9, %v1128_v16  ;;  %v1138_v26 = vrot.slane %v1136_v49, 4  ;;  %v695_v42 = vpop.permute.xlu1 %694 }
  0xa6   : > { %v1165_v2 = vrot.slane %v7714_v11, 6  ;;  %v7715_v10 = vshrl.u32 %v4475_v52, 16  ;;  %v7716_v29 = vshll.u32 %v4475_v52, 16  ;;  %v1143_v4 = vor.u32 %v1142_v6, %v1141_v59  ;;  %782 = vst.msk [vmem:[#allocation2 + $0x48] sm:$0xf] %vm772_vm7, %v695_v42 }
  0xa7   : > { %v1151_v8 = vor.u32 %v1150_v19, %v1149_v1  ;;  %v1156_v11 = vrot.slane %v1154_v30, 5  ;;  %v7717_v44 = vshll.u32 %v4472_v51, 16  ;;  %v5334_v9 = vsel %vm5278_vm10, %v1118_v39, %v1121_v15 }
  0xa8   : > { %v1160_v23 = vrot.slane %v7715_v10, 5  ;;  %v1161_v25 = vrot.slane %v7716_v29, 6  ;;  %1340 = vrot.lane.b32.xlu0 %v1107_v54, %s4308_s23  ;;  %v1133_v16 = vrot.slane %v1132_v12, 4  ;;  %v1147_v46 = vor.u32 %v1146_v40, %v1145_v50  ;;  %v693_v29 = vpop.permute.xlu0 %692 }
  0xa9   : > { %v1157_v48 = vrot.slane %v7717_v44, 6  ;;  %v7718_v10 = vshll.u32 %v4490_v57, 16  ;;  %v1166_v54 = vor.u32 %v1165_v2, %v1164_v13  ;;  %v1171_v6 = vrot.slane %v1169_v24, 5  ;;  %781 = vst.msk [vmem:[#allocation2 + $0x40] sm:$0xf] %vm772_vm7, %v693_v29  ;;  %1346 = vrot.lane.b32.xlu1 %v5323_v61, %s4308_s23  ;;  %v699_v19 = vpop.permute.xlu1 %698 }
  0xaa   : > { %v7719_v30 = vshrl.u32 %v4493_v58, 16  ;;  %v7720_v51 = vshll.u32 %v4493_v58, 16  ;;  %v1162_v15 = vor.u32 %v1161_v25, %v1160_v23  ;;  %v1184_v57 = vshrl.u32 %v4548_v47, 16  ;;  %784 = vst.msk [vmem:[#allocation2 + $0x58] sm:$0xf] %vm772_vm7, %v699_v19 }
  0xab   : > { %v1172_v41 = vrot.slane %v7718_v10, 6  ;;  %v5351_v24 = vsel %vm5278_vm10, %v1138_v26, %v1143_v4  ;;  %v1153_v2 = vrot.slane %v1151_v8, 4  ;;  %v1158_v39 = vor.u32 %v1157_v48, %v1156_v11 }
  0xac   : > { %v1179_v59 = vrot.slane %v7719_v30, 5  ;;  %v1180_v1 = vrot.slane %v7720_v51, 6  ;;  %1344 = vrot.lane.b32.xlu0 %v5334_v9, %s4308_s23  ;;  %v5355_v12 = vsel %vm5278_vm10, %v1133_v16, %v1136_v49  ;;  %v1148_v50 = vrot.slane %v1147_v46, 4  ;;  %v697_v44 = vpop.permute.xlu0 %696 }
  0xad   : > { %v7721_v40 = vshrl.u32 %v4503_v63, 16  ;;  %v7722_v23 = vshll.u32 %v4503_v63, 16  ;;  %v1168_v42 = vrot.slane %v1166_v54, 4  ;;  %v1173_v26 = vor.u32 %v1172_v41, %v1171_v6  ;;  %783 = vst.msk [vmem:[#allocation2 + $0x50] sm:$0xf] %vm772_vm7, %v697_v44  ;;  %1350 = vrot.lane.b32.xlu1 %v5351_v24, %s4308_s23  ;;  %v703_v6 = vpop.permute.xlu1 %702 }
  0xae   : > { %v1181_v4 = vor.u32 %v1180_v1, %v1179_v59  ;;  %v7723_v48 = vshll.u32 %v4548_v47, 16  ;;  %v1163_v46 = vrot.slane %v1162_v15, 4  ;;  %v1186_v49 = vrot.slane %v1184_v57, 5  ;;  %786 = vst.msk [vmem:[#allocation2 + $0x68] sm:$0xf] %vm772_vm7, %v703_v6 }
  0xaf   : > { %v1175_v13 = vrot.slane %v7721_v40, 5  ;;  %v1176_v25 = vrot.slane %v7722_v23, 6  ;;  %v7724_v16 = vshrl.u32 %v4513_v18, 16  ;;  %v7725_v29 = vshll.u32 %v4513_v18, 16 }
  0xb0   : > { %v1187_v11 = vrot.slane %v7723_v48, 6  ;;  %1348 = vrot.lane.b32.xlu0 %v5355_v12, %s4308_s23  ;;  %v5375_v41 = vsel %vm5278_vm10, %v1153_v2, %v1158_v39  ;;  %v1199_v47 = vshrl.u32 %v4601_v21, 16  ;;  %v5380_v59 = vsel %vm5278_vm10, %v1148_v50, %v1151_v8  ;;  %v701_v40 = vpop.permute.xlu0 %700 }
  0xb1   : > { %v1194_v10 = vrot.slane %v7724_v16, 5  ;;  %v1195_v30 = vrot.slane %v7725_v29, 6  ;;  %7726 = vst [vmem:[#allocation85_spill] sm:$0xff] %v5375_v41  ;;  %7727 = vst [vmem:[#allocation86_spill] sm:$0xff] %v5380_v59  ;;  %v1177_v51 = vor.u32 %v1176_v25, %v1175_v13  ;;  %v7728_v1 = vshrl.u32 %v4527_v27, 16  ;;  %1354 = vrot.lane.b32.xlu1 %v5375_v41, %s4308_s23  ;;  %v707_v6 = vpop.permute.xlu1 %706 }
  0xb2   : > { %v7729_v57 = vshll.u32 %v4527_v27, 16  ;;  %v5389_v2 = vsel %vm5278_vm10, %v1168_v42, %v1173_v26  ;;  %v1183_v39 = vrot.slane %v1181_v4, 4  ;;  %785 = vst.msk [vmem:[#allocation2 + $0x60] sm:$0xf] %vm772_vm7, %v701_v40  ;;  %v5396_v8 = vsel %vm5278_vm10, %v1163_v46, %v1166_v54  ;;  %788 = vst.msk [vmem:[#allocation2 + $0x78] sm:$0xf] %vm772_vm7, %v707_v6 }
  0xb3   : > { %v1190_v15 = vrot.slane %v7728_v1, 5  ;;  %7730 = vst [vmem:[#allocation87_spill] sm:$0xff] %v5389_v2  ;;  %7731 = vst [vmem:[#allocation88_spill] sm:$0xff] %v5396_v8  ;;  %v1188_v50 = vor.u32 %v1187_v11, %v1186_v49  ;;  %v1196_v13 = vor.u32 %v1195_v30, %v1194_v10  ;;  %v7732_v23 = vshll.u32 %v4601_v21, 16 }
  0xb4   : > { %v1191_v19 = vrot.slane %v7729_v57, 6  ;;  %1352 = vrot.lane.b32.xlu0 %v5380_v59, %s4308_s23  ;;  %v1201_v44 = vrot.slane %v1199_v47, 5  ;;  %v7733_v42 = vshrl.u32 %v4540_v37, 16  ;;  %v7734_v48 = vshll.u32 %v4540_v37, 16 }
  0xb5   : > { %v1202_v25 = vrot.slane %v7732_v23, 6  ;;  %v1214_v29 = vshrl.u32 %v4642_v22, 16  ;;  %v1178_v54 = vrot.slane %v1177_v51, 4  ;;  %v7735_v11 = vshrl.u32 %v4557_v60, 16  ;;  %v705_v30 = vpop.permute.xlu0 %704  ;;  %1358 = vrot.lane.b32.xlu1 %v5389_v2, %s4308_s23 }
  0xb6   : > { %v1209_v26 = vrot.slane %v7733_v42, 5  ;;  %v1210_v16 = vrot.slane %v7734_v48, 6  ;;  %v1192_v46 = vor.u32 %v1191_v19, %v1190_v15  ;;  %v7736_v21 = vshll.u32 %v4557_v60, 16  ;;  %787 = vst.msk [vmem:[#allocation2 + $0x70] sm:$0xf] %vm772_vm7, %v705_v30  ;;  %v711_v2 = vpop.permute.xlu1 %710 }
  0xb7   : > { %v1205_v49 = vrot.slane %v7735_v11, 5  ;;  %v7737_v47 = vshrl.u32 %v4570_v34, 16  ;;  %v7738_v57 = vshll.u32 %v4570_v34, 16  ;;  %v1229_v23 = vshrl.u32 %v4675_v17, 16  ;;  %790 = vst.msk [vmem:[#allocation2 + $0x88] sm:$0xf] %vm772_vm7, %v711_v2 }
  0xb8   : > { %v1206_v10 = vrot.slane %v7736_v21, 6  ;;  %v5422_v51 = vsel %vm5278_vm10, %v1183_v39, %v1188_v50  ;;  %v1198_v15 = vrot.slane %v1196_v13, 4  ;;  %v7740_v19 = vshrl.u32 %v4593_v55, 16  ;;  %1356 = vrot.lane.b32.xlu0 %v5396_v8, %s4308_s23 }
  0xb9   : > { %v1224_v1 = vrot.slane %v7737_v47, 5  ;;  %v1225_v40 = vrot.slane %v7738_v57, 6  ;;  %7739 = vst [vmem:[#allocation89_spill] sm:$0xff] %v5422_v51  ;;  %v7741_v48 = vshll.u32 %v4593_v55, 16  ;;  %v1203_v11 = vor.u32 %v1202_v25, %v1201_v44  ;;  %1362 = vrot.lane.b32.xlu1 %v5422_v51, %s4308_s23 }
  0xba   : > { %v1220_v42 = vrot.slane %v7740_v19, 5  ;;  %v1211_v21 = vor.u32 %v1210_v16, %v1209_v26  ;;  %v1216_v30 = vrot.slane %v1214_v29, 5  ;;  %v7742_v47 = vshll.u32 %v4642_v22, 16 }
  0xbb   : > { %v1221_v6 = vrot.slane %v7741_v48, 6  ;;  %v5434_v39 = vsel %vm5278_vm10, %v1178_v54, %v1181_v4  ;;  %v1193_v50 = vrot.slane %v1192_v46, 4  ;;  %v1207_v59 = vor.u32 %v1206_v10, %v1205_v49  ;;  %v709_v48 = vpop.permute.xlu0 %708  ;;  %v715_v46 = vpop.permute.xlu1 %714 }
  0xbc   : > { %v1217_v57 = vrot.slane %v7742_v47, 6  ;;  %7743 = vst [vmem:[#allocation90_spill] sm:$0xff] %v5434_v39  ;;  %v7744_v19 = vshll.u32 %v4675_v17, 16  ;;  %v1226_v8 = vor.u32 %v1225_v40, %v1224_v1  ;;  %v1231_v25 = vrot.slane %v1229_v23, 5  ;;  %789 = vst.msk [vmem:[#allocation2 + $0x80] sm:$0xf] %vm772_vm7, %v709_v48  ;;  %1360 = vrot.lane.b32.xlu0 %v5434_v39, %s4308_s23 }
  0xbd   : > { %v7745_v44 = vshrl.u32 %v4604_v33, 16  ;;  %v7746_v22 = vshll.u32 %v4604_v33, 16  ;;  %v1222_v4 = vor.u32 %v1221_v6, %v1220_v42  ;;  %v1244_v17 = vshrl.u32 %v4731_v43, 16  ;;  %792 = vst.msk [vmem:[#allocation2 + $0x98] sm:$0xf] %vm772_vm7, %v715_v46 }
  0xbe   : > { %v1232_v41 = vrot.slane %v7744_v19, 6  ;;  %v5451_v2 = vsel %vm5278_vm10, %v1198_v15, %v1203_v11  ;;  %v1213_v29 = vrot.slane %v1211_v21, 4  ;;  %v1218_v54 = vor.u32 %v1217_v57, %v1216_v30 }
  0xbf   : > { %v1239_v26 = vrot.slane %v7745_v44, 5  ;;  %v1240_v16 = vrot.slane %v7746_v22, 6  ;;  %7747 = vst [vmem:[#allocation91_spill] sm:$0xff] %v5451_v2  ;;  %v5455_v49 = vsel %vm5278_vm10, %v1193_v50, %v1196_v13  ;;  %v1208_v10 = vrot.slane %v1207_v59, 4  ;;  %v713_v6 = vpop.permute.xlu0 %712  ;;  %1366 = vrot.lane.b32.xlu1 %v5451_v2, %s4308_s23 }
  0xc0   : > { %7748 = vst [vmem:[#allocation92_spill] sm:$0xff] %v5455_v49  ;;  %v7749_v1 = vshrl.u32 %v4617_v38, 16  ;;  %v7750_v23 = vshll.u32 %v4617_v38, 16  ;;  %v1228_v47 = vrot.slane %v1226_v8, 4  ;;  %v1233_v15 = vor.u32 %v1232_v41, %v1231_v25  ;;  %791 = vst.msk [vmem:[#allocation2 + $0x90] sm:$0xf] %vm772_vm7, %v713_v6  ;;  %1364 = vrot.lane.b32.xlu0 %v5455_v49, %s4308_s23  ;;  %v719_v25 = vpop.permute.xlu1 %718 }
  0xc1   : > { %v1241_v11 = vor.u32 %v1240_v16, %v1239_v26  ;;  %v7751_v30 = vshll.u32 %v4731_v43, 16  ;;  %v1223_v59 = vrot.slane %v1222_v4, 4  ;;  %v1246_v13 = vrot.slane %v1244_v17, 5  ;;  %794 = vst.msk [vmem:[#allocation2 + $0xa8] sm:$0xf] %vm772_vm7, %v719_v25 }
  0xc2   : > { %v1235_v40 = vrot.slane %v7749_v1, 5  ;;  %v1236_v42 = vrot.slane %v7750_v23, 6  ;;  %v7752_v50 = vshrl.u32 %v4631_v62, 16  ;;  %v7753_v48 = vshll.u32 %v4631_v62, 16 }
  0xc3   : > { %v1247_v57 = vrot.slane %v7751_v30, 6  ;;  %v5475_v43 = vsel %vm5278_vm10, %v1213_v29, %v1218_v54  ;;  %v1259_v41 = vshrl.u32 %v4770_v3, 16  ;;  %v5480_v26 = vsel %vm5278_vm10, %v1208_v10, %v1211_v21  ;;  %v717_v1 = vpop.permute.xlu0 %716 }
  0xc4   : > { %v1254_v19 = vrot.slane %v7752_v50, 5  ;;  %v1255_v44 = vrot.slane %v7753_v48, 6  ;;  %7754 = vst [vmem:[#allocation93_spill] sm:$0xff] %v5475_v43  ;;  %7755 = vst [vmem:[#allocation94_spill] sm:$0xff] %v5480_v26  ;;  %v1237_v22 = vor.u32 %v1236_v42, %v1235_v40  ;;  %v7756_v16 = vshrl.u32 %v7676_v32, 16  ;;  %1370 = vrot.lane.b32.xlu1 %v5475_v43, %s4308_s23  ;;  %1368 = vrot.lane.b32.xlu0 %v5480_v26, %s4308_s23  ;;  %v723_v25 = vpop.permute.xlu1 %722 }
  0xc5   : > { %v7757_v17 = vshll.u32 %v7676_v32, 16  ;;  %v5489_v29 = vsel %vm5278_vm10, %v1228_v47, %v1233_v15  ;;  %v1243_v54 = vrot.slane %v1241_v11, 4  ;;  %793 = vst.msk [vmem:[#allocation2 + $0xa0] sm:$0xf] %vm772_vm7, %v717_v1  ;;  %v5496_v21 = vsel %vm5278_vm10, %v1223_v59, %v1226_v8  ;;  %796 = vst.msk [vmem:[#allocation2 + $0xb8] sm:$0xf] %vm772_vm7, %v723_v25 }
  0xc6   : > { %v1250_v4 = vrot.slane %v7756_v16, 5  ;;  %7758 = vst [vmem:[#allocation95_spill] sm:$0xff] %v5489_v29  ;;  %7759 = vst [vmem:[#allocation96_spill] sm:$0xff] %v5496_v21  ;;  %v1248_v10 = vor.u32 %v1247_v57, %v1246_v13  ;;  %v1256_v40 = vor.u32 %v1255_v44, %v1254_v19  ;;  %v7760_v23 = vshll.u32 %v4770_v3, 16 }
  0xc7   : > { %v1251_v46 = vrot.slane %v7757_v17, 6  ;;  %v1261_v6 = vrot.slane %v1259_v41, 5  ;;  %v7761_v47 = vshrl.u32 %v7674_v35, 16  ;;  %v7762_v30 = vshll.u32 %v7674_v35, 16  ;;  %v721_v44 = vpop.permute.xlu0 %720 }
  0xc8   : > { %v1262_v42 = vrot.slane %v7760_v23, 6  ;;  %v1274_v48 = vshrl.u32 %v4807_v5, 16  ;;  %v1238_v8 = vrot.slane %v1237_v22, 4  ;;  %v7763_v57 = vshrl.u32 %v4687_v28, 16  ;;  %795 = vst.msk [vmem:[#allocation2 + $0xb0] sm:$0xf] %vm772_vm7, %v721_v44  ;;  %1374 = vrot.lane.b32.xlu1 %v5489_v29, %s4308_s23  ;;  %1372 = vrot.lane.b32.xlu0 %v5496_v21, %s4308_s23  ;;  %v727_v29 = vpop.permute.xlu1 %726 }
  0xc9   : > { %v1269_v15 = vrot.slane %v7761_v47, 5  ;;  %v1270_v50 = vrot.slane %v7762_v30, 6  ;;  %v1252_v59 = vor.u32 %v1251_v46, %v1250_v4  ;;  %v7764_v3 = vshll.u32 %v4687_v28, 16  ;;  %798 = vst.msk [vmem:[#allocation2 + $0xc8] sm:$0xf] %vm772_vm7, %v727_v29 }
  0xca   : > { %v1265_v13 = vrot.slane %v7763_v57, 5  ;;  %v7765_v41 = vshrl.u32 %v4693_v7, 16  ;;  %v7766_v17 = vshll.u32 %v4693_v7, 16  ;;  %v1289_v23 = vshrl.u32 %v4845_v45, 16 }
  0xcb   : > { %v1266_v19 = vrot.slane %v7764_v3, 6  ;;  %v5522_v22 = vsel %vm5278_vm10, %v1243_v54, %v1248_v10  ;;  %v1258_v4 = vrot.slane %v1256_v40, 4  ;;  %v7768_v46 = vshrl.u32 %v7681_v53, 16 }
  0xcc   : > { %v1284_v16 = vrot.slane %v7765_v41, 5  ;;  %v1285_v1 = vrot.slane %v7766_v17, 6  ;;  %7767 = vst [vmem:[#allocation97_spill] sm:$0xff] %v5522_v22  ;;  %v7769_v30 = vshll.u32 %v7681_v53, 16  ;;  %v1263_v57 = vor.u32 %v1262_v42, %v1261_v6  ;;  %v7773_v6 = vld [vmem:[#allocation29_spill] sm:$0xff]  ;;  %1378 = vrot.lane.b32.xlu1 %v5522_v22, %s4308_s23 }
  0xcd   : > { %v1280_v47 = vrot.slane %v7768_v46, 5  ;;  %v1271_v3 = vor.u32 %v1270_v50, %v1269_v15  ;;  %v1276_v44 = vrot.slane %v1274_v48, 5  ;;  %v7770_v41 = vshll.u32 %v4807_v5, 16 }
  0xce   : > { %v1281_v25 = vrot.slane %v7769_v30, 6  ;;  %v5534_v54 = vsel %vm5278_vm10, %v1238_v8, %v1241_v11  ;;  %v1253_v10 = vrot.slane %v1252_v59, 4  ;;  %v1267_v26 = vor.u32 %v1266_v19, %v1265_v13  ;;  %v725_v30 = vpop.permute.xlu0 %724  ;;  %v7776_v8 = vld [vmem:[#allocation41_spill] sm:$0xff]  ;;  %v731_v19 = vpop.permute.xlu1 %730 }
  0xcf   : > { %v1277_v17 = vrot.slane %v7770_v41, 6  ;;  %7771 = vst [vmem:[#allocation98_spill] sm:$0xff] %v5534_v54  ;;  %v7772_v46 = vshll.u32 %v4845_v45, 16  ;;  %v1286_v21 = vor.u32 %v1285_v1, %v1284_v16  ;;  %v1291_v42 = vrot.slane %v1289_v23, 5  ;;  %797 = vst.msk [vmem:[#allocation2 + $0xc0] sm:$0xf] %vm772_vm7, %v725_v30  ;;  %1376 = vrot.lane.b32.xlu0 %v5534_v54, %s4308_s23 }
  0xd0   : > { %v7774_v15 = vshrl.u32 %v7773_v6, 16  ;;  %v7775_v5 = vshll.u32 %v7773_v6, 16  ;;  %v1282_v11 = vor.u32 %v1281_v25, %v1280_v47  ;;  %v1304_v45 = vshrl.u32 %v7776_v8, 16  ;;  %v7779_v23 = vld [vmem:[#allocation31_spill] sm:$0xff]  ;;  %800 = vst.msk [vmem:[#allocation2 + $0xd8] sm:$0xf] %vm772_vm7, %v731_v19 }
  0xd1   : > { %v1292_v43 = vrot.slane %v7772_v46, 6  ;;  %v5551_v29 = vsel %vm5278_vm10, %v1258_v4, %v1263_v57  ;;  %v1273_v59 = vrot.slane %v1271_v3, 4  ;;  %v1278_v13 = vor.u32 %v1277_v17, %v1276_v44 }
  0xd2   : > { %v1299_v50 = vrot.slane %v7774_v15, 5  ;;  %v1300_v48 = vrot.slane %v7775_v5, 6  ;;  %7777 = vst [vmem:[#allocation29_spill] sm:$0xff] %v5551_v29  ;;  %v5555_v16 = vsel %vm5278_vm10, %v1253_v10, %v1256_v40  ;;  %v1268_v1 = vrot.slane %v1267_v26, 4  ;;  %v729_v30 = vpop.permute.xlu0 %728  ;;  %1382 = vrot.lane.b32.xlu1 %v5551_v29, %s4308_s23  ;;  %v7783_v10 = vld [vmem:[#allocation32_spill] sm:$0xff] }
  0xd3   : > { %7778 = vst [vmem:[#allocation41_spill] sm:$0xff] %v5555_v16  ;;  %v7780_v41 = vshrl.u32 %v7779_v23, 16  ;;  %v7781_v25 = vshll.u32 %v7779_v23, 16  ;;  %v1288_v15 = vrot.slane %v1286_v21, 4  ;;  %v1293_v4 = vor.u32 %v1292_v43, %v1291_v42  ;;  %799 = vst.msk [vmem:[#allocation2 + $0xd0] sm:$0xf] %vm772_vm7, %v729_v30  ;;  %1380 = vrot.lane.b32.xlu0 %v5555_v16, %s4308_s23 }
  0xd4   : > { %v1301_v57 = vor.u32 %v1300_v48, %v1299_v50  ;;  %v7782_v44 = vshll.u32 %v7776_v8, 16  ;;  %v1283_v26 = vrot.slane %v1282_v11, 4  ;;  %v1306_v40 = vrot.slane %v1304_v45, 5  ;;  %v7787_v42 = vld [vmem:[#allocation46_spill] sm:$0xff]  ;;  %v735_v48 = vpop.permute.xlu1 %734 }
  0xd5   : > { %v1295_v47 = vrot.slane %v7780_v41, 5  ;;  %v1296_v46 = vrot.slane %v7781_v25, 6  ;;  %v7784_v5 = vshrl.u32 %v7783_v10, 16  ;;  %v7785_v25 = vshll.u32 %v7783_v10, 16  ;;  %802 = vst.msk [vmem:[#allocation2 + $0xe8] sm:$0xf] %vm772_vm7, %v735_v48 }
  0xd6   : > { %v1307_v17 = vrot.slane %v7782_v44, 6  ;;  %v5575_v43 = vsel %vm5278_vm10, %v1273_v59, %v1278_v13  ;;  %v1319_v50 = vshrl.u32 %v7787_v42, 16  ;;  %v5580_v11 = vsel %vm5278_vm10, %v1268_v1, %v1271_v3 }
  0xd7   : > { %v1314_v41 = vrot.slane %v7784_v5, 5  ;;  %v1315_v19 = vrot.slane %v7785_v25, 6  ;;  %7786 = vst [vmem:[#allocation31_spill] sm:$0xff] %v5575_v43  ;;  %v1297_v8 = vor.u32 %v1296_v46, %v1295_v47  ;;  %v7788_v45 = vshrl.u32 %v4778_v56, 16  ;;  %v733_v25 = vpop.permute.xlu0 %732  ;;  %1386 = vrot.lane.b32.xlu1 %v5575_v43, %s4308_s23  ;;  %1384 = vrot.lane.b32.xlu0 %v5580_v11, %s4308_s23 }
  0xd8   : > { %v7789_v44 = vshll.u32 %v4778_v56, 16  ;;  %v5589_v59 = vsel %vm5278_vm10, %v1288_v15, %v1293_v4  ;;  %v1303_v13 = vrot.slane %v1301_v57, 4  ;;  %801 = vst.msk [vmem:[#allocation2 + $0xe0] sm:$0xf] %vm772_vm7, %v733_v25  ;;  %v5596_v3 = vsel %vm5278_vm10, %v1283_v26, %v1286_v21  ;;  %v7792_v4 = vld [vmem:[#allocation34_spill] sm:$0xff]  ;;  %v739_v29 = vpop.permute.xlu1 %738 }
  0xd9   : > { %v1310_v30 = vrot.slane %v7788_v45, 5  ;;  %7790 = vst [vmem:[#allocation32_spill] sm:$0xff] %v5589_v59  ;;  %v1308_v1 = vor.u32 %v1307_v17, %v1306_v40  ;;  %v1316_v47 = vor.u32 %v1315_v19, %v1314_v41  ;;  %v7791_v46 = vshll.u32 %v7787_v42, 16  ;;  %v7795_v17 = vld [vmem:[#allocation36_spill] sm:$0xff]  ;;  %804 = vst.msk [vmem:[#allocation2 + $0xf8] sm:$0xf] %vm772_vm7, %v739_v29 }
  0xda   : > { %v1311_v5 = vrot.slane %v7789_v44, 6  ;;  %v1321_v15 = vrot.slane %v1319_v50, 5  ;;  %v7793_v45 = vshrl.u32 %v7792_v4, 16  ;;  %v7794_v25 = vshll.u32 %v7792_v4, 16 }
  0xdb   : > { %v1322_v48 = vrot.slane %v7791_v46, 6  ;;  %v1334_v43 = vshrl.u32 %v4944_v14, 16  ;;  %v1298_v21 = vrot.slane %v1297_v8, 4  ;;  %v7796_v40 = vshrl.u32 %v7795_v17, 16  ;;  %v737_v50 = vpop.permute.xlu0 %736  ;;  %1390 = vrot.lane.b32.xlu1 %v5589_v59, %s4308_s23  ;;  %1388 = vrot.lane.b32.xlu0 %v5596_v3, %s4308_s23 }
  0xdc   : > { %v1329_v44 = vrot.slane %v7793_v45, 5  ;;  %v1330_v16 = vrot.slane %v7794_v25, 6  ;;  %v1312_v26 = vor.u32 %v1311_v5, %v1310_v30  ;;  %v7797_v19 = vshll.u32 %v7795_v17, 16  ;;  %803 = vst.msk [vmem:[#allocation2 + $0xf0] sm:$0xf] %vm772_vm7, %v737_v50 }
  0xdd   : > { %v1325_v41 = vrot.slane %v7796_v40, 5  ;;  %v5617_v46 = vsel %vm5278_vm10, %v1303_v13, %v1308_v1  ;;  %v1318_v8 = vrot.slane %v1316_v47, 4  ;;  %v1323_v30 = vor.u32 %v1322_v48, %v1321_v15  ;;  %v971_v40 = vpop.permute.xlu1 %970 }
  0xde   : > { %v1326_v42 = vrot.slane %v7797_v19, 6  ;;  %v1331_v5 = vor.u32 %v1330_v16, %v1329_v44  ;;  %v1336_v45 = vrot.slane %v1334_v43, 5  ;;  %v7798_v29 = vshll.u32 %v4944_v14, 16  ;;  %1066 = vst.msk [vmem:[#allocation2 + $0x8] sm:$0xf] %vm1064_vm11, %v971_v40 }
  0xdf   : > { %v5625_v19 = vsel %vm5278_vm10, %v1298_v21, %v1301_v57  ;;  %v1313_v50 = vrot.slane %v1312_v26, 4  ;;  %v969_v13 = vpop.permute.xlu0 %968  ;;  %1394 = vrot.lane.b32.xlu1 %v5617_v46, %s4308_s23  ;;  %v5635_v14 = vsel %vm5278_vm10, %v1318_v8, %v1323_v30  ;;  %v7804_v8 = vld [vmem:[#allocation3_spill] sm:$0xff]  ;;  %vm2422_vm7 = vcmask 982016  }
  0xe0   : > { %v1337_v25 = vrot.slane %v7798_v29, 6  ;;  %v1327_v59 = vor.u32 %v1326_v42, %v1325_v41  ;;  %1065 = vst.msk [vmem:[#allocation2] sm:$0xf] %vm1064_vm11, %v969_v13  ;;  %1392 = vrot.lane.b32.xlu0 %v5625_v19, %s4308_s23  ;;  %7799 = vst [vmem:[#allocation46_spill] sm:$0xff] %v5635_v14  ;;  %v1333_v16 = vrot.slane %v1331_v5, 4  ;;  %v7803_v42 = vld [vmem:[#allocation4_spill] sm:$0xff] }
  0xe1   : > { %v975_v43 = vpop.permute.xlu1 %974  ;;  %v5639_v1 = vsel %vm5278_vm10, %v1313_v50, %v1316_v47  ;;  %v7806_v13 = vld [vmem:[#allocation8_spill] sm:$0xff] }
  0xe2   : > { %v1338_v57 = vor.u32 %v1337_v25, %v1336_v45  ;;  %7800 = vst [vmem:[#allocation99_spill] sm:$0xff] %v5639_v1  ;;  %v1328_v48 = vrot.slane %v1327_v59, 4  ;;  %1068 = vst.msk [vmem:[#allocation2 + $0x18] sm:$0xf] %vm1064_vm11, %v975_v43  ;;  %v7805_v25 = vld [vmem:[#allocation6_spill] sm:$0xff] }
  0xe3   : > { %v973_v15 = vpop.permute.xlu0 %972  ;;  %1398 = vrot.lane.b32.xlu1 %v5635_v14, %s4308_s23 }
  0xe4   : > { %1067 = vst.msk [vmem:[#allocation2 + $0x10] sm:$0xf] %vm1064_vm11, %v973_v15  ;;  %1396 = vrot.lane.b32.xlu0 %v5639_v1, %s4308_s23  ;;  %v5649_v44 = vsel %vm5278_vm10, %v1333_v16, %v1338_v57  ;;  %v5653_v47 = vsel %vm5278_vm10, %v1328_v48, %v1331_v5 }
  0xe5   : > { %7801 = vst [vmem:[#allocation100_spill] sm:$0xff] %v5649_v44  ;;  %v979_v21 = vpop.permute.xlu1 %978  ;;  %7802 = vst [vmem:[#allocation101_spill] sm:$0xff] %v5653_v47 }
  0xe6   : > { %1070 = vst.msk [vmem:[#allocation2 + $0x28] sm:$0xf] %vm1064_vm11, %v979_v21 }
  0xe7   : > { %v977_v59 = vpop.permute.xlu0 %976  ;;  %1402 = vrot.lane.b32.xlu1 %v5649_v44, %s4308_s23 }
  0xe8   : > { %1069 = vst.msk [vmem:[#allocation2 + $0x20] sm:$0xf] %vm1064_vm11, %v977_v59  ;;  %1400 = vrot.lane.b32.xlu0 %v5653_v47, %s4308_s23 }
  0xe9   : > { %v983_v26 = vpop.permute.xlu1 %982 }
  0xea   : > { %1072 = vst.msk [vmem:[#allocation2 + $0x38] sm:$0xf] %vm1064_vm11, %v983_v26 }
  0xeb   : > { %v981_v41 = vpop.permute.xlu0 %980  ;;  %1473 = vrot.lane.b32.xlu1 %v7803_v42, %s4309_s24 }
  0xec   : > { %1071 = vst.msk [vmem:[#allocation2 + $0x30] sm:$0xf] %vm1064_vm11, %v981_v41  ;;  %1471 = vrot.lane.b32.xlu0 %v7804_v8, %s4309_s24 }
  0xed   : > { %v987_v30 = vpop.permute.xlu1 %986 }
  0xee   : > { %1074 = vst.msk [vmem:[#allocation2 + $0x48] sm:$0xf] %vm1064_vm11, %v987_v30 }
  0xef   : > { %v985_v5 = vpop.permute.xlu0 %984  ;;  %1477 = vrot.lane.b32.xlu1 %v4410_v20, %s4309_s24 }
  0xf0   : > { %1073 = vst.msk [vmem:[#allocation2 + $0x40] sm:$0xf] %vm1064_vm11, %v985_v5  ;;  %1475 = vrot.lane.b32.xlu0 %v4432_v31, %s4309_s24 }
  0xf1   : > { %v991_v45 = vpop.permute.xlu1 %990 }
  0xf2   : > { %1076 = vst.msk [vmem:[#allocation2 + $0x58] sm:$0xf] %vm1064_vm11, %v991_v45 }
  0xf3   : > { %v989_v29 = vpop.permute.xlu0 %988  ;;  %1481 = vrot.lane.b32.xlu1 %v4437_v36, %s4309_s24 }
  0xf4   : > { %1075 = vst.msk [vmem:[#allocation2 + $0x50] sm:$0xf] %vm1064_vm11, %v989_v29  ;;  %1479 = vrot.lane.b32.xlu0 %v7805_v25, %s4309_s24 }
  0xf5   : > { %v995_v40 = vpop.permute.xlu1 %994 }
  0xf6   : > { %1078 = vst.msk [vmem:[#allocation2 + $0x68] sm:$0xf] %vm1064_vm11, %v995_v40 }
  0xf7   : > { %v993_v50 = vpop.permute.xlu0 %992  ;;  %1485 = vrot.lane.b32.xlu1 %v7806_v13, %s4309_s24 }
  0xf8   : > { %1077 = vst.msk [vmem:[#allocation2 + $0x60] sm:$0xf] %vm1064_vm11, %v993_v50  ;;  %1483 = vrot.lane.b32.xlu0 %v4475_v52, %s4309_s24 }
  0xf9   : > { %v999_v16 = vpop.permute.xlu1 %998 }
  0xfa   : > { %1080 = vst.msk [vmem:[#allocation2 + $0x78] sm:$0xf] %vm1064_vm11, %v999_v16 }
  0xfb   : > { %v997_v57 = vpop.permute.xlu0 %996  ;;  %1489 = vrot.lane.b32.xlu1 %v4493_v58, %s4309_s24 }
  0xfc   : > { %1079 = vst.msk [vmem:[#allocation2 + $0x70] sm:$0xf] %vm1064_vm11, %v997_v57  ;;  %1487 = vrot.lane.b32.xlu0 %v4503_v63, %s4309_s24 }
  0xfd   : > { %v1003_v43 = vpop.permute.xlu1 %1002 }
  0xfe   : > { %1082 = vst.msk [vmem:[#allocation2 + $0x88] sm:$0xf] %vm1064_vm11, %v1003_v43 }
  0xff   : > { %v1001_v48 = vpop.permute.xlu0 %1000  ;;  %1493 = vrot.lane.b32.xlu1 %v4513_v18, %s4309_s24 }
 0x100   : > { %1081 = vst.msk [vmem:[#allocation2 + $0x80] sm:$0xf] %vm1064_vm11, %v1001_v48  ;;  %1491 = vrot.lane.b32.xlu0 %v4527_v27, %s4309_s24 }
 0x101   : > { %v1007_v15 = vpop.permute.xlu1 %1006 }
 0x102   : > { %1084 = vst.msk [vmem:[#allocation2 + $0x98] sm:$0xf] %vm1064_vm11, %v1007_v15 }
 0x103   : > { %v1005_v21 = vpop.permute.xlu0 %1004  ;;  %1497 = vrot.lane.b32.xlu1 %v4540_v37, %s4309_s24 }
 0x104   : > { %1083 = vst.msk [vmem:[#allocation2 + $0x90] sm:$0xf] %vm1064_vm11, %v1005_v21  ;;  %1495 = vrot.lane.b32.xlu0 %v4557_v60, %s4309_s24  ;;  %v5752_v21 = vld [vmem:[%s4361_s20 + $0xc4] sm:$0xf] }
 0x105   : > { %v1011_v59 = vpop.permute.xlu1 %1010 }
 0x106   : > { %1086 = vst.msk [vmem:[#allocation2 + $0xa8] sm:$0xf] %vm1064_vm11, %v1011_v59 }
 0x107   : > { %v1009_v26 = vpop.permute.xlu0 %1008  ;;  %1501 = vrot.lane.b32.xlu1 %v4570_v34, %s4309_s24 }
 0x108   : > { %1085 = vst.msk [vmem:[#allocation2 + $0xa0] sm:$0xf] %vm1064_vm11, %v1009_v26  ;;  %1499 = vrot.lane.b32.xlu0 %v4593_v55, %s4309_s24  ;;  %v5755_v26 = vld [vmem:[%s4361_s20 + $0xc0] sm:$0xf] }
 0x109   : > { %v1015_v41 = vpop.permute.xlu1 %1014 }
 0x10a   : > { %1088 = vst.msk [vmem:[#allocation2 + $0xb8] sm:$0xf] %vm1064_vm11, %v1015_v41 }
 0x10b   : > { %v1013_v42 = vpop.permute.xlu0 %1012  ;;  %1505 = vrot.lane.b32.xlu1 %v4604_v33, %s4309_s24 }
 0x10c   : > { %1087 = vst.msk [vmem:[#allocation2 + $0xb0] sm:$0xf] %vm1064_vm11, %v1013_v42  ;;  %1503 = vrot.lane.b32.xlu0 %v4617_v38, %s4309_s24 }
 0x10d   : > { %v1019_v8 = vpop.permute.xlu1 %1018 }
 0x10e   : > { %1090 = vst.msk [vmem:[#allocation2 + $0xc8] sm:$0xf] %vm1064_vm11, %v1019_v8 }
 0x10f   : > { %v1017_v30 = vpop.permute.xlu0 %1016  ;;  %1509 = vrot.lane.b32.xlu1 %v4631_v62, %s4309_s24 }
 0x110   : > { %1089 = vst.msk [vmem:[#allocation2 + $0xc0] sm:$0xf] %vm1064_vm11, %v1017_v30  ;;  %1507 = vrot.lane.b32.xlu0 %v7676_v32, %s4309_s24  ;;  %v7807_v30 = vld [vmem:[#allocation9_spill] sm:$0xff] }
 0x111   : > { %v1023_v5 = vpop.permute.xlu1 %1022 }
 0x112   : > { %1092 = vst.msk [vmem:[#allocation2 + $0xd8] sm:$0xf] %vm1064_vm11, %v1023_v5  ;;  %v7808_v5 = vld [vmem:[#allocation7_spill] sm:$0xff] }
 0x113   : > { %v1021_v45 = vpop.permute.xlu0 %1020  ;;  %1513 = vrot.lane.b32.xlu1 %v7674_v35, %s4309_s24 }
 0x114   : > { %1091 = vst.msk [vmem:[#allocation2 + $0xd0] sm:$0xf] %vm1064_vm11, %v1021_v45  ;;  %1511 = vrot.lane.b32.xlu0 %v4687_v28, %s4309_s24 }
 0x115   : > { %v1027_v29 = vpop.permute.xlu1 %1026 }
 0x116   : > { %1094 = vst.msk [vmem:[#allocation2 + $0xe8] sm:$0xf] %vm1064_vm11, %v1027_v29 }
 0x117   : > { %v1025_v40 = vpop.permute.xlu0 %1024  ;;  %1517 = vrot.lane.b32.xlu1 %v4693_v7, %s4309_s24 }
 0x118   : > { %1093 = vst.msk [vmem:[#allocation2 + $0xe0] sm:$0xf] %vm1064_vm11, %v1025_v40  ;;  %1515 = vrot.lane.b32.xlu0 %v7681_v53, %s4309_s24  ;;  %v7809_v40 = vld [vmem:[#allocation10_spill] sm:$0xff] }
 0x119   : > { %v1031_v50 = vpop.permute.xlu1 %1030 }
 0x11a   : > { %1096 = vst.msk [vmem:[#allocation2 + $0xf8] sm:$0xf] %vm1064_vm11, %v1031_v50  ;;  %v7810_v50 = vld [vmem:[#allocation13_spill] sm:$0xff] }
 0x11b   : > { %v1029_v16 = vpop.permute.xlu0 %1028  ;;  %1521 = vrot.lane.b32.xlu1 %v7773_v6, %s4309_s24 }
 0x11c   : > { %1095 = vst.msk [vmem:[#allocation2 + $0xf0] sm:$0xf] %vm1064_vm11, %v1029_v16  ;;  %1519 = vrot.lane.b32.xlu0 %v7779_v23, %s4309_s24  ;;  %vm2764_vm11 = vcmask 224384  }
 0x11d   : > { %v1343_v57 = vpop.permute.xlu1 %1342 }
 0x11e   : > { %1438 = vst.msk [vmem:[#allocation2 + $0x8] sm:$0xf] %vm1436_vm12, %v1343_v57 }
 0x11f   : > { %v1341_v43 = vpop.permute.xlu0 %1340  ;;  %1525 = vrot.lane.b32.xlu1 %v7783_v10, %s4309_s24 }
 0x120   : > { %1437 = vst.msk [vmem:[#allocation2] sm:$0xf] %vm1436_vm12, %v1341_v43  ;;  %1523 = vrot.lane.b32.xlu0 %v4778_v56, %s4309_s24  ;;  %v7811_v43 = vld [vmem:[#allocation15_spill] sm:$0xff] }
 0x121   : > { %v1347_v48 = vpop.permute.xlu1 %1346 }
 0x122   : > { %1440 = vst.msk [vmem:[#allocation2 + $0x18] sm:$0xf] %vm1436_vm12, %v1347_v48  ;;  %v7812_v48 = vld [vmem:[#allocation17_spill] sm:$0xff] }
 0x123   : > { %v1345_v15 = vpop.permute.xlu0 %1344  ;;  %1529 = vrot.lane.b32.xlu1 %v7792_v4, %s4309_s24 }
 0x124   : > { %1439 = vst.msk [vmem:[#allocation2 + $0x10] sm:$0xf] %vm1436_vm12, %v1345_v15  ;;  %1527 = vrot.lane.b32.xlu0 %v7795_v17, %s4309_s24 }
 0x125   : > { %v1351_v59 = vpop.permute.xlu1 %1350 }
 0x126   : > { %1442 = vst.msk [vmem:[#allocation2 + $0x28] sm:$0xf] %vm1436_vm12, %v1351_v59 }
 0x127   : > { %v1349_v41 = vpop.permute.xlu0 %1348  ;;  %1533 = vrot.lane.b32.xlu1 %v5752_v21, %s4309_s24 }
 0x128   : > { %1441 = vst.msk [vmem:[#allocation2 + $0x20] sm:$0xf] %vm1436_vm12, %v1349_v41  ;;  %1531 = vrot.lane.b32.xlu0 %v5755_v26, %s4309_s24  ;;  %v7813_v41 = vld [vmem:[#allocation20_spill] sm:$0xff] }
 0x129   : > { %v1355_v42 = vpop.permute.xlu1 %1354 }
 0x12a   : > { %1444 = vst.msk [vmem:[#allocation2 + $0x38] sm:$0xf] %vm1436_vm12, %v1355_v42  ;;  %v7814_v42 = vld [vmem:[#allocation22_spill] sm:$0xff] }
 0x12b   : > { %v1353_v8 = vpop.permute.xlu0 %1352  ;;  %1626 = vrot.lane.b32.xlu1 %v7807_v30, %s4310_s25 }
 0x12c   : > { %1443 = vst.msk [vmem:[#allocation2 + $0x30] sm:$0xf] %vm1436_vm12, %v1353_v8  ;;  %1624 = vrot.lane.b32.xlu0 %v7808_v5, %s4310_s25  ;;  %v7815_v5 = vld [vmem:[#allocation25_spill] sm:$0xff] }
 0x12d   : > { %v1359_v45 = vpop.permute.xlu1 %1358 }
 0x12e   : > { %1446 = vst.msk [vmem:[#allocation2 + $0x48] sm:$0xf] %vm1436_vm12, %v1359_v45  ;;  %v7816_v45 = vld [vmem:[#allocation26_spill] sm:$0xff] }
 0x12f   : > { %v1357_v29 = vpop.permute.xlu0 %1356  ;;  %1630 = vrot.lane.b32.xlu1 %v7809_v40, %s4310_s25 }
 0x130   : > { %1445 = vst.msk [vmem:[#allocation2 + $0x40] sm:$0xf] %vm1436_vm12, %v1357_v29  ;;  %1628 = vrot.lane.b32.xlu0 %v7810_v50, %s4310_s25 }
 0x131   : > { %v1363_v16 = vpop.permute.xlu1 %1362 }
 0x132   : > { %1448 = vst.msk [vmem:[#allocation2 + $0x58] sm:$0xf] %vm1436_vm12, %v1363_v16 }
 0x133   : > { %v1361_v57 = vpop.permute.xlu0 %1360  ;;  %1634 = vrot.lane.b32.xlu1 %v7811_v43, %s4310_s25 }
 0x134   : > { %1447 = vst.msk [vmem:[#allocation2 + $0x50] sm:$0xf] %vm1436_vm12, %v1361_v57  ;;  %1632 = vrot.lane.b32.xlu0 %v7812_v48, %s4310_s25  ;;  %v7817_v57 = vld [vmem:[#allocation27_spill] sm:$0xff] }
 0x135   : > { %v1367_v15 = vpop.permute.xlu1 %1366 }
 0x136   : > { %1450 = vst.msk [vmem:[#allocation2 + $0x68] sm:$0xf] %vm1436_vm12, %v1367_v15  ;;  %v7818_v15 = vld [vmem:[#allocation30_spill] sm:$0xff] }
 0x137   : > { %v1365_v59 = vpop.permute.xlu0 %1364  ;;  %1638 = vrot.lane.b32.xlu1 %v7813_v41, %s4310_s25  ;;  %v5844_v41 = vld [vmem:[%s4361_s20 + $0xc8] sm:$0x3] }
 0x138   : > { %1449 = vst.msk [vmem:[#allocation2 + $0x60] sm:$0xf] %vm1436_vm12, %v1365_v59  ;;  %1636 = vrot.lane.b32.xlu0 %v7814_v42, %s4310_s25  ;;  %v7540_v43 = vshll.u32 %v5844_v41, 16 }
 0x139   : > { %v1371_v8 = vpop.permute.xlu1 %1370 }
 0x13a   : > { %1452 = vst.msk [vmem:[#allocation2 + $0x78] sm:$0xf] %vm1436_vm12, %v1371_v8 }
 0x13b   : > { %v1369_v30 = vpop.permute.xlu0 %1368  ;;  %1642 = vrot.lane.b32.xlu1 %v7815_v5, %s4310_s25 }
 0x13c   : > { %1451 = vst.msk [vmem:[#allocation2 + $0x70] sm:$0xf] %vm1436_vm12, %v1369_v30  ;;  %1640 = vrot.lane.b32.xlu0 %v7816_v45, %s4310_s25  ;;  %v7819_v30 = vld [vmem:[#allocation33_spill] sm:$0xff] }
 0x13d   : > { %v1375_v29 = vpop.permute.xlu1 %1374 }
 0x13e   : > { %1454 = vst.msk [vmem:[#allocation2 + $0x88] sm:$0xf] %vm1436_vm12, %v1375_v29  ;;  %v7820_v29 = vld [vmem:[#allocation35_spill] sm:$0xff] }
 0x13f   : > { %v1373_v16 = vpop.permute.xlu0 %1372  ;;  %1646 = vrot.lane.b32.xlu1 %v7817_v57, %s4310_s25 }
 0x140   : > { %1453 = vst.msk [vmem:[#allocation2 + $0x80] sm:$0xf] %vm1436_vm12, %v1373_v16  ;;  %1644 = vrot.lane.b32.xlu0 %v7818_v15, %s4310_s25  ;;  %v7821_v15 = vld [vmem:[#allocation37_spill] sm:$0xff] }
 0x141   : > { %v1379_v59 = vpop.permute.xlu1 %1378 }
 0x142   : > { %1456 = vst.msk [vmem:[#allocation2 + $0x98] sm:$0xf] %vm1436_vm12, %v1379_v59  ;;  %v7822_v59 = vld [vmem:[#allocation38_spill] sm:$0xff] }
 0x143   : > { %v1377_v8 = vpop.permute.xlu0 %1376  ;;  %1650 = vrot.lane.b32.xlu1 %v7819_v30, %s4310_s25 }
 0x144   : > { %1455 = vst.msk [vmem:[#allocation2 + $0x90] sm:$0xf] %vm1436_vm12, %v1377_v8  ;;  %1648 = vrot.lane.b32.xlu0 %v7820_v29, %s4310_s25  ;;  %v7823_v29 = vld [vmem:[#allocation39_spill] sm:$0xff] }
 0x145   : > { %v1383_v45 = vpop.permute.xlu1 %1382 }
 0x146   : > { %1458 = vst.msk [vmem:[#allocation2 + $0xa8] sm:$0xf] %vm1436_vm12, %v1383_v45  ;;  %v7824_v45 = vld [vmem:[#allocation40_spill] sm:$0xff] }
 0x147   : > { %v1381_v16 = vpop.permute.xlu0 %1380  ;;  %1654 = vrot.lane.b32.xlu1 %v7821_v15, %s4310_s25 }
 0x148   : > { %1457 = vst.msk [vmem:[#allocation2 + $0xa0] sm:$0xf] %vm1436_vm12, %v1381_v16  ;;  %1652 = vrot.lane.b32.xlu0 %v7822_v59, %s4310_s25  ;;  %v7825_v59 = vld [vmem:[#allocation42_spill] sm:$0xff] }
 0x149   : > { %v1387_v57 = vpop.permute.xlu1 %1386 }
 0x14a   : > { %1460 = vst.msk [vmem:[#allocation2 + $0xb8] sm:$0xf] %vm1436_vm12, %v1387_v57  ;;  %v7826_v57 = vld [vmem:[#allocation43_spill] sm:$0xff] }
 0x14b   : > { %v1385_v8 = vpop.permute.xlu0 %1384  ;;  %1658 = vrot.lane.b32.xlu1 %v7823_v29, %s4310_s25 }
 0x14c   : > { %1459 = vst.msk [vmem:[#allocation2 + $0xb0] sm:$0xf] %vm1436_vm12, %v1385_v8  ;;  %1656 = vrot.lane.b32.xlu0 %v7824_v45, %s4310_s25  ;;  %v7827_v45 = vld [vmem:[#allocation44_spill] sm:$0xff] }
 0x14d   : > { %v1391_v30 = vpop.permute.xlu1 %1390 }
 0x14e   : > { %1462 = vst.msk [vmem:[#allocation2 + $0xc8] sm:$0xf] %vm1436_vm12, %v1391_v30  ;;  %v7828_v30 = vld [vmem:[#allocation45_spill] sm:$0xff] }
 0x14f   : > { %v1389_v16 = vpop.permute.xlu0 %1388  ;;  %1662 = vrot.lane.b32.xlu1 %v7825_v59, %s4310_s25  ;;  %v7539_v59 = vshrl.u32 %v5752_v21, 16 }
 0x150   : > { %1461 = vst.msk [vmem:[#allocation2 + $0xc0] sm:$0xf] %vm1436_vm12, %v1389_v16  ;;  %1660 = vrot.lane.b32.xlu0 %v7826_v57, %s4310_s25  ;;  %v7538_v16 = vshll.u32 %v5752_v21, 16 }
 0x151   : > { %v1395_v15 = vpop.permute.xlu1 %1394  ;;  %v1616_v42 = vrot.slane %v7539_v59, 4 }
 0x152   : > { %1464 = vst.msk [vmem:[#allocation2 + $0xd8] sm:$0xf] %vm1436_vm12, %v1395_v15 }
 0x153   : > { %v1393_v8 = vpop.permute.xlu0 %1392  ;;  %1666 = vrot.lane.b32.xlu1 %v7827_v45, %s4310_s25  ;;  %v7830_v45 = vld [vmem:[#allocation48_spill] sm:$0xff] }
 0x154   : > { %1463 = vst.msk [vmem:[#allocation2 + $0xd0] sm:$0xf] %vm1436_vm12, %v1393_v8  ;;  %1664 = vrot.lane.b32.xlu0 %v7828_v30, %s4310_s25  ;;  %v7829_v8 = vld [vmem:[#allocation47_spill] sm:$0xff]  ;;  %v1612_v30 = vrot.slane %v7538_v16, 5  ;;  %v7834_v16 = vld [vmem:[#allocation50_spill] sm:$0xff] }
 0x155   : > { %v1399_v29 = vpop.permute.xlu1 %1398 }
 0x156   : > { %1466 = vst.msk [vmem:[#allocation2 + $0xe8] sm:$0xf] %vm1436_vm12, %v1399_v29  ;;  %v7831_v29 = vshrl.u32 %v5755_v26, 16  ;;  %v1617_v59 = vor.u32 %v1616_v42, %v1612_v30 }
 0x157   : > { %v1397_v15 = vpop.permute.xlu0 %1396  ;;  %1670 = vrot.lane.b32.xlu1 %v7829_v8, %s4310_s25 }
 0x158   : > { %1465 = vst.msk [vmem:[#allocation2 + $0xe0] sm:$0xf] %vm1436_vm12, %v1397_v15  ;;  %1668 = vrot.lane.b32.xlu0 %v7830_v45, %s4310_s25  ;;  %v1603_v5 = vrot.slane %v7831_v29, 4  ;;  %v7832_v15 = vshll.u32 %v5755_v26, 16  ;;  %v7833_v45 = vld [vmem:[#allocation49_spill] sm:$0xff] }
 0x159   : > { %v1403_v57 = vpop.permute.xlu1 %1402 }
 0x15a   : > { %v1606_v48 = vrot.slane %v7832_v15, 5  ;;  %1468 = vst.msk [vmem:[#allocation2 + $0xf8] sm:$0xf] %vm1436_vm12, %v1403_v57  ;;  %v7835_v57 = vld [vmem:[#allocation51_spill] sm:$0xff] }
 0x15b   : > { %v1401_v8 = vpop.permute.xlu0 %1400  ;;  %1674 = vrot.lane.b32.xlu1 %v7833_v45, %s4310_s25  ;;  %v1618_v45 = vrot.slane %v1617_v59, 4 }
 0x15c   : > { %1467 = vst.msk [vmem:[#allocation2 + $0xf0] sm:$0xf] %vm1436_vm12, %v1401_v8  ;;  %1672 = vrot.lane.b32.xlu0 %v7834_v16, %s4310_s25  ;;  %v1607_v29 = vor.u32 %v1606_v48, %v1603_v5  ;;  %v7836_v8 = vld [vmem:[#allocation53_spill] sm:$0xff]  ;;  %v1622_v16 = vrot.slane %v7540_v43, 5  ;;  %v7838_v5 = vld [vmem:[#allocation55_spill] sm:$0xff]  ;;  %vm2917_vm12 = vcmask 322784  }
 0x15d   : > { %v1474_v50 = vpop.permute.xlu1 %1473 }
 0x15e   : > { %1569 = vst.msk [vmem:[#allocation2 + $0x8] sm:$0xf] %vm1567_vm13, %v1474_v50  ;;  %v1608_v40 = vrot.slane %v1607_v29, 4  ;;  %v7837_v50 = vld [vmem:[#allocation54_spill] sm:$0xff] }
 0x15f   : > { %v1472_v15 = vpop.permute.xlu0 %1471  ;;  %1678 = vrot.lane.b32.xlu1 %v7835_v57, %s4310_s25 }
 0x160   : > { %1568 = vst.msk [vmem:[#allocation2] sm:$0xf] %vm1567_vm13, %v1472_v15  ;;  %1676 = vrot.lane.b32.xlu0 %v7836_v8, %s4310_s25  ;;  %v5873_v8 = vsel %vm4424_vm3, %v1618_v45, %v1622_v16  ;;  %v5877_v43 = vsel %vm4424_vm3, %v1608_v40, %v1612_v30  ;;  %v7842_v40 = vld [vmem:[#allocation56_spill] sm:$0xff]  ;;  %v7843_v30 = vld [vmem:[#allocation57_spill] sm:$0xff] }
 0x161   : > { %v1478_v42 = vpop.permute.xlu1 %1477  ;;  %7840 = vst [vmem:[#allocation4_spill] sm:$0xff] %v5873_v8  ;;  %7841 = vst [vmem:[#allocation3_spill] sm:$0xff] %v5877_v43 }
 0x162   : > { %1571 = vst.msk [vmem:[#allocation2 + $0x18] sm:$0xf] %vm1567_vm13, %v1478_v42 }
 0x163   : > { %v1476_v48 = vpop.permute.xlu0 %1475  ;;  %1682 = vrot.lane.b32.xlu1 %v7837_v50, %s4310_s25 }
 0x164   : > { %1570 = vst.msk [vmem:[#allocation2 + $0x10] sm:$0xf] %vm1567_vm13, %v1476_v48  ;;  %1680 = vrot.lane.b32.xlu0 %v7838_v5, %s4310_s25 }
 0x165   : > { %v1482_v59 = vpop.permute.xlu1 %1481 }
 0x166   : > { %1573 = vst.msk [vmem:[#allocation2 + $0x28] sm:$0xf] %vm1567_vm13, %v1482_v59  ;;  %v7844_v59 = vld [vmem:[#allocation58_spill] sm:$0xff] }
 0x167   : > { %v1480_v29 = vpop.permute.xlu0 %1479  ;;  %1686 = vrot.lane.b32.xlu1 %v5873_v8, %s4310_s25 }
 0x168   : > { %1572 = vst.msk [vmem:[#allocation2 + $0x20] sm:$0xf] %vm1567_vm13, %v1480_v29  ;;  %1684 = vrot.lane.b32.xlu0 %v5877_v43, %s4310_s25  ;;  %v7845_v29 = vld [vmem:[#allocation59_spill] sm:$0xff] }
 0x169   : > { %v1486_v42 = vpop.permute.xlu1 %1485 }
 0x16a   : > { %1575 = vst.msk [vmem:[#allocation2 + $0x38] sm:$0xf] %vm1567_vm13, %v1486_v42 }
 0x16b   : > { %v1484_v45 = vpop.permute.xlu0 %1483  ;;  %1763 = vrot.lane.b32.xlu1 %v7842_v40, %s4311_s26  ;;  %v7846_v40 = vld [vmem:[#allocation60_spill] sm:$0xff] }
 0x16c   : > { %1574 = vst.msk [vmem:[#allocation2 + $0x30] sm:$0xf] %vm1567_vm13, %v1484_v45  ;;  %1761 = vrot.lane.b32.xlu0 %v7843_v30, %s4311_s26  ;;  %v7847_v30 = vld [vmem:[#allocation61_spill] sm:$0xff] }
 0x16d   : > { %v1490_v16 = vpop.permute.xlu1 %1489 }
 0x16e   : > { %1577 = vst.msk [vmem:[#allocation2 + $0x48] sm:$0xf] %vm1567_vm13, %v1490_v16 }
 0x16f   : > { %v1488_v48 = vpop.permute.xlu0 %1487  ;;  %1767 = vrot.lane.b32.xlu1 %v7844_v59, %s4311_s26 }
 0x170   : > { %1576 = vst.msk [vmem:[#allocation2 + $0x40] sm:$0xf] %vm1567_vm13, %v1488_v48  ;;  %1765 = vrot.lane.b32.xlu0 %v7845_v29, %s4311_s26  ;;  %v7848_v29 = vld [vmem:[#allocation62_spill] sm:$0xff] }
 0x171   : > { %v1494_v42 = vpop.permute.xlu1 %1493 }
 0x172   : > { %1579 = vst.msk [vmem:[#allocation2 + $0x58] sm:$0xf] %vm1567_vm13, %v1494_v42  ;;  %v7849_v42 = vld [vmem:[#allocation63_spill] sm:$0xff] }
 0x173   : > { %v1492_v45 = vpop.permute.xlu0 %1491  ;;  %1771 = vrot.lane.b32.xlu1 %v7846_v40, %s4311_s26 }
 0x174   : > { %1578 = vst.msk [vmem:[#allocation2 + $0x50] sm:$0xf] %vm1567_vm13, %v1492_v45  ;;  %1769 = vrot.lane.b32.xlu0 %v7847_v30, %s4311_s26  ;;  %v7850_v30 = vld [vmem:[#allocation64_spill] sm:$0xff] }
 0x175   : > { %v1498_v16 = vpop.permute.xlu1 %1497 }
 0x176   : > { %1581 = vst.msk [vmem:[#allocation2 + $0x68] sm:$0xf] %vm1567_vm13, %v1498_v16  ;;  %v7851_v16 = vld [vmem:[#allocation65_spill] sm:$0xff] }
 0x177   : > { %v1496_v48 = vpop.permute.xlu0 %1495  ;;  %1775 = vrot.lane.b32.xlu1 %v7848_v29, %s4311_s26 }
 0x178   : > { %1580 = vst.msk [vmem:[#allocation2 + $0x60] sm:$0xf] %vm1567_vm13, %v1496_v48  ;;  %1773 = vrot.lane.b32.xlu0 %v7849_v42, %s4311_s26  ;;  %v7852_v42 = vld [vmem:[#allocation66_spill] sm:$0xff] }
 0x179   : > { %v1502_v59 = vpop.permute.xlu1 %1501 }
 0x17a   : > { %1583 = vst.msk [vmem:[#allocation2 + $0x78] sm:$0xf] %vm1567_vm13, %v1502_v59  ;;  %v7853_v59 = vld [vmem:[#allocation67_spill] sm:$0xff] }
 0x17b   : > { %v1500_v45 = vpop.permute.xlu0 %1499  ;;  %1779 = vrot.lane.b32.xlu1 %v7850_v30, %s4311_s26 }
 0x17c   : > { %1582 = vst.msk [vmem:[#allocation2 + $0x70] sm:$0xf] %vm1567_vm13, %v1500_v45  ;;  %1777 = vrot.lane.b32.xlu0 %v7851_v16, %s4311_s26  ;;  %v7854_v16 = vld [vmem:[#allocation68_spill] sm:$0xff] }
 0x17d   : > { %v1506_v40 = vpop.permute.xlu1 %1505 }
 0x17e   : > { %1585 = vst.msk [vmem:[#allocation2 + $0x88] sm:$0xf] %vm1567_vm13, %v1506_v40  ;;  %v7855_v40 = vld [vmem:[#allocation69_spill] sm:$0xff] }
 0x17f   : > { %v1504_v48 = vpop.permute.xlu0 %1503  ;;  %1783 = vrot.lane.b32.xlu1 %v7852_v42, %s4311_s26 }
 0x180   : > { %1584 = vst.msk [vmem:[#allocation2 + $0x80] sm:$0xf] %vm1567_vm13, %v1504_v48  ;;  %1781 = vrot.lane.b32.xlu0 %v7853_v59, %s4311_s26  ;;  %v7856_v59 = vld [vmem:[#allocation70_spill] sm:$0xff] }
 0x181   : > { %v1510_v29 = vpop.permute.xlu1 %1509 }
 0x182   : > { %1587 = vst.msk [vmem:[#allocation2 + $0x98] sm:$0xf] %vm1567_vm13, %v1510_v29  ;;  %v7857_v29 = vld [vmem:[#allocation71_spill] sm:$0xff] }
 0x183   : > { %v1508_v45 = vpop.permute.xlu0 %1507  ;;  %1787 = vrot.lane.b32.xlu1 %v7854_v16, %s4311_s26 }
 0x184   : > { %1586 = vst.msk [vmem:[#allocation2 + $0x90] sm:$0xf] %vm1567_vm13, %v1508_v45  ;;  %1785 = vrot.lane.b32.xlu0 %v7855_v40, %s4311_s26  ;;  %v7858_v40 = vld [vmem:[#allocation72_spill] sm:$0xff] }
 0x185   : > { %v1514_v30 = vpop.permute.xlu1 %1513 }
 0x186   : > { %1589 = vst.msk [vmem:[#allocation2 + $0xa8] sm:$0xf] %vm1567_vm13, %v1514_v30  ;;  %v7859_v30 = vld [vmem:[#allocation24_spill] sm:$0xff] }
 0x187   : > { %v1512_v48 = vpop.permute.xlu0 %1511  ;;  %1791 = vrot.lane.b32.xlu1 %v7856_v59, %s4311_s26 }
 0x188   : > { %1588 = vst.msk [vmem:[#allocation2 + $0xa0] sm:$0xf] %vm1567_vm13, %v1512_v48  ;;  %1789 = vrot.lane.b32.xlu0 %v7857_v29, %s4311_s26  ;;  %v7860_v29 = vld [vmem:[#allocation73_spill] sm:$0xff] }
 0x189   : > { %v1518_v42 = vpop.permute.xlu1 %1517 }
 0x18a   : > { %1591 = vst.msk [vmem:[#allocation2 + $0xb8] sm:$0xf] %vm1567_vm13, %v1518_v42  ;;  %v7861_v42 = vld [vmem:[#allocation74_spill] sm:$0xff] }
 0x18b   : > { %v1516_v45 = vpop.permute.xlu0 %1515  ;;  %1795 = vrot.lane.b32.xlu1 %v7858_v40, %s4311_s26 }
 0x18c   : > { %1590 = vst.msk [vmem:[#allocation2 + $0xb0] sm:$0xf] %vm1567_vm13, %v1516_v45  ;;  %1793 = vrot.lane.b32.xlu0 %v7859_v30, %s4311_s26  ;;  %v7862_v30 = vld [vmem:[#allocation75_spill] sm:$0xff] }
 0x18d   : > { %v1522_v16 = vpop.permute.xlu1 %1521 }
 0x18e   : > { %1593 = vst.msk [vmem:[#allocation2 + $0xc8] sm:$0xf] %vm1567_vm13, %v1522_v16  ;;  %v7863_v16 = vld [vmem:[#allocation76_spill] sm:$0xff] }
 0x18f   : > { %v1520_v48 = vpop.permute.xlu0 %1519  ;;  %1799 = vrot.lane.b32.xlu1 %v7860_v29, %s4311_s26 }
 0x190   : > { %1592 = vst.msk [vmem:[#allocation2 + $0xc0] sm:$0xf] %vm1567_vm13, %v1520_v48  ;;  %1797 = vrot.lane.b32.xlu0 %v7861_v42, %s4311_s26  ;;  %v7864_v42 = vld [vmem:[#allocation28_spill] sm:$0xff] }
 0x191   : > { %v1526_v59 = vpop.permute.xlu1 %1525 }
 0x192   : > { %1595 = vst.msk [vmem:[#allocation2 + $0xd8] sm:$0xf] %vm1567_vm13, %v1526_v59  ;;  %v7865_v59 = vld [vmem:[#allocation77_spill] sm:$0xff] }
 0x193   : > { %v1524_v45 = vpop.permute.xlu0 %1523  ;;  %1803 = vrot.lane.b32.xlu1 %v7862_v30, %s4311_s26 }
 0x194   : > { %1594 = vst.msk [vmem:[#allocation2 + $0xd0] sm:$0xf] %vm1567_vm13, %v1524_v45  ;;  %1801 = vrot.lane.b32.xlu0 %v7863_v16, %s4311_s26  ;;  %v7866_v16 = vld [vmem:[#allocation78_spill] sm:$0xff] }
 0x195   : > { %v1530_v40 = vpop.permute.xlu1 %1529 }
 0x196   : > { %1597 = vst.msk [vmem:[#allocation2 + $0xe8] sm:$0xf] %vm1567_vm13, %v1530_v40  ;;  %v7867_v40 = vld [vmem:[#allocation79_spill] sm:$0xff] }
 0x197   : > { %v1528_v48 = vpop.permute.xlu0 %1527  ;;  %1807 = vrot.lane.b32.xlu1 %v7864_v42, %s4311_s26 }
 0x198   : > { %1596 = vst.msk [vmem:[#allocation2 + $0xe0] sm:$0xf] %vm1567_vm13, %v1528_v48  ;;  %1805 = vrot.lane.b32.xlu0 %v7865_v59, %s4311_s26  ;;  %v1756_v48 = vrot.slane %v5752_v21, 5 }
 0x199   : > { %v1534_v29 = vpop.permute.xlu1 %1533 }
 0x19a   : > { %1599 = vst.msk [vmem:[#allocation2 + $0xf8] sm:$0xf] %vm1567_vm13, %v1534_v29  ;;  %v7868_v29 = vld [vmem:[#allocation80_spill] sm:$0xff]  ;;  %v1758_v59 = vrot.slane %v1756_v48, 4 }
 0x19b   : > { %v1532_v45 = vpop.permute.xlu0 %1531  ;;  %1811 = vrot.lane.b32.xlu1 %v7866_v16, %s4311_s26  ;;  %v1759_v16 = vrot.slane %v5844_v41, 5 }
 0x19c   : > { %1598 = vst.msk [vmem:[#allocation2 + $0xf0] sm:$0xf] %vm1567_vm13, %v1532_v45  ;;  %1809 = vrot.lane.b32.xlu0 %v7867_v40, %s4311_s26  ;;  %v7869_v45 = vld [vmem:[#allocation81_spill] sm:$0xff]  ;;  %v4063_v40 = vrot.slane %v5755_v26, 9  ;;  %vm3054_vm13 = vcmask 421184  }
 0x19d   : > { %v1627_v30 = vpop.permute.xlu1 %1626 }
 0x19e   : > { %1722 = vst.msk [vmem:[#allocation2 + $0x8] sm:$0xf] %vm1720_vm14, %v1627_v30  ;;  %v7870_v30 = vld [vmem:[#allocation82_spill] sm:$0xff]  ;;  %v5984_v5 = vsel %vm4989_vm6, %v4063_v40, %v1756_v48 }
 0x19f   : > { %v1625_v42 = vpop.permute.xlu0 %1624  ;;  %1815 = vrot.lane.b32.xlu1 %v7868_v29, %s4311_s26  ;;  %7874 = vst [vmem:[#allocation8_spill] sm:$0xff] %v5984_v5 }
 0x1a0   : > { %1721 = vst.msk [vmem:[#allocation2] sm:$0xf] %vm1720_vm14, %v1625_v42  ;;  %1813 = vrot.lane.b32.xlu0 %v7869_v45, %s4311_s26  ;;  %v7871_v42 = vld [vmem:[#allocation84_spill] sm:$0xff]  ;;  %v5980_v45 = vsel %vm4989_vm6, %v1758_v59, %v1759_v16 }
 0x1a1   : > { %v1631_v15 = vpop.permute.xlu1 %1630  ;;  %7873 = vst [vmem:[#allocation6_spill] sm:$0xff] %v5980_v45 }
 0x1a2   : > { %1724 = vst.msk [vmem:[#allocation2 + $0x18] sm:$0xf] %vm1720_vm14, %v1631_v15 }
 0x1a3   : > { %v1629_v43 = vpop.permute.xlu0 %1628  ;;  %1819 = vrot.lane.b32.xlu1 %v7870_v30, %s4311_s26 }
 0x1a4   : > { %1723 = vst.msk [vmem:[#allocation2 + $0x10] sm:$0xf] %vm1720_vm14, %v1629_v43  ;;  %1817 = vrot.lane.b32.xlu0 %v7871_v42, %s4311_s26  ;;  %v1899_v42 = vshrl.u32 %v5844_v41, 16 }
 0x1a5   : > { %v1635_v8 = vpop.permute.xlu1 %1634 }
 0x1a6   : > { %1726 = vst.msk [vmem:[#allocation2 + $0x28] sm:$0xf] %vm1720_vm14, %v1635_v8 }
 0x1a7   : > { %v1633_v15 = vpop.permute.xlu0 %1632  ;;  %1823 = vrot.lane.b32.xlu1 %v5980_v45, %s4311_s26 }
 0x1a8   : > { %1725 = vst.msk [vmem:[#allocation2 + $0x20] sm:$0xf] %vm1720_vm14, %v1633_v15  ;;  %1821 = vrot.lane.b32.xlu0 %v5984_v5, %s4311_s26  ;;  %v7881_v5 = vld [vmem:[#allocation95_spill] sm:$0xff]  ;;  %s4319_s26 = smov 28  }
 0x1a9   : > { %v1639_v43 = vpop.permute.xlu1 %1638 }
 0x1aa   : > { %1728 = vst.msk [vmem:[#allocation2 + $0x38] sm:$0xf] %vm1720_vm14, %v1639_v43 }
 0x1ab   : > { %v1637_v16 = vpop.permute.xlu0 %1636  ;;  %1907 = vrot.lane.b32.xlu1 %v5323_v61, %s4312_s27  ;;  %v7875_v61 = vld [vmem:[#allocation85_spill] sm:$0xff] }
 0x1ac   : > { %1727 = vst.msk [vmem:[#allocation2 + $0x30] sm:$0xf] %vm1720_vm14, %v1637_v16  ;;  %1905 = vrot.lane.b32.xlu0 %v5334_v9, %s4312_s27  ;;  %v7876_v9 = vld [vmem:[#allocation86_spill] sm:$0xff]  ;;  %v7877_v16 = vld [vmem:[#allocation87_spill] sm:$0xff] }
 0x1ad   : > { %v1643_v8 = vpop.permute.xlu1 %1642 }
 0x1ae   : > { %1730 = vst.msk [vmem:[#allocation2 + $0x48] sm:$0xf] %vm1720_vm14, %v1643_v8  ;;  %v7878_v8 = vld [vmem:[#allocation88_spill] sm:$0xff] }
 0x1af   : > { %v1641_v59 = vpop.permute.xlu0 %1640  ;;  %1911 = vrot.lane.b32.xlu1 %v5351_v24, %s4312_s27 }
 0x1b0   : > { %1729 = vst.msk [vmem:[#allocation2 + $0x40] sm:$0xf] %vm1720_vm14, %v1641_v59  ;;  %1909 = vrot.lane.b32.xlu0 %v5355_v12, %s4312_s27 }
 0x1b1   : > { %v1647_v40 = vpop.permute.xlu1 %1646 }
 0x1b2   : > { %1732 = vst.msk [vmem:[#allocation2 + $0x58] sm:$0xf] %vm1720_vm14, %v1647_v40 }
 0x1b3   : > { %v1645_v48 = vpop.permute.xlu0 %1644  ;;  %1915 = vrot.lane.b32.xlu1 %v7875_v61, %s4312_s27 }
 0x1b4   : > { %1731 = vst.msk [vmem:[#allocation2 + $0x50] sm:$0xf] %vm1720_vm14, %v1645_v48  ;;  %1913 = vrot.lane.b32.xlu0 %v7876_v9, %s4312_s27 }
 0x1b5   : > { %v1651_v15 = vpop.permute.xlu1 %1650 }
 0x1b6   : > { %1734 = vst.msk [vmem:[#allocation2 + $0x68] sm:$0xf] %vm1720_vm14, %v1651_v15 }
 0x1b7   : > { %v1649_v43 = vpop.permute.xlu0 %1648  ;;  %1919 = vrot.lane.b32.xlu1 %v7877_v16, %s4312_s27 }
 0x1b8   : > { %1733 = vst.msk [vmem:[#allocation2 + $0x60] sm:$0xf] %vm1720_vm14, %v1649_v43  ;;  %1917 = vrot.lane.b32.xlu0 %v7878_v8, %s4312_s27 }
 0x1b9   : > { %v1655_v59 = vpop.permute.xlu1 %1654 }
 0x1ba   : > { %1736 = vst.msk [vmem:[#allocation2 + $0x78] sm:$0xf] %vm1720_vm14, %v1655_v59 }
 0x1bb   : > { %v1653_v40 = vpop.permute.xlu0 %1652  ;;  %1923 = vrot.lane.b32.xlu1 %v5422_v51, %s4312_s27 }
 0x1bc   : > { %1735 = vst.msk [vmem:[#allocation2 + $0x70] sm:$0xf] %vm1720_vm14, %v1653_v40  ;;  %1921 = vrot.lane.b32.xlu0 %v5434_v39, %s4312_s27  ;;  %v7879_v40 = vld [vmem:[#allocation93_spill] sm:$0xff]  ;;  %v7891_v39 = vshll.u32 %v5844_v41, 16 }
 0x1bd   : > { %v1659_v48 = vpop.permute.xlu1 %1658 }
 0x1be   : > { %1738 = vst.msk [vmem:[#allocation2 + $0x88] sm:$0xf] %vm1720_vm14, %v1659_v48  ;;  %v7880_v48 = vld [vmem:[#allocation94_spill] sm:$0xff] }
 0x1bf   : > { %v1657_v15 = vpop.permute.xlu0 %1656  ;;  %1927 = vrot.lane.b32.xlu1 %v5451_v2, %s4312_s27 }
 0x1c0   : > { %1737 = vst.msk [vmem:[#allocation2 + $0x80] sm:$0xf] %vm1720_vm14, %v1657_v15  ;;  %1925 = vrot.lane.b32.xlu0 %v5455_v49, %s4312_s27 }
 0x1c1   : > { %v1663_v43 = vpop.permute.xlu1 %1662 }
 0x1c2   : > { %1740 = vst.msk [vmem:[#allocation2 + $0x98] sm:$0xf] %vm1720_vm14, %v1663_v43  ;;  %v7882_v43 = vld [vmem:[#allocation96_spill] sm:$0xff] }
 0x1c3   : > { %v1661_v59 = vpop.permute.xlu0 %1660  ;;  %1931 = vrot.lane.b32.xlu1 %v7879_v40, %s4312_s27 }
 0x1c4   : > { %1739 = vst.msk [vmem:[#allocation2 + $0x90] sm:$0xf] %vm1720_vm14, %v1661_v59  ;;  %1929 = vrot.lane.b32.xlu0 %v7880_v48, %s4312_s27  ;;  %v7888_v48 = vshll.u32 %v5752_v21, 16 }
 0x1c5   : > { %v1667_v29 = vpop.permute.xlu1 %1666 }
 0x1c6   : > { %1742 = vst.msk [vmem:[#allocation2 + $0xa8] sm:$0xf] %vm1720_vm14, %v1667_v29  ;;  %v1895_v40 = vrot.slane %v7888_v48, 6 }
 0x1c7   : > { %v1665_v15 = vpop.permute.xlu0 %1664  ;;  %1935 = vrot.lane.b32.xlu1 %v7881_v5, %s4312_s27 }
 0x1c8   : > { %1741 = vst.msk [vmem:[#allocation2 + $0xa0] sm:$0xf] %vm1720_vm14, %v1665_v15  ;;  %1933 = vrot.lane.b32.xlu0 %v7882_v43, %s4312_s27  ;;  %v7883_v43 = vld [vmem:[#allocation29_spill] sm:$0xff] }
 0x1c9   : > { %v1671_v45 = vpop.permute.xlu1 %1670 }
 0x1ca   : > { %1744 = vst.msk [vmem:[#allocation2 + $0xb8] sm:$0xf] %vm1720_vm14, %v1671_v45  ;;  %v7884_v45 = vld [vmem:[#allocation41_spill] sm:$0xff] }
 0x1cb   : > { %v1669_v59 = vpop.permute.xlu0 %1668  ;;  %1939 = vrot.lane.b32.xlu1 %v5522_v22, %s4312_s27  ;;  %v7886_v22 = vld [vmem:[#allocation32_spill] sm:$0xff] }
 0x1cc   : > { %1743 = vst.msk [vmem:[#allocation2 + $0xb0] sm:$0xf] %vm1720_vm14, %v1669_v59  ;;  %1937 = vrot.lane.b32.xlu0 %v5534_v54, %s4312_s27  ;;  %v7885_v54 = vld [vmem:[#allocation31_spill] sm:$0xff] }
 0x1cd   : > { %v1675_v29 = vpop.permute.xlu1 %1674 }
 0x1ce   : > { %1746 = vst.msk [vmem:[#allocation2 + $0xc8] sm:$0xf] %vm1720_vm14, %v1675_v29 }
 0x1cf   : > { %v1673_v15 = vpop.permute.xlu0 %1672  ;;  %1943 = vrot.lane.b32.xlu1 %v7883_v43, %s4312_s27 }
 0x1d0   : > { %1745 = vst.msk [vmem:[#allocation2 + $0xc0] sm:$0xf] %vm1720_vm14, %v1673_v15  ;;  %1941 = vrot.lane.b32.xlu0 %v7884_v45, %s4312_s27 }
 0x1d1   : > { %v1679_v5 = vpop.permute.xlu1 %1678 }
 0x1d2   : > { %1748 = vst.msk [vmem:[#allocation2 + $0xd8] sm:$0xf] %vm1720_vm14, %v1679_v5  ;;  %v7887_v5 = vshrl.u32 %v5752_v21, 16 }
 0x1d3   : > { %v1677_v59 = vpop.permute.xlu0 %1676  ;;  %1947 = vrot.lane.b32.xlu1 %v7885_v54, %s4312_s27 }
 0x1d4   : > { %1747 = vst.msk [vmem:[#allocation2 + $0xd0] sm:$0xf] %vm1720_vm14, %v1677_v59  ;;  %1945 = vrot.lane.b32.xlu0 %v5580_v11, %s4312_s27  ;;  %v1894_v59 = vrot.slane %v7887_v5, 5  ;;  %v1901_v5 = vrot.slane %v1899_v42, 5 }
 0x1d5   : > { %v1683_v29 = vpop.permute.xlu1 %1682 }
 0x1d6   : > { %1750 = vst.msk [vmem:[#allocation2 + $0xe8] sm:$0xf] %vm1720_vm14, %v1683_v29  ;;  %v7889_v29 = vshrl.u32 %v5755_v26, 16  ;;  %v1896_v48 = vor.u32 %v1895_v40, %v1894_v59 }
 0x1d7   : > { %v1681_v15 = vpop.permute.xlu0 %1680  ;;  %1951 = vrot.lane.b32.xlu1 %v7886_v22, %s4312_s27 }
 0x1d8   : > { %1749 = vst.msk [vmem:[#allocation2 + $0xe0] sm:$0xf] %vm1720_vm14, %v1681_v15  ;;  %1949 = vrot.lane.b32.xlu0 %v5596_v3, %s4312_s27  ;;  %v1890_v49 = vrot.slane %v7889_v29, 5  ;;  %v7890_v15 = vshll.u32 %v5755_v26, 16  ;;  %v1902_v29 = vrot.slane %v7891_v39, 6 }
 0x1d9   : > { %v1687_v30 = vpop.permute.xlu1 %1686 }
 0x1da   : > { %v1891_v2 = vrot.slane %v7890_v15, 6  ;;  %1752 = vst.msk [vmem:[#allocation2 + $0xf8] sm:$0xf] %vm1720_vm14, %v1687_v30  ;;  %v1903_v15 = vor.u32 %v1902_v29, %v1901_v5 }
 0x1db   : > { %v1685_v51 = vpop.permute.xlu0 %1684  ;;  %1955 = vrot.lane.b32.xlu1 %v5617_v46, %s4312_s27 }
 0x1dc   : > { %1751 = vst.msk [vmem:[#allocation2 + $0xf0] sm:$0xf] %vm1720_vm14, %v1685_v51  ;;  %1953 = vrot.lane.b32.xlu0 %v5625_v19, %s4312_s27  ;;  %v1892_v16 = vor.u32 %v1891_v2, %v1890_v49  ;;  %v1898_v51 = vrot.slane %v1896_v48, 4  ;;  %vm3198_vm14 = vcmask 519584  }
 0x1dd   : > { %v1764_v22 = vpop.permute.xlu1 %1763 }
 0x1de   : > { %1859 = vst.msk [vmem:[#allocation2 + $0x8] sm:$0xf] %vm1857_vm15, %v1764_v22  ;;  %v1893_v42 = vrot.slane %v1892_v16, 4  ;;  %v6095_v2 = vsel %vm5278_vm10, %v1898_v51, %v1903_v15 }
 0x1df   : > { %v1762_v30 = vpop.permute.xlu0 %1761  ;;  %1959 = vrot.lane.b32.xlu1 %v5635_v14, %s4312_s27  ;;  %7892 = vst [vmem:[#allocation9_spill] sm:$0xff] %v6095_v2  ;;  %v4248_v14 = vld [vmem:[%s7287_s1 + $0x18] sm:$0xff]  }
 0x1e0   : > { %1858 = vst.msk [vmem:[#allocation2] sm:$0xf] %vm1857_vm15, %v1762_v30  ;;  %1957 = vrot.lane.b32.xlu0 %v5639_v1, %s4312_s27  ;;  %v6099_v22 = vsel %vm5278_vm10, %v1893_v42, %v1896_v48  ;;  %v4247_v1 = vld [vmem:[%s7287_s1 + $0x20] sm:$0xff]  }
 0x1e1   : > { %v1768_v40 = vpop.permute.xlu1 %1767  ;;  %7893 = vst [vmem:[#allocation7_spill] sm:$0xff] %v6099_v22 }
 0x1e2   : > { %1861 = vst.msk [vmem:[#allocation2 + $0x18] sm:$0xf] %vm1857_vm15, %v1768_v40 }
 0x1e3   : > { %v1766_v39 = vpop.permute.xlu0 %1765  ;;  %1963 = vrot.lane.b32.xlu1 %v5649_v44, %s4312_s27 }
 0x1e4   : > { %1860 = vst.msk [vmem:[#allocation2 + $0x10] sm:$0xf] %vm1857_vm15, %v1766_v39  ;;  %1961 = vrot.lane.b32.xlu0 %v5653_v47, %s4312_s27 }
 0x1e5   : > { %v1772_v49 = vpop.permute.xlu1 %1771 }
 0x1e6   : > { %1863 = vst.msk [vmem:[#allocation2 + $0x28] sm:$0xf] %vm1857_vm15, %v1772_v49 }
 0x1e7   : > { %v1770_v41 = vpop.permute.xlu0 %1769  ;;  %1967 = vrot.lane.b32.xlu1 %v6095_v2, %s4312_s27  ;;  %v6290_v2 = vld [vmem:[%s4361_s20 + $0xd4] sm:$0x3] }
 0x1e8   : > { %1862 = vst.msk [vmem:[#allocation2 + $0x20] sm:$0xf] %vm1857_vm15, %v1770_v41  ;;  %1965 = vrot.lane.b32.xlu0 %v6099_v22, %s4312_s27  ;;  %7922 = vst [vmem:[#allocation57_spill] sm:$0xff] %v6290_v2 }
 0x1e9   : > { %v1776_v16 = vpop.permute.xlu1 %1775 }
 0x1ea   : > { %1865 = vst.msk [vmem:[#allocation2 + $0x38] sm:$0xf] %vm1857_vm15, %v1776_v16 }
 0x1eb   : > { %v1774_v59 = vpop.permute.xlu0 %1773  ;;  %2038 = vrot.lane.b32.xlu1 %v4410_v20, %s4313_s28 }
 0x1ec   : > { %1864 = vst.msk [vmem:[#allocation2 + $0x30] sm:$0xf] %vm1857_vm15, %v1774_v59  ;;  %2036 = vrot.lane.b32.xlu0 %v4432_v31, %s4313_s28 }
 0x1ed   : > { %v1780_v48 = vpop.permute.xlu1 %1779 }
 0x1ee   : > { %1867 = vst.msk [vmem:[#allocation2 + $0x48] sm:$0xf] %vm1857_vm15, %v1780_v48 }
 0x1ef   : > { %v1778_v5 = vpop.permute.xlu0 %1777  ;;  %2042 = vrot.lane.b32.xlu1 %v4437_v36, %s4313_s28 }
 0x1f0   : > { %1866 = vst.msk [vmem:[#allocation2 + $0x40] sm:$0xf] %vm1857_vm15, %v1778_v5  ;;  %2040 = vrot.lane.b32.xlu0 %v7805_v25, %s4313_s28 }
 0x1f1   : > { %v1784_v29 = vpop.permute.xlu1 %1783 }
 0x1f2   : > { %1869 = vst.msk [vmem:[#allocation2 + $0x58] sm:$0xf] %vm1857_vm15, %v1784_v29 }
 0x1f3   : > { %v1782_v30 = vpop.permute.xlu0 %1781  ;;  %2046 = vrot.lane.b32.xlu1 %v7806_v13, %s4313_s28 }
 0x1f4   : > { %1868 = vst.msk [vmem:[#allocation2 + $0x50] sm:$0xf] %vm1857_vm15, %v1782_v30  ;;  %2044 = vrot.lane.b32.xlu0 %v4475_v52, %s4313_s28 }
 0x1f5   : > { %v1788_v20 = vpop.permute.xlu1 %1787 }
 0x1f6   : > { %1871 = vst.msk [vmem:[#allocation2 + $0x68] sm:$0xf] %vm1857_vm15, %v1788_v20 }
 0x1f7   : > { %v1786_v31 = vpop.permute.xlu0 %1785  ;;  %2050 = vrot.lane.b32.xlu1 %v4493_v58, %s4313_s28 }
 0x1f8   : > { %1870 = vst.msk [vmem:[#allocation2 + $0x60] sm:$0xf] %vm1857_vm15, %v1786_v31  ;;  %2048 = vrot.lane.b32.xlu0 %v4503_v63, %s4313_s28 }
 0x1f9   : > { %v1792_v51 = vpop.permute.xlu1 %1791 }
 0x1fa   : > { %1873 = vst.msk [vmem:[#allocation2 + $0x78] sm:$0xf] %vm1857_vm15, %v1792_v51 }
 0x1fb   : > { %v1790_v15 = vpop.permute.xlu0 %1789  ;;  %2054 = vrot.lane.b32.xlu1 %v4513_v18, %s4313_s28 }
 0x1fc   : > { %1872 = vst.msk [vmem:[#allocation2 + $0x70] sm:$0xf] %vm1857_vm15, %v1790_v15  ;;  %2052 = vrot.lane.b32.xlu0 %v4527_v27, %s4313_s28 }
 0x1fd   : > { %v1796_v40 = vpop.permute.xlu1 %1795 }
 0x1fe   : > { %1875 = vst.msk [vmem:[#allocation2 + $0x88] sm:$0xf] %vm1857_vm15, %v1796_v40 }
 0x1ff   : > { %v1794_v42 = vpop.permute.xlu0 %1793  ;;  %2058 = vrot.lane.b32.xlu1 %v4540_v37, %s4313_s28  ;;  %v7955_v37 = vld [vmem:[#allocation79_spill] sm:$0xff] }
 0x200   : > { %1874 = vst.msk [vmem:[#allocation2 + $0x80] sm:$0xf] %vm1857_vm15, %v1794_v42  ;;  %2056 = vrot.lane.b32.xlu0 %v4557_v60, %s4313_s28  ;;  %v4246_v60 = vld [vmem:[%s7287_s1 + $0x28] sm:$0xff]  }
 0x201   : > { %v1800_v39 = vpop.permute.xlu1 %1799 }
 0x202   : > { %1877 = vst.msk [vmem:[#allocation2 + $0x98] sm:$0xf] %vm1857_vm15, %v1800_v39 }
 0x203   : > { %v1798_v49 = vpop.permute.xlu0 %1797  ;;  %2062 = vrot.lane.b32.xlu1 %v4570_v34, %s4313_s28 }
 0x204   : > { %1876 = vst.msk [vmem:[#allocation2 + $0x90] sm:$0xf] %vm1857_vm15, %v1798_v49  ;;  %2060 = vrot.lane.b32.xlu0 %v4593_v55, %s4313_s28 }
 0x205   : > { %v1804_v41 = vpop.permute.xlu1 %1803 }
 0x206   : > { %1879 = vst.msk [vmem:[#allocation2 + $0xa8] sm:$0xf] %vm1857_vm15, %v1804_v41 }
 0x207   : > { %v1802_v16 = vpop.permute.xlu0 %1801  ;;  %2066 = vrot.lane.b32.xlu1 %v4604_v33, %s4313_s28 }
 0x208   : > { %1878 = vst.msk [vmem:[#allocation2 + $0xa0] sm:$0xf] %vm1857_vm15, %v1802_v16  ;;  %2064 = vrot.lane.b32.xlu0 %v4617_v38, %s4313_s28  ;;  %v6198_v16 = vld [vmem:[%s4361_s20 + $0xd0] sm:$0xf]  ;;  %v7912_v38 = vld [vmem:[#allocation42_spill] sm:$0xff] }
 0x209   : > { %v1808_v59 = vpop.permute.xlu1 %1807  ;;  %7894 = vst [vmem:[#allocation51_spill] sm:$0xff] %v6198_v16  ;;  %v7921_v55 = vshrl.u32 %v6198_v16, 16 }
 0x20a   : > { %1881 = vst.msk [vmem:[#allocation2 + $0xb8] sm:$0xf] %vm1857_vm15, %v1808_v59 }
 0x20b   : > { %v1806_v48 = vpop.permute.xlu0 %1805  ;;  %2070 = vrot.lane.b32.xlu1 %v4631_v62, %s4313_s28  ;;  %v7910_v62 = vld [vmem:[#allocation39_spill] sm:$0xff]  ;;  %v2181_v22 = vrot.slane %v7921_v55, 4  ;;  %v7925_v55 = vld [vmem:[#allocation53_spill] sm:$0xff] }
 0x20c   : > { %1880 = vst.msk [vmem:[#allocation2 + $0xb0] sm:$0xf] %vm1857_vm15, %v1806_v48  ;;  %2068 = vrot.lane.b32.xlu0 %v7676_v32, %s4313_s28  ;;  %v6201_v48 = vld [vmem:[%s4361_s20 + $0xcc] sm:$0xf] }
 0x20d   : > { %v1812_v5 = vpop.permute.xlu1 %1811  ;;  %7895 = vst [vmem:[#allocation56_spill] sm:$0xff] %v6201_v48 }
 0x20e   : > { %1883 = vst.msk [vmem:[#allocation2 + $0xc8] sm:$0xf] %vm1857_vm15, %v1812_v5 }
 0x20f   : > { %v1810_v29 = vpop.permute.xlu0 %1809  ;;  %2074 = vrot.lane.b32.xlu1 %v7674_v35, %s4313_s28 }
 0x210   : > { %1882 = vst.msk [vmem:[#allocation2 + $0xc0] sm:$0xf] %vm1857_vm15, %v1810_v29  ;;  %2072 = vrot.lane.b32.xlu0 %v4687_v28, %s4313_s28  ;;  %v7896_v29 = vld [vmem:[#allocation10_spill] sm:$0xff] }
 0x211   : > { %v1816_v30 = vpop.permute.xlu1 %1815 }
 0x212   : > { %1885 = vst.msk [vmem:[#allocation2 + $0xd8] sm:$0xf] %vm1857_vm15, %v1816_v30  ;;  %v7897_v30 = vld [vmem:[#allocation13_spill] sm:$0xff] }
 0x213   : > { %v1814_v20 = vpop.permute.xlu0 %1813  ;;  %2078 = vrot.lane.b32.xlu1 %v4693_v7, %s4313_s28 }
 0x214   : > { %1884 = vst.msk [vmem:[#allocation2 + $0xd0] sm:$0xf] %vm1857_vm15, %v1814_v20  ;;  %2076 = vrot.lane.b32.xlu0 %v7681_v53, %s4313_s28 }
 0x215   : > { %v1820_v31 = vpop.permute.xlu1 %1819 }
 0x216   : > { %1887 = vst.msk [vmem:[#allocation2 + $0xe8] sm:$0xf] %vm1857_vm15, %v1820_v31 }
 0x217   : > { %v1818_v51 = vpop.permute.xlu0 %1817  ;;  %2082 = vrot.lane.b32.xlu1 %v7773_v6, %s4313_s28 }
 0x218   : > { %1886 = vst.msk [vmem:[#allocation2 + $0xe0] sm:$0xf] %vm1857_vm15, %v1818_v51  ;;  %2080 = vrot.lane.b32.xlu0 %v7779_v23, %s4313_s28  ;;  %v7898_v51 = vld [vmem:[#allocation15_spill] sm:$0xff] }
 0x219   : > { %v1824_v15 = vpop.permute.xlu1 %1823 }
 0x21a   : > { %1889 = vst.msk [vmem:[#allocation2 + $0xf8] sm:$0xf] %vm1857_vm15, %v1824_v15  ;;  %v7899_v15 = vld [vmem:[#allocation17_spill] sm:$0xff] }
 0x21b   : > { %v1822_v40 = vpop.permute.xlu0 %1821  ;;  %2086 = vrot.lane.b32.xlu1 %v7783_v10, %s4313_s28 }
 0x21c   : > { %1888 = vst.msk [vmem:[#allocation2 + $0xf0] sm:$0xf] %vm1857_vm15, %v1822_v40  ;;  %2084 = vrot.lane.b32.xlu0 %v4778_v56, %s4313_s28  ;;  %vm3503_vm15 = vcmask 523264  }
 0x21d   : > { %v1908_v42 = vpop.permute.xlu1 %1907 }
 0x21e   : > { %2003 = vst.msk [vmem:[#allocation2 + $0x8] sm:$0xf] %vm2001_vm0, %v1908_v42 }
 0x21f   : > { %v1906_v39 = vpop.permute.xlu0 %1905  ;;  %2090 = vrot.lane.b32.xlu1 %v7792_v4, %s4313_s28 }
 0x220   : > { %2002 = vst.msk [vmem:[#allocation2] sm:$0xf] %vm2001_vm0, %v1906_v39  ;;  %2088 = vrot.lane.b32.xlu0 %v7795_v17, %s4313_s28  ;;  %v7900_v39 = vld [vmem:[#allocation20_spill] sm:$0xff] }
 0x221   : > { %v1912_v49 = vpop.permute.xlu1 %1911 }
 0x222   : > { %2005 = vst.msk [vmem:[#allocation2 + $0x18] sm:$0xf] %vm2001_vm0, %v1912_v49  ;;  %v7901_v49 = vld [vmem:[#allocation22_spill] sm:$0xff] }
 0x223   : > { %v1910_v41 = vpop.permute.xlu0 %1909  ;;  %2094 = vrot.lane.b32.xlu1 %v5752_v21, %s4313_s28 }
 0x224   : > { %2004 = vst.msk [vmem:[#allocation2 + $0x10] sm:$0xf] %vm2001_vm0, %v1910_v41  ;;  %2092 = vrot.lane.b32.xlu0 %v5755_v26, %s4313_s28 }
 0x225   : > { %v1916_v59 = vpop.permute.xlu1 %1915 }
 0x226   : > { %2007 = vst.msk [vmem:[#allocation2 + $0x28] sm:$0xf] %vm2001_vm0, %v1916_v59 }
 0x227   : > { %v1914_v5 = vpop.permute.xlu0 %1913  ;;  %2098 = vrot.lane.b32.xlu1 %v6198_v16, %s4313_s28 }
 0x228   : > { %2006 = vst.msk [vmem:[#allocation2 + $0x20] sm:$0xf] %vm2001_vm0, %v1914_v5  ;;  %2096 = vrot.lane.b32.xlu0 %v6201_v48, %s4313_s28  ;;  %v7902_v5 = vld [vmem:[#allocation25_spill] sm:$0xff] }
 0x229   : > { %v1920_v21 = vpop.permute.xlu1 %1919 }
 0x22a   : > { %2009 = vst.msk [vmem:[#allocation2 + $0x38] sm:$0xf] %vm2001_vm0, %v1920_v21  ;;  %v7903_v21 = vld [vmem:[#allocation26_spill] sm:$0xff] }
 0x22b   : > { %v1918_v26 = vpop.permute.xlu0 %1917  ;;  %2191 = vrot.lane.b32.xlu1 %v7896_v29, %s4314_s29 }
 0x22c   : > { %2008 = vst.msk [vmem:[#allocation2 + $0x30] sm:$0xf] %vm2001_vm0, %v1918_v26  ;;  %2189 = vrot.lane.b32.xlu0 %v7897_v30, %s4314_s29  ;;  %v7904_v30 = vld [vmem:[#allocation27_spill] sm:$0xff] }
 0x22d   : > { %v1924_v20 = vpop.permute.xlu1 %1923 }
 0x22e   : > { %2011 = vst.msk [vmem:[#allocation2 + $0x48] sm:$0xf] %vm2001_vm0, %v1924_v20  ;;  %v7905_v20 = vld [vmem:[#allocation30_spill] sm:$0xff] }
 0x22f   : > { %v1922_v31 = vpop.permute.xlu0 %1921  ;;  %2195 = vrot.lane.b32.xlu1 %v7898_v51, %s4314_s29 }
 0x230   : > { %2010 = vst.msk [vmem:[#allocation2 + $0x40] sm:$0xf] %vm2001_vm0, %v1922_v31  ;;  %2193 = vrot.lane.b32.xlu0 %v7899_v15, %s4314_s29 }
 0x231   : > { %v1928_v40 = vpop.permute.xlu1 %1927 }
 0x232   : > { %2013 = vst.msk [vmem:[#allocation2 + $0x58] sm:$0xf] %vm2001_vm0, %v1928_v40 }
 0x233   : > { %v1926_v42 = vpop.permute.xlu0 %1925  ;;  %2199 = vrot.lane.b32.xlu1 %v7900_v39, %s4314_s29 }
 0x234   : > { %2012 = vst.msk [vmem:[#allocation2 + $0x50] sm:$0xf] %vm2001_vm0, %v1926_v42  ;;  %2197 = vrot.lane.b32.xlu0 %v7901_v49, %s4314_s29  ;;  %v7906_v42 = vld [vmem:[#allocation33_spill] sm:$0xff] }
 0x235   : > { %v1932_v41 = vpop.permute.xlu1 %1931 }
 0x236   : > { %2015 = vst.msk [vmem:[#allocation2 + $0x68] sm:$0xf] %vm2001_vm0, %v1932_v41  ;;  %v7907_v41 = vld [vmem:[#allocation35_spill] sm:$0xff] }
 0x237   : > { %v1930_v59 = vpop.permute.xlu0 %1929  ;;  %2203 = vrot.lane.b32.xlu1 %v7902_v5, %s4314_s29 }
 0x238   : > { %2014 = vst.msk [vmem:[#allocation2 + $0x60] sm:$0xf] %vm2001_vm0, %v1930_v59  ;;  %2201 = vrot.lane.b32.xlu0 %v7903_v21, %s4314_s29 }
 0x239   : > { %v1936_v26 = vpop.permute.xlu1 %1935 }
 0x23a   : > { %2017 = vst.msk [vmem:[#allocation2 + $0x78] sm:$0xf] %vm2001_vm0, %v1936_v26 }
 0x23b   : > { %v1934_v29 = vpop.permute.xlu0 %1933  ;;  %2207 = vrot.lane.b32.xlu1 %v7904_v30, %s4314_s29 }
 0x23c   : > { %2016 = vst.msk [vmem:[#allocation2 + $0x70] sm:$0xf] %vm2001_vm0, %v1934_v29  ;;  %2205 = vrot.lane.b32.xlu0 %v7905_v20, %s4314_s29  ;;  %v7908_v29 = vld [vmem:[#allocation37_spill] sm:$0xff] }
 0x23d   : > { %v1940_v31 = vpop.permute.xlu1 %1939 }
 0x23e   : > { %2019 = vst.msk [vmem:[#allocation2 + $0x88] sm:$0xf] %vm2001_vm0, %v1940_v31  ;;  %v7909_v31 = vld [vmem:[#allocation38_spill] sm:$0xff] }
 0x23f   : > { %v1938_v40 = vpop.permute.xlu0 %1937  ;;  %2211 = vrot.lane.b32.xlu1 %v7906_v42, %s4314_s29 }
 0x240   : > { %2018 = vst.msk [vmem:[#allocation2 + $0x80] sm:$0xf] %vm2001_vm0, %v1938_v40  ;;  %2209 = vrot.lane.b32.xlu0 %v7907_v41, %s4314_s29 }
 0x241   : > { %v1944_v59 = vpop.permute.xlu1 %1943 }
 0x242   : > { %2021 = vst.msk [vmem:[#allocation2 + $0x98] sm:$0xf] %vm2001_vm0, %v1944_v59  ;;  %v7911_v59 = vld [vmem:[#allocation40_spill] sm:$0xff] }
 0x243   : > { %v1942_v26 = vpop.permute.xlu0 %1941  ;;  %2215 = vrot.lane.b32.xlu1 %v7908_v29, %s4314_s29 }
 0x244   : > { %2020 = vst.msk [vmem:[#allocation2 + $0x90] sm:$0xf] %vm2001_vm0, %v1942_v26  ;;  %2213 = vrot.lane.b32.xlu0 %v7909_v31, %s4314_s29 }
 0x245   : > { %v1948_v32 = vpop.permute.xlu1 %1947 }
 0x246   : > { %2023 = vst.msk [vmem:[#allocation2 + $0xa8] sm:$0xf] %vm2001_vm0, %v1948_v32  ;;  %v7913_v32 = vld [vmem:[#allocation43_spill] sm:$0xff] }
 0x247   : > { %v1946_v40 = vpop.permute.xlu0 %1945  ;;  %2219 = vrot.lane.b32.xlu1 %v7910_v62, %s4314_s29 }
 0x248   : > { %2022 = vst.msk [vmem:[#allocation2 + $0xa0] sm:$0xf] %vm2001_vm0, %v1946_v40  ;;  %2217 = vrot.lane.b32.xlu0 %v7911_v59, %s4314_s29  ;;  %v7914_v59 = vld [vmem:[#allocation44_spill] sm:$0xff] }
 0x249   : > { %v1952_v0 = vpop.permute.xlu1 %1951 }
 0x24a   : > { %2025 = vst.msk [vmem:[#allocation2 + $0xb8] sm:$0xf] %vm2001_vm0, %v1952_v0  ;;  %v7915_v0 = vld [vmem:[#allocation45_spill] sm:$0xff] }
 0x24b   : > { %v1950_v26 = vpop.permute.xlu0 %1949  ;;  %2223 = vrot.lane.b32.xlu1 %v7912_v38, %s4314_s29  ;;  %v7917_v38 = vld [vmem:[#allocation48_spill] sm:$0xff] }
 0x24c   : > { %2024 = vst.msk [vmem:[#allocation2 + $0xb0] sm:$0xf] %vm2001_vm0, %v1950_v26  ;;  %2221 = vrot.lane.b32.xlu0 %v7913_v32, %s4314_s29  ;;  %v7916_v32 = vld [vmem:[#allocation47_spill] sm:$0xff] }
 0x24d   : > { %v1956_v33 = vpop.permute.xlu1 %1955 }
 0x24e   : > { %2027 = vst.msk [vmem:[#allocation2 + $0xc8] sm:$0xf] %vm2001_vm0, %v1956_v33  ;;  %v7919_v33 = vld [vmem:[#allocation50_spill] sm:$0xff] }
 0x24f   : > { %v1954_v40 = vpop.permute.xlu0 %1953  ;;  %2227 = vrot.lane.b32.xlu1 %v7914_v59, %s4314_s29 }
 0x250   : > { %2026 = vst.msk [vmem:[#allocation2 + $0xc0] sm:$0xf] %vm2001_vm0, %v1954_v40  ;;  %2225 = vrot.lane.b32.xlu0 %v7915_v0, %s4314_s29  ;;  %v7920_v40 = vshll.u32 %v6198_v16, 16  ;;  %v7584_v16 = vshll.u32 %v6290_v2, 16 }
 0x251   : > { %v1960_v62 = vpop.permute.xlu1 %1959 }
 0x252   : > { %2029 = vst.msk [vmem:[#allocation2 + $0xd8] sm:$0xf] %vm2001_vm0, %v1960_v62  ;;  %v2177_v29 = vrot.slane %v7920_v40, 5 }
 0x253   : > { %v1958_v26 = vpop.permute.xlu0 %1957  ;;  %2231 = vrot.lane.b32.xlu1 %v7916_v32, %s4314_s29 }
 0x254   : > { %2028 = vst.msk [vmem:[#allocation2 + $0xd0] sm:$0xf] %vm2001_vm0, %v1958_v26  ;;  %2229 = vrot.lane.b32.xlu0 %v7917_v38, %s4314_s29  ;;  %v7918_v26 = vld [vmem:[#allocation49_spill] sm:$0xff]  ;;  %v2182_v40 = vor.u32 %v2181_v22, %v2177_v29 }
 0x255   : > { %v1964_v31 = vpop.permute.xlu1 %1963 }
 0x256   : > { %2031 = vst.msk [vmem:[#allocation2 + $0xe8] sm:$0xf] %vm2001_vm0, %v1964_v31  ;;  %v7923_v31 = vshrl.u32 %v6201_v48, 16 }
 0x257   : > { %v1962_v62 = vpop.permute.xlu0 %1961  ;;  %2235 = vrot.lane.b32.xlu1 %v7918_v26, %s4314_s29 }
 0x258   : > { %2030 = vst.msk [vmem:[#allocation2 + $0xe0] sm:$0xf] %vm2001_vm0, %v1962_v62  ;;  %2233 = vrot.lane.b32.xlu0 %v7919_v33, %s4314_s29  ;;  %v2168_v47 = vrot.slane %v7923_v31, 4  ;;  %v7924_v62 = vshll.u32 %v6201_v48, 16  ;;  %v2187_v48 = vrot.slane %v7584_v16, 5 }
 0x259   : > { %v1968_v34 = vpop.permute.xlu1 %1967 }
 0x25a   : > { %v2171_v44 = vrot.slane %v7924_v62, 5  ;;  %2033 = vst.msk [vmem:[#allocation2 + $0xf8] sm:$0xf] %vm2001_vm0, %v1968_v34  ;;  %v7926_v34 = vld [vmem:[#allocation55_spill] sm:$0xff] }
 0x25b   : > { %v1966_v41 = vpop.permute.xlu0 %1965  ;;  %2239 = vrot.lane.b32.xlu1 %v7835_v57, %s4314_s29 }
 0x25c   : > { %2032 = vst.msk [vmem:[#allocation2 + $0xf0] sm:$0xf] %vm2001_vm0, %v1966_v41  ;;  %2237 = vrot.lane.b32.xlu0 %v7925_v55, %s4314_s29  ;;  %v2172_v31 = vor.u32 %v2171_v44, %v2168_v47  ;;  %v2183_v41 = vrot.slane %v2182_v40, 4  ;;  %v7927_v47 = vld [vmem:[#allocation4_spill] sm:$0xff] }
 0x25d   : > { %v2039_v42 = vpop.permute.xlu1 %2038 }
 0x25e   : > { %2134 = vst.msk [vmem:[#allocation2 + $0x8] sm:$0xf] %vm2132_vm1, %v2039_v42  ;;  %v2173_v17 = vrot.slane %v2172_v31, 4  ;;  %v7928_v42 = vld [vmem:[#allocation3_spill] sm:$0xff] }
 0x25f   : > { %v2037_v62 = vpop.permute.xlu0 %2036  ;;  %2243 = vrot.lane.b32.xlu1 %v7837_v50, %s4314_s29  ;;  %v7944_v50 = vld [vmem:[#allocation70_spill] sm:$0xff] }
 0x260   : > { %2133 = vst.msk [vmem:[#allocation2] sm:$0xf] %vm2132_vm1, %v2037_v62  ;;  %2241 = vrot.lane.b32.xlu0 %v7926_v34, %s4314_s29  ;;  %v6319_v34 = vsel %vm4424_vm3, %v2183_v41, %v2187_v48  ;;  %v6323_v16 = vsel %vm4424_vm3, %v2173_v17, %v2177_v29  ;;  %v7932_v17 = vld [vmem:[#allocation58_spill] sm:$0xff]  ;;  %v7933_v29 = vld [vmem:[#allocation59_spill] sm:$0xff]  ;;  %v7938_v62 = vld [vmem:[#allocation64_spill] sm:$0xff] }
 0x261   : > { %v2043_v22 = vpop.permute.xlu1 %2042  ;;  %7930 = vst [vmem:[#allocation85_spill] sm:$0xff] %v6319_v34  ;;  %7931 = vst [vmem:[#allocation86_spill] sm:$0xff] %v6323_v16 }
 0x262   : > { %2136 = vst.msk [vmem:[#allocation2 + $0x18] sm:$0xf] %vm2132_vm1, %v2043_v22 }
 0x263   : > { %v2041_v44 = vpop.permute.xlu0 %2040  ;;  %2247 = vrot.lane.b32.xlu1 %v7927_v47, %s4314_s29 }
 0x264   : > { %2135 = vst.msk [vmem:[#allocation2 + $0x10] sm:$0xf] %vm2132_vm1, %v2041_v44  ;;  %2245 = vrot.lane.b32.xlu0 %v7928_v42, %s4314_s29  ;;  %v7942_v42 = vld [vmem:[#allocation68_spill] sm:$0xff] }
 0x265   : > { %v2047_v40 = vpop.permute.xlu1 %2046 }
 0x266   : > { %2138 = vst.msk [vmem:[#allocation2 + $0x28] sm:$0xf] %vm2132_vm1, %v2047_v40  ;;  %v7934_v40 = vld [vmem:[#allocation60_spill] sm:$0xff] }
 0x267   : > { %v2045_v31 = vpop.permute.xlu0 %2044  ;;  %2251 = vrot.lane.b32.xlu1 %v6319_v34, %s4314_s29 }
 0x268   : > { %2137 = vst.msk [vmem:[#allocation2 + $0x20] sm:$0xf] %vm2132_vm1, %v2045_v31  ;;  %2249 = vrot.lane.b32.xlu0 %v6323_v16, %s4314_s29  ;;  %v7935_v31 = vld [vmem:[#allocation61_spill] sm:$0xff]  ;;  %v7940_v16 = vld [vmem:[#allocation66_spill] sm:$0xff] }
 0x269   : > { %v2051_v22 = vpop.permute.xlu1 %2050 }
 0x26a   : > { %2140 = vst.msk [vmem:[#allocation2 + $0x38] sm:$0xf] %vm2132_vm1, %v2051_v22 }
 0x26b   : > { %v2049_v48 = vpop.permute.xlu0 %2048  ;;  %2328 = vrot.lane.b32.xlu1 %v7932_v17, %s4315_s30  ;;  %v7936_v17 = vld [vmem:[#allocation62_spill] sm:$0xff] }
 0x26c   : > { %2139 = vst.msk [vmem:[#allocation2 + $0x30] sm:$0xf] %vm2132_vm1, %v2049_v48  ;;  %2326 = vrot.lane.b32.xlu0 %v7933_v29, %s4315_s30  ;;  %v7937_v29 = vld [vmem:[#allocation63_spill] sm:$0xff] }
 0x26d   : > { %v2055_v41 = vpop.permute.xlu1 %2054 }
 0x26e   : > { %2142 = vst.msk [vmem:[#allocation2 + $0x48] sm:$0xf] %vm2132_vm1, %v2055_v41 }
 0x26f   : > { %v2053_v44 = vpop.permute.xlu0 %2052  ;;  %2332 = vrot.lane.b32.xlu1 %v7934_v40, %s4315_s30 }
 0x270   : > { %2141 = vst.msk [vmem:[#allocation2 + $0x40] sm:$0xf] %vm2132_vm1, %v2053_v44  ;;  %2330 = vrot.lane.b32.xlu0 %v7935_v31, %s4315_s30 }
 0x271   : > { %v2059_v22 = vpop.permute.xlu1 %2058 }
 0x272   : > { %2144 = vst.msk [vmem:[#allocation2 + $0x58] sm:$0xf] %vm2132_vm1, %v2059_v22  ;;  %v7939_v22 = vld [vmem:[#allocation65_spill] sm:$0xff] }
 0x273   : > { %v2057_v48 = vpop.permute.xlu0 %2056  ;;  %2336 = vrot.lane.b32.xlu1 %v7936_v17, %s4315_s30 }
 0x274   : > { %2143 = vst.msk [vmem:[#allocation2 + $0x50] sm:$0xf] %vm2132_vm1, %v2057_v48  ;;  %2334 = vrot.lane.b32.xlu0 %v7937_v29, %s4315_s30 }
 0x275   : > { %v2063_v41 = vpop.permute.xlu1 %2062 }
 0x276   : > { %2146 = vst.msk [vmem:[#allocation2 + $0x68] sm:$0xf] %vm2132_vm1, %v2063_v41  ;;  %v7941_v41 = vld [vmem:[#allocation67_spill] sm:$0xff] }
 0x277   : > { %v2061_v44 = vpop.permute.xlu0 %2060  ;;  %2340 = vrot.lane.b32.xlu1 %v7938_v62, %s4315_s30 }
 0x278   : > { %2145 = vst.msk [vmem:[#allocation2 + $0x60] sm:$0xf] %vm2132_vm1, %v2061_v44  ;;  %2338 = vrot.lane.b32.xlu0 %v7939_v22, %s4315_s30 }
 0x279   : > { %v2067_v2 = vpop.permute.xlu1 %2066 }
 0x27a   : > { %2148 = vst.msk [vmem:[#allocation2 + $0x78] sm:$0xf] %vm2132_vm1, %v2067_v2  ;;  %v7943_v2 = vld [vmem:[#allocation69_spill] sm:$0xff] }
 0x27b   : > { %v2065_v48 = vpop.permute.xlu0 %2064  ;;  %2344 = vrot.lane.b32.xlu1 %v7940_v16, %s4315_s30 }
 0x27c   : > { %2147 = vst.msk [vmem:[#allocation2 + $0x70] sm:$0xf] %vm2132_vm1, %v2065_v48  ;;  %2342 = vrot.lane.b32.xlu0 %v7941_v41, %s4315_s30 }
 0x27d   : > { %v2071_v34 = vpop.permute.xlu1 %2070 }
 0x27e   : > { %2150 = vst.msk [vmem:[#allocation2 + $0x88] sm:$0xf] %vm2132_vm1, %v2071_v34  ;;  %v7945_v34 = vld [vmem:[#allocation71_spill] sm:$0xff] }
 0x27f   : > { %v2069_v44 = vpop.permute.xlu0 %2068  ;;  %2348 = vrot.lane.b32.xlu1 %v7942_v42, %s4315_s30 }
 0x280   : > { %2149 = vst.msk [vmem:[#allocation2 + $0x80] sm:$0xf] %vm2132_vm1, %v2069_v44  ;;  %2346 = vrot.lane.b32.xlu0 %v7943_v2, %s4315_s30  ;;  %v7946_v2 = vld [vmem:[#allocation72_spill] sm:$0xff] }
 0x281   : > { %v2075_v47 = vpop.permute.xlu1 %2074 }
 0x282   : > { %2152 = vst.msk [vmem:[#allocation2 + $0x98] sm:$0xf] %vm2132_vm1, %v2075_v47  ;;  %v7947_v47 = vld [vmem:[#allocation24_spill] sm:$0xff] }
 0x283   : > { %v2073_v48 = vpop.permute.xlu0 %2072  ;;  %2352 = vrot.lane.b32.xlu1 %v7944_v50, %s4315_s30  ;;  %v4316_v50 = vmov 0  }
 0x284   : > { %2151 = vst.msk [vmem:[#allocation2 + $0x90] sm:$0xf] %vm2132_vm1, %v2073_v48  ;;  %2350 = vrot.lane.b32.xlu0 %v7945_v34, %s4315_s30  ;;  %v7948_v34 = vld [vmem:[#allocation73_spill] sm:$0xff]  ;;  %3552 = vmatprep.subr.bf16.mxu0 %v4316_v50 }
 0x285   : > { %v2079_v4 = vpop.permute.xlu1 %2078  ;;  %4195 = vmatprep.subr.bf16.mxu1 %v4316_v50 }
 0x286   : > { %2154 = vst.msk [vmem:[#allocation2 + $0xa8] sm:$0xf] %vm2132_vm1, %v2079_v4  ;;  %v7949_v4 = vld [vmem:[#allocation74_spill] sm:$0xff] }
 0x287   : > { %v2077_v44 = vpop.permute.xlu0 %2076  ;;  %2356 = vrot.lane.b32.xlu1 %v7946_v2, %s4315_s30 }
 0x288   : > { %2153 = vst.msk [vmem:[#allocation2 + $0xa0] sm:$0xf] %vm2132_vm1, %v2077_v44  ;;  %2354 = vrot.lane.b32.xlu0 %v7947_v47, %s4315_s30  ;;  %v4244_v44 = vld [vmem:[%s7287_s1 + $0x38] sm:$0xff]   ;;  %v7953_v47 = vld [vmem:[#allocation77_spill] sm:$0xff] }
 0x289   : > { %v2083_v42 = vpop.permute.xlu1 %2082  ;;  %3553 = vmatpush1.bf16.msra.mxu0 %v4244_v44  ;;  %4207 = vmatpush1.bf16.msra.mxu1 %v4244_v44 }
 0x28a   : > { %2156 = vst.msk [vmem:[#allocation2 + $0xb8] sm:$0xf] %vm2132_vm1, %v2083_v42  ;;  %3554 = vmatprep.subr.bf16.mxu0 %v4316_v50  ;;  %4196 = vmatprep.subr.bf16.mxu1 %v4316_v50 }
 0x28b   : > { %v2081_v48 = vpop.permute.xlu0 %2080  ;;  %2360 = vrot.lane.b32.xlu1 %v7948_v34, %s4315_s30  ;;  %v4245_v34 = vld [vmem:[%s7287_s1 + $0x30] sm:$0xff]  }
 0x28c   : > { %2155 = vst.msk [vmem:[#allocation2 + $0xb0] sm:$0xf] %vm2132_vm1, %v2081_v48  ;;  %2358 = vrot.lane.b32.xlu0 %v7949_v4, %s4315_s30  ;;  %v7950_v48 = vld [vmem:[#allocation75_spill] sm:$0xff]  ;;  %v7951_v4 = vld [vmem:[#allocation76_spill] sm:$0xff] }
 0x28d   : > { %v2087_v2 = vpop.permute.xlu1 %2086  ;;  %3555 = vmatpush1.bf16.msra.mxu0 %v4245_v34  ;;  %4208 = vmatpush1.bf16.msra.mxu1 %v4245_v34 }
 0x28e   : > { %2158 = vst.msk [vmem:[#allocation2 + $0xc8] sm:$0xf] %vm2132_vm1, %v2087_v2  ;;  %3556 = vmatprep.subr.bf16.mxu0 %v4316_v50  ;;  %4197 = vmatprep.subr.bf16.mxu1 %v4316_v50 }
 0x28f   : > { %v2085_v42 = vpop.permute.xlu0 %2084  ;;  %2364 = vrot.lane.b32.xlu1 %v7950_v48, %s4315_s30 }
 0x290   : > { %2157 = vst.msk [vmem:[#allocation2 + $0xc0] sm:$0xf] %vm2132_vm1, %v2085_v42  ;;  %2362 = vrot.lane.b32.xlu0 %v7951_v4, %s4315_s30  ;;  %v7952_v42 = vld [vmem:[#allocation28_spill] sm:$0xff] }
 0x291   : > { %v2091_v2 = vpop.permute.xlu1 %2090  ;;  %3557 = vmatpush1.bf16.msra.mxu0 %v4246_v60  ;;  %4209 = vmatpush1.bf16.msra.mxu1 %v4246_v60 }
 0x292   : > { %2160 = vst.msk [vmem:[#allocation2 + $0xd8] sm:$0xf] %vm2132_vm1, %v2091_v2  ;;  %3558 = vmatprep.subr.bf16.mxu0 %v4316_v50  ;;  %4198 = vmatprep.subr.bf16.mxu1 %v4316_v50 }
 0x293   : > { %v2089_v44 = vpop.permute.xlu0 %2088  ;;  %2368 = vrot.lane.b32.xlu1 %v7952_v42, %s4315_s30 }
 0x294   : > { %2159 = vst.msk [vmem:[#allocation2 + $0xd0] sm:$0xf] %vm2132_vm1, %v2089_v44  ;;  %2366 = vrot.lane.b32.xlu0 %v7953_v47, %s4315_s30  ;;  %v7954_v44 = vld [vmem:[#allocation78_spill] sm:$0xff] }
 0x295   : > { %v2095_v2 = vpop.permute.xlu1 %2094  ;;  %3559 = vmatpush1.bf16.msra.mxu0 %v4247_v1  ;;  %4210 = vmatpush1.bf16.msra.mxu1 %v4247_v1 }
 0x296   : > { %2162 = vst.msk [vmem:[#allocation2 + $0xe8] sm:$0xf] %vm2132_vm1, %v2095_v2  ;;  %3560 = vmatprep.subr.bf16.mxu0 %v4316_v50  ;;  %4199 = vmatprep.subr.bf16.mxu1 %v4316_v50 }
 0x297   : > { %v2093_v34 = vpop.permute.xlu0 %2092  ;;  %2372 = vrot.lane.b32.xlu1 %v7954_v44, %s4315_s30 }
 0x298   : > { %2161 = vst.msk [vmem:[#allocation2 + $0xe0] sm:$0xf] %vm2132_vm1, %v2093_v34  ;;  %2370 = vrot.lane.b32.xlu0 %v7955_v37, %s4315_s30  ;;  %v7956_v34 = vld [vmem:[#allocation81_spill] sm:$0xff] }
 0x299   : > { %v2099_v2 = vpop.permute.xlu1 %2098  ;;  %3561 = vmatpush1.bf16.msra.mxu0 %v4248_v14  ;;  %4211 = vmatpush1.bf16.msra.mxu1 %v4248_v14 }
 0x29a   : > { %2164 = vst.msk [vmem:[#allocation2 + $0xf8] sm:$0xf] %vm2132_vm1, %v2099_v2  ;;  %3562 = vmatprep.subr.bf16.mxu0 %v4316_v50  ;;  %4200 = vmatprep.subr.bf16.mxu1 %v4316_v50 }
 0x29b   : > { %v2097_v60 = vpop.permute.xlu0 %2096  ;;  %2537 = vrot.lane.b32.xlu1 %v5355_v12, %s4317_s13  ;;  %v4249_v12 = vld [vmem:[%s7287_s1 + $0x10] sm:$0xff]  }
 0x29c   : > { %2163 = vst.msk [vmem:[#allocation2 + $0xf0] sm:$0xf] %vm2132_vm1, %v2097_v60  ;;  %2374 = vrot.lane.b32.xlu0 %v7956_v34, %s4315_s30 }
 0x29d   : > { %v2192_v2 = vpop.permute.xlu1 %2191  ;;  %3563 = vmatpush1.bf16.msra.mxu0 %v4249_v12  ;;  %4212 = vmatpush1.bf16.msra.mxu1 %v4249_v12 }
 0x29e   : > { %2287 = vst.msk [vmem:[#allocation2 + $0x8] sm:$0xf] %vm2285_vm2, %v2192_v2  ;;  %3564 = vmatprep.subr.bf16.mxu0 %v4316_v50  ;;  %4201 = vmatprep.subr.bf16.mxu1 %v4316_v50 }
 0x29f   : > { %v2190_v1 = vpop.permute.xlu0 %2189  ;;  %2569 = vrot.lane.b32.xlu1 %v7884_v45, %s4317_s13 }
 0x2a0   : > { %2286 = vst.msk [vmem:[#allocation2] sm:$0xf] %vm2285_vm2, %v2190_v1  ;;  %2539 = vrot.lane.b32.xlu0 %v5351_v24, %s4317_s13  ;;  %v4250_v24 = vld [vmem:[%s7287_s1 + $0x8] sm:$0xff]  }
 0x2a1   : > { %v2196_v60 = vpop.permute.xlu1 %2195  ;;  %3565 = vmatpush1.bf16.msra.mxu0 %v4250_v24  ;;  %4213 = vmatpush1.bf16.msra.mxu1 %v4250_v24 }
 0x2a2   : > { %2289 = vst.msk [vmem:[#allocation2 + $0x18] sm:$0xf] %vm2285_vm2, %v2196_v60  ;;  %3566 = vmatprep.subr.bf16.mxu0 %v4316_v50  ;;  %4202 = vmatprep.subr.bf16.mxu1 %v4316_v50 }
 0x2a3   : > { %v2194_v14 = vpop.permute.xlu0 %2193  ;;  %2668 = vrot.lane.b32.xlu1 %v7805_v25, %s4318_s21  ;;  %v4251_v25 = vld [vmem:[%s7287_s1] sm:$0xff]  }
 0x2a4   : > { %2288 = vst.msk [vmem:[#allocation2 + $0x10] sm:$0xf] %vm2285_vm2, %v2194_v14  ;;  %2571 = vrot.lane.b32.xlu0 %v7883_v43, %s4317_s13 }
 0x2a5   : > { %v2200_v2 = vpop.permute.xlu1 %2199  ;;  %3567 = vmatpush1.bf16.msra.mxu0 %v4251_v25  ;;  %4214 = vmatpush1.bf16.msra.mxu1 %v4251_v25 }
 0x2a6   : > { %2291 = vst.msk [vmem:[#allocation2 + $0x28] sm:$0xf] %vm2285_vm2, %v2200_v2  ;;  %3576 = vmatprep.subr.bf16.mxu0 %v4316_v50  ;;  %4203 = vmatprep.subr.bf16.mxu1 %v4316_v50 }
 0x2a7   : > { %v2198_v1 = vpop.permute.xlu0 %2197  ;;  %2700 = vrot.lane.b32.xlu1 %v4687_v28, %s4318_s21  ;;  %v4252_v28 = vld [vmem:[%s7287_s1 + $0x58] sm:$0xff]  }
 0x2a8   : > { %2290 = vst.msk [vmem:[#allocation2 + $0x20] sm:$0xf] %vm2285_vm2, %v2198_v1  ;;  %2670 = vrot.lane.b32.xlu0 %v4437_v36, %s4318_s21 }
 0x2a9   : > { %v2204_v12 = vpop.permute.xlu1 %2203  ;;  %3577 = vmatpush2.bf16.msra.mxu0 %v4252_v28  ;;  %4215 = vmatpush2.bf16.msra.mxu1 %v4252_v28 }
 0x2aa   : > { %2293 = vst.msk [vmem:[#allocation2 + $0x38] sm:$0xf] %vm2285_vm2, %v2204_v12  ;;  %3578 = vmatprep.subr.bf16.mxu0 %v4316_v50  ;;  %4204 = vmatprep.subr.bf16.mxu1 %v4316_v50 }
 0x2ab   : > { %v2202_v60 = vpop.permute.xlu0 %2201  ;;  %2821 = vrot.lane.b32.xlu1 %v7899_v15, %s4319_s26 }
 0x2ac   : > { %2292 = vst.msk [vmem:[#allocation2 + $0x30] sm:$0xf] %vm2285_vm2, %v2202_v60  ;;  %2702 = vrot.lane.b32.xlu0 %v7674_v35, %s4318_s21  ;;  %v4253_v35 = vld [vmem:[%s7287_s1 + $0x50] sm:$0xff]  }
 0x2ad   : > { %v2208_v36 = vpop.permute.xlu1 %2207  ;;  %3579 = vmatpush2.bf16.msra.mxu0 %v4253_v35  ;;  %4216 = vmatpush2.bf16.msra.mxu1 %v4253_v35 }
 0x2ae   : > { %2295 = vst.msk [vmem:[#allocation2 + $0x48] sm:$0xf] %vm2285_vm2, %v2208_v36  ;;  %3580 = vmatprep.subr.bf16.mxu0 %v4316_v50  ;;  %4205 = vmatprep.subr.bf16.mxu1 %v4316_v50 }
 0x2af   : > { %v2206_v14 = vpop.permute.xlu0 %2205  ;;  %2853 = vrot.lane.b32.xlu1 %v7915_v0, %s4319_s26 }
 0x2b0   : > { %2294 = vst.msk [vmem:[#allocation2 + $0x40] sm:$0xf] %vm2285_vm2, %v2206_v14  ;;  %2823 = vrot.lane.b32.xlu0 %v7898_v51, %s4319_s26  ;;  %v4254_v51 = vld [vmem:[%s7287_s1 + $0x48] sm:$0xff]  }
 0x2b1   : > { %v2212_v15 = vpop.permute.xlu1 %2211  ;;  %3581 = vmatpush2.bf16.msra.mxu0 %v4254_v51  ;;  %4217 = vmatpush2.bf16.msra.mxu1 %v4254_v51 }
 0x2b2   : > { %2297 = vst.msk [vmem:[#allocation2 + $0x58] sm:$0xf] %vm2285_vm2, %v2212_v15  ;;  %3582 = vmatprep.subr.bf16.mxu0 %v4316_v50  ;;  %4206 = vmatprep.subr.bf16.mxu1 %v4316_v50 }
 0x2b3   : > { %v2210_v24 = vpop.permute.xlu0 %2209  ;;  %2958 = vrot.lane.b32.xlu1 %v7935_v31, %s4320_s6 }
 0x2b4   : > { %2296 = vst.msk [vmem:[#allocation2 + $0x50] sm:$0xf] %vm2285_vm2, %v2210_v24  ;;  %2855 = vrot.lane.b32.xlu0 %v7914_v59, %s4319_s26  ;;  %v4255_v59 = vld [vmem:[%s7287_s1 + $0x40] sm:$0xff]  }
 0x2b5   : > { %v2216_v0 = vpop.permute.xlu1 %2215  ;;  %3583 = vmatpush2.bf16.msra.mxu0 %v4255_v59  ;;  %4218 = vmatpush2.bf16.msra.mxu1 %v4255_v59 }
 0x2b6   : > { %2299 = vst.msk [vmem:[#allocation2 + $0x68] sm:$0xf] %vm2285_vm2, %v2216_v0 }
 0x2b7   : > { %v2214_v2 = vpop.permute.xlu0 %2213  ;;  %2990 = vrot.lane.b32.xlu1 %v7951_v4, %s4320_s6 }
 0x2b8   : > { %2298 = vst.msk [vmem:[#allocation2 + $0x60] sm:$0xf] %vm2285_vm2, %v2214_v2  ;;  %2960 = vrot.lane.b32.xlu0 %v7934_v40, %s4320_s6 }
 0x2b9   : > { %v2220_v31 = vpop.permute.xlu1 %2219 }
 0x2ba   : > { %2301 = vst.msk [vmem:[#allocation2 + $0x78] sm:$0xf] %vm2285_vm2, %v2220_v31 }
 0x2bb   : > { %v2218_v1 = vpop.permute.xlu0 %2217  ;;  %3102 = vrot.lane.b32.xlu1 %v7876_v9, %s4321_s11 }
 0x2bc   : > { %2300 = vst.msk [vmem:[#allocation2 + $0x70] sm:$0xf] %vm2285_vm2, %v2218_v1  ;;  %2992 = vrot.lane.b32.xlu0 %v7950_v48, %s4320_s6 }
 0x2bd   : > { %v2224_v40 = vpop.permute.xlu1 %2223 }
 0x2be   : > { %2303 = vst.msk [vmem:[#allocation2 + $0x88] sm:$0xf] %vm2285_vm2, %v2224_v40  ;;  %v7959_v40 = vld [vmem:[#allocation87_spill] sm:$0xff] }
 0x2bf   : > { %v2222_v4 = vpop.permute.xlu0 %2221  ;;  %3134 = vrot.lane.b32.xlu1 %v5580_v11, %s4321_s11 }
 0x2c0   : > { %2302 = vst.msk [vmem:[#allocation2 + $0x80] sm:$0xf] %vm2285_vm2, %v2222_v4  ;;  %3104 = vrot.lane.b32.xlu0 %v7875_v61, %s4321_s11 }
 0x2c1   : > { %v2228_v50 = vpop.permute.xlu1 %2227 }
 0x2c2   : > { %2305 = vst.msk [vmem:[#allocation2 + $0x98] sm:$0xf] %vm2285_vm2, %v2228_v50 }
 0x2c3   : > { %v2226_v25 = vpop.permute.xlu0 %2225  ;;  %2541 = vrot.lane.b32.xlu1 %v7876_v9, %s4317_s13 }
 0x2c4   : > { %2304 = vst.msk [vmem:[#allocation2 + $0x90] sm:$0xf] %vm2285_vm2, %v2226_v25  ;;  %3136 = vrot.lane.b32.xlu0 %v7885_v54, %s4321_s11 }
 0x2c5   : > { %v2232_v48 = vpop.permute.xlu1 %2231 }
 0x2c6   : > { %2307 = vst.msk [vmem:[#allocation2 + $0xa8] sm:$0xf] %vm2285_vm2, %v2232_v48 }
 0x2c7   : > { %v2230_v12 = vpop.permute.xlu0 %2229  ;;  %2573 = vrot.lane.b32.xlu1 %v5580_v11, %s4317_s13 }
 0x2c8   : > { %2306 = vst.msk [vmem:[#allocation2 + $0xa0] sm:$0xf] %vm2285_vm2, %v2230_v12  ;;  %2543 = vrot.lane.b32.xlu0 %v7875_v61, %s4317_s13 }
 0x2c9   : > { %v2236_v60 = vpop.permute.xlu1 %2235 }
 0x2ca   : > { %2309 = vst.msk [vmem:[#allocation2 + $0xb8] sm:$0xf] %vm2285_vm2, %v2236_v60  ;;  %v7960_v60 = vld [vmem:[#allocation32_spill] sm:$0xff] }
 0x2cb   : > { %v2234_v28 = vpop.permute.xlu0 %2233  ;;  %2672 = vrot.lane.b32.xlu1 %v4475_v52, %s4318_s21 }
 0x2cc   : > { %2308 = vst.msk [vmem:[#allocation2 + $0xb0] sm:$0xf] %vm2285_vm2, %v2234_v28  ;;  %2575 = vrot.lane.b32.xlu0 %v7885_v54, %s4317_s13 }
 0x2cd   : > { %v2240_v9 = vpop.permute.xlu1 %2239 }
 0x2ce   : > { %2311 = vst.msk [vmem:[#allocation2 + $0xc8] sm:$0xf] %vm2285_vm2, %v2240_v9 }
 0x2cf   : > { %v2238_v36 = vpop.permute.xlu0 %2237  ;;  %2704 = vrot.lane.b32.xlu1 %v7681_v53, %s4318_s21 }
 0x2d0   : > { %2310 = vst.msk [vmem:[#allocation2 + $0xc0] sm:$0xf] %vm2285_vm2, %v2238_v36  ;;  %2674 = vrot.lane.b32.xlu0 %v7806_v13, %s4318_s21 }
 0x2d1   : > { %v2244_v11 = vpop.permute.xlu1 %2243 }
 0x2d2   : > { %2313 = vst.msk [vmem:[#allocation2 + $0xd8] sm:$0xf] %vm2285_vm2, %v2244_v11 }
 0x2d3   : > { %v2242_v61 = vpop.permute.xlu0 %2241  ;;  %2825 = vrot.lane.b32.xlu1 %v7901_v49, %s4319_s26 }
 0x2d4   : > { %2312 = vst.msk [vmem:[#allocation2 + $0xd0] sm:$0xf] %vm2285_vm2, %v2242_v61  ;;  %2706 = vrot.lane.b32.xlu0 %v4693_v7, %s4318_s21 }
 0x2d5   : > { %v2248_v52 = vpop.permute.xlu1 %2247 }
 0x2d6   : > { %2315 = vst.msk [vmem:[#allocation2 + $0xe8] sm:$0xf] %vm2285_vm2, %v2248_v52 }
 0x2d7   : > { %v2246_v54 = vpop.permute.xlu0 %2245  ;;  %2857 = vrot.lane.b32.xlu1 %v7917_v38, %s4319_s26 }
 0x2d8   : > { %2314 = vst.msk [vmem:[#allocation2 + $0xe0] sm:$0xf] %vm2285_vm2, %v2246_v54  ;;  %2827 = vrot.lane.b32.xlu0 %v7900_v39, %s4319_s26 }
 0x2d9   : > { %v2252_v53 = vpop.permute.xlu1 %2251 }
 0x2da   : > { %2317 = vst.msk [vmem:[#allocation2 + $0xf8] sm:$0xf] %vm2285_vm2, %v2252_v53 }
 0x2db   : > { %v2250_v13 = vpop.permute.xlu0 %2249  ;;  %2962 = vrot.lane.b32.xlu1 %v7937_v29, %s4320_s6 }
 0x2dc   : > { %2316 = vst.msk [vmem:[#allocation2 + $0xf0] sm:$0xf] %vm2285_vm2, %v2250_v13  ;;  %2859 = vrot.lane.b32.xlu0 %v7916_v32, %s4319_s26 }
 0x2dd   : > { %v2329_v7 = vpop.permute.xlu1 %2328 }
 0x2de   : > { %v2391_v38 = vrot.slane %v2329_v7, 4 }
 0x2df   : > { %v2327_v49 = vpop.permute.xlu0 %2326  ;;  %2994 = vrot.lane.b32.xlu1 %v7953_v47, %s4320_s6 }
 0x2e0   : > { %v2390_v14 = vrot.slane %v2327_v49, 4  ;;  %v2424_v35 = vsel %vm2422_vm7, %v2391_v38, %v2329_v7  ;;  %2964 = vrot.lane.b32.xlu0 %v7936_v17, %s4320_s6 }
 0x2e1   : > { %v2333_v32 = vpop.permute.xlu1 %2332  ;;  %2491 = vst.msk [vmem:[#allocation2 + $0x8] sm:$0xff] %vm6565_vm8, %v2424_v35 }
 0x2e2   : > { %v2423_v29 = vsel %vm2422_vm7, %v2390_v14, %v2327_v49  ;;  %v2393_v15 = vrot.slane %v2333_v32, 4 }
 0x2e3   : > { %v2331_v24 = vpop.permute.xlu0 %2330  ;;  %2490 = vst.msk [vmem:[#allocation2] sm:$0xff] %vm6565_vm8, %v2423_v29  ;;  %3106 = vrot.lane.b32.xlu1 %v7878_v8, %s4321_s11 }
 0x2e4   : > { %v2392_v51 = vrot.slane %v2331_v24, 4  ;;  %v2426_v47 = vsel %vm2422_vm7, %v2393_v15, %v2333_v32  ;;  %2996 = vrot.lane.b32.xlu0 %v7952_v42, %s4320_s6 }
 0x2e5   : > { %v2337_v0 = vpop.permute.xlu1 %2336  ;;  %2493 = vst.msk [vmem:[#allocation2 + $0x18] sm:$0xff] %vm6565_vm8, %v2426_v47 }
 0x2e6   : > { %v2425_v17 = vsel %vm2422_vm7, %v2392_v51, %v2331_v24  ;;  %v2395_v2 = vrot.slane %v2337_v0, 4 }
 0x2e7   : > { %v2335_v59 = vpop.permute.xlu0 %2334  ;;  %2492 = vst.msk [vmem:[#allocation2 + $0x10] sm:$0xff] %vm6565_vm8, %v2425_v17  ;;  %3138 = vrot.lane.b32.xlu1 %v5596_v3, %s4321_s11 }
 0x2e8   : > { %v2394_v31 = vrot.slane %v2335_v59, 4  ;;  %v2428_v1 = vsel %vm2422_vm7, %v2395_v2, %v2337_v0  ;;  %3108 = vrot.lane.b32.xlu0 %v7959_v40, %s4321_s11 }
 0x2e9   : > { %v2341_v4 = vpop.permute.xlu1 %2340  ;;  %2495 = vst.msk [vmem:[#allocation2 + $0x28] sm:$0xff] %vm6565_vm8, %v2428_v1 }
 0x2ea   : > { %v2427_v42 = vsel %vm2422_vm7, %v2394_v31, %v2335_v59  ;;  %v2397_v50 = vrot.slane %v2341_v4, 4 }
 0x2eb   : > { %v2339_v25 = vpop.permute.xlu0 %2338  ;;  %2494 = vst.msk [vmem:[#allocation2 + $0x20] sm:$0xff] %vm6565_vm8, %v2427_v42  ;;  %2545 = vrot.lane.b32.xlu1 %v7878_v8, %s4317_s13 }
 0x2ec   : > { %v2396_v48 = vrot.slane %v2339_v25, 4  ;;  %v2430_v12 = vsel %vm2422_vm7, %v2397_v50, %v2341_v4  ;;  %3140 = vrot.lane.b32.xlu0 %v7960_v60, %s4321_s11 }
 0x2ed   : > { %v2345_v9 = vpop.permute.xlu1 %2344  ;;  %2497 = vst.msk [vmem:[#allocation2 + $0x38] sm:$0xff] %vm6565_vm8, %v2430_v12 }
 0x2ee   : > { %v2429_v28 = vsel %vm2422_vm7, %v2396_v48, %v2339_v25  ;;  %v2399_v36 = vrot.slane %v2345_v9, 4 }
 0x2ef   : > { %v2343_v11 = vpop.permute.xlu0 %2342  ;;  %2496 = vst.msk [vmem:[#allocation2 + $0x30] sm:$0xff] %vm6565_vm8, %v2429_v28  ;;  %2577 = vrot.lane.b32.xlu1 %v5596_v3, %s4317_s13 }
 0x2f0   : > { %v2398_v61 = vrot.slane %v2343_v11, 4  ;;  %v2432_v8 = vsel %vm2422_vm7, %v2399_v36, %v2345_v9  ;;  %2547 = vrot.lane.b32.xlu0 %v7959_v40, %s4317_s13  ;;  %v7961_v36 = vld [vmem:[#allocation90_spill] sm:$0xff] }
 0x2f1   : > { %v2349_v54 = vpop.permute.xlu1 %2348  ;;  %2499 = vst.msk [vmem:[#allocation2 + $0x48] sm:$0xff] %vm6565_vm8, %v2432_v8 }
 0x2f2   : > { %v2431_v52 = vsel %vm2422_vm7, %v2398_v61, %v2343_v11  ;;  %v2401_v53 = vrot.slane %v2349_v54, 4 }
 0x2f3   : > { %v2347_v13 = vpop.permute.xlu0 %2346  ;;  %2498 = vst.msk [vmem:[#allocation2 + $0x40] sm:$0xff] %vm6565_vm8, %v2431_v52  ;;  %2676 = vrot.lane.b32.xlu1 %v4503_v63, %s4318_s21  ;;  %v7962_v52 = vld [vmem:[#allocation89_spill] sm:$0xff] }
 0x2f4   : > { %v2400_v7 = vrot.slane %v2347_v13, 4  ;;  %v2434_v3 = vsel %vm2422_vm7, %v2401_v53, %v2349_v54  ;;  %2579 = vrot.lane.b32.xlu0 %v7960_v60, %s4317_s13 }
 0x2f5   : > { %v2353_v49 = vpop.permute.xlu1 %2352  ;;  %2501 = vst.msk [vmem:[#allocation2 + $0x58] sm:$0xff] %vm6565_vm8, %v2434_v3 }
 0x2f6   : > { %v2433_v38 = vsel %vm2422_vm7, %v2400_v7, %v2347_v13  ;;  %v2403_v14 = vrot.slane %v2353_v49, 4 }
 0x2f7   : > { %v2351_v35 = vpop.permute.xlu0 %2350  ;;  %2500 = vst.msk [vmem:[#allocation2 + $0x50] sm:$0xff] %vm6565_vm8, %v2433_v38  ;;  %2708 = vrot.lane.b32.xlu1 %v7779_v23, %s4318_s21 }
 0x2f8   : > { %v2402_v29 = vrot.slane %v2351_v35, 4  ;;  %v2436_v63 = vsel %vm2422_vm7, %v2403_v14, %v2353_v49  ;;  %2678 = vrot.lane.b32.xlu0 %v4493_v58, %s4318_s21 }
 0x2f9   : > { %v2357_v15 = vpop.permute.xlu1 %2356  ;;  %2503 = vst.msk [vmem:[#allocation2 + $0x68] sm:$0xff] %vm6565_vm8, %v2436_v63 }
 0x2fa   : > { %v2435_v32 = vsel %vm2422_vm7, %v2402_v29, %v2351_v35  ;;  %v2405_v24 = vrot.slane %v2357_v15, 4 }
 0x2fb   : > { %v2355_v51 = vpop.permute.xlu0 %2354  ;;  %2502 = vst.msk [vmem:[#allocation2 + $0x60] sm:$0xff] %vm6565_vm8, %v2435_v32  ;;  %2829 = vrot.lane.b32.xlu1 %v7903_v21, %s4319_s26 }
 0x2fc   : > { %v2404_v47 = vrot.slane %v2355_v51, 4  ;;  %v2438_v23 = vsel %vm2422_vm7, %v2405_v24, %v2357_v15  ;;  %2710 = vrot.lane.b32.xlu0 %v7773_v6, %s4318_s21  ;;  %v4256_v15 = vld [vmem:[#allocation2] ss:$8 sps:$4 sm:$0xff]  }
 0x2fd   : > { %v2361_v17 = vpop.permute.xlu1 %2360  ;;  %2505 = vst.msk [vmem:[#allocation2 + $0x78] sm:$0xff] %vm6565_vm8, %v2438_v23 }
 0x2fe   : > { %v2437_v58 = vsel %vm2422_vm7, %v2404_v47, %v2355_v51  ;;  %v2407_v0 = vrot.slane %v2361_v17, 4  ;;  %v7966_v51 = vld [vmem:[#allocation46_spill] sm:$0xff]  ;;  %v7967_v47 = vld [vmem:[#allocation99_spill] sm:$0xff] }
 0x2ff   : > { %v2359_v2 = vpop.permute.xlu0 %2358  ;;  %2504 = vst.msk [vmem:[#allocation2 + $0x70] sm:$0xff] %vm6565_vm8, %v2437_v58  ;;  %2861 = vrot.lane.b32.xlu1 %v7919_v33, %s4319_s26 }
 0x300   : > { %v2406_v59 = vrot.slane %v2359_v2, 4  ;;  %v2440_v21 = vsel %vm2422_vm7, %v2407_v0, %v2361_v17  ;;  %2831 = vrot.lane.b32.xlu0 %v7902_v5, %s4319_s26 }
 0x301   : > { %v2365_v31 = vpop.permute.xlu1 %2364  ;;  %2507 = vst.msk [vmem:[#allocation2 + $0x88] sm:$0xff] %vm6565_vm8, %v2440_v21 }
 0x302   : > { %v2439_v6 = vsel %vm2422_vm7, %v2406_v59, %v2359_v2  ;;  %v2409_v1 = vrot.slane %v2365_v31, 4 }
 0x303   : > { %v2363_v40 = vpop.permute.xlu0 %2362  ;;  %2506 = vst.msk [vmem:[#allocation2 + $0x80] sm:$0xff] %vm6565_vm8, %v2439_v6  ;;  %2966 = vrot.lane.b32.xlu1 %v7939_v22, %s4320_s6 }
 0x304   : > { %v2408_v42 = vrot.slane %v2363_v40, 4  ;;  %v2442_v33 = vsel %vm2422_vm7, %v2409_v1, %v2365_v31  ;;  %2863 = vrot.lane.b32.xlu0 %v7918_v26, %s4319_s26  ;;  %v7968_v31 = vld [vmem:[#allocation11_spill] sm:$0xff]  ;;  %v7969_v1 = vld [vmem:[#allocation12_spill] sm:$0xff] }
 0x305   : > { %v2369_v4 = vpop.permute.xlu1 %2368  ;;  %2509 = vst.msk [vmem:[#allocation2 + $0x98] sm:$0xff] %vm6565_vm8, %v2442_v33  ;;  %v7970_v33 = vld [vmem:[#allocation34_spill] sm:$0xff] }
 0x306   : > { %v2441_v5 = vsel %vm2422_vm7, %v2408_v42, %v2363_v40  ;;  %v2411_v50 = vrot.slane %v2369_v4, 4 }
 0x307   : > { %v2367_v25 = vpop.permute.xlu0 %2366  ;;  %2508 = vst.msk [vmem:[#allocation2 + $0x90] sm:$0xff] %vm6565_vm8, %v2441_v5  ;;  %2998 = vrot.lane.b32.xlu1 %v7955_v37, %s4320_s6  ;;  %v7971_v5 = vld [vmem:[#allocation36_spill] sm:$0xff] }
 0x308   : > { %v2410_v48 = vrot.slane %v2367_v25, 4  ;;  %v2444_v22 = vsel %vm2422_vm7, %v2411_v50, %v2369_v4  ;;  %2968 = vrot.lane.b32.xlu0 %v7938_v62, %s4320_s6 }
 0x309   : > { %v2373_v12 = vpop.permute.xlu1 %2372  ;;  %2511 = vst.msk [vmem:[#allocation2 + $0xa8] sm:$0xff] %vm6565_vm8, %v2444_v22 }
 0x30a   : > { %v2443_v26 = vsel %vm2422_vm7, %v2410_v48, %v2367_v25  ;;  %v2413_v60 = vrot.slane %v2373_v12, 4  ;;  %v4259_v17 = vld [vmem:[#allocation2 + $0x80] ss:$8 sps:$4 sm:$0xff]   ;;  %v7972_v25 = vld [vmem:[#allocation33_spill] sm:$0xff] }
 0x30b   : > { %v2371_v28 = vpop.permute.xlu0 %2370  ;;  %2510 = vst.msk [vmem:[#allocation2 + $0xa0] sm:$0xff] %vm6565_vm8, %v2443_v26  ;;  %3110 = vrot.lane.b32.xlu1 %v7961_v36, %s4321_s11  ;;  %v7973_v48 = vld [vmem:[#allocation35_spill] sm:$0xff] }
 0x30c   : > { %v2412_v9 = vrot.slane %v2371_v28, 4  ;;  %v2446_v37 = vsel %vm2422_vm7, %v2413_v60, %v2373_v12  ;;  %3000 = vrot.lane.b32.xlu0 %v7954_v44, %s4320_s6  ;;  %v7974_v12 = vld [vmem:[#allocation54_spill] sm:$0xff]  ;;  %v7975_v60 = vld [vmem:[#allocation55_spill] sm:$0xff] }
 0x30d   : > { %v2538_v11 = vpop.permute.xlu1 %2537  ;;  %2513 = vst.msk [vmem:[#allocation2 + $0xb8] sm:$0xff] %vm6565_vm8, %v2446_v37  ;;  %v7977_v37 = vld [vmem:[#allocation69_spill] sm:$0xff] }
 0x30e   : > { %v2445_v62 = vsel %vm2422_vm7, %v2412_v9, %v2371_v28  ;;  %2634 = vst.msk [vmem:[#allocation2 + $0x4] sm:$0xf] %vm2633_vm9, %v2538_v11 }
 0x30f   : > { %2512 = vst.msk [vmem:[#allocation2 + $0xb0] sm:$0xff] %vm6565_vm8, %v2445_v62  ;;  %v2375_v61 = vpop.permute.xlu0 %2374  ;;  %3142 = vrot.lane.b32.xlu1 %v5625_v19, %s4321_s11 }
 0x310   : > { %v2414_v8 = vrot.slane %v2375_v61, 4  ;;  %3112 = vrot.lane.b32.xlu0 %v7962_v52, %s4321_s11 }
 0x311   : > { %v2570_v54 = vpop.permute.xlu1 %2569 }
 0x312   : > { %v2447_v44 = vsel %vm2422_vm7, %v2414_v8, %v2375_v61  ;;  %2650 = vst.msk [vmem:[#allocation2 + $0x84] sm:$0xf] %vm2633_vm9, %v2570_v54  ;;  %v7978_v61 = vld [vmem:[#allocation82_spill] sm:$0xff]  ;;  %v7979_v8 = vld [vmem:[#allocation84_spill] sm:$0xff] }
 0x313   : > { %2514 = vst.msk [vmem:[#allocation2 + $0xc0] sm:$0xff] %vm6565_vm8, %v2447_v44  ;;  %v2540_v53 = vpop.permute.xlu0 %2539  ;;  %2549 = vrot.lane.b32.xlu1 %v7961_v36, %s4317_s13  ;;  %v7976_v36 = vld [vmem:[#allocation68_spill] sm:$0xff] }
 0x314   : > { %2635 = vst.msk [vmem:[#allocation2 + $0xc] sm:$0xf] %vm2633_vm9, %v2540_v53  ;;  %3144 = vrot.lane.b32.xlu0 %v5617_v46, %s4321_s11 }
 0x315   : > { %v2669_v13 = vpop.permute.xlu1 %2668 }
 0x316   : > { %2765 = vst.msk [vmem:[#allocation2 + $0x4] sm:$0xf] %vm2764_vm11, %v2669_v13 }
 0x317   : > { %v2572_v7 = vpop.permute.xlu0 %2571  ;;  %2581 = vrot.lane.b32.xlu1 %v5625_v19, %s4317_s13 }
 0x318   : > { %2651 = vst.msk [vmem:[#allocation2 + $0x8c] sm:$0xf] %vm2633_vm9, %v2572_v7  ;;  %2551 = vrot.lane.b32.xlu0 %v7962_v52, %s4317_s13 }
 0x319   : > { %v2701_v3 = vpop.permute.xlu1 %2700 }
 0x31a   : > { %2781 = vst.msk [vmem:[#allocation2 + $0x84] sm:$0xf] %vm2764_vm11, %v2701_v3 }
 0x31b   : > { %v2671_v38 = vpop.permute.xlu0 %2670  ;;  %2680 = vrot.lane.b32.xlu1 %v4527_v27, %s4318_s21 }
 0x31c   : > { %2766 = vst.msk [vmem:[#allocation2 + $0xc] sm:$0xf] %vm2764_vm11, %v2671_v38  ;;  %2583 = vrot.lane.b32.xlu0 %v5617_v46, %s4317_s13  ;;  %v7980_v38 = vld [vmem:[#allocation93_spill] sm:$0xff] }
 0x31d   : > { %v2822_v49 = vpop.permute.xlu1 %2821 }
 0x31e   : > { %2918 = vst.msk [vmem:[#allocation2 + $0x4] sm:$0xf] %vm2917_vm12, %v2822_v49 }
 0x31f   : > { %v2703_v19 = vpop.permute.xlu0 %2702  ;;  %2712 = vrot.lane.b32.xlu1 %v4778_v56, %s4318_s21 }
 0x320   : > { %2782 = vst.msk [vmem:[#allocation2 + $0x8c] sm:$0xf] %vm2764_vm11, %v2703_v19  ;;  %2682 = vrot.lane.b32.xlu0 %v4513_v18, %s4318_s21  ;;  %v7981_v19 = vld [vmem:[#allocation94_spill] sm:$0xff] }
 0x321   : > { %v2854_v14 = vpop.permute.xlu1 %2853 }
 0x322   : > { %2934 = vst.msk [vmem:[#allocation2 + $0x84] sm:$0xf] %vm2917_vm12, %v2854_v14 }
 0x323   : > { %v2824_v27 = vpop.permute.xlu0 %2823  ;;  %2833 = vrot.lane.b32.xlu1 %v7905_v20, %s4319_s26 }
 0x324   : > { %2919 = vst.msk [vmem:[#allocation2 + $0xc] sm:$0xf] %vm2917_vm12, %v2824_v27  ;;  %2714 = vrot.lane.b32.xlu0 %v7783_v10, %s4318_s21 }
 0x325   : > { %v2959_v46 = vpop.permute.xlu1 %2958 }
 0x326   : > { %3055 = vst.msk [vmem:[#allocation2 + $0x4] sm:$0xf] %vm3054_vm13, %v2959_v46 }
 0x327   : > { %v2856_v56 = vpop.permute.xlu0 %2855  ;;  %2865 = vrot.lane.b32.xlu1 %v7925_v55, %s4319_s26 }
 0x328   : > { %2935 = vst.msk [vmem:[#allocation2 + $0x8c] sm:$0xf] %vm2917_vm12, %v2856_v56  ;;  %2835 = vrot.lane.b32.xlu0 %v7904_v30, %s4319_s26 }
 0x329   : > { %v2991_v18 = vpop.permute.xlu1 %2990 }
 0x32a   : > { %3071 = vst.msk [vmem:[#allocation2 + $0x84] sm:$0xf] %vm3054_vm13, %v2991_v18 }
 0x32b   : > { %v2961_v20 = vpop.permute.xlu0 %2960  ;;  %2970 = vrot.lane.b32.xlu1 %v7941_v41, %s4320_s6 }
 0x32c   : > { %3056 = vst.msk [vmem:[#allocation2 + $0xc] sm:$0xf] %vm3054_vm13, %v2961_v20  ;;  %2867 = vrot.lane.b32.xlu0 %v7835_v57, %s4319_s26  ;;  %v7963_v57 = vld [vmem:[#allocation80_spill] sm:$0xff] }
 0x32d   : > { %v3103_v10 = vpop.permute.xlu1 %3102  ;;  %v7982_v20 = vld [vmem:[#allocation100_spill] sm:$0xff] }
 0x32e   : > { %3199 = vst.msk [vmem:[#allocation2 + $0x4] sm:$0xf] %vm3198_vm14, %v3103_v10 }
 0x32f   : > { %v2993_v55 = vpop.permute.xlu0 %2992  ;;  %3002 = vrot.lane.b32.xlu1 %v7956_v34, %s4320_s6  ;;  %v7965_v34 = vld [vmem:[#allocation92_spill] sm:$0xff] }
 0x330   : > { %3072 = vst.msk [vmem:[#allocation2 + $0x8c] sm:$0xf] %vm3054_vm13, %v2993_v55  ;;  %2972 = vrot.lane.b32.xlu0 %v7940_v16, %s4320_s6  ;;  %v7964_v16 = vld [vmem:[#allocation91_spill] sm:$0xff]  ;;  %v7983_v55 = vld [vmem:[#allocation101_spill] sm:$0xff] }
 0x331   : > { %v3135_v30 = vpop.permute.xlu1 %3134 }
 0x332   : > { %3215 = vst.msk [vmem:[#allocation2 + $0x84] sm:$0xf] %vm3198_vm14, %v3135_v30 }
 0x333   : > { %v3105_v41 = vpop.permute.xlu0 %3104  ;;  %2376 = vrot.lane.b32.xlu1 %v7963_v57, %s4315_s30 }
 0x334   : > { %3200 = vst.msk [vmem:[#allocation2 + $0xc] sm:$0xf] %vm3198_vm14, %v3105_v41  ;;  %3004 = vrot.lane.b32.xlu0 %v7963_v57, %s4320_s6 }
 0x335   : > { %v2542_v35 = vpop.permute.xlu1 %2541 }
 0x336   : > { %2636 = vst.msk [vmem:[#allocation2 + $0x14] sm:$0xf] %vm2633_vm9, %v2542_v35 }
 0x337   : > { %v3137_v29 = vpop.permute.xlu0 %3136  ;;  %3116 = vrot.lane.b32.xlu1 %v7964_v16, %s4321_s11 }
 0x338   : > { %3216 = vst.msk [vmem:[#allocation2 + $0x8c] sm:$0xf] %vm3198_vm14, %v3137_v29  ;;  %3114 = vrot.lane.b32.xlu0 %v7965_v34, %s4321_s11 }
 0x339   : > { %v2574_v63 = vpop.permute.xlu1 %2573 }
 0x33a   : > { %2652 = vst.msk [vmem:[#allocation2 + $0x94] sm:$0xf] %vm2633_vm9, %v2574_v63  ;;  %v7985_v63 = vld [vmem:[#allocation16_spill] sm:$0xff] }
 0x33b   : > { %v2544_v32 = vpop.permute.xlu0 %2543  ;;  %v4258_v24 = vld [vmem:[#allocation2 + $0x4] ss:$8 sps:$4 sm:$0xff]   ;;  %3148 = vrot.lane.b32.xlu1 %v7966_v51, %s4321_s11 }
 0x33c   : > { %2637 = vst.msk [vmem:[#allocation2 + $0x1c] sm:$0xf] %vm2633_vm9, %v2544_v32  ;;  %3146 = vrot.lane.b32.xlu0 %v7967_v47, %s4321_s11  ;;  %4110 = vmatprep.mubr.msk.bf16.mxu0 %vm3503_vm15, %v4258_v24  ;;  %v4293_v24 = vld [vmem:[%s4361_s20 + $0xc4] sm:$0xf] }
 0x33d   : > { %v2673_v23 = vpop.permute.xlu1 %2672  ;;  %3585 = vmatmul.mubr.bf16.vlgmr.msra.gmra.mxu0 %v4256_v15 }
 0x33e   : > { %2767 = vst.msk [vmem:[#allocation2 + $0x14] sm:$0xf] %vm2764_vm11, %v2673_v23 }
 0x33f   : > { %v2576_v58 = vpop.permute.xlu0 %2575  ;;  %v4261_v0 = vld [vmem:[#allocation2 + $0x84] ss:$8 sps:$4 sm:$0xff]   ;;  %2555 = vrot.lane.b32.xlu1 %v7964_v16, %s4317_s13 }
 0x340   : > { %2653 = vst.msk [vmem:[#allocation2 + $0x9c] sm:$0xf] %vm2633_vm9, %v2576_v58  ;;  %2553 = vrot.lane.b32.xlu0 %v7965_v34, %s4317_s13  ;;  %4118 = vmatprep.mubr.msk.bf16.mxu1 %vm3503_vm15, %v4261_v0  ;;  %v7984_v34 = vld [vmem:[#allocation14_spill] sm:$0xff]  ;;  %v7986_v58 = vld [vmem:[#allocation37_spill] sm:$0xff] }
 0x341   : > { %v2705_v2 = vpop.permute.xlu1 %2704  ;;  %3649 = vmatmul.mubr.bf16.vlgmr.msra.gmra.mxu1 %v4259_v17  ;;  %v7987_v17 = vld [vmem:[#allocation38_spill] sm:$0xff] }
 0x342   : > { %2783 = vst.msk [vmem:[#allocation2 + $0x94] sm:$0xf] %vm2764_vm11, %v2705_v2 }
 0x343   : > { %v2675_v59 = vpop.permute.xlu0 %2674  ;;  %2587 = vrot.lane.b32.xlu1 %v7966_v51, %s4317_s13  ;;  %v4294_v51 = vld [vmem:[%s4361_s20 + $0xc0] sm:$0xf] }
 0x344   : > { %2768 = vst.msk [vmem:[#allocation2 + $0x1c] sm:$0xf] %vm2764_vm11, %v2675_v59  ;;  %2585 = vrot.lane.b32.xlu0 %v7967_v47, %s4317_s13  ;;  %v7988_v59 = vld [vmem:[#allocation4_spill] sm:$0xff] }
 0x345   : > { %v2826_v21 = vpop.permute.xlu1 %2825 }
 0x346   : > { %2920 = vst.msk [vmem:[#allocation2 + $0x14] sm:$0xf] %vm2917_vm12, %v2826_v21  ;;  %v7989_v21 = vld [vmem:[#allocation3_spill] sm:$0xff] }
 0x347   : > { %v2707_v6 = vpop.permute.xlu0 %2706  ;;  %2686 = vrot.lane.b32.xlu1 %v7968_v31, %s4318_s21 }
 0x348   : > { %2784 = vst.msk [vmem:[#allocation2 + $0x9c] sm:$0xf] %vm2764_vm11, %v2707_v6  ;;  %2684 = vrot.lane.b32.xlu0 %v7969_v1, %s4318_s21  ;;  %v7990_v1 = vld [vmem:[#allocation70_spill] sm:$0xff] }
 0x349   : > { %v2858_v40 = vpop.permute.xlu1 %2857 }
 0x34a   : > { %2936 = vst.msk [vmem:[#allocation2 + $0x94] sm:$0xf] %vm2917_vm12, %v2858_v40  ;;  %v7991_v40 = vld [vmem:[#allocation71_spill] sm:$0xff] }
 0x34b   : > { %v2828_v42 = vpop.permute.xlu0 %2827  ;;  %2718 = vrot.lane.b32.xlu1 %v7970_v33, %s4318_s21 }
 0x34c   : > { %2921 = vst.msk [vmem:[#allocation2 + $0x1c] sm:$0xf] %vm2917_vm12, %v2828_v42  ;;  %2716 = vrot.lane.b32.xlu0 %v7971_v5, %s4318_s21  ;;  %v7992_v5 = vld [vmem:[#allocation6_spill] sm:$0xff] }
 0x34d   : > { %v2963_v4 = vpop.permute.xlu1 %2962 }
 0x34e   : > { %3057 = vst.msk [vmem:[#allocation2 + $0x14] sm:$0xf] %vm3054_vm13, %v2963_v4  ;;  %v7993_v4 = vld [vmem:[#allocation8_spill] sm:$0xff] }
 0x34f   : > { %v2860_v50 = vpop.permute.xlu0 %2859  ;;  %2839 = vrot.lane.b32.xlu1 %v7972_v25, %s4319_s26 }
 0x350   : > { %2937 = vst.msk [vmem:[#allocation2 + $0x9c] sm:$0xf] %vm2917_vm12, %v2860_v50  ;;  %2837 = vrot.lane.b32.xlu0 %v7973_v48, %s4319_s26 }
 0x351   : > { %v2995_v22 = vpop.permute.xlu1 %2994 }
 0x352   : > { %3073 = vst.msk [vmem:[#allocation2 + $0x94] sm:$0xf] %vm3054_vm13, %v2995_v22 }
 0x353   : > { %v2965_v26 = vpop.permute.xlu0 %2964  ;;  %2871 = vrot.lane.b32.xlu1 %v7974_v12, %s4319_s26 }
 0x354   : > { %3058 = vst.msk [vmem:[#allocation2 + $0x1c] sm:$0xf] %vm3054_vm13, %v2965_v26  ;;  %2869 = vrot.lane.b32.xlu0 %v7975_v60, %s4319_s26 }
 0x355   : > { %v3107_v28 = vpop.permute.xlu1 %3106 }
 0x356   : > { %3201 = vst.msk [vmem:[#allocation2 + $0x14] sm:$0xf] %vm3198_vm14, %v3107_v28 }
 0x357   : > { %v2997_v9 = vpop.permute.xlu0 %2996  ;;  %2976 = vrot.lane.b32.xlu1 %v7976_v36, %s4320_s6 }
 0x358   : > { %3074 = vst.msk [vmem:[#allocation2 + $0x9c] sm:$0xf] %vm3054_vm13, %v2997_v9  ;;  %2974 = vrot.lane.b32.xlu0 %v7977_v37, %s4320_s6 }
 0x359   : > { %v3139_v62 = vpop.permute.xlu1 %3138 }
 0x35a   : > { %3217 = vst.msk [vmem:[#allocation2 + $0x94] sm:$0xf] %vm3198_vm14, %v3139_v62  ;;  %v7994_v62 = vld [vmem:[#allocation95_spill] sm:$0xff] }
 0x35b   : > { %v3109_v11 = vpop.permute.xlu0 %3108  ;;  %3008 = vrot.lane.b32.xlu1 %v7978_v61, %s4320_s6 }
 0x35c   : > { %3202 = vst.msk [vmem:[#allocation2 + $0x1c] sm:$0xf] %vm3198_vm14, %v3109_v11  ;;  %3006 = vrot.lane.b32.xlu0 %v7979_v8, %s4320_s6 }
 0x35d   : > { %v2546_v52 = vpop.permute.xlu1 %2545  ;;  %v3233_v13 = vld [vmem:[#allocation2 + $0x10] sm:$0xff] }
 0x35e   : > { %2638 = vst.msk [vmem:[#allocation2 + $0x24] sm:$0xf] %vm2633_vm9, %v2546_v52 }
 0x35f   : > { %v3141_v44 = vpop.permute.xlu0 %3140  ;;  %2380 = vrot.lane.b32.xlu1 %v7978_v61, %s4315_s30  ;;  %v7995_v61 = vld [vmem:[#allocation96_spill] sm:$0xff] }
 0x360   : > { %3218 = vst.msk [vmem:[#allocation2 + $0x9c] sm:$0xf] %vm3198_vm14, %v3141_v44  ;;  %2378 = vrot.lane.b32.xlu0 %v7979_v8, %s4315_s30  ;;  %v7996_v44 = vld [vmem:[#allocation9_spill] sm:$0xff] }
 0x361   : > { %v2578_v54 = vpop.permute.xlu1 %2577  ;;  %v3249_v46 = vld [vmem:[#allocation2 + $0x90] sm:$0xff] }
 0x362   : > { %2654 = vst.msk [vmem:[#allocation2 + $0xa4] sm:$0xf] %vm2633_vm9, %v2578_v54  ;;  %v7997_v54 = vld [vmem:[#allocation7_spill] sm:$0xff] }
 0x363   : > { %v2548_v53 = vpop.permute.xlu0 %2547  ;;  %v3234_v7 = vld [vmem:[#allocation2 + $0x18] sm:$0xff]  ;;  %3120 = vrot.lane.b32.xlu1 %v7980_v38, %s4321_s11 }
 0x364   : > { %v4262_v3 = vld [vmem:[#allocation2 + $0x14] ss:$8 sps:$4 sm:$0xff]   ;;  %2639 = vst.msk [vmem:[#allocation2 + $0x2c] sm:$0xf] %vm2633_vm9, %v2548_v53  ;;  %v4068_v49 = vcombine.low %v3233_v13, %v3234_v7  ;;  %3118 = vrot.lane.b32.xlu0 %v7981_v19, %s4321_s11 }
 0x365   : > { %4111 = vmatprep.mubr.msk.bf16.mxu0 %vm3503_vm15, %v4262_v3  ;;  %v2677_v14 = vpop.permute.xlu1 %2676 }
 0x366   : > { %3593 = vmatmul.mubr.bf16.gmra.mxu0 %v4068_v49  ;;  %2769 = vst.msk [vmem:[#allocation2 + $0x24] sm:$0xf] %vm2764_vm11, %v2677_v14  ;;  %v7999_v14 = vld [vmem:[#allocation19_spill] sm:$0xff] }
 0x367   : > { %v2580_v27 = vpop.permute.xlu0 %2579  ;;  %v3250_v56 = vld [vmem:[#allocation2 + $0x98] sm:$0xff]  ;;  %3152 = vrot.lane.b32.xlu1 %v7982_v20, %s4321_s11 }
 0x368   : > { %v4264_v18 = vld [vmem:[#allocation2 + $0x94] ss:$8 sps:$4 sm:$0xff]   ;;  %2655 = vst.msk [vmem:[#allocation2 + $0xac] sm:$0xf] %vm2633_vm9, %v2580_v27  ;;  %v4084_v10 = vcombine.low %v3249_v46, %v3250_v56  ;;  %3150 = vrot.lane.b32.xlu0 %v7983_v55, %s4321_s11  ;;  %v4295_v56 = vld [vmem:[%s4361_s20 + $0xd0] sm:$0xf] }
 0x369   : > { %4119 = vmatprep.mubr.msk.bf16.mxu1 %vm3503_vm15, %v4264_v18  ;;  %v2709_v30 = vpop.permute.xlu1 %2708  ;;  %v4296_v18 = vld [vmem:[%s4361_s20 + $0xcc] sm:$0xf] }
 0x36a   : > { %3657 = vmatmul.mubr.bf16.gmra.mxu1 %v4084_v10  ;;  %2785 = vst.msk [vmem:[#allocation2 + $0xa4] sm:$0xf] %vm2764_vm11, %v2709_v30  ;;  %v8000_v30 = vld [vmem:[#allocation39_spill] sm:$0xff] }
 0x36b   : > { %v2679_v41 = vpop.permute.xlu0 %2678  ;;  %2559 = vrot.lane.b32.xlu1 %v7980_v38, %s4317_s13 }
 0x36c   : > { %2770 = vst.msk [vmem:[#allocation2 + $0x2c] sm:$0xf] %vm2764_vm11, %v2679_v41  ;;  %2557 = vrot.lane.b32.xlu0 %v7981_v19, %s4317_s13  ;;  %v7998_v19 = vld [vmem:[#allocation18_spill] sm:$0xff] }
 0x36d   : > { %v2830_v57 = vpop.permute.xlu1 %2829 }
 0x36e   : > { %2922 = vst.msk [vmem:[#allocation2 + $0x24] sm:$0xf] %vm2917_vm12, %v2830_v57  ;;  %v8001_v57 = vld [vmem:[#allocation40_spill] sm:$0xff] }
 0x36f   : > { %v2711_v35 = vpop.permute.xlu0 %2710  ;;  %2591 = vrot.lane.b32.xlu1 %v7982_v20, %s4317_s13 }
 0x370   : > { %2786 = vst.msk [vmem:[#allocation2 + $0xac] sm:$0xf] %vm2764_vm11, %v2711_v35  ;;  %2589 = vrot.lane.b32.xlu0 %v7983_v55, %s4317_s13  ;;  %v2321_v35 = vrot.slane %v4295_v56, 5 }
 0x371   : > { %v2862_v29 = vpop.permute.xlu1 %2861 }
 0x372   : > { %2938 = vst.msk [vmem:[#allocation2 + $0xa4] sm:$0xf] %vm2917_vm12, %v2862_v29 }
 0x373   : > { %v2832_v16 = vpop.permute.xlu0 %2831  ;;  %2690 = vrot.lane.b32.xlu1 %v7984_v34, %s4318_s21  ;;  %v8002_v34 = vld [vmem:[#allocation85_spill] sm:$0xff] }
 0x374   : > { %2923 = vst.msk [vmem:[#allocation2 + $0x2c] sm:$0xf] %vm2917_vm12, %v2832_v16  ;;  %2688 = vrot.lane.b32.xlu0 %v7985_v63, %s4318_s21  ;;  %v8003_v63 = vld [vmem:[#allocation86_spill] sm:$0xff] }
 0x375   : > { %v2967_v32 = vpop.permute.xlu1 %2966 }
 0x376   : > { %3059 = vst.msk [vmem:[#allocation2 + $0x24] sm:$0xf] %vm3054_vm13, %v2967_v32  ;;  %v2323_v32 = vrot.slane %v2321_v35, 4 }
 0x377   : > { %v2864_v15 = vpop.permute.xlu0 %2863  ;;  %2722 = vrot.lane.b32.xlu1 %v4293_v24, %s4318_s21 }
 0x378   : > { %2939 = vst.msk [vmem:[#allocation2 + $0xac] sm:$0xf] %vm2917_vm12, %v2864_v15  ;;  %2720 = vrot.lane.b32.xlu0 %v4294_v51, %s4318_s21  ;;  %v4297_v15 = vld [vmem:[%s4361_s20 + $0xd4] sm:$0x3] }
 0x379   : > { %v2999_v47 = vpop.permute.xlu1 %2998  ;;  %v2324_v24 = vrot.slane %v4297_v15, 5 }
 0x37a   : > { %3075 = vst.msk [vmem:[#allocation2 + $0xa4] sm:$0xf] %vm3054_vm13, %v2999_v47  ;;  %v4064_v47 = vrot.slane %v4296_v18, 9 }
 0x37b   : > { %v2969_v23 = vpop.permute.xlu0 %2968  ;;  %2843 = vrot.lane.b32.xlu1 %v7986_v58, %s4319_s26  ;;  %v8004_v58 = vld [vmem:[#allocation72_spill] sm:$0xff] }
 0x37c   : > { %3060 = vst.msk [vmem:[#allocation2 + $0x2c] sm:$0xf] %vm3054_vm13, %v2969_v23  ;;  %2841 = vrot.lane.b32.xlu0 %v7987_v17, %s4319_s26  ;;  %v8005_v17 = vld [vmem:[#allocation24_spill] sm:$0xff] }
 0x37d   : > { %v3111_v0 = vpop.permute.xlu1 %3110 }
 0x37e   : > { %3203 = vst.msk [vmem:[#allocation2 + $0x24] sm:$0xf] %vm3198_vm14, %v3111_v0 }
 0x37f   : > { %v3001_v2 = vpop.permute.xlu0 %3000  ;;  %2875 = vrot.lane.b32.xlu1 %v7988_v59, %s4319_s26  ;;  %v8007_v59 = vld [vmem:[#allocation51_spill] sm:$0xff] }
 0x380   : > { %3076 = vst.msk [vmem:[#allocation2 + $0xac] sm:$0xf] %vm3054_vm13, %v3001_v2  ;;  %2873 = vrot.lane.b32.xlu0 %v7989_v21, %s4319_s26  ;;  %v2325_v2 = vsel %vm4989_vm6, %v2323_v32, %v2324_v24  ;;  %v8008_v21 = vshrl.u32 %v8007_v59, 16 }
 0x381   : > { %v3143_v6 = vpop.permute.xlu1 %3142 }
 0x382   : > { %3219 = vst.msk [vmem:[#allocation2 + $0xa4] sm:$0xf] %vm3198_vm14, %v3143_v6  ;;  %v2526_v6 = vrot.slane %v8008_v21, 5 }
 0x383   : > { %v3113_v31 = vpop.permute.xlu0 %3112  ;;  %2980 = vrot.lane.b32.xlu1 %v7990_v1, %s4320_s6 }
 0x384   : > { %3204 = vst.msk [vmem:[#allocation2 + $0x2c] sm:$0xf] %vm3198_vm14, %v3113_v31  ;;  %2978 = vrot.lane.b32.xlu0 %v7991_v40, %s4320_s6  ;;  %v8009_v31 = vshll.u32 %v8007_v59, 16  ;;  %v2531_v40 = vshrl.u32 %v4297_v15, 16  ;;  %v8019_v59 = vld [vmem:[#allocation23_spill] sm:$0xff] }
 0x385   : > { %v2550_v42 = vpop.permute.xlu1 %2549  ;;  %v3235_v48 = vld [vmem:[#allocation2 + $0x20] sm:$0xff] }
 0x386   : > { %2640 = vst.msk [vmem:[#allocation2 + $0x34] sm:$0xf] %vm2633_vm9, %v2550_v42  ;;  %v2527_v1 = vrot.slane %v8009_v31, 6 }
 0x387   : > { %v3145_v33 = vpop.permute.xlu0 %3144  ;;  %3012 = vrot.lane.b32.xlu1 %v7992_v5, %s4320_s6 }
 0x388   : > { %3220 = vst.msk [vmem:[#allocation2 + $0xac] sm:$0xf] %vm3198_vm14, %v3145_v33  ;;  %3010 = vrot.lane.b32.xlu0 %v7993_v4, %s4320_s6  ;;  %v2322_v33 = vsel %vm4989_vm6, %v4064_v47, %v2321_v35 }
 0x389   : > { %v2582_v50 = vpop.permute.xlu1 %2581  ;;  %v3251_v9 = vld [vmem:[#allocation2 + $0xa0] sm:$0xff] }
 0x38a   : > { %2656 = vst.msk [vmem:[#allocation2 + $0xb4] sm:$0xf] %vm2633_vm9, %v2582_v50 }
 0x38b   : > { %v2552_v25 = vpop.permute.xlu0 %2551  ;;  %v3236_v22 = vld [vmem:[#allocation2 + $0x28] sm:$0xff]  ;;  %2384 = vrot.lane.b32.xlu1 %v7992_v5, %s4315_s30 }
 0x38c   : > { %v4266_v26 = vld [vmem:[#allocation2 + $0x24] ss:$8 sps:$4 sm:$0xff]   ;;  %2641 = vst.msk [vmem:[#allocation2 + $0x3c] sm:$0xf] %vm2633_vm9, %v2552_v25  ;;  %v4070_v12 = vcombine.low %v3235_v48, %v3236_v22  ;;  %2382 = vrot.lane.b32.xlu0 %v7993_v4, %s4315_s30 }
 0x38d   : > { %4112 = vmatprep.mubr.msk.bf16.mxu0 %vm3503_vm15, %v4266_v26  ;;  %v2681_v60 = vpop.permute.xlu1 %2680  ;;  %v8010_v4 = vld [vmem:[#allocation56_spill] sm:$0xff] }
 0x38e   : > { %3601 = vmatmul.mubr.bf16.gmra.mxu0 %v4070_v12  ;;  %2771 = vst.msk [vmem:[#allocation2 + $0x34] sm:$0xf] %vm2764_vm11, %v2681_v60  ;;  %v8011_v50 = vshrl.u32 %v8010_v4, 16  ;;  %v8012_v48 = vshll.u32 %v8010_v4, 16 }
 0x38f   : > { %v2584_v28 = vpop.permute.xlu0 %2583  ;;  %v3252_v36 = vld [vmem:[#allocation2 + $0xa8] sm:$0xff]  ;;  %3124 = vrot.lane.b32.xlu1 %v7994_v62, %s4321_s11 }
 0x390   : > { %v4268_v37 = vld [vmem:[#allocation2 + $0xa4] ss:$8 sps:$4 sm:$0xff]   ;;  %2657 = vst.msk [vmem:[#allocation2 + $0xbc] sm:$0xf] %vm2633_vm9, %v2584_v28  ;;  %v4086_v11 = vcombine.low %v3251_v9, %v3252_v36  ;;  %3122 = vrot.lane.b32.xlu0 %v7995_v61, %s4321_s11  ;;  %v2522_v25 = vrot.slane %v8011_v50, 5  ;;  %v2523_v22 = vrot.slane %v8012_v48, 6  ;;  %v2528_v9 = vor.u32 %v2527_v1, %v2526_v6 }
 0x391   : > { %4120 = vmatprep.mubr.msk.bf16.mxu1 %vm3503_vm15, %v4268_v37  ;;  %v2713_v8 = vpop.permute.xlu1 %2712  ;;  %v2533_v36 = vrot.slane %v2531_v40, 5  ;;  %v8013_v37 = vld [vmem:[#allocation57_spill] sm:$0xff] }
 0x392   : > { %3665 = vmatmul.mubr.bf16.gmra.mxu1 %v4086_v11  ;;  %2787 = vst.msk [vmem:[#allocation2 + $0xb4] sm:$0xf] %vm2764_vm11, %v2713_v8 }
 0x393   : > { %v2683_v52 = vpop.permute.xlu0 %2682  ;;  %3156 = vrot.lane.b32.xlu1 %v7996_v44, %s4321_s11 }
 0x394   : > { %2772 = vst.msk [vmem:[#allocation2 + $0x3c] sm:$0xf] %vm2764_vm11, %v2683_v52  ;;  %3154 = vrot.lane.b32.xlu0 %v7997_v54, %s4321_s11  ;;  %v2524_v52 = vor.u32 %v2523_v22, %v2522_v25  ;;  %v8020_v22 = vld [vmem:[#allocation42_spill] sm:$0xff] }
 0x395   : > { %v2834_v53 = vpop.permute.xlu1 %2833 }
 0x396   : > { %2924 = vst.msk [vmem:[#allocation2 + $0x34] sm:$0xf] %vm2917_vm12, %v2834_v53 }
 0x397   : > { %v2715_v13 = vpop.permute.xlu0 %2714  ;;  %2563 = vrot.lane.b32.xlu1 %v7994_v62, %s4317_s13  ;;  %v8014_v62 = vshll.u32 %v8013_v37, 16 }
 0x398   : > { %2788 = vst.msk [vmem:[#allocation2 + $0xbc] sm:$0xf] %vm2764_vm11, %v2715_v13  ;;  %2561 = vrot.lane.b32.xlu0 %v7995_v61, %s4317_s13 }
 0x399   : > { %v2866_v7 = vpop.permute.xlu1 %2865  ;;  %v2534_v11 = vrot.slane %v8014_v62, 6 }
 0x39a   : > { %2940 = vst.msk [vmem:[#allocation2 + $0xb4] sm:$0xf] %vm2917_vm12, %v2866_v7  ;;  %v2530_v7 = vrot.slane %v2528_v9, 4 }
 0x39b   : > { %v2836_v3 = vpop.permute.xlu0 %2835  ;;  %2595 = vrot.lane.b32.xlu1 %v7996_v44, %s4317_s13 }
 0x39c   : > { %2925 = vst.msk [vmem:[#allocation2 + $0x3c] sm:$0xf] %vm2917_vm12, %v2836_v3  ;;  %2593 = vrot.lane.b32.xlu0 %v7997_v54, %s4317_s13  ;;  %v2535_v3 = vor.u32 %v2534_v11, %v2533_v36 }
 0x39d   : > { %v2971_v38 = vpop.permute.xlu1 %2970 }
 0x39e   : > { %3061 = vst.msk [vmem:[#allocation2 + $0x34] sm:$0xf] %vm3054_vm13, %v2971_v38 }
 0x39f   : > { %v2868_v49 = vpop.permute.xlu0 %2867  ;;  %2694 = vrot.lane.b32.xlu1 %v7998_v19, %s4318_s21 }
 0x3a0   : > { %2941 = vst.msk [vmem:[#allocation2 + $0xbc] sm:$0xf] %vm2917_vm12, %v2868_v49  ;;  %2692 = vrot.lane.b32.xlu0 %v7999_v14, %s4318_s21  ;;  %v2525_v49 = vrot.slane %v2524_v52, 4  ;;  %v8015_v14 = vld [vmem:[#allocation97_spill] sm:$0xff] }
 0x3a1   : > { %v3003_v27 = vpop.permute.xlu1 %3002 }
 0x3a2   : > { %3077 = vst.msk [vmem:[#allocation2 + $0xb4] sm:$0xf] %vm3054_vm13, %v3003_v27  ;;  %v8016_v27 = vld [vmem:[#allocation98_spill] sm:$0xff] }
 0x3a3   : > { %v2973_v46 = vpop.permute.xlu0 %2972  ;;  %2726 = vrot.lane.b32.xlu1 %v4295_v56, %s4318_s21  ;;  %v2536_v56 = vsel %vm5278_vm10, %v2530_v7, %v2535_v3 }
 0x3a4   : > { %3062 = vst.msk [vmem:[#allocation2 + $0x3c] sm:$0xf] %vm3054_vm13, %v2973_v46  ;;  %2724 = vrot.lane.b32.xlu0 %v4296_v18, %s4318_s21 }
 0x3a5   : > { %v2377_v20 = vpop.permute.xlu1 %2376 }
 0x3a6   : > { %v2415_v10 = vrot.slane %v2377_v20, 4 }
 0x3a7   : > { %v3005_v55 = vpop.permute.xlu0 %3004  ;;  %2847 = vrot.lane.b32.xlu1 %v8000_v30, %s4319_s26  ;;  %v6985_v30 = vld [vmem:[%s4361_s20 + $0xdc] sm:$0xf] }
 0x3a8   : > { %3078 = vst.msk [vmem:[#allocation2 + $0xbc] sm:$0xf] %vm3054_vm13, %v3005_v55  ;;  %v2448_v41 = vsel %vm2422_vm7, %v2415_v10, %v2377_v20  ;;  %2845 = vrot.lane.b32.xlu0 %v8001_v57, %s4319_s26  ;;  %v2529_v20 = vsel %vm5278_vm10, %v2525_v49, %v2528_v9  ;;  %v6989_v57 = vld [vmem:[%s4361_s20 + $0xd8] sm:$0xf]  ;;  %v2807_v35 = vshll.u32 %v6985_v30, 16  ;;  %v8023_v49 = vld [vmem:[#allocation73_spill] sm:$0xff] }
 0x3a9   : > { %2515 = vst.msk [vmem:[#allocation2 + $0xc8] sm:$0xff] %vm6565_vm8, %v2448_v41  ;;  %v3117_v29 = vpop.permute.xlu1 %3116 }
 0x3aa   : > { %3206 = vst.msk [vmem:[#allocation2 + $0x3c] sm:$0xf] %vm3198_vm14, %v3117_v29  ;;  %v2811_v29 = vshrl.u32 %v6985_v30, 16  ;;  %v2809_v15 = vrot.slane %v2807_v35, 5 }
 0x3ab   : > { %v3115_v16 = vpop.permute.xlu0 %3114  ;;  %2879 = vrot.lane.b32.xlu1 %v8002_v34, %s4319_s26  ;;  %v2798_v34 = vshrl.u32 %v6989_v57, 16 }
 0x3ac   : > { %3205 = vst.msk [vmem:[#allocation2 + $0x34] sm:$0xf] %vm3198_vm14, %v3115_v16  ;;  %2877 = vrot.lane.b32.xlu0 %v8003_v63, %s4319_s26  ;;  %v2801_v63 = vshll.u32 %v6989_v57, 16  ;;  %v2813_v24 = vrot.slane %v2811_v29, 4 }
 0x3ad   : > { %v3149_v51 = vpop.permute.xlu1 %3148  ;;  %v2800_v47 = vrot.slane %v2798_v34, 4 }
 0x3ae   : > { %3222 = vst.msk [vmem:[#allocation2 + $0xbc] sm:$0xf] %vm3198_vm14, %v3149_v51  ;;  %v2814_v21 = vor.u32 %v2813_v24, %v2809_v15  ;;  %v3088_v7 = vrot.slane %v2801_v63, 6 }
 0x3af   : > { %v3147_v23 = vpop.permute.xlu0 %3146  ;;  %2984 = vrot.lane.b32.xlu1 %v8004_v58, %s4320_s6  ;;  %v255_v58 = vld [vmem:[%s4361_s20 + $0xe0] sm:$0x3] }
 0x3b0   : > { %3221 = vst.msk [vmem:[#allocation2 + $0xb4] sm:$0xf] %vm3198_vm14, %v3147_v23  ;;  %2982 = vrot.lane.b32.xlu0 %v8005_v17, %s4320_s6  ;;  %v2803_v23 = vrot.slane %v2801_v63, 5  ;;  %v2817_v6 = vshll.u32 %v255_v58, 16 }
 0x3b1   : > { %v2556_v42 = vpop.permute.xlu1 %2555  ;;  %v3238_v5 = vld [vmem:[#allocation2 + $0x38] sm:$0xff] }
 0x3b2   : > { %2643 = vst.msk [vmem:[#allocation2 + $0x4c] sm:$0xf] %vm2633_vm9, %v2556_v42  ;;  %v2804_v1 = vor.u32 %v2803_v23, %v2800_v47  ;;  %v2815_v42 = vrot.slane %v2814_v21, 4 }
 0x3b3   : > { %v2554_v26 = vpop.permute.xlu0 %2553  ;;  %v3237_v12 = vld [vmem:[#allocation2 + $0x30] sm:$0xff]  ;;  %3016 = vrot.lane.b32.xlu1 %v2325_v2, %s4320_s6 }
 0x3b4   : > { %v4270_v60 = vld [vmem:[#allocation2 + $0x34] ss:$8 sps:$4 sm:$0xff]   ;;  %2642 = vst.msk [vmem:[#allocation2 + $0x44] sm:$0xf] %vm2633_vm9, %v2554_v26  ;;  %v4072_v28 = vcombine.low %v3237_v12, %v3238_v5  ;;  %3014 = vrot.lane.b32.xlu0 %v2322_v33, %s4320_s6  ;;  %v2805_v4 = vrot.slane %v2804_v1, 4  ;;  %v2953_v26 = vrot.slane %v6985_v30, 5 }
 0x3b5   : > { %4113 = vmatprep.mubr.msk.bf16.mxu0 %vm3503_vm15, %v4270_v60  ;;  %v2588_v61 = vpop.permute.xlu1 %2587  ;;  %v3254_v8 = vld [vmem:[#allocation2 + $0xb8] sm:$0xff]  ;;  %v8021_v60 = vld [vmem:[#allocation43_spill] sm:$0xff] }
 0x3b6   : > { %3609 = vmatmul.mubr.bf16.gmra.mxu0 %v4072_v28  ;;  %2659 = vst.msk [vmem:[#allocation2 + $0xcc] sm:$0xf] %vm2633_vm9, %v2588_v61  ;;  %v2810_v62 = vsel %vm4424_vm3, %v2805_v4, %v2809_v15  ;;  %v3091_v61 = vrot.slane %v2811_v29, 5  ;;  %v2955_v52 = vrot.slane %v2953_v26, 4 }
 0x3b7   : > { %v2586_v44 = vpop.permute.xlu0 %2585  ;;  %v3253_v54 = vld [vmem:[#allocation2 + $0xb0] sm:$0xff]  ;;  %2388 = vrot.lane.b32.xlu1 %v2325_v2, %s4315_s30 }
 0x3b8   : > { %v4272_v53 = vld [vmem:[#allocation2 + $0xb4] ss:$8 sps:$4 sm:$0xff]   ;;  %2658 = vst.msk [vmem:[#allocation2 + $0xc4] sm:$0xf] %vm2633_vm9, %v2586_v44  ;;  %v4088_v13 = vcombine.low %v3253_v54, %v3254_v8  ;;  %2386 = vrot.lane.b32.xlu0 %v2322_v33, %s4315_s30  ;;  %v2819_v33 = vrot.slane %v2817_v6, 5  ;;  %v3092_v8 = vrot.slane %v2807_v35, 6 }
 0x3b9   : > { %4121 = vmatprep.mubr.msk.bf16.mxu1 %vm3503_vm15, %v4272_v53  ;;  %v2687_v38 = vpop.permute.xlu1 %2686  ;;  %v8018_v2 = vld [vmem:[#allocation21_spill] sm:$0xff]  ;;  %v2956_v44 = vrot.slane %v255_v58, 5  ;;  %v3096_v54 = vshrl.u32 %v255_v58, 16  ;;  %v4065_v53 = vrot.slane %v6989_v57, 9 }
 0x3ba   : > { %3673 = vmatmul.mubr.bf16.gmra.mxu1 %v4088_v13  ;;  %2774 = vst.msk [vmem:[#allocation2 + $0x4c] sm:$0xf] %vm2764_vm11, %v2687_v38  ;;  %v2820_v9 = vsel %vm4424_vm3, %v2815_v42, %v2819_v33  ;;  %v3087_v13 = vrot.slane %v2798_v34, 5  ;;  %v7080_v33 = vld [vmem:[%s7288_s2] ss:$0 sm:$0xff]  ;;  %vm3951_vm3 = vcmask 60416  }
 0x3bb   : > { %v2685_v19 = vpop.permute.xlu0 %2684  ;;  %3128 = vrot.lane.b32.xlu1 %v8015_v14, %s4321_s11 }
 0x3bc   : > { %2773 = vst.msk [vmem:[#allocation2 + $0x44] sm:$0xf] %vm2764_vm11, %v2685_v19  ;;  %3126 = vrot.lane.b32.xlu0 %v8016_v27, %s4321_s11  ;;  %v8024_v19 = vld [vmem:[#allocation74_spill] sm:$0xff] }
 0x3bd   : > { %v2719_v18 = vpop.permute.xlu1 %2718 }
 0x3be   : > { %2790 = vst.msk [vmem:[#allocation2 + $0xcc] sm:$0xf] %vm2764_vm11, %v2719_v18  ;;  %v3099_v18 = vrot.slane %v2817_v6, 6 }
 0x3bf   : > { %v2717_v10 = vpop.permute.xlu0 %2716  ;;  %3160 = vrot.lane.b32.xlu1 %v2536_v56, %s4321_s11 }
 0x3c0   : > { %2789 = vst.msk [vmem:[#allocation2 + $0xc4] sm:$0xf] %vm2764_vm11, %v2717_v10  ;;  %3158 = vrot.lane.b32.xlu0 %v2529_v20, %s4321_s11  ;;  %v2954_v10 = vsel %vm4989_vm6, %v4065_v53, %v2953_v26 }
 0x3c1   : > { %v2840_v55 = vpop.permute.xlu1 %2839 }
 0x3c2   : > { %2927 = vst.msk [vmem:[#allocation2 + $0x4c] sm:$0xf] %vm2917_vm12, %v2840_v55 }
 0x3c3   : > { %v2838_v41 = vpop.permute.xlu0 %2837  ;;  %2567 = vrot.lane.b32.xlu1 %v8015_v14, %s4317_s13  ;;  %v2957_v14 = vsel %vm4989_vm6, %v2955_v52, %v2956_v44 }
 0x3c4   : > { %2926 = vst.msk [vmem:[#allocation2 + $0x44] sm:$0xf] %vm2917_vm12, %v2838_v41  ;;  %2565 = vrot.lane.b32.xlu0 %v8016_v27, %s4317_s13  ;;  %v3093_v27 = vor.u32 %v3092_v8, %v3091_v61 }
 0x3c5   : > { %v2872_v16 = vpop.permute.xlu1 %2871 }
 0x3c6   : > { %2943 = vst.msk [vmem:[#allocation2 + $0xcc] sm:$0xf] %vm2917_vm12, %v2872_v16  ;;  %v3095_v16 = vrot.slane %v3093_v27, 4 }
 0x3c7   : > { %v2870_v32 = vpop.permute.xlu0 %2869  ;;  %2599 = vrot.lane.b32.xlu1 %v2536_v56, %s4317_s13  ;;  %v3098_v56 = vrot.slane %v3096_v54, 5 }
 0x3c8   : > { %2942 = vst.msk [vmem:[#allocation2 + $0xc4] sm:$0xf] %vm2917_vm12, %v2870_v32  ;;  %2597 = vrot.lane.b32.xlu0 %v2529_v20, %s4317_s13 }
 0x3c9   : > { %v2977_v51 = vpop.permute.xlu1 %2976  ;;  %v3100_v34 = vor.u32 %v3099_v18, %v3098_v56 }
 0x3ca   : > { %3064 = vst.msk [vmem:[#allocation2 + $0x4c] sm:$0xf] %vm3054_vm13, %v2977_v51 }
 0x3cb   : > { %v2975_v17 = vpop.permute.xlu0 %2974  ;;  %2698 = vrot.lane.b32.xlu1 %v8018_v2, %s4318_s21  ;;  %v3101_v23 = vsel %vm5278_vm10, %v3095_v16, %v3100_v34 }
 0x3cc   : > { %3063 = vst.msk [vmem:[#allocation2 + $0x44] sm:$0xf] %vm3054_vm13, %v2975_v17  ;;  %2696 = vrot.lane.b32.xlu0 %v8019_v59, %s4318_s21 }
 0x3cd   : > { %v3009_v31 = vpop.permute.xlu1 %3008 }
 0x3ce   : > { %3080 = vst.msk [vmem:[#allocation2 + $0xcc] sm:$0xf] %vm3054_vm13, %v3009_v31 }
 0x3cf   : > { %v3007_v40 = vpop.permute.xlu0 %3006  ;;  %2730 = vrot.lane.b32.xlu1 %v6985_v30, %s4318_s21  ;;  %v3089_v30 = vor.u32 %v3088_v7, %v3087_v13 }
 0x3d0   : > { %3079 = vst.msk [vmem:[#allocation2 + $0xc4] sm:$0xf] %vm3054_vm13, %v3007_v40  ;;  %2728 = vrot.lane.b32.xlu0 %v6989_v57, %s4318_s21 }
 0x3d1   : > { %v2381_v5 = vpop.permute.xlu1 %2380  ;;  %v3090_v32 = vrot.slane %v3089_v30, 4 }
 0x3d2   : > { %v2417_v50 = vrot.slane %v2381_v5, 4 }
 0x3d3   : > { %v2379_v25 = vpop.permute.xlu0 %2378  ;;  %2851 = vrot.lane.b32.xlu1 %v8020_v22, %s4319_s26  ;;  %v3094_v17 = vsel %vm5278_vm10, %v3090_v32, %v3093_v27 }
 0x3d4   : > { %v2416_v48 = vrot.slane %v2379_v25, 4  ;;  %v2450_v12 = vsel %vm2422_vm7, %v2417_v50, %v2381_v5  ;;  %2849 = vrot.lane.b32.xlu0 %v8021_v60, %s4319_s26  ;;  %v7085_v50 = vld [vmem:[%s7289_s3] ss:$0 sm:$0xff] }
 0x3d5   : > { %2517 = vst.msk [vmem:[#allocation2 + $0xd8] sm:$0xff] %vm6565_vm8, %v2450_v12  ;;  %v3121_v37 = vpop.permute.xlu1 %3120 }
 0x3d6   : > { %v2449_v36 = vsel %vm2422_vm7, %v2416_v48, %v2379_v25  ;;  %3208 = vst.msk [vmem:[#allocation2 + $0x4c] sm:$0xf] %vm3198_vm14, %v3121_v37 }
 0x3d7   : > { %2516 = vst.msk [vmem:[#allocation2 + $0xd0] sm:$0xff] %vm6565_vm8, %v2449_v36  ;;  %v3119_v11 = vpop.permute.xlu0 %3118  ;;  %2883 = vrot.lane.b32.xlu1 %v2820_v9, %s4319_s26 }
 0x3d8   : > { %3207 = vst.msk [vmem:[#allocation2 + $0x44] sm:$0xf] %vm3198_vm14, %v3119_v11  ;;  %2881 = vrot.lane.b32.xlu0 %v2810_v62, %s4319_s26 }
 0x3d9   : > { %v3153_v3 = vpop.permute.xlu1 %3152 }
 0x3da   : > { %3224 = vst.msk [vmem:[#allocation2 + $0xcc] sm:$0xf] %vm3198_vm14, %v3153_v3 }
 0x3db   : > { %v3151_v38 = vpop.permute.xlu0 %3150  ;;  %2988 = vrot.lane.b32.xlu1 %v8023_v49, %s4320_s6 }
 0x3dc   : > { %3223 = vst.msk [vmem:[#allocation2 + $0xc4] sm:$0xf] %vm3198_vm14, %v3151_v38  ;;  %2986 = vrot.lane.b32.xlu0 %v8024_v19, %s4320_s6 }
 0x3dd   : > { %v2560_v20 = vpop.permute.xlu1 %2559  ;;  %v3240_v55 = vld [vmem:[#allocation2 + $0x48] sm:$0xff] }
 0x3de   : > { %2645 = vst.msk [vmem:[#allocation2 + $0x5c] sm:$0xf] %vm2633_vm9, %v2560_v20 }
 0x3df   : > { %v2558_v41 = vpop.permute.xlu0 %2557  ;;  %v3239_v57 = vld [vmem:[#allocation2 + $0x40] sm:$0xff]  ;;  %3020 = vrot.lane.b32.xlu1 %v2957_v14, %s4320_s6 }
 0x3e0   : > { %v4274_v35 = vld [vmem:[#allocation2 + $0x44] ss:$8 sps:$4 sm:$0xff]   ;;  %2644 = vst.msk [vmem:[#allocation2 + $0x54] sm:$0xf] %vm2633_vm9, %v2558_v41  ;;  %v4074_v29 = vcombine.low %v3239_v57, %v3240_v55  ;;  %3018 = vrot.lane.b32.xlu0 %v2954_v10, %s4320_s6 }
 0x3e1   : > { %4114 = vmatprep.mubr.msk.bf16.mxu0 %vm3503_vm15, %v4274_v35  ;;  %v2592_v0 = vpop.permute.xlu1 %2591  ;;  %v3256_v63 = vld [vmem:[#allocation2 + $0xc8] sm:$0xff] }
 0x3e2   : > { %3617 = vmatmul.mubr.bf16.gmra.mxu0 %v4074_v29  ;;  %2661 = vst.msk [vmem:[#allocation2 + $0xdc] sm:$0xf] %vm2633_vm9, %v2592_v0 }
 0x3e3   : > { %v2590_v15 = vpop.permute.xlu0 %2589  ;;  %v3255_v24 = vld [vmem:[#allocation2 + $0xc0] sm:$0xff]  ;;  %3132 = vrot.lane.b32.xlu1 %v7883_v43, %s4321_s11 }
 0x3e4   : > { %v4276_v51 = vld [vmem:[#allocation2 + $0xc4] ss:$8 sps:$4 sm:$0xff]   ;;  %2660 = vst.msk [vmem:[#allocation2 + $0xd4] sm:$0xf] %vm2633_vm9, %v2590_v15  ;;  %v4090_v47 = vcombine.low %v3255_v24, %v3256_v63  ;;  %3130 = vrot.lane.b32.xlu0 %v7884_v45, %s4321_s11 }
 0x3e5   : > { %4122 = vmatprep.mubr.msk.bf16.mxu1 %vm3503_vm15, %v4276_v51  ;;  %v2691_v58 = vpop.permute.xlu1 %2690 }
 0x3e6   : > { %3681 = vmatmul.mubr.bf16.gmra.mxu1 %v4090_v47  ;;  %2776 = vst.msk [vmem:[#allocation2 + $0x5c] sm:$0xf] %vm2764_vm11, %v2691_v58 }
 0x3e7   : > { %v2689_v2 = vpop.permute.xlu0 %2688  ;;  %3164 = vrot.lane.b32.xlu1 %v3101_v23, %s4321_s11 }
 0x3e8   : > { %2775 = vst.msk [vmem:[#allocation2 + $0x54] sm:$0xf] %vm2764_vm11, %v2689_v2  ;;  %3162 = vrot.lane.b32.xlu0 %v3094_v17, %s4321_s11 }
 0x3e9   : > { %v2723_v43 = vpop.permute.xlu1 %2722 }
 0x3ea   : > { %2792 = vst.msk [vmem:[#allocation2 + $0xdc] sm:$0xf] %vm2764_vm11, %v2723_v43 }
 0x3eb   : > { %v2721_v45 = vpop.permute.xlu0 %2720 }
 0x3ec   : > { %2791 = vst.msk [vmem:[#allocation2 + $0xd4] sm:$0xf] %vm2764_vm11, %v2721_v45 }
 0x3ed   : > { %v2844_v59 = vpop.permute.xlu1 %2843 }
 0x3ee   : > { %2929 = vst.msk [vmem:[#allocation2 + $0x5c] sm:$0xf] %vm2917_vm12, %v2844_v59 }
 0x3ef   : > { %v2842_v46 = vpop.permute.xlu0 %2841 }
 0x3f0   : > { %2928 = vst.msk [vmem:[#allocation2 + $0x54] sm:$0xf] %vm2917_vm12, %v2842_v46 }
 0x3f1   : > { %v2876_v21 = vpop.permute.xlu1 %2875 }
 0x3f2   : > { %2945 = vst.msk [vmem:[#allocation2 + $0xdc] sm:$0xf] %vm2917_vm12, %v2876_v21 }
 0x3f3   : > { %v2874_v6 = vpop.permute.xlu0 %2873 }
 0x3f4   : > { %2944 = vst.msk [vmem:[#allocation2 + $0xd4] sm:$0xf] %vm2917_vm12, %v2874_v6 }
 0x3f5   : > { %v2981_v31 = vpop.permute.xlu1 %2980 }
 0x3f6   : > { %3066 = vst.msk [vmem:[#allocation2 + $0x5c] sm:$0xf] %vm3054_vm13, %v2981_v31 }
 0x3f7   : > { %v2979_v1 = vpop.permute.xlu0 %2978 }
 0x3f8   : > { %3065 = vst.msk [vmem:[#allocation2 + $0x54] sm:$0xf] %vm3054_vm13, %v2979_v1 }
 0x3f9   : > { %v3013_v40 = vpop.permute.xlu1 %3012 }
 0x3fa   : > { %3082 = vst.msk [vmem:[#allocation2 + $0xdc] sm:$0xf] %vm3054_vm13, %v3013_v40 }
 0x3fb   : > { %v3011_v42 = vpop.permute.xlu0 %3010 }
 0x3fc   : > { %3081 = vst.msk [vmem:[#allocation2 + $0xd4] sm:$0xf] %vm3054_vm13, %v3011_v42 }
 0x3fd   : > { %v2385_v5 = vpop.permute.xlu1 %2384  ;;  %v3586_v4 = vpop.f32.mrf.mxu0 }
 0x3fe   : > { %v2419_v25 = vrot.slane %v2385_v5, 4  ;;  %v3720_v22 = vmul.f32 %v7080_v33, %v3586_v4 }
 0x3ff   : > { %v2383_v48 = vpop.permute.xlu0 %2382  ;;  %v3588_v12 = vpop.f32.mrf.mxu0 }
 0x400   : > { %v2418_v26 = vrot.slane %v2383_v48, 4  ;;  %v2452_v60 = vsel %vm2422_vm7, %v2419_v25, %v2385_v5  ;;  %v3759_v28 = vadd.f32 %v7085_v50, %v3720_v22 }
 0x401   : > { %2519 = vst.msk [vmem:[#allocation2 + $0xe8] sm:$0xff] %vm6565_vm8, %v2452_v60  ;;  %v3125_v36 = vpop.permute.xlu1 %3124  ;;  %v3650_v37 = vpop.f32.mrf.mxu1 }
 0x402   : > { %v2451_v9 = vsel %vm2422_vm7, %v2418_v26, %v2383_v48  ;;  %v3791_v62 = vmax.f32 %v3759_v28, 0.0  ;;  %3210 = vst.msk [vmem:[#allocation2 + $0x5c] sm:$0xf] %vm3198_vm14, %v3125_v36  ;;  %v3736_v11 = vmul.f32 %v7080_v33, %v3650_v37  ;;  %v3589_v8 = vpop.f32.mrf.mxu0 }
 0x403   : > { %2518 = vst.msk [vmem:[#allocation2 + $0xe0] sm:$0xff] %vm6565_vm8, %v2451_v9  ;;  %v3123_v61 = vpop.permute.xlu0 %3122  ;;  %v3721_v52 = vmul.f32 %v7080_v33, %v3589_v8  ;;  %v3652_v44 = vpop.f32.mrf.mxu1 }
 0x404   : > { %3209 = vst.msk [vmem:[#allocation2 + $0x54] sm:$0xf] %vm3198_vm14, %v3123_v61  ;;  %v4163_v54 = vpack.c.bf16 %v3791_v62, %v3791_v62  ;;  %v3775_v53 = vadd.f32 %v7085_v50, %v3736_v11  ;;  %v3591_v13 = vpop.f32.mrf.mxu0 }
 0x405   : > { %v3760_v7 = vadd.f32 %v7085_v50, %v3721_v52  ;;  %v3157_v3 = vpop.permute.xlu1 %3156  ;;  %v3653_v38 = vpop.f32.mrf.mxu1 }
 0x406   : > { %3952 = vst.msk [vmem:[%s7101_s18] sm:$0xf] %vm3951_vm3, %v4163_v54  ;;  %v3807_v49 = vmax.f32 %v3775_v53, 0.0  ;;  %v3737_v19 = vmul.f32 %v7080_v33, %v3653_v38 }
 0x407   : > { %3226 = vst.msk [vmem:[#allocation2 + $0xdc] sm:$0xf] %vm3198_vm14, %v3157_v3  ;;  %v3155_v14 = vpop.permute.xlu0 %3154  ;;  %v3792_v27 = vmax.f32 %v3760_v7, 0.0  ;;  %v3655_v56 = vpop.f32.mrf.mxu1 }
 0x408   : > { %3225 = vst.msk [vmem:[#allocation2 + $0xd4] sm:$0xf] %vm3198_vm14, %v3155_v14  ;;  %v4179_v18 = vpack.c.bf16 %v3807_v49, %v3807_v49  ;;  %v3776_v20 = vadd.f32 %v7085_v50, %v3737_v19 }
 0x409   : > { %v4164_v10 = vpack.c.bf16 %v3792_v27, %v3792_v27  ;;  %v2564_v55 = vpop.permute.xlu1 %2563  ;;  %v3242_v30 = vld [vmem:[#allocation2 + $0x58] sm:$0xff] }
 0x40a   : > { %3968 = vst.msk [vmem:[%s7101_s18 + $0x40] sm:$0xf] %vm3951_vm3, %v4179_v18  ;;  %v3808_v41 = vmax.f32 %v3776_v20, 0.0 }
 0x40b   : > { %2647 = vst.msk [vmem:[#allocation2 + $0x6c] sm:$0xf] %vm2633_vm9, %v2564_v55  ;;  %v2562_v57 = vpop.permute.xlu0 %2561  ;;  %v3241_v35 = vld [vmem:[#allocation2 + $0x50] sm:$0xff] }
 0x40c   : > { %v4278_v29 = vld [vmem:[#allocation2 + $0x54] ss:$8 sps:$4 sm:$0xff]   ;;  %3953 = vst.msk [vmem:[%s7101_s18 + $0x4] sm:$0xf] %vm3951_vm3, %v4164_v10  ;;  %v4076_v16 = vcombine.low %v3241_v35, %v3242_v30  ;;  %v4180_v34 = vpack.c.bf16 %v3808_v41, %v3808_v41 }
 0x40d   : > { %2646 = vst.msk [vmem:[#allocation2 + $0x64] sm:$0xf] %vm2633_vm9, %v2562_v57  ;;  %4115 = vmatprep.mubr.msk.bf16.mxu0 %vm3503_vm15, %v4278_v29  ;;  %v2596_v0 = vpop.permute.xlu1 %2595 }
 0x40e   : > { %3625 = vmatmul.mubr.bf16.gmra.mxu0 %v4076_v16  ;;  %v3258_v63 = vld [vmem:[#allocation2 + $0xd8] sm:$0xff]  ;;  %3969 = vst.msk [vmem:[%s7101_s18 + $0x44] sm:$0xf] %vm3951_vm3, %v4180_v34 }
 0x40f   : > { %2663 = vst.msk [vmem:[#allocation2 + $0xec] sm:$0xf] %vm2633_vm9, %v2596_v0  ;;  %v2594_v32 = vpop.permute.xlu0 %2593  ;;  %v3257_v15 = vld [vmem:[#allocation2 + $0xd0] sm:$0xff] }
 0x410   : > { %v4280_v24 = vld [vmem:[#allocation2 + $0xd4] ss:$8 sps:$4 sm:$0xff]   ;;  %2662 = vst.msk [vmem:[#allocation2 + $0xe4] sm:$0xf] %vm2633_vm9, %v2594_v32  ;;  %v4092_v51 = vcombine.low %v3257_v15, %v3258_v63 }
 0x411   : > { %4123 = vmatprep.mubr.msk.bf16.mxu1 %vm3503_vm15, %v4280_v24  ;;  %v2695_v47 = vpop.permute.xlu1 %2694 }
 0x412   : > { %3689 = vmatmul.mubr.bf16.gmra.mxu1 %v4092_v51  ;;  %2778 = vst.msk [vmem:[#allocation2 + $0x6c] sm:$0xf] %vm2764_vm11, %v2695_v47 }
 0x413   : > { %v2693_v23 = vpop.permute.xlu0 %2692 }
 0x414   : > { %2777 = vst.msk [vmem:[#allocation2 + $0x64] sm:$0xf] %vm2764_vm11, %v2693_v23 }
 0x415   : > { %v2727_v58 = vpop.permute.xlu1 %2726 }
 0x416   : > { %2794 = vst.msk [vmem:[#allocation2 + $0xec] sm:$0xf] %vm2764_vm11, %v2727_v58 }
 0x417   : > { %v2725_v17 = vpop.permute.xlu0 %2724 }
 0x418   : > { %2793 = vst.msk [vmem:[#allocation2 + $0xe4] sm:$0xf] %vm2764_vm11, %v2725_v17 }
 0x419   : > { %v2848_v2 = vpop.permute.xlu1 %2847 }
 0x41a   : > { %2931 = vst.msk [vmem:[#allocation2 + $0x6c] sm:$0xf] %vm2917_vm12, %v2848_v2 }
 0x41b   : > { %v2846_v43 = vpop.permute.xlu0 %2845 }
 0x41c   : > { %2930 = vst.msk [vmem:[#allocation2 + $0x64] sm:$0xf] %vm2917_vm12, %v2846_v43 }
 0x41d   : > { %v2880_v45 = vpop.permute.xlu1 %2879 }
 0x41e   : > { %2947 = vst.msk [vmem:[#allocation2 + $0xec] sm:$0xf] %vm2917_vm12, %v2880_v45 }
 0x41f   : > { %v2878_v59 = vpop.permute.xlu0 %2877 }
 0x420   : > { %2946 = vst.msk [vmem:[#allocation2 + $0xe4] sm:$0xf] %vm2917_vm12, %v2878_v59 }
 0x421   : > { %v2985_v46 = vpop.permute.xlu1 %2984 }
 0x422   : > { %3068 = vst.msk [vmem:[#allocation2 + $0x6c] sm:$0xf] %vm3054_vm13, %v2985_v46 }
 0x423   : > { %v2983_v21 = vpop.permute.xlu0 %2982 }
 0x424   : > { %3067 = vst.msk [vmem:[#allocation2 + $0x64] sm:$0xf] %vm3054_vm13, %v2983_v21 }
 0x425   : > { %v3017_v6 = vpop.permute.xlu1 %3016 }
 0x426   : > { %v3594_v31 = vpop.f32.mrf.mxu0  ;;  %3084 = vst.msk [vmem:[#allocation2 + $0xec] sm:$0xf] %vm3054_vm13, %v3017_v6 }
 0x427   : > { %v3015_v1 = vpop.permute.xlu0 %3014  ;;  %v3722_v40 = vmul.f32 %v7080_v33, %v3594_v31 }
 0x428   : > { %3083 = vst.msk [vmem:[#allocation2 + $0xe4] sm:$0xf] %vm3054_vm13, %v3015_v1  ;;  %v3596_v42 = vpop.f32.mrf.mxu0 }
 0x429   : > { %v3761_v5 = vadd.f32 %v7085_v50, %v3722_v40  ;;  %v2389_v4 = vpop.permute.xlu1 %2388 }
 0x42a   : > { %v3658_v25 = vpop.f32.mrf.mxu1  ;;  %v2421_v22 = vrot.slane %v2389_v4, 4  ;;  %v3597_v60 = vpop.f32.mrf.mxu0 }
 0x42b   : > { %v3793_v48 = vmax.f32 %v3761_v5, 0.0  ;;  %v3738_v26 = vmul.f32 %v7080_v33, %v3658_v25  ;;  %v2387_v12 = vpop.permute.xlu0 %2386  ;;  %v3723_v9 = vmul.f32 %v7080_v33, %v3597_v60 }
 0x42c   : > { %v2420_v28 = vrot.slane %v2387_v12, 4  ;;  %v3660_v36 = vpop.f32.mrf.mxu1  ;;  %v2454_v62 = vsel %vm2422_vm7, %v2421_v22, %v2389_v4  ;;  %v3599_v61 = vpop.f32.mrf.mxu0 }
 0x42d   : > { %v4165_v37 = vpack.c.bf16 %v3793_v48, %v3793_v48  ;;  %v3777_v11 = vadd.f32 %v7085_v50, %v3738_v26  ;;  %2521 = vst.msk [vmem:[#allocation2 + $0xf8] sm:$0xff] %vm6565_vm8, %v2454_v62  ;;  %v3762_v52 = vadd.f32 %v7085_v50, %v3723_v9  ;;  %v3129_v44 = vpop.permute.xlu1 %3128 }
 0x42e   : > { %v2453_v8 = vsel %vm2422_vm7, %v2420_v28, %v2387_v12  ;;  %v3661_v54 = vpop.f32.mrf.mxu1  ;;  %3212 = vst.msk [vmem:[#allocation2 + $0x6c] sm:$0xf] %vm3198_vm14, %v3129_v44 }
 0x42f   : > { %3954 = vst.msk [vmem:[%s7101_s18 + $0x8] sm:$0xf] %vm3951_vm3, %v4165_v37  ;;  %v3809_v53 = vmax.f32 %v3777_v11, 0.0  ;;  %v3739_v13 = vmul.f32 %v7080_v33, %v3661_v54  ;;  %v3127_v7 = vpop.permute.xlu0 %3126  ;;  %v3794_v3 = vmax.f32 %v3762_v52, 0.0 }
 0x430   : > { %2520 = vst.msk [vmem:[#allocation2 + $0xf0] sm:$0xff] %vm6565_vm8, %v2453_v8  ;;  %v3663_v38 = vpop.f32.mrf.mxu1 }
 0x431   : > { %3211 = vst.msk [vmem:[#allocation2 + $0x64] sm:$0xf] %vm3198_vm14, %v3127_v7  ;;  %v4181_v49 = vpack.c.bf16 %v3809_v53, %v3809_v53  ;;  %v3778_v19 = vadd.f32 %v7085_v50, %v3739_v13  ;;  %v4166_v14 = vpack.c.bf16 %v3794_v3, %v3794_v3  ;;  %v3161_v27 = vpop.permute.xlu1 %3160  ;;  %v4288_v3 = vld [vmem:[#allocation2 + $0x70] ss:$8 sps:$4 sm:$0xff]  }
 0x432   : > { %3228 = vst.msk [vmem:[#allocation2 + $0xec] sm:$0xf] %vm3198_vm14, %v3161_v27 }
 0x433   : > { %3970 = vst.msk [vmem:[%s7101_s18 + $0x48] sm:$0xf] %vm3951_vm3, %v4181_v49  ;;  %v3810_v39 = vmax.f32 %v3778_v19, 0.0  ;;  %v3159_v56 = vpop.permute.xlu0 %3158  ;;  %3955 = vst.msk [vmem:[%s7101_s18 + $0xc] sm:$0xf] %vm3951_vm3, %v4166_v14 }
 0x434   : > { %3227 = vst.msk [vmem:[#allocation2 + $0xe4] sm:$0xf] %vm3198_vm14, %v3159_v56 }
 0x435   : > { %v4182_v18 = vpack.c.bf16 %v3810_v39, %v3810_v39  ;;  %v2568_v20 = vpop.permute.xlu1 %2567  ;;  %v3244_v10 = vld [vmem:[#allocation2 + $0x68] sm:$0xff] }
 0x436   : > { %2649 = vst.msk [vmem:[#allocation2 + $0x7c] sm:$0xf] %vm2633_vm9, %v2568_v20 }
 0x437   : > { %3971 = vst.msk [vmem:[%s7101_s18 + $0x4c] sm:$0xf] %vm3951_vm3, %v4182_v18  ;;  %v2566_v55 = vpop.permute.xlu0 %2565  ;;  %v4291_v49 = vld [vmem:[#allocation2 + $0xf0] ss:$8 sps:$4 sm:$0xff]  }
 0x438   : > { %v3243_v30 = vld [vmem:[#allocation2 + $0x60] sm:$0xff]  ;;  %2648 = vst.msk [vmem:[#allocation2 + $0x74] sm:$0xf] %vm2633_vm9, %v2566_v55 }
 0x439   : > { %v4282_v41 = vld [vmem:[#allocation2 + $0x64] ss:$8 sps:$4 sm:$0xff]   ;;  %v4078_v57 = vcombine.low %v3243_v30, %v3244_v10  ;;  %v2600_v35 = vpop.permute.xlu1 %2599 }
 0x43a   : > { %4116 = vmatprep.mubr.msk.bf16.mxu0 %vm3503_vm15, %v4282_v41  ;;  %v3260_v29 = vld [vmem:[#allocation2 + $0xe8] sm:$0xff]  ;;  %2665 = vst.msk [vmem:[#allocation2 + $0xfc] sm:$0xf] %vm2633_vm9, %v2600_v35 }
 0x43b   : > { %3633 = vmatmul.mubr.bf16.gmra.mxu0 %v4078_v57  ;;  %v2598_v16 = vpop.permute.xlu0 %2597  ;;  %v3259_v34 = vld [vmem:[#allocation2 + $0xe0] sm:$0xff] }
 0x43c   : > { %v4284_v0 = vld [vmem:[#allocation2 + $0xe4] ss:$8 sps:$4 sm:$0xff]   ;;  %2664 = vst.msk [vmem:[#allocation2 + $0xf4] sm:$0xf] %vm2633_vm9, %v2598_v16  ;;  %v4094_v63 = vcombine.low %v3259_v34, %v3260_v29 }
 0x43d   : > { %4124 = vmatprep.mubr.msk.bf16.mxu1 %vm3503_vm15, %v4284_v0  ;;  %v2699_v32 = vpop.permute.xlu1 %2698 }
 0x43e   : > { %3697 = vmatmul.mubr.bf16.gmra.mxu1 %v4094_v63  ;;  %2780 = vst.msk [vmem:[#allocation2 + $0x7c] sm:$0xf] %vm2764_vm11, %v2699_v32 }
 0x43f   : > { %v2697_v15 = vpop.permute.xlu0 %2696 }
 0x440   : > { %2779 = vst.msk [vmem:[#allocation2 + $0x74] sm:$0xf] %vm2764_vm11, %v2697_v15 }
 0x441   : > { %v2731_v24 = vpop.permute.xlu1 %2730 }
 0x442   : > { %2796 = vst.msk [vmem:[#allocation2 + $0xfc] sm:$0xf] %vm2764_vm11, %v2731_v24 }
 0x443   : > { %v2729_v51 = vpop.permute.xlu0 %2728 }
 0x444   : > { %2795 = vst.msk [vmem:[#allocation2 + $0xf4] sm:$0xf] %vm2764_vm11, %v2729_v51 }
 0x445   : > { %v2852_v47 = vpop.permute.xlu1 %2851 }
 0x446   : > { %2933 = vst.msk [vmem:[#allocation2 + $0x7c] sm:$0xf] %vm2917_vm12, %v2852_v47 }
 0x447   : > { %v2850_v23 = vpop.permute.xlu0 %2849 }
 0x448   : > { %2932 = vst.msk [vmem:[#allocation2 + $0x74] sm:$0xf] %vm2917_vm12, %v2850_v23 }
 0x449   : > { %v2884_v58 = vpop.permute.xlu1 %2883 }
 0x44a   : > { %2949 = vst.msk [vmem:[#allocation2 + $0xfc] sm:$0xf] %vm2917_vm12, %v2884_v58 }
 0x44b   : > { %v2882_v17 = vpop.permute.xlu0 %2881 }
 0x44c   : > { %2948 = vst.msk [vmem:[#allocation2 + $0xf4] sm:$0xf] %vm2917_vm12, %v2882_v17 }
 0x44d   : > { %v2989_v2 = vpop.permute.xlu1 %2988 }
 0x44e   : > { %v3602_v43 = vpop.f32.mrf.mxu0  ;;  %3070 = vst.msk [vmem:[#allocation2 + $0x7c] sm:$0xf] %vm3054_vm13, %v2989_v2 }
 0x44f   : > { %v2987_v45 = vpop.permute.xlu0 %2986  ;;  %v3724_v59 = vmul.f32 %v7080_v33, %v3602_v43 }
 0x450   : > { %3069 = vst.msk [vmem:[#allocation2 + $0x74] sm:$0xf] %vm3054_vm13, %v2987_v45  ;;  %v3604_v46 = vpop.f32.mrf.mxu0 }
 0x451   : > { %v3763_v21 = vadd.f32 %v7085_v50, %v3724_v59  ;;  %v3021_v6 = vpop.permute.xlu1 %3020 }
 0x452   : > { %v3666_v31 = vpop.f32.mrf.mxu1  ;;  %3086 = vst.msk [vmem:[#allocation2 + $0xfc] sm:$0xf] %vm3054_vm13, %v3021_v6  ;;  %v3605_v5 = vpop.f32.mrf.mxu0 }
 0x453   : > { %v3795_v1 = vmax.f32 %v3763_v21, 0.0  ;;  %v3740_v40 = vmul.f32 %v7080_v33, %v3666_v31  ;;  %v3019_v42 = vpop.permute.xlu0 %3018  ;;  %v3725_v4 = vmul.f32 %v7080_v33, %v3605_v5 }
 0x454   : > { %3085 = vst.msk [vmem:[#allocation2 + $0xf4] sm:$0xf] %vm3054_vm13, %v3019_v42  ;;  %v3668_v25 = vpop.f32.mrf.mxu1  ;;  %v3607_v26 = vpop.f32.mrf.mxu0 }
 0x455   : > { %v4167_v48 = vpack.c.bf16 %v3795_v1, %v3795_v1  ;;  %v3779_v22 = vadd.f32 %v7085_v50, %v3740_v40  ;;  %v3764_v12 = vadd.f32 %v7085_v50, %v3725_v4  ;;  %v3133_v60 = vpop.permute.xlu1 %3132 }
 0x456   : > { %v3669_v28 = vpop.f32.mrf.mxu1  ;;  %3214 = vst.msk [vmem:[#allocation2 + $0x7c] sm:$0xf] %vm3198_vm14, %v3133_v60 }
 0x457   : > { %3956 = vst.msk [vmem:[%s7101_s18 + $0x10] sm:$0xf] %vm3951_vm3, %v4167_v48  ;;  %v3811_v9 = vmax.f32 %v3779_v22, 0.0  ;;  %v3741_v36 = vmul.f32 %v7080_v33, %v3669_v28  ;;  %v3131_v37 = vpop.permute.xlu0 %3130  ;;  %v3796_v62 = vmax.f32 %v3764_v12, 0.0 }
 0x458   : > { %3213 = vst.msk [vmem:[#allocation2 + $0x74] sm:$0xf] %vm3198_vm14, %v3131_v37  ;;  %v3671_v11 = vpop.f32.mrf.mxu1 }
 0x459   : > { %v4183_v61 = vpack.c.bf16 %v3811_v9, %v3811_v9  ;;  %v3780_v8 = vadd.f32 %v7085_v50, %v3741_v36  ;;  %v4168_v52 = vpack.c.bf16 %v3796_v62, %v3796_v62  ;;  %v3165_v44 = vpop.permute.xlu1 %3164 }
 0x45a   : > { %3230 = vst.msk [vmem:[#allocation2 + $0xfc] sm:$0xf] %vm3198_vm14, %v3165_v44 }
 0x45b   : > { %3972 = vst.msk [vmem:[%s7101_s18 + $0x50] sm:$0xf] %vm3951_vm3, %v4183_v61  ;;  %v3812_v54 = vmax.f32 %v3780_v8, 0.0  ;;  %v3163_v53 = vpop.permute.xlu0 %3162  ;;  %3957 = vst.msk [vmem:[%s7101_s18 + $0x14] sm:$0xf] %vm3951_vm3, %v4168_v52 }
 0x45c   : > { %3229 = vst.msk [vmem:[#allocation2 + $0xf4] sm:$0xf] %vm3198_vm14, %v3163_v53 }
 0x45d   : > { %v4184_v13 = vpack.c.bf16 %v3812_v54, %v3812_v54 }
 0x45f   : > { %3973 = vst.msk [vmem:[%s7101_s18 + $0x54] sm:$0xf] %vm3951_vm3, %v4184_v13  ;;  %v4286_v7 = vld [vmem:[#allocation2 + $0x74] ss:$8 sps:$4 sm:$0xff]  }
 0x460   : > { %4117 = vmatprep.mubr.msk.bf16.mxu0 %vm3503_vm15, %v4286_v7 }
 0x461   : > { %3641 = vmatmul.mubr.bf16.gmra.mxu0 %v4288_v3 }
 0x463   : > { %v4289_v38 = vld [vmem:[#allocation2 + $0xf4] ss:$8 sps:$4 sm:$0xff]  }
 0x464   : > { %4125 = vmatprep.mubr.msk.bf16.mxu1 %vm3503_vm15, %v4289_v38 }
 0x465   : > { %3705 = vmatmul.mubr.bf16.gmra.mxu1 %v4291_v49 }
 0x476   : > { %v3610_v19 = vpop.f32.mrf.mxu0 }
 0x477   : > { %v3726_v14 = vmul.f32 %v7080_v33, %v3610_v19 }
 0x478   : > { %v3612_v27 = vpop.f32.mrf.mxu0 }
 0x479   : > { %v3765_v39 = vadd.f32 %v7085_v50, %v3726_v14 }
 0x47a   : > { %v3613_v56 = vpop.f32.mrf.mxu0  ;;  %v3674_v18 = vpop.f32.mrf.mxu1 }
 0x47b   : > { %v3797_v20 = vmax.f32 %v3765_v39, 0.0  ;;  %v3727_v10 = vmul.f32 %v7080_v33, %v3613_v56  ;;  %v3742_v55 = vmul.f32 %v7080_v33, %v3674_v18 }
 0x47c   : > { %v3615_v30 = vpop.f32.mrf.mxu0  ;;  %v3676_v41 = vpop.f32.mrf.mxu1 }
 0x47d   : > { %v4169_v57 = vpack.c.bf16 %v3797_v20, %v3797_v20  ;;  %v3766_v35 = vadd.f32 %v7085_v50, %v3727_v10  ;;  %v3781_v29 = vadd.f32 %v7085_v50, %v3742_v55 }
 0x47e   : > { %v3677_v16 = vpop.f32.mrf.mxu1 }
 0x47f   : > { %3958 = vst.msk [vmem:[%s7101_s18 + $0x18] sm:$0xf] %vm3951_vm3, %v4169_v57  ;;  %v3798_v34 = vmax.f32 %v3766_v35, 0.0  ;;  %v3813_v0 = vmax.f32 %v3781_v29, 0.0  ;;  %v3743_v63 = vmul.f32 %v7080_v33, %v3677_v16 }
 0x480   : > { %v3679_v32 = vpop.f32.mrf.mxu1 }
 0x481   : > { %v4170_v15 = vpack.c.bf16 %v3798_v34, %v3798_v34  ;;  %v4185_v24 = vpack.c.bf16 %v3813_v0, %v3813_v0  ;;  %v3782_v51 = vadd.f32 %v7085_v50, %v3743_v63 }
 0x483   : > { %3959 = vst.msk [vmem:[%s7101_s18 + $0x1c] sm:$0xf] %vm3951_vm3, %v4170_v15  ;;  %3974 = vst.msk [vmem:[%s7101_s18 + $0x58] sm:$0xf] %vm3951_vm3, %v4185_v24  ;;  %v3814_v47 = vmax.f32 %v3782_v51, 0.0 }
 0x485   : > { %v4186_v23 = vpack.c.bf16 %v3814_v47, %v3814_v47 }
 0x487   : > { %3975 = vst.msk [vmem:[%s7101_s18 + $0x5c] sm:$0xf] %vm3951_vm3, %v4186_v23 }
 0x4a2   : > { %v3618_v58 = vpop.f32.mrf.mxu0 }
 0x4a3   : > { %v3728_v17 = vmul.f32 %v7080_v33, %v3618_v58 }
 0x4a4   : > { %v3620_v2 = vpop.f32.mrf.mxu0 }
 0x4a5   : > { %v3767_v43 = vadd.f32 %v7085_v50, %v3728_v17 }
 0x4a6   : > { %v3621_v45 = vpop.f32.mrf.mxu0  ;;  %v3682_v59 = vpop.f32.mrf.mxu1 }
 0x4a7   : > { %v3799_v46 = vmax.f32 %v3767_v43, 0.0  ;;  %v3729_v21 = vmul.f32 %v7080_v33, %v3621_v45  ;;  %v3744_v6 = vmul.f32 %v7080_v33, %v3682_v59 }
 0x4a8   : > { %v3623_v31 = vpop.f32.mrf.mxu0  ;;  %v3684_v1 = vpop.f32.mrf.mxu1 }
 0x4a9   : > { %v4171_v40 = vpack.c.bf16 %v3799_v46, %v3799_v46  ;;  %v3768_v42 = vadd.f32 %v7085_v50, %v3729_v21  ;;  %v3783_v5 = vadd.f32 %v7085_v50, %v3744_v6 }
 0x4aa   : > { %v3685_v4 = vpop.f32.mrf.mxu1 }
 0x4ab   : > { %3960 = vst.msk [vmem:[%s7101_s18 + $0x20] sm:$0xf] %vm3951_vm3, %v4171_v40  ;;  %v3800_v25 = vmax.f32 %v3768_v42, 0.0  ;;  %v3815_v48 = vmax.f32 %v3783_v5, 0.0  ;;  %v3745_v22 = vmul.f32 %v7080_v33, %v3685_v4 }
 0x4ac   : > { %v3687_v26 = vpop.f32.mrf.mxu1 }
 0x4ad   : > { %v4172_v12 = vpack.c.bf16 %v3800_v25, %v3800_v25  ;;  %v4187_v60 = vpack.c.bf16 %v3815_v48, %v3815_v48  ;;  %v3784_v28 = vadd.f32 %v7085_v50, %v3745_v22 }
 0x4af   : > { %3961 = vst.msk [vmem:[%s7101_s18 + $0x24] sm:$0xf] %vm3951_vm3, %v4172_v12  ;;  %3976 = vst.msk [vmem:[%s7101_s18 + $0x60] sm:$0xf] %vm3951_vm3, %v4187_v60  ;;  %v3816_v9 = vmax.f32 %v3784_v28, 0.0 }
 0x4b1   : > { %v4188_v36 = vpack.c.bf16 %v3816_v9, %v3816_v9 }
 0x4b3   : > { %3977 = vst.msk [vmem:[%s7101_s18 + $0x64] sm:$0xf] %vm3951_vm3, %v4188_v36 }
 0x4ce   : > { %v3626_v37 = vpop.f32.mrf.mxu0 }
 0x4cf   : > { %v3730_v62 = vmul.f32 %v7080_v33, %v3626_v37 }
 0x4d0   : > { %v3628_v11 = vpop.f32.mrf.mxu0 }
 0x4d1   : > { %v3769_v61 = vadd.f32 %v7085_v50, %v3730_v62 }
 0x4d2   : > { %v3629_v8 = vpop.f32.mrf.mxu0  ;;  %v3690_v52 = vpop.f32.mrf.mxu1 }
 0x4d3   : > { %v3801_v44 = vmax.f32 %v3769_v61, 0.0  ;;  %v3731_v54 = vmul.f32 %v7080_v33, %v3629_v8  ;;  %v3746_v53 = vmul.f32 %v7080_v33, %v3690_v52 }
 0x4d4   : > { %v3631_v13 = vpop.f32.mrf.mxu0  ;;  %v3692_v7 = vpop.f32.mrf.mxu1 }
 0x4d5   : > { %v4173_v3 = vpack.c.bf16 %v3801_v44, %v3801_v44  ;;  %v3770_v38 = vadd.f32 %v7085_v50, %v3731_v54  ;;  %v3785_v49 = vadd.f32 %v7085_v50, %v3746_v53 }
 0x4d6   : > { %v3693_v19 = vpop.f32.mrf.mxu1 }
 0x4d7   : > { %3962 = vst.msk [vmem:[%s7101_s18 + $0x28] sm:$0xf] %vm3951_vm3, %v4173_v3  ;;  %v3802_v14 = vmax.f32 %v3770_v38, 0.0  ;;  %v3817_v27 = vmax.f32 %v3785_v49, 0.0  ;;  %v3747_v39 = vmul.f32 %v7080_v33, %v3693_v19 }
 0x4d8   : > { %v3695_v56 = vpop.f32.mrf.mxu1 }
 0x4d9   : > { %v4174_v18 = vpack.c.bf16 %v3802_v14, %v3802_v14  ;;  %v4189_v20 = vpack.c.bf16 %v3817_v27, %v3817_v27  ;;  %v3786_v10 = vadd.f32 %v7085_v50, %v3747_v39 }
 0x4db   : > { %3963 = vst.msk [vmem:[%s7101_s18 + $0x2c] sm:$0xf] %vm3951_vm3, %v4174_v18  ;;  %3978 = vst.msk [vmem:[%s7101_s18 + $0x68] sm:$0xf] %vm3951_vm3, %v4189_v20  ;;  %v3818_v55 = vmax.f32 %v3786_v10, 0.0 }
 0x4dd   : > { %v4190_v30 = vpack.c.bf16 %v3818_v55, %v3818_v55 }
 0x4df   : > { %3979 = vst.msk [vmem:[%s7101_s18 + $0x6c] sm:$0xf] %vm3951_vm3, %v4190_v30 }
 0x4fb   : > { %v3634_v41 = vpop.f32.mrf.mxu0 }
 0x4fc   : > { %v3732_v57 = vmul.f32 %v7080_v33, %v3634_v41 }
 0x4fd   : > { %v3636_v35 = vpop.f32.mrf.mxu0 }
 0x4fe   : > { %v3771_v29 = vadd.f32 %v7085_v50, %v3732_v57  ;;  %v3698_v34 = vpop.f32.mrf.mxu1 }
 0x4ff   : > { %v3637_v16 = vpop.f32.mrf.mxu0  ;;  %v3748_v32 = vmul.f32 %v7080_v33, %v3698_v34 }
 0x500   : > { %v3803_v0 = vmax.f32 %v3771_v29, 0.0  ;;  %v3733_v63 = vmul.f32 %v7080_v33, %v3637_v16  ;;  %v3700_v24 = vpop.f32.mrf.mxu1 }
 0x501   : > { %v3639_v15 = vpop.f32.mrf.mxu0  ;;  %v3787_v23 = vadd.f32 %v7085_v50, %v3748_v32 }
 0x502   : > { %v4175_v51 = vpack.c.bf16 %v3803_v0, %v3803_v0  ;;  %v3772_v47 = vadd.f32 %v7085_v50, %v3733_v63  ;;  %v3701_v58 = vpop.f32.mrf.mxu1 }
 0x503   : > { %v3819_v2 = vmax.f32 %v3787_v23, 0.0  ;;  %v3749_v43 = vmul.f32 %v7080_v33, %v3701_v58 }
 0x504   : > { %3964 = vst.msk [vmem:[%s7101_s18 + $0x30] sm:$0xf] %vm3951_vm3, %v4175_v51  ;;  %v3804_v17 = vmax.f32 %v3772_v47, 0.0  ;;  %v3703_v45 = vpop.f32.mrf.mxu1 }
 0x505   : > { %v4191_v46 = vpack.c.bf16 %v3819_v2, %v3819_v2  ;;  %v3788_v21 = vadd.f32 %v7085_v50, %v3749_v43 }
 0x506   : > { %v4176_v59 = vpack.c.bf16 %v3804_v17, %v3804_v17 }
 0x507   : > { %3980 = vst.msk [vmem:[%s7101_s18 + $0x70] sm:$0xf] %vm3951_vm3, %v4191_v46  ;;  %v3820_v6 = vmax.f32 %v3788_v21, 0.0 }
 0x508   : > { %3965 = vst.msk [vmem:[%s7101_s18 + $0x34] sm:$0xf] %vm3951_vm3, %v4176_v59 }
 0x509   : > { %v4192_v31 = vpack.c.bf16 %v3820_v6, %v3820_v6 }
 0x50b   : > { %3981 = vst.msk [vmem:[%s7101_s18 + $0x74] sm:$0xf] %vm3951_vm3, %v4192_v31 }
 0x521   : > { %v3642_v1 = vpop.f32.mrf.mxu0 }
 0x522   : > { %v3734_v40 = vmul.f32 %v7080_v33, %v3642_v1 }
 0x523   : > { %v3644_v42 = vpop.f32.mrf.mxu0 }
 0x524   : > { %v3773_v5 = vadd.f32 %v7085_v50, %v3734_v40 }
 0x525   : > { %v3645_v4 = vpop.f32.mrf.mxu0  ;;  %v3706_v25 = vpop.f32.mrf.mxu1 }
 0x526   : > { %v3805_v48 = vmax.f32 %v3773_v5, 0.0  ;;  %v3735_v22 = vmul.f32 %v7080_v33, %v3645_v4  ;;  %v3750_v26 = vmul.f32 %v7080_v33, %v3706_v25 }
 0x527   : > { %v3647_v12 = vpop.f32.mrf.mxu0  ;;  %v3708_v60 = vpop.f32.mrf.mxu1 }
 0x528   : > { %v4177_v28 = vpack.c.bf16 %v3805_v48, %v3805_v48  ;;  %v3774_v9 = vadd.f32 %v7085_v50, %v3735_v22  ;;  %v3789_v36 = vadd.f32 %v7085_v50, %v3750_v26 }
 0x529   : > { %v3709_v37 = vpop.f32.mrf.mxu1 }
 0x52a   : > { %3966 = vst.msk [vmem:[%s7101_s18 + $0x38] sm:$0xf] %vm3951_vm3, %v4177_v28  ;;  %v3806_v62 = vmax.f32 %v3774_v9, 0.0  ;;  %v3821_v11 = vmax.f32 %v3789_v36, 0.0  ;;  %v3751_v61 = vmul.f32 %v7080_v33, %v3709_v37 }
 0x52b   : > { %v3711_v8 = vpop.f32.mrf.mxu1 }
 0x52c   : > { %v4178_v52 = vpack.c.bf16 %v3806_v62, %v3806_v62  ;;  %v4193_v44 = vpack.c.bf16 %v3821_v11, %v3821_v11  ;;  %v3790_v54 = vadd.f32 %v7085_v50, %v3751_v61 }
 0x52e   : > { %3967 = vst.msk [vmem:[%s7101_s18 + $0x3c] sm:$0xf] %vm3951_vm3, %v4178_v52  ;;  %3982 = vst.msk [vmem:[%s7101_s18 + $0x78] sm:$0xf] %vm3951_vm3, %v4193_v44  ;;  %v3822_v53 = vmax.f32 %v3790_v54, 0.0 }
 0x530   : > { %v4194_v13 = vpack.c.bf16 %v3822_v53, %v3822_v53 }
 0x532   : > { %3983 = vst.msk [vmem:[%s7101_s18 + $0x7c] sm:$0xf] %vm3951_vm3, %v4194_v13 }
 0x533 PF: > { %s14_s15 = sadd.s32 1, %s4304_s15  }
 0x534   : > { %p11_p4 = scmp.ge.s32.totalorder %s14_s15, 4  }
 0x536   :  { %13 = sbr.rel (!%p11_p4) target bundleno = 1 (0x1), region = 66 }

// kernel: _lambda_.6
= control target key start
LH: loop header
LB: loop body
LE: loop exit
PB: predicated region body
PF: predicated region fallthrough
CT: control target
= control target key end

     0   :  { %s1385_s25 = smov 0   ;;  %s1550_s0 = inlined_call_operand.vmem [shape: bf16[2,16,128], index: 0, kind: input, shape index: {}]   ;;  %s1551_s1 = inlined_call_operand.vmem [shape: bf16[128,64], index: 1, kind: input, shape index: {}]   ;;  %s1552_s2 = inlined_call_operand.vmem [shape: bf16[256,16], index: 2, kind: input, shape index: {}]   ;;  %s1553_s3 = inlined_call_operand.vmem [shape: bf16[16,64], index: 3, kind: input, shape index: {}]   ;;  %s1554_s4 = inlined_call_operand.vmem [shape: bf16[32,64], index: 4, kind: input, shape index: {}]   ;;  %s1555_s5 = inlined_call_operand.vmem [shape: f32[1,64], index: 5, kind: input, shape index: {}]   ;;  %s1556_s6 = inlined_call_operand.vmem [shape: f32[1,64], index: 6, kind: input, shape index: {}]   ;;  %s1557_s7 = inlined_call_operand.vmem [shape: f32[1,16], index: 7, kind: input, shape index: {}]   ;;  %s1558_s8 = inlined_call_operand.vmem [shape: f32[1,16], index: 8, kind: input, shape index: {}]   ;;  %s1559_s9 = inlined_call_operand.vmem [shape: f32[1,64], index: 9, kind: input, shape index: {}]   ;;  %s1560_s10 = inlined_call_operand.vmem [shape: f32[1,64], index: 10, kind: input, shape index: {}]   ;;  %s1561_s11 = inlined_call_operand.vmem [shape: f32[1,64], index: 11, kind: input, shape index: {}]   ;;  %s1562_s12 = inlined_call_operand.vmem [shape: f32[1,64], index: 12, kind: input, shape index: {}]   ;;  %s1563_s13 = inlined_call_operand.vmem [shape: bf16[2,16,64], index: 13, kind: output, shape index: {}]  }
   0x1 LB: > { %s1111_s26 = sadd.s32 4294967295, %s1310_s25   ;;  %p1115_p0 = scmp.ge.s32.totalorder %s1310_s25, 1  ;;  %s1310_s25 = sphi %s1385_s25, %s23_s25  }
   0x2   : > { %p387_p1 = scmp.lt.s32.totalorder %s1310_s25, 3 }
   0x4   : > { %p388_p2 = pnand %p1115_p0, %p387_p1 }
   0x5   : > { %p431_p3 = scmp.lt.s32.totalorder (!%p388_p2), %s1111_s26, 1  ;;  %s1314_s24 = smov (!%p388_p2), 64  }
   0x6   : > { %391 = sbr.rel (%p388_p2) target bundleno = 800 (0x320), region = 72 }
   0xb   : > { %v1265_v0 = vld [vmem:[%s1551_s1 + $0x38] sm:$0xff]   ;;  %v1312_v1 = vmov 0.0   ;;  %v1266_v2 = vld [vmem:[%s1551_s1 + $0x30] sm:$0xff]   ;;  %vm1313_vm0 = vmmov 0   ;;  %s1565_s26 = smov (!%p431_p3, %s1111_s26), 1  ;;  %v1267_v3 = vld [vmem:[%s1551_s1 + $0x28] sm:$0xff]  }
   0xc   : > { %1220 = vmatprep.subr.bf16.mxu0 %v1312_v1  ;;  %1236 = vmatprep.mubr.msk.bf16.mxu0 %vm1313_vm0, %v1312_v1  ;;  %s1172_s16 = sshll.u32 %s1565_s26, 3  ;;  %v1268_v4 = vld [vmem:[%s1551_s1 + $0x20] sm:$0xff]   ;;  %v1269_v5 = vld [vmem:[%s1551_s1 + $0x18] sm:$0xff]   ;;  %v1270_v6 = vld [vmem:[%s1551_s1 + $0x10] sm:$0xff]   ;;  %vm575_vm1 = vcmask 520192   ;;  %vm588_vm2 = vcmask 519168  }
   0xd   : > { %1221 = vmatpush3.bf16.msra.mxu0 %v1265_v0  ;;  %s435_s19 = scalar_lea.vmem %s1550_s0, %s1172_s16  ;;  %v1271_v7 = vld [vmem:[%s1551_s1 + $0x8] sm:$0xff]   ;;  %v1272_v8 = vld [vmem:[%s1551_s1] sm:$0xff]   ;;  %576 = vst.msk [vmem:[#allocation2] sm:$0x1f] %vm575_vm1, %v1312_v1  ;;  %577 = vst.msk [vmem:[#allocation2 + $0x8] sm:$0x1f] %vm575_vm1, %v1312_v1  ;;  %s440_s17 = scalar_lea.vmem %s1563_s13, %s1172_s16 }
   0xe   : > { %1222 = vmatprep.subr.bf16.mxu0 %v1312_v1  ;;  %v1435_v9 = vld [vmem:[%s435_s19] sm:$0xff]   ;;  %578 = vst.msk [vmem:[#allocation2 + $0x10] sm:$0x1f] %vm575_vm1, %v1312_v1  ;;  %579 = vst.msk [vmem:[#allocation2 + $0x18] sm:$0x1f] %vm575_vm1, %v1312_v1  ;;  %v1278_v10 = vld [vmem:[%s1552_s2 + $0x78] sm:$0xff]  }
   0xf   : > { %580 = vst.msk [vmem:[#allocation2 + $0x20] sm:$0x1f] %vm575_vm1, %v1312_v1  ;;  %v1279_v11 = vld [vmem:[%s1552_s2 + $0x38] sm:$0xff]   ;;  %v1280_v12 = vld [vmem:[%s1552_s2 + $0x70] sm:$0xff]   ;;  %1193 = vmatprep.subr.bf16.mxu1 %v1278_v10  ;;  %v1282_v14 = vld [vmem:[%s1552_s2 + $0x68] sm:$0xff]   ;;  %vm639_vm3 = vcmask 1043968  }
  0x10   : > { %1194 = vmatpush3.bf16.msra.mxu1 %v1279_v11  ;;  %v1281_v13 = vld [vmem:[%s1552_s2 + $0x30] sm:$0xff]   ;;  %v1283_v15 = vld [vmem:[%s1552_s2 + $0x28] sm:$0xff]   ;;  %v1284_v16 = vld [vmem:[%s1552_s2 + $0x60] sm:$0xff]   ;;  %vm979_vm4 = vcmask 261120   ;;  %vm900_vm5 = vcmask 130048  }
  0x11   : > { %1223 = vmatpush3.bf16.msra.mxu0 %v1266_v2  ;;  %1195 = vmatprep.subr.bf16.mxu1 %v1280_v12  ;;  %v1285_v17 = vld [vmem:[%s1552_s2 + $0x20] sm:$0xff]   ;;  %v1287_v25 = vld [vmem:[%s1552_s2 + $0x58] sm:$0xff]   ;;  %v1291_v32 = vld [vmem:[%s1552_s2 + $0x50] sm:$0xff]  }
  0x12   : > { %1224 = vmatprep.subr.bf16.mxu0 %v1312_v1  ;;  %v1129_v18 = vld [vmem:[%s1555_s5] ss:$0 sm:$0xff]  ;;  %v1289_v28 = vld [vmem:[%s1552_s2 + $0x18] sm:$0xff]   ;;  %v1293_v34 = vld [vmem:[%s1552_s2 + $0x10] sm:$0xff]  }
  0x13   : > { %v1130_v20 = vld [vmem:[%s1556_s6] ss:$0 sm:$0xff]  ;;  %v1294_v36 = vld [vmem:[%s1552_s2 + $0x48] sm:$0xff]  }
  0x14   : > { %1196 = vmatpush3.bf16.msra.mxu1 %v1281_v13  ;;  %v1295_v37 = vld [vmem:[%s1552_s2 + $0x8] sm:$0xff]   ;;  %v1296_v38 = vld [vmem:[%s1552_s2 + $0x40] sm:$0xff]  }
  0x15   : > { %1225 = vmatpush3.bf16.msra.mxu0 %v1267_v3  ;;  %1197 = vmatprep.subr.bf16.mxu1 %v1282_v14  ;;  %v1297_v39 = vld [vmem:[%s1552_s2] sm:$0xff]   ;;  %v1301_v62 = vld [vmem:[%s1554_s4 + $0x8] sm:$0xff]  }
  0x16   : > { %1226 = vmatprep.subr.bf16.mxu0 %v1312_v1  ;;  %v1302_v63 = vld [vmem:[%s1554_s4] sm:$0xff]  }
  0x17   : > { %v1303_v0 = vld [vmem:[%s1553_s3] sm:$0xff]  }
  0x18   : > { %1198 = vmatpush3.bf16.msra.mxu1 %v1283_v15 }
  0x19   : > { %1227 = vmatpush3.bf16.msra.mxu0 %v1268_v4  ;;  %1199 = vmatprep.subr.bf16.mxu1 %v1284_v16  ;;  %v1157_v4 = vld [vmem:[%s1557_s7] ss:$0 sm:$0xff] }
  0x1a   : > { %1228 = vmatprep.subr.bf16.mxu0 %v1312_v1 }
  0x1c   : > { %1200 = vmatpush3.bf16.msra.mxu1 %v1285_v17 }
  0x1d   : > { %1229 = vmatpush3.bf16.msra.mxu0 %v1269_v5  ;;  %1201 = vmatprep.subr.bf16.mxu1 %v1287_v25  ;;  %v1162_v25 = vld [vmem:[%s1560_s10] ss:$0 sm:$0xff] }
  0x1e   : > { %1230 = vmatprep.subr.bf16.mxu0 %v1312_v1 }
  0x20   : > { %1202 = vmatpush3.bf16.msra.mxu1 %v1289_v28 }
  0x21   : > { %1231 = vmatpush3.bf16.msra.mxu0 %v1270_v6  ;;  %1203 = vmatprep.subr.bf16.mxu1 %v1291_v32 }
  0x22   : > { %1232 = vmatprep.subr.bf16.mxu0 %v1312_v1 }
  0x24   : > { %1204 = vmatpush3.bf16.msra.mxu1 %v1293_v34 }
  0x25   : > { %1233 = vmatpush3.bf16.msra.mxu0 %v1271_v7  ;;  %1205 = vmatprep.subr.bf16.mxu1 %v1294_v36  ;;  %v1158_v7 = vld [vmem:[%s1558_s8] ss:$0 sm:$0xff] }
  0x26   : > { %1234 = vmatprep.subr.bf16.mxu0 %v1312_v1 }
  0x28   : > { %1206 = vmatpush3.bf16.msra.mxu1 %v1295_v37 }
  0x29   : > { %1235 = vmatpush3.bf16.msra.mxu0 %v1272_v8  ;;  %1207 = vmatprep.subr.bf16.mxu1 %v1296_v38 }
  0x2a   : > { %1240 = vmatprep.subr.bf16.mxu0 %v1312_v1 }
  0x2c   : > { %1237 = vmatmul.mubr.bf16.vlgmr.msra.gmra.mxu0 %v1435_v9  ;;  %1208 = vmatpush3.bf16.msra.mxu1 %v1297_v39 }
  0x2d   : > { %1242 = vmatprep.mubr.msk.bf16.mxu0 %vm1313_vm0, %v1312_v1  ;;  %1246 = vmatprep.subr.bf16.mxu1 %v1312_v1 }
  0x2e   : > { %1241 = vmatpush3.bf16.msra.mxu0 %v1303_v0 }
  0xec   : > { %v548_v19 = vpop.f32.mrf.mxu0 }
  0xed   : > { %v562_v21 = vmul.f32 %v1129_v18, %v548_v19 }
  0xee   : > { %v1238_v22 = vpop.f32.mrf.mxu0 }
  0xef   : > { %v571_v23 = vadd.f32 %v1130_v20, %v562_v21  ;;  %v1167_v22 = vld [vmem:[%s1562_s12] ss:$0 sm:$0xff] }
  0xf0   : > { %v551_v24 = vpop.f32.mrf.mxu0 }
  0xf1   : > { %v573_v26 = vmax.f32 %v571_v23, 0.0  ;;  %v563_v27 = vmul.f32 %v1129_v18, %v551_v24  ;;  %v1161_v23 = vld [vmem:[%s1559_s9] ss:$0 sm:$0xff] }
  0xf2   : > { %v1239_v29 = vpop.f32.mrf.mxu0 }
  0xf3   : > { %v583_v30 = vcombine.high %v573_v26, %v573_v26  ;;  %589 = vst.msk [vmem:[#allocation2 + $0x9] sm:$0xf] %vm588_vm2, %v573_v26  ;;  %v572_v31 = vadd.f32 %v1130_v20, %v563_v27  ;;  %v1166_v20 = vld [vmem:[%s1561_s11] ss:$0 sm:$0xff] }
  0xf5   : > { %590 = vst.msk [vmem:[#allocation2 + $0x11] sm:$0xf] %vm588_vm2, %v583_v30  ;;  %v574_v33 = vmax.f32 %v572_v31, 0.0 }
  0xf7   : > { %v584_v35 = vcombine.high %v574_v33, %v574_v33  ;;  %591 = vst.msk [vmem:[#allocation2 + $0x19] sm:$0xf] %vm588_vm2, %v574_v33 }
  0xf9   : > { %592 = vst.msk [vmem:[#allocation2 + $0x21] sm:$0xf] %vm588_vm2, %v584_v35 }
  0xfa   : > { %v1274_v40 = vld [vmem:[#allocation2 + $0x1] ss:$8 sps:$4 sm:$0xff]  }
  0xfb   : > { %v1286_v41 = vld [vmem:[#allocation2] ss:$8 sps:$4 sm:$0xff]   ;;  %v1176_v42 = vpack.c.bf16 %v1274_v40, %v1274_v40 }
  0xfc   : > { %v1275_v43 = vld [vmem:[#allocation2 + $0x9] ss:$8 sps:$4 sm:$0xff]   ;;  %v1174_v44 = vpack.c.bf16 %v1286_v41, %v1286_v41 }
  0xfd   : > { %v1288_v45 = vld [vmem:[#allocation2 + $0x8] ss:$8 sps:$4 sm:$0xff]   ;;  %633 = vrot.lane.b32.xlu0 %v1176_v42, %s1314_s24  ;;  %v1180_v46 = vpack.c.bf16 %v1275_v43, %v1275_v43 }
  0xfe   : > { %v1276_v47 = vld [vmem:[#allocation2 + $0x11] ss:$8 sps:$4 sm:$0xff]   ;;  %613 = vst.msk [vmem:[#allocation3] sm:$0xf] %vm588_vm2, %v1174_v44  ;;  %v1178_v48 = vpack.c.bf16 %v1288_v45, %v1288_v45 }
  0xff   : > { %v1290_v49 = vld [vmem:[#allocation2 + $0x10] ss:$8 sps:$4 sm:$0xff]   ;;  %682 = vrot.lane.b32.xlu1 %v1180_v46, %s1314_s24  ;;  %v1177_v50 = vpack.c.bf16 %v1276_v47, %v1276_v47 }
 0x100   : > { %v1277_v51 = vld [vmem:[#allocation2 + $0x19] ss:$8 sps:$4 sm:$0xff]   ;;  %662 = vst.msk [vmem:[#allocation3 + $0x4] sm:$0xf] %vm588_vm2, %v1178_v48  ;;  %v1175_v52 = vpack.c.bf16 %v1290_v49, %v1290_v49 }
 0x101   : > { %v1292_v53 = vld [vmem:[#allocation2 + $0x18] ss:$8 sps:$4 sm:$0xff]   ;;  %635 = vrot.lane.b32.xlu0 %v1177_v50, %s1314_s24  ;;  %v1181_v54 = vpack.c.bf16 %v1277_v51, %v1277_v51 }
 0x102   : > { %614 = vst.msk [vmem:[#allocation3 + $0x8] sm:$0xf] %vm588_vm2, %v1175_v52  ;;  %v1179_v55 = vpack.c.bf16 %v1292_v53, %v1292_v53 }
 0x103   : > { %684 = vrot.lane.b32.xlu1 %v1181_v54, %s1314_s24 }
 0x104   : > { %663 = vst.msk [vmem:[#allocation3 + $0xc] sm:$0xf] %vm588_vm2, %v1179_v55 }
 0x16f   : > { %v634_v56 = vpop.permute.xlu0 %633 }
 0x170   : > { %640 = vst.msk [vmem:[#allocation3] sm:$0xf] %vm639_vm3, %v634_v56 }
 0x171   : > { %v683_v57 = vpop.permute.xlu1 %682 }
 0x172   : > { %688 = vst.msk [vmem:[#allocation3 + $0x4] sm:$0xf] %vm639_vm3, %v683_v57 }
 0x173   : > { %v636_v58 = vpop.permute.xlu0 %635 }
 0x174   : > { %641 = vst.msk [vmem:[#allocation3 + $0x8] sm:$0xf] %vm639_vm3, %v636_v58 }
 0x175   : > { %v685_v59 = vpop.permute.xlu1 %684 }
 0x176   : > { %689 = vst.msk [vmem:[#allocation3 + $0xc] sm:$0xf] %vm639_vm3, %v685_v59 }
 0x17b   : > { %v1298_v60 = vld [vmem:[#allocation3] ss:$8 sps:$4 sm:$0xff]  }
 0x17d   : > { %v1300_v61 = vld [vmem:[#allocation3 + $0x4] ss:$8 sps:$4 sm:$0xff]  }
 0x17e   : > { %862 = vmatprep.mubr.bf16.mxu1 %v1300_v61 }
 0x17f   : > { %863 = vmatmul.mubr.bf16.vlgmr.msra.gmra.mxu1 %v1298_v60 }
 0x180   : > { %1250 = vmatprep.mubr.msk.bf16.mxu1 %vm1313_vm0, %v1312_v1  ;;  %1247 = vmatpush3.bf16.msra.mxu1 %v1301_v62 }
 0x181   : > { %1248 = vmatprep.subr.bf16.mxu1 %v1312_v1 }
 0x184   : > { %1249 = vmatpush3.bf16.msra.mxu1 %v1302_v63 }
 0x187   : > { %1251 = vmatmul.mubr.msk.bf16.vlgmr.msra.gmra.mxu1 %vm979_vm4, %v1435_v9 }
 0x23f   : > { %v1209_v2 = vpop.f32.mrf.mxu1 }
 0x241   : > { %v1210_v3 = vpop.f32.mrf.mxu1 }
 0x242   : > { %v1211_v1 = vadd.f32 %v1210_v3, %v1209_v2 }
 0x243   : > { %v1212_v5 = vpop.f32.mrf.mxu1 }
 0x244   : > { %v878_v6 = vmul.f32 %v1211_v1, %v1157_v4 }
 0x245   : > { %v1213_v8 = vpop.f32.mrf.mxu1 }
 0x246   : > { %v1214_v9 = vadd.f32 %v1213_v8, %v1212_v5  ;;  %v887_v10 = vadd.f32 %v1158_v7, %v878_v6 }
 0x247   : > { %v1017_v16 = vpop.f32.mrf.mxu1 }
 0x248   : > { %v879_v11 = vmul.f32 %v1214_v9, %v1157_v4  ;;  %v889_v13 = vmax.f32 %v887_v10, 0.0  ;;  %v1031_v21 = vmul.f32 %v1166_v20, %v1017_v16 }
 0x249   : > { %v1252_v17 = vpop.f32.mrf.mxu1 }
 0x24a   : > { %v888_v12 = vadd.f32 %v1158_v7, %v879_v11  ;;  %v1040_v26 = vadd.f32 %v1167_v22, %v1031_v21 }
 0x24b   : > { %v1020_v18 = vpop.f32.mrf.mxu1 }
 0x24c   : > { %v890_v14 = vmax.f32 %v888_v12, 0.0  ;;  %v1032_v29 = vmul.f32 %v1166_v20, %v1020_v18 }
 0x24d   : > { %v1253_v19 = vpop.f32.mrf.mxu1 }
 0x24e   : > { %v891_v15 = vpack.c.bf16 %v890_v14, %v889_v13  ;;  %v1041_v35 = vadd.f32 %v1167_v22, %v1032_v29 }
 0x250   : > { %1243 = vmatmul.mubr.msk.bf16.vlgmr.msra.gmra.mxu0 %vm900_vm5, %v891_v15 }
 0x310   : > { %v938_v24 = vpop.f32.mrf.mxu0 }
 0x311   : > { %v952_v27 = vmul.f32 %v1161_v23, %v938_v24 }
 0x312   : > { %v1244_v28 = vpop.f32.mrf.mxu0 }
 0x313   : > { %v961_v30 = vadd.f32 %v1162_v25, %v952_v27 }
 0x314   : > { %v941_v31 = vpop.f32.mrf.mxu0 }
 0x315   : > { %v1042_v32 = vadd.f32 %v1040_v26, %v961_v30  ;;  %v953_v33 = vmul.f32 %v1161_v23, %v941_v31 }
 0x316   : > { %v1245_v34 = vpop.f32.mrf.mxu0 }
 0x317   : > { %v1044_v36 = vmax.f32 %v1042_v32, 0.0  ;;  %v962_v37 = vadd.f32 %v1162_v25, %v953_v33 }
 0x319   : > { %v1182_v38 = vpack.c.bf16 %v1044_v36, %v1044_v36  ;;  %v1043_v39 = vadd.f32 %v1041_v35, %v962_v37 }
 0x31b   : > { %1054 = vst.msk [vmem:[%s440_s17] sm:$0xf] %vm588_vm2, %v1182_v38  ;;  %v1045_v40 = vmax.f32 %v1043_v39, 0.0 }
 0x31d   : > { %v1183_v41 = vpack.c.bf16 %v1045_v40, %v1045_v40 }
 0x31f   : > { %1055 = vst.msk [vmem:[%s440_s17 + $0x4] sm:$0xf] %vm588_vm2, %v1183_v41 }
 0x320 PF: > { %s23_s25 = sadd.s32 1, %s1310_s25  }
 0x321   : > { %p20_p4 = scmp.ge.s32.totalorder %s23_s25, 4  }
 0x323   :  { %22 = sbr.rel (!%p20_p4) target bundleno = 1 (0x1), region = 103 }

// kernel: _lambda_.7
= control target key start
LH: loop header
LB: loop body
LE: loop exit
PB: predicated region body
PF: predicated region fallthrough
CT: control target
= control target key end

     0   :  { %v3630_v1 = vmov 2   ;;  %v2367_v2 = vmov 1   ;;  %vm102_vm0 = vcmask 261120   ;;  %vm1359_vm1 = vcmask 523264   ;;  %s2376_s13 = smov 24   ;;  %s2377_s14 = smov 32   ;;  %s3610_s2 = inlined_call_operand.vmem [shape: bf16[32,8], index: 2, kind: input, shape index: {}]   ;;  %s3611_s0 = inlined_call_operand.vmem [shape: bf16[2,64,32], index: 0, kind: input, shape index: {}]   ;;  %s3612_s3 = inlined_call_operand.vmem [shape: bf16[64,8], index: 3, kind: input, shape index: {}]   ;;  %s3613_s1 = inlined_call_operand.vmem [shape: bf16[2,16,64], index: 1, kind: input, shape index: {}]   ;;  %s3614_s4 = inlined_call_operand.vmem [shape: bf16[64,192], index: 4, kind: input, shape index: {}]   ;;  %s3615_s5 = inlined_call_operand.vmem [shape: f32[1,192], index: 5, kind: input, shape index: {}]   ;;  %s3616_s6 = inlined_call_operand.vmem [shape: bf16[64,64], index: 6, kind: input, shape index: {}]   ;;  %s3617_s7 = inlined_call_operand.vmem [shape: f32[1,64], index: 7, kind: input, shape index: {}]   ;;  %s3618_s8 = inlined_call_operand.vmem [shape: f32[2,64], index: 8, kind: output, shape index: {}]  }
   0x1   :  { %v2322_v0 = vld [vmem:[%s3610_s2 + $0x8] sm:$0xff]   ;;  %2236 = vset.pattern.permute.xlu0 %v3630_v1  ;;  %2235 = vset.pattern.permute.xlu1 %v2367_v2  ;;  %v2323_v3 = vld [vmem:[%s3610_s2] sm:$0xff]   ;;  %v2326_v5 = vld [vmem:[%s3612_s3 + $0x18] sm:$0xff]   ;;  %v3628_v21 = vmov 3   ;;  %v3626_v24 = vmov 4   ;;  %v3622_v27 = vmov 5  }
   0x2   :  { %2173 = vmatprep.subr.bf16.mxu0 %v2322_v0  ;;  %v2324_v4 = vld [vmem:[%s3611_s0] sm:$0xff]   ;;  %v2327_v6 = vld [vmem:[%s3612_s3 + $0x10] sm:$0xff]   ;;  %v2325_v7 = vld [vmem:[%s3611_s0 + $0x8] sm:$0xff]   ;;  %2193 = vmatprep.subr.bf16.mxu1 %v2326_v5  ;;  %v3624_v29 = vmov 7   ;;  %v3620_v34 = vmov 6   ;;  %v3619_v42 = vmov 0  }
   0x3   :  { %2174 = vmatpush3.bf16.msra.mxu0 %v2322_v0  ;;  %2177 = vmatprep.mubr.msk.bf16.mxu0 %vm102_vm0, %v2324_v4  ;;  %v2328_v8 = vld [vmem:[%s3612_s3 + $0x8] sm:$0xff]   ;;  %v2330_v9 = vld [vmem:[%s3611_s0 + $0x10] sm:$0xff]   ;;  %v2332_v10 = vld [vmem:[%s3613_s1] sm:$0xff]   ;;  %vm272_vm2 = vcmask 64512   ;;  %s2378_s15 = smov 40   ;;  %s2379_s23 = smov 48  }
   0x4   :  { %2175 = vmatprep.subr.bf16.mxu0 %v2323_v3  ;;  %2194 = vmatpush3.bf16.msra.mxu1 %v2326_v5  ;;  %v2329_v11 = vld [vmem:[%s3612_s3] sm:$0xff]   ;;  %v2331_v12 = vld [vmem:[%s3611_s0 + $0x18] sm:$0xff]   ;;  %v2333_v14 = vld [vmem:[%s3613_s1 + $0x8] sm:$0xff]   ;;  %s2375_s1 = smov 16   ;;  %vm295_vm3 = vcmask 57344   ;;  %vm363_vm4 = vcmask 122944  }
   0x5   :  { %2195 = vmatprep.subr.bf16.mxu1 %v2327_v6  ;;  %2201 = vmatprep.mubr.msk.bf16.mxu1 %vm1359_vm1, %v2332_v10  ;;  %v2334_v13 = vld [vmem:[%s3611_s0 + $0x20] sm:$0xff]   ;;  %v2335_v15 = vld [vmem:[%s3611_s0 + $0x28] sm:$0xff]   ;;  %v2336_v16 = vld [vmem:[%s3611_s0 + $0x30] sm:$0xff]   ;;  %vm431_vm5 = vcmask 188544   ;;  %vm499_vm6 = vcmask 254144   ;;  %vm567_vm7 = vcmask 319744  }
   0x6   :  { %v2337_v17 = vld [vmem:[%s3611_s0 + $0x38] sm:$0xff]   ;;  %s2374_s0 = smov 8   ;;  %vm635_vm8 = vcmask 385344   ;;  %vm703_vm9 = vcmask 450944   ;;  %vm771_vm10 = vcmask 516544   ;;  %s2381_s11 = smov 64  }
   0x7   :  { %2176 = vmatpush3.bf16.msra.mxu0 %v2323_v3  ;;  %vm1968_vm11 = vcmask 517120   ;;  %vm2383_vm12 = vmmov 0  }
   0x8   :  { %2196 = vmatpush3.bf16.msra.mxu1 %v2327_v6 }
   0x9   :  { %2197 = vmatprep.subr.bf16.mxu1 %v2328_v8 }
   0xa   :  { %2178 = vmatmul.mubr.msk.bf16.vlgmr.msra.gmra.mxu0 %vm102_vm0, %v2325_v7 }
   0xb   :  { %2181 = vmatprep.mubr.msk.bf16.mxu0 %vm102_vm0, %v2330_v9 }
   0xc   :  { %2198 = vmatpush3.bf16.msra.mxu1 %v2328_v8 }
   0xd   :  { %2199 = vmatprep.subr.bf16.mxu1 %v2329_v11 }
  0x10   :  { %2200 = vmatpush3.bf16.msra.mxu1 %v2329_v11 }
  0x12   :  { %2182 = vmatmul.mubr.msk.bf16.gmra.mxu0 %vm102_vm0, %v2331_v12 }
  0x13   :  { %2185 = vmatprep.mubr.msk.bf16.mxu0 %vm102_vm0, %v2334_v13  ;;  %2202 = vmatmul.mubr.msk.bf16.vlgmr.msra.gmra.mxu1 %vm1359_vm1, %v2333_v14 }
  0x14   :  { %1910 = vmatprep.mubr.bf16.mxu1 %v3619_v42 }
  0x1a   :  { %2186 = vmatmul.mubr.msk.bf16.gmra.mxu0 %vm102_vm0, %v2335_v15 }
  0x1b   :  { %2189 = vmatprep.mubr.msk.bf16.mxu0 %vm102_vm0, %v2336_v16 }
  0x22   :  { %2190 = vmatmul.mubr.msk.bf16.gmra.mxu0 %vm102_vm0, %v2337_v17 }
  0x23   :  { %1954 = vmatprep.mubr.bf16.mxu0 %v3619_v42 }
  0xca   :  { %v2489_v18 = vpop.f32.mrf.mxu0 }
  0xcb   :  { %374 = vperm.xlu0 %2236, %v2489_v18   ;;  %306 = vperm.xlu1 %2235, %v2489_v18  }
  0xcc   :  { %v2493_v19 = vpop.f32.mrf.mxu0 }
  0xce   :  { %v2495_v20 = vpop.f32.mrf.mxu0 }
  0xcf   :  { %2241 = vset.pattern.permute.xlu0 %v2367_v2  ;;  %2237 = vset.pattern.permute.xlu1 %v3628_v21 }
  0xd0   :  { %442 = vperm.xlu1 %2237, %v2489_v18   ;;  %298 = vperm.xlu0 %2241, %v2493_v19   ;;  %v2501_v22 = vpop.f32.mrf.mxu0 }
  0xd2   :  { %v2503_v23 = vpop.f32.mrf.mxu0 }
  0xd3   :  { %v2522_v30 = vpop.f32.mrf.mxu1 }
  0xd4   :  { %2238 = vset.pattern.permute.xlu1 %v3626_v24  ;;  %2242 = vset.pattern.permute.xlu0 %v3630_v1  ;;  %v2507_v25 = vpop.f32.mrf.mxu0 }
  0xd5   :  { %3636 = vst [vmem:[#allocation4_spill] sm:$0xff] %v2507_v25  ;;  %510 = vperm.xlu1 %2238, %v2489_v18   ;;  %366 = vperm.xlu0 %2242, %v2493_v19   ;;  %v2561_v40 = vpop.f32.mrf.mxu1 }
  0xd6   :  { %v2511_v26 = vpop.f32.mrf.mxu0 }
  0xd7   :  { %3637 = vst [vmem:[#allocation5_spill] sm:$0xff] %v2511_v26  ;;  %v2567_v41 = vpop.f32.mrf.mxu1 }
  0xd8   :  { %v2516_v28 = vpop.f32.mrf.mxu0 }
  0xd9   :  { %2239 = vset.pattern.permute.xlu1 %v3622_v27  ;;  %378 = vperm.xlu0 %2242, %v2495_v20   ;;  %v2645_v49 = vpop.f32.mrf.mxu1 }
  0xda   :  { %578 = vperm.xlu1 %2239, %v2489_v18   ;;  %v2524_v31 = vpop.f32.mrf.mxu0 }
  0xdc   :  { %v2528_v32 = vpop.f32.mrf.mxu0 }
  0xdd   :  { %2250 = vset.pattern.permute.xlu0 %v2367_v2 }
  0xde   :  { %2240 = vset.pattern.permute.xlu1 %v3624_v29  ;;  %302 = vperm.xlu0 %2250, %v2501_v22   ;;  %v2532_v33 = vpop.f32.mrf.mxu0 }
  0xdf   :  { %714 = vperm.xlu1 %2240, %v2489_v18  }
  0xe0   :  { %v2538_v35 = vpop.f32.mrf.mxu0 }
  0xe2   :  { %1637 = vperm.xlu0 %2250, %v2522_v30   ;;  %v2541_v36 = vpop.f32.mrf.mxu0 }
  0xe3   :  { %2243 = vset.pattern.permute.xlu1 %v3626_v24 }
  0xe4   :  { %502 = vperm.xlu1 %2243, %v2493_v19   ;;  %v2545_v37 = vpop.f32.mrf.mxu0 }
  0xe6   :  { %314 = vperm.xlu0 %2250, %v2507_v25   ;;  %v2551_v38 = vpop.f32.mrf.mxu0 }
  0xe8   :  { %2244 = vset.pattern.permute.xlu1 %v3620_v34  ;;  %v2556_v39 = vpop.f32.mrf.mxu0 }
  0xe9   :  { %638 = vperm.xlu1 %2244, %v2493_v19  }
  0xea   :  { %2268 = vset.pattern.permute.xlu0 %v3630_v1 }
  0xeb   :  { %920 = vperm.xlu0 %2268, %v2524_v31  }
  0xed   :  { %2245 = vset.pattern.permute.xlu1 %v2367_v2 }
  0xee   :  { %310 = vperm.xlu1 %2245, %v2495_v20  }
  0xef   :  { %916 = vperm.xlu0 %2268, %v2538_v35  }
  0xf2   :  { %2246 = vset.pattern.permute.xlu1 %v3628_v21 }
  0xf3   :  { %446 = vperm.xlu1 %2246, %v2495_v20   ;;  %2284 = vset.pattern.permute.xlu0 %v2367_v2 }
  0xf4   :  { %869 = vperm.xlu0 %2284, %v2541_v36  }
  0xf7   :  { %2247 = vset.pattern.permute.xlu1 %v3626_v24 }
  0xf8   :  { %514 = vperm.xlu1 %2247, %v2495_v20   ;;  %873 = vperm.xlu0 %2284, %v2551_v38  }
  0xfc   :  { %2248 = vset.pattern.permute.xlu1 %v3622_v27  ;;  %865 = vperm.xlu0 %2284, %v2556_v39  }
  0xfd   :  { %582 = vperm.xlu1 %2248, %v2495_v20  }
 0x100   :  { %2299 = vset.pattern.permute.xlu0 %v3630_v1 }
 0x101   :  { %2249 = vset.pattern.permute.xlu1 %v3624_v29  ;;  %1464 = vperm.xlu0 %2299, %v2561_v40  }
 0x102   :  { %718 = vperm.xlu1 %2249, %v2495_v20  }
 0x105   :  { %1666 = vperm.xlu0 %2299, %v2567_v41  }
 0x106   :  { %2251 = vset.pattern.permute.xlu1 %v3630_v1 }
 0x107   :  { %370 = vperm.xlu1 %2251, %v2501_v22  }
 0x109   :  { %2301 = vset.pattern.permute.xlu0 %v3628_v21 }
 0x10a   :  { %434 = vperm.xlu0 %2301, %v2493_v19  }
 0x10b   :  { %2252 = vset.pattern.permute.xlu1 %v3628_v21 }
 0x10c   :  { %438 = vperm.xlu1 %2252, %v2501_v22  }
 0x10e   :  { %979 = vperm.xlu0 %2301, %v2528_v32  }
 0x110   :  { %2253 = vset.pattern.permute.xlu1 %v3626_v24 }
 0x111   :  { %506 = vperm.xlu1 %2253, %v2501_v22  }
 0x112   :  { %987 = vperm.xlu0 %2301, %v2524_v31  }
 0x115   :  { %2254 = vset.pattern.permute.xlu1 %v3622_v27 }
 0x116   :  { %574 = vperm.xlu1 %2254, %v2501_v22   ;;  %991 = vperm.xlu0 %2301, %v2532_v33  }
 0x11a   :  { %2255 = vset.pattern.permute.xlu1 %v3624_v29  ;;  %450 = vperm.xlu0 %2301, %v2507_v25  }
 0x11b   :  { %710 = vperm.xlu1 %2255, %v2501_v22  }
 0x11e   :  { %454 = vperm.xlu0 %2301, %v2516_v28  }
 0x11f   :  { %2256 = vset.pattern.permute.xlu1 %v2367_v2 }
 0x120   :  { %322 = vperm.xlu1 %2256, %v2503_v23  }
 0x122   :  { %458 = vperm.xlu0 %2301, %v2503_v23  }
 0x124   :  { %2257 = vset.pattern.permute.xlu1 %v3630_v1 }
 0x125   :  { %390 = vperm.xlu1 %2257, %v2503_v23  }
 0x126   :  { %1489 = vperm.xlu0 %2301, %v2561_v40  }
 0x129   :  { %382 = vperm.xlu1 %2257, %v2507_v25  }
 0x12a   :  { %1691 = vperm.xlu0 %2301, %v2567_v41  }
 0x12d   :  { %2258 = vset.pattern.permute.xlu1 %v3626_v24 }
 0x12e   :  { %518 = vperm.xlu1 %2258, %v2507_v25   ;;  %2307 = vset.pattern.permute.xlu0 %v3626_v24 }
 0x12f   :  { %1050 = vperm.xlu0 %2307, %v2538_v35  }
 0x132   :  { %2259 = vset.pattern.permute.xlu1 %v3622_v27 }
 0x133   :  { %586 = vperm.xlu1 %2259, %v2507_v25   ;;  %526 = vperm.xlu0 %2307, %v2503_v23  }
 0x137   :  { %2260 = vset.pattern.permute.xlu1 %v3624_v29  ;;  %1070 = vperm.xlu0 %2307, %v2541_v36  }
 0x138   :  { %722 = vperm.xlu1 %2260, %v2507_v25  }
 0x13b   :  { %1514 = vperm.xlu0 %2307, %v2561_v40  }
 0x13c   :  { %2261 = vset.pattern.permute.xlu1 %v2367_v2 }
 0x13d   :  { %1439 = vperm.xlu1 %2261, %v2561_v40  }
 0x13f   :  { %1716 = vperm.xlu0 %2307, %v2567_v41  }
 0x141   :  { %326 = vperm.xlu1 %2261, %v2511_v26  }
 0x143   :  { %2311 = vset.pattern.permute.xlu0 %v3622_v27 }
 0x144   :  { %570 = vperm.xlu0 %2311, %v2493_v19  }
 0x145   :  { %1641 = vperm.xlu1 %2261, %v2567_v41  }
 0x146   :  { %v2615_v43 = vpop.permute.xlu1 %306  ;;  %v2683_v57 = vpop.permute.xlu0 %374 }
 0x148   :  { %594 = vperm.xlu0 %2311, %v2503_v23  }
 0x149   :  { %2262 = vset.pattern.permute.xlu1 %v3630_v1 }
 0x14a   :  { %394 = vperm.xlu1 %2262, %v2511_v26  }
 0x14b   :  { %v2620_v44 = vpop.permute.xlu1 %442  ;;  %v299_v59 = vpop.permute.xlu0 %298 }
 0x14c   :  { %1137 = vperm.xlu0 %2311, %v2541_v36  }
 0x14e   :  { %2263 = vset.pattern.permute.xlu1 %v2367_v2 }
 0x14f   :  { %318 = vperm.xlu1 %2263, %v2516_v28  }
 0x150   :  { %v2625_v45 = vpop.permute.xlu1 %510  ;;  %1539 = vperm.xlu0 %2311, %v2561_v40   ;;  %v367_v61 = vpop.permute.xlu0 %366 }
 0x153   :  { %2264 = vset.pattern.permute.xlu1 %v3630_v1 }
 0x154   :  { %386 = vperm.xlu1 %2264, %v2516_v28   ;;  %1741 = vperm.xlu0 %2311, %v2567_v41   ;;  %v2706_v0 = vpop.permute.xlu0 %378 }
 0x155   :  { %v2631_v46 = vpop.permute.xlu1 %578 }
 0x158   :  { %2265 = vset.pattern.permute.xlu1 %v3626_v24  ;;  %2315 = vset.pattern.permute.xlu0 %v3620_v34 }
 0x159   :  { %522 = vperm.xlu1 %2265, %v2516_v28   ;;  %642 = vperm.xlu0 %2315, %v2501_v22   ;;  %v303_v4 = vpop.permute.xlu0 %302 }
 0x15a   :  { %v2637_v47 = vpop.permute.xlu1 %714  ;;  %v330_v16 = vmul.f32 %v303_v4, %v2501_v22 }
 0x15d   :  { %2266 = vset.pattern.permute.xlu1 %v3622_v27  ;;  %1180 = vperm.xlu0 %2315, %v2528_v32   ;;  %v2720_v6 = vpop.permute.xlu0 %1637 }
 0x15e   :  { %590 = vperm.xlu1 %2266, %v2516_v28  }
 0x15f   :  { %v2642_v48 = vpop.permute.xlu1 %502 }
 0x161   :  { %646 = vperm.xlu0 %2315, %v2489_v18   ;;  %v315_v8 = vpop.permute.xlu0 %314 }
 0x162   :  { %2267 = vset.pattern.permute.xlu1 %v2367_v2 }
 0x163   :  { %1443 = vperm.xlu1 %2267, %v2645_v49  }
 0x164   :  { %v2649_v50 = vpop.permute.xlu1 %638 }
 0x165   :  { %1188 = vperm.xlu0 %2315, %v2524_v31  }
 0x166   :  { %v2734_v11 = vpop.permute.xlu0 %920 }
 0x167   :  { %853 = vperm.xlu1 %2267, %v2524_v31  }
 0x169   :  { %v2653_v51 = vpop.permute.xlu1 %310  ;;  %650 = vperm.xlu0 %2315, %v2495_v20  }
 0x16a   :  { %v2742_v13 = vpop.permute.xlu0 %916 }
 0x16b   :  { %2269 = vset.pattern.permute.xlu1 %v3626_v24 }
 0x16c   :  { %1054 = vperm.xlu1 %2269, %v2524_v31  }
 0x16d   :  { %1192 = vperm.xlu0 %2315, %v2532_v33  }
 0x16e   :  { %v2659_v52 = vpop.permute.xlu1 %446 }
 0x16f   :  { %v2749_v15 = vpop.permute.xlu0 %869 }
 0x170   :  { %2270 = vset.pattern.permute.xlu1 %v3622_v27 }
 0x171   :  { %1121 = vperm.xlu1 %2270, %v2524_v31   ;;  %654 = vperm.xlu0 %2315, %v2507_v25  }
 0x173   :  { %v2664_v53 = vpop.permute.xlu1 %514 }
 0x175   :  { %2271 = vset.pattern.permute.xlu1 %v2367_v2  ;;  %1196 = vperm.xlu0 %2315, %v2545_v37  }
 0x176   :  { %845 = vperm.xlu1 %2271, %v2528_v32  }
 0x178   :  { %v2669_v54 = vpop.permute.xlu1 %582 }
 0x179   :  { %662 = vperm.xlu0 %2315, %v2503_v23  }
 0x17a   :  { %2272 = vset.pattern.permute.xlu1 %v3630_v1 }
 0x17b   :  { %912 = vperm.xlu1 %2272, %v2528_v32  }
 0x17d   :  { %v2674_v55 = vpop.permute.xlu1 %718  ;;  %1208 = vperm.xlu0 %2315, %v2551_v38  }
 0x17f   :  { %2273 = vset.pattern.permute.xlu1 %v3626_v24 }
 0x180   :  { %1046 = vperm.xlu1 %2273, %v2528_v32  }
 0x181   :  { %1762 = vperm.xlu0 %2315, %v2522_v30  }
 0x182   :  { %v2680_v56 = vpop.permute.xlu1 %370 }
 0x184   :  { %2274 = vset.pattern.permute.xlu1 %v3622_v27 }
 0x185   :  { %1113 = vperm.xlu1 %2274, %v2528_v32   ;;  %2317 = vset.pattern.permute.xlu0 %v3624_v29 }
 0x186   :  { %706 = vperm.xlu0 %2317, %v2493_v19  }
 0x187   :  { %v2688_v58 = vpop.permute.xlu1 %438 }
 0x189   :  { %2275 = vset.pattern.permute.xlu1 %v3624_v29  ;;  %v398_v29 = vmul.f32 %v2680_v56, %v2501_v22 }
 0x18a   :  { %1247 = vperm.xlu1 %2275, %v2528_v32   ;;  %1251 = vperm.xlu0 %2317, %v2538_v35  }
 0x18b   :  { %v406_v56 = vsel %vm272_vm2, %v398_v29, 0.0 }
 0x18c   :  { %v2693_v60 = vpop.permute.xlu1 %506 }
 0x18d   :  { %3638 = vst [vmem:[#allocation6_spill] sm:$0xff] %v2693_v60 }
 0x18e   :  { %2276 = vset.pattern.permute.xlu1 %v2367_v2  ;;  %1255 = vperm.xlu0 %2317, %v2524_v31  }
 0x18f   :  { %857 = vperm.xlu1 %2276, %v2532_v33  }
 0x191   :  { %v2698_v62 = vpop.permute.xlu1 %574 }
 0x192   :  { %3639 = vst [vmem:[#allocation7_spill] sm:$0xff] %v2698_v62  ;;  %1259 = vperm.xlu0 %2317, %v2532_v33  }
 0x193   :  { %2277 = vset.pattern.permute.xlu1 %v3630_v1 }
 0x194   :  { %924 = vperm.xlu1 %2277, %v2532_v33  }
 0x196   :  { %v2703_v63 = vpop.permute.xlu1 %710  ;;  %1263 = vperm.xlu0 %2317, %v2545_v37  }
 0x197   :  { %3640 = vst [vmem:[#allocation8_spill] sm:$0xff] %v2703_v63 }
 0x198   :  { %2278 = vset.pattern.permute.xlu1 %v3626_v24  ;;  %v331_v24 = vmul.f32 %v2489_v18, %v2615_v43 }
 0x199   :  { %1058 = vperm.xlu1 %2278, %v2532_v33  }
 0x19a   :  { %730 = vperm.xlu0 %2317, %v2503_v23  }
 0x19b   :  { %v2711_v3 = vpop.permute.xlu1 %322 }
 0x19d   :  { %2279 = vset.pattern.permute.xlu1 %v3622_v27 }
 0x19e   :  { %1125 = vperm.xlu1 %2279, %v2532_v33   ;;  %734 = vperm.xlu0 %2317, %v2511_v26  }
 0x1a0   :  { %v2716_v5 = vpop.permute.xlu1 %390 }
 0x1a2   :  { %2280 = vset.pattern.permute.xlu1 %v2367_v2  ;;  %1593 = vperm.xlu0 %2317, %v2645_v49  }
 0x1a3   :  { %849 = vperm.xlu1 %2280, %v2538_v35  }
 0x1a4   :  { %v383_v7 = vpop.permute.xlu1 %382 }
 0x1a5   :  { %v401_v63 = vmul.f32 %v383_v7, %v2507_v25 }
 0x1a6   :  { %1791 = vperm.xlu0 %2317, %v2567_v41  }
 0x1a7   :  { %2281 = vset.pattern.permute.xlu1 %v3628_v21 }
 0x1a8   :  { %983 = vperm.xlu1 %2281, %v2538_v35  }
 0x1a9   :  { %v2726_v9 = vpop.permute.xlu1 %518 }
 0x1aa   :  { %3641 = vst [vmem:[#allocation9_spill] sm:$0xff] %v2726_v9  ;;  %2320 = vset.pattern.permute.xlu0 %v3619_v42  ;;  %v329_v42 = vmul.f32 %v299_v59, %v2493_v19  ;;  %v332_v59 = vmul.f32 %v2495_v20, %v2653_v51  ;;  %v399_v51 = vmul.f32 %v2489_v18, %v2683_v57  ;;  %v3645_v57 = vmov 3  }
 0x1ab   :  { %231 = vperm.xlu0 %2320, %v2501_v22  }
 0x1ac   :  { %2282 = vset.pattern.permute.xlu1 %v3622_v27  ;;  %v2757_v27 = vpop.permute.xlu0 %873 }
 0x1ad   :  { %1117 = vperm.xlu1 %2282, %v2538_v35  }
 0x1ae   :  { %v2732_v10 = vpop.permute.xlu1 %586 }
 0x1af   :  { %3642 = vst [vmem:[#allocation10_spill] sm:$0xff] %v2732_v10  ;;  %236 = vperm.xlu0 %2320, %v2489_v18  }
 0x1b0   :  { %v2776_v10 = vpop.permute.xlu0 %865 }
 0x1b1   :  { %2283 = vset.pattern.permute.xlu1 %v3620_v34  ;;  %v338_v34 = vsel %vm272_vm2, %v330_v16, 0.0  ;;  %v397_v16 = vmul.f32 %v367_v61, %v2493_v19 }
 0x1b2   :  { %1184 = vperm.xlu1 %2283, %v2538_v35  }
 0x1b3   :  { %v2739_v12 = vpop.permute.xlu1 %722  ;;  %241 = vperm.xlu0 %2320, %v2495_v20   ;;  %v405_v9 = vsel %vm272_vm2, %v397_v16, 0.0 }
 0x1b4   :  { %3643 = vst [vmem:[#allocation11_spill] sm:$0xff] %v2739_v12  ;;  %v340_v12 = vsel %vm272_vm2, %v331_v24, 0.0  ;;  %v407_v29 = vadd.f32 %v406_v56, %v405_v9 }
 0x1b6   :  { %2285 = vset.pattern.permute.xlu1 %v3630_v1 }
 0x1b7   :  { %936 = vperm.xlu1 %2285, %v2541_v36   ;;  %246 = vperm.xlu0 %2320, %v2507_v25  }
 0x1b8   :  { %v2747_v14 = vpop.permute.xlu1 %1439 }
 0x1bb   :  { %2286 = vset.pattern.permute.xlu1 %v3628_v21  ;;  %251 = vperm.xlu0 %2320, %v2516_v28   ;;  %v337_v21 = vsel %vm272_vm2, %v329_v42, 0.0  ;;  %v3644_v42 = vmov 2  }
 0x1bc   :  { %v327_v17 = vpop.permute.xlu1 %326  ;;  %1003 = vperm.xlu1 %2286, %v2541_v36   ;;  %v339_v1 = vadd.f32 %v338_v34, %v337_v21  ;;  %v333_v21 = vmul.f32 %v315_v8, %v2507_v25  ;;  %v408_v34 = vsel %vm272_vm2, %v399_v51, 0.0  ;;  %v335_v8 = vmul.f32 %v2503_v23, %v2711_v3 }
 0x1bd   :  { %v409_v16 = vadd.f32 %v408_v34, %v407_v29  ;;  %v336_v7 = vmul.f32 %v2511_v26, %v327_v17  ;;  %v412_v51 = vsel %vm272_vm2, %v401_v63, 0.0  ;;  %v3646_v34 = vmov 4  }
 0x1be   :  { %v341_v61 = vadd.f32 %v340_v12, %v339_v1  ;;  %v344_v1 = vsel %vm272_vm2, %v333_v21, 0.0  ;;  %v2791_v12 = vpop.permute.xlu0 %1464  ;;  %v348_v21 = vsel %vm272_vm2, %v335_v8, 0.0 }
 0x1bf   :  { %256 = vperm.xlu0 %2320, %v2503_v23   ;;  %v350_v63 = vsel %vm272_vm2, %v336_v7, 0.0 }
 0x1c0   :  { %v2762_v4 = vpop.permute.xlu1 %1641  ;;  %2287 = vset.pattern.permute.xlu1 %v2367_v2  ;;  %v342_v2 = vsel %vm272_vm2, %v332_v59, 0.0  ;;  %v400_v59 = vmul.f32 %v2495_v20, %v2706_v0 }
 0x1c1   :  { %861 = vperm.xlu1 %2287, %v2545_v37   ;;  %v343_v24 = vadd.f32 %v342_v2, %v341_v61 }
 0x1c2   :  { %v410_v2 = vsel %vm272_vm2, %v400_v59, 0.0 }
 0x1c3   :  { %261 = vperm.xlu0 %2320, %v2511_v26   ;;  %v345_v0 = vadd.f32 %v344_v1, %v343_v24  ;;  %v411_v29 = vadd.f32 %v410_v2, %v409_v16  ;;  %v403_v24 = vmul.f32 %v2503_v23, %v2716_v5  ;;  %v3649_v5 = vmov 5  }
 0x1c5   :  { %v395_v43 = vpop.permute.xlu1 %394  ;;  %2288 = vset.pattern.permute.xlu1 %v3644_v42  ;;  %v413_v59 = vadd.f32 %v412_v51, %v411_v29 }
 0x1c6   :  { %928 = vperm.xlu1 %2288, %v2545_v37   ;;  %v404_v16 = vmul.f32 %v2511_v26, %v395_v43 }
 0x1c7   :  { %1417 = vperm.xlu0 %2320, %v2561_v40  }
 0x1c8   :  { %v418_v7 = vsel %vm272_vm2, %v404_v16, 0.0 }
 0x1ca   :  { %v319_v62 = vpop.permute.xlu1 %318  ;;  %2289 = vset.pattern.permute.xlu1 %v3645_v57 }
 0x1cb   :  { %v334_v9 = vmul.f32 %v319_v62, %v2516_v28  ;;  %995 = vperm.xlu1 %2289, %v2545_v37   ;;  %1615 = vperm.xlu0 %2320, %v2522_v30   ;;  %v3647_v62 = vmov 7  }
 0x1cd   :  { %v346_v56 = vsel %vm272_vm2, %v334_v9, 0.0 }
 0x1ce   :  { %v347_v61 = vadd.f32 %v346_v56, %v345_v0  ;;  %v416_v56 = vsel %vm272_vm2, %v403_v24, 0.0 }
 0x1cf   :  { %v387_v3 = vpop.permute.xlu1 %386  ;;  %2290 = vset.pattern.permute.xlu1 %v3646_v34  ;;  %2321 = vset.pattern.permute.xlu0 %v3647_v62 }
 0x1d0   :  { %v349_v1 = vadd.f32 %v348_v21, %v347_v61  ;;  %v402_v17 = vmul.f32 %v387_v3, %v2516_v28  ;;  %1062 = vperm.xlu1 %2290, %v2545_v37   ;;  %v2817_v21 = vpop.permute.xlu0 %1666 }
 0x1d1   :  { %3650 = vst [vmem:[#allocation13_spill] sm:$0xff] %v2817_v21 }
 0x1d2   :  { %v351_v9 = vadd.f32 %v350_v63, %v349_v1  ;;  %v414_v8 = vsel %vm272_vm2, %v402_v17, 0.0  ;;  %v1446_v63 = vmul.f32 %v2747_v14, %v2561_v40 }
 0x1d3   :  { %v415_v0 = vadd.f32 %v414_v8, %v413_v59 }
 0x1d4   :  { %v352_v2 = vrot.slane %v351_v9, 4  ;;  %v2813_v60 = vpop.permute.xlu1 %522  ;;  %2291 = vset.pattern.permute.xlu1 %v3649_v5  ;;  %v2824_v24 = vpop.permute.xlu0 %434 }
 0x1d5   :  { %3648 = vst [vmem:[#allocation12_spill] sm:$0xff] %v2813_v60  ;;  %v417_v61 = vadd.f32 %v416_v56, %v415_v0  ;;  %1129 = vperm.xlu1 %2291, %v2545_v37  }
 0x1d6   :  { %v353_v51 = vadd.f32 %v352_v2, %v351_v9  ;;  %v1448_v2 = vsel %vm272_vm2, %v1446_v63, 0.0 }
 0x1d7   :  { %v419_v29 = vadd.f32 %v418_v7, %v417_v61 }
 0x1d8   :  { %v354_v3 = vrot.slane %v353_v51, 2 }
 0x1d9   :  { %v2820_v1 = vpop.permute.xlu1 %590  ;;  %2292 = vset.pattern.permute.xlu1 %v3644_v42  ;;  %v420_v17 = vrot.slane %v419_v29, 4 }
 0x1da   :  { %3651 = vst [vmem:[#allocation14_spill] sm:$0xff] %v2820_v1  ;;  %932 = vperm.xlu1 %2292, %v2556_v39   ;;  %v355_v43 = vadd.f32 %v354_v3, %v353_v51  ;;  %v2833_v51 = vpop.permute.xlu0 %979 }
 0x1db   :  { %v421_v0 = vadd.f32 %v420_v17, %v419_v29 }
 0x1dc   :  { %v356_v59 = vrot.slane %v355_v43, 1 }
 0x1de   :  { %v1444_v8 = vpop.permute.xlu1 %1443  ;;  %2293 = vset.pattern.permute.xlu1 %v3645_v57  ;;  %v357_v9 = vadd.f32 %v356_v59, %v355_v43  ;;  %v422_v43 = vrot.slane %v421_v0, 2  ;;  %v2842_v59 = vpop.permute.xlu0 %987 }
 0x1df   :  { %v1447_v16 = vmul.f32 %v1444_v8, %v2645_v49  ;;  %999 = vperm.xlu1 %2293, %v2556_v39  }
 0x1e0   :  { %v358_v56 = vmul.f32 0.015625, %v357_v9  ;;  %v423_v8 = vadd.f32 %v422_v43, %v421_v0 }
 0x1e1   :  { %v1449_v61 = vsel %vm272_vm2, %v1447_v16, 0.0 }
 0x1e2   :  { %v1450_v7 = vadd.f32 %v1449_v61, %v1448_v2  ;;  %v2835_v3 = vpop.permute.xlu1 %853  ;;  %360 = vrot.lane.b32.xlu0 %v358_v56, %s2374_s0  ;;  %v424_v2 = vrot.slane %v423_v8, 1  ;;  %v3654_v61 = vmov 6   ;;  %v2849_v1 = vpop.permute.xlu0 %991 }
 0x1e3   :  { %2294 = vset.pattern.permute.xlu1 %v3646_v34  ;;  %3655 = vst [vmem:[#allocation17_spill] sm:$0xff] %v2849_v1 }
 0x1e4   :  { %v1451_v14 = vrot.slane %v1450_v7, 4  ;;  %1066 = vperm.xlu1 %2294, %v2556_v39  }
 0x1e6   :  { %v1452_v29 = vadd.f32 %v1451_v14, %v1450_v7  ;;  %v2857_v0 = vpop.permute.xlu0 %450 }
 0x1e7   :  { %v2840_v17 = vpop.permute.xlu1 %1054 }
 0x1e8   :  { %3652 = vst [vmem:[#allocation15_spill] sm:$0xff] %v2840_v17  ;;  %v1453_v63 = vrot.slane %v1452_v29, 2  ;;  %2295 = vset.pattern.permute.xlu1 %v3649_v5  ;;  %v425_v17 = vadd.f32 %v424_v2, %v423_v8 }
 0x1e9   :  { %1133 = vperm.xlu1 %2295, %v2556_v39  }
 0x1ea   :  { %v1454_v9 = vadd.f32 %v1453_v63, %v1452_v29  ;;  %v426_v43 = vmul.f32 0.015625, %v425_v17  ;;  %v2864_v63 = vpop.permute.xlu0 %454 }
 0x1ec   :  { %v2846_v16 = vpop.permute.xlu1 %1121  ;;  %v1455_v56 = vrot.slane %v1454_v9, 1 }
 0x1ed   :  { %3653 = vst [vmem:[#allocation16_spill] sm:$0xff] %v2846_v16  ;;  %2296 = vset.pattern.permute.xlu1 %v3654_v61 }
 0x1ee   :  { %658 = vperm.xlu1 %2296, %v2516_v28   ;;  %v1456_v7 = vadd.f32 %v1455_v56, %v1454_v9  ;;  %v2870_v9 = vpop.permute.xlu0 %458 }
 0x1f0   :  { %v1457_v14 = vmul.f32 0.0625, %v1456_v7 }
 0x1f1   :  { %v2852_v60 = vpop.permute.xlu1 %845 }
 0x1f2   :  { %2297 = vset.pattern.permute.xlu1 %v3644_v42  ;;  %1459 = vrot.lane.b32.xlu0 %v1457_v14, %s2374_s0  ;;  %v2878_v2 = vpop.permute.xlu0 %1489 }
 0x1f3   :  { %940 = vperm.xlu1 %2297, %v2551_v38   ;;  %3659 = vst [vmem:[#allocation21_spill] sm:$0xff] %v2878_v2 }
 0x1f6   :  { %v2859_v29 = vpop.permute.xlu1 %912  ;;  %428 = vrot.lane.b32.xlu0 %v426_v43, %s2375_s1 }
 0x1f7   :  { %2298 = vset.pattern.permute.xlu1 %v3654_v61 }
 0x1f8   :  { %1200 = vperm.xlu1 %2298, %v2556_v39  }
 0x1fb   :  { %v2866_v8 = vpop.permute.xlu1 %1046 }
 0x1fc   :  { %3656 = vst [vmem:[#allocation18_spill] sm:$0xff] %v2866_v8  ;;  %2300 = vset.pattern.permute.xlu1 %v3644_v42  ;;  %v2885_v42 = vpop.permute.xlu0 %1691 }
 0x1fd   :  { %1468 = vperm.xlu1 %2300, %v2645_v49   ;;  %3660 = vst [vmem:[#allocation22_spill] sm:$0xff] %v2885_v42 }
 0x200   :  { %v2872_v17 = vpop.permute.xlu1 %1113  ;;  %v2891_v43 = vpop.permute.xlu0 %1050 }
 0x201   :  { %3657 = vst [vmem:[#allocation19_spill] sm:$0xff] %v2872_v17  ;;  %1662 = vperm.xlu1 %2300, %v2522_v30   ;;  %3661 = vst [vmem:[#allocation23_spill] sm:$0xff] %v2891_v43 }
 0x204   :  { %v2897_v16 = vpop.permute.xlu0 %526 }
 0x205   :  { %v2875_v56 = vpop.permute.xlu1 %1247  ;;  %2302 = vset.pattern.permute.xlu1 %v3645_v57  ;;  %3663 = vst [vmem:[#allocation25_spill] sm:$0xff] %v2897_v16 }
 0x206   :  { %3658 = vst [vmem:[#allocation20_spill] sm:$0xff] %v2875_v56  ;;  %462 = vperm.xlu1 %2302, %v2511_v26  }
 0x208   :  { %v2903_v8 = vpop.permute.xlu0 %1070 }
 0x209   :  { %3665 = vst [vmem:[#allocation27_spill] sm:$0xff] %v2903_v8 }
 0x20a   :  { %v2881_v7 = vpop.permute.xlu1 %857  ;;  %2303 = vset.pattern.permute.xlu1 %v3647_v62 }
 0x20b   :  { %726 = vperm.xlu1 %2303, %v2516_v28  }
 0x20c   :  { %v2910_v43 = vpop.permute.xlu0 %1514 }
 0x20d   :  { %3666 = vst [vmem:[#allocation28_spill] sm:$0xff] %v2910_v43 }
 0x20f   :  { %v2887_v14 = vpop.permute.xlu1 %924  ;;  %2304 = vset.pattern.permute.xlu1 %v3645_v57 }
 0x210   :  { %1007 = vperm.xlu1 %2304, %v2551_v38  }
 0x214   :  { %v2893_v56 = vpop.permute.xlu1 %1058  ;;  %2305 = vset.pattern.permute.xlu1 %v3647_v62 }
 0x215   :  { %3662 = vst [vmem:[#allocation24_spill] sm:$0xff] %v2893_v56  ;;  %1267 = vperm.xlu1 %2305, %v2556_v39  }
 0x219   :  { %v2899_v17 = vpop.permute.xlu1 %1125  ;;  %2306 = vset.pattern.permute.xlu1 %v3645_v57  ;;  %v2915_v57 = vpop.permute.xlu0 %1716 }
 0x21a   :  { %3664 = vst [vmem:[#allocation26_spill] sm:$0xff] %v2899_v17  ;;  %1493 = vperm.xlu1 %2306, %v2645_v49   ;;  %3668 = vst [vmem:[#allocation30_spill] sm:$0xff] %v2915_v57 }
 0x21d   :  { %v2921_v16 = vpop.permute.xlu0 %570 }
 0x21e   :  { %v850_v42 = vpop.permute.xlu1 %849  ;;  %1687 = vperm.xlu1 %2306, %v2522_v30   ;;  %3670 = vst [vmem:[#allocation32_spill] sm:$0xff] %v2921_v16 }
 0x221   :  { %v2928_v43 = vpop.permute.xlu0 %594 }
 0x222   :  { %2308 = vset.pattern.permute.xlu1 %v3646_v34  ;;  %3671 = vst [vmem:[#allocation33_spill] sm:$0xff] %v2928_v43 }
 0x223   :  { %v2907_v56 = vpop.permute.xlu1 %983  ;;  %530 = vperm.xlu1 %2308, %v2511_v26  }
 0x225   :  { %v2934_v57 = vpop.permute.xlu0 %1137 }
 0x226   :  { %3673 = vst [vmem:[#allocation35_spill] sm:$0xff] %v2934_v57 }
 0x227   :  { %1074 = vperm.xlu1 %2308, %v2551_v38  }
 0x228   :  { %v2913_v17 = vpop.permute.xlu1 %1117 }
 0x229   :  { %3667 = vst [vmem:[#allocation29_spill] sm:$0xff] %v2913_v17  ;;  %v2939_v16 = vpop.permute.xlu0 %1539 }
 0x22a   :  { %3674 = vst [vmem:[#allocation36_spill] sm:$0xff] %v2939_v16 }
 0x22b   :  { %2309 = vset.pattern.permute.xlu1 %v3654_v61 }
 0x22c   :  { %1204 = vperm.xlu1 %2309, %v2541_v36  }
 0x22d   :  { %v2919_v8 = vpop.permute.xlu1 %1184 }
 0x22e   :  { %3669 = vst [vmem:[#allocation31_spill] sm:$0xff] %v2919_v8 }
 0x230   :  { %2310 = vset.pattern.permute.xlu1 %v3646_v34 }
 0x231   :  { %1518 = vperm.xlu1 %2310, %v2645_v49  }
 0x232   :  { %v2925_v2 = vpop.permute.xlu1 %936 }
 0x235   :  { %1712 = vperm.xlu1 %2310, %v2522_v30  }
 0x237   :  { %v2930_v17 = vpop.permute.xlu1 %1003 }
 0x238   :  { %3672 = vst [vmem:[#allocation34_spill] sm:$0xff] %v2930_v17  ;;  %v2946_v17 = vpop.permute.xlu0 %1741 }
 0x239   :  { %2312 = vset.pattern.permute.xlu1 %v3649_v5  ;;  %3676 = vst [vmem:[#allocation38_spill] sm:$0xff] %v2946_v17 }
 0x23a   :  { %598 = vperm.xlu1 %2312, %v2511_v26  }
 0x23c   :  { %v862_v8 = vpop.permute.xlu1 %861  ;;  %v2952_v1 = vpop.permute.xlu0 %642 }
 0x23d   :  { %3678 = vst [vmem:[#allocation40_spill] sm:$0xff] %v2952_v1 }
 0x23e   :  { %1141 = vperm.xlu1 %2312, %v2551_v38  }
 0x240   :  { %v2958_v16 = vpop.permute.xlu0 %1180 }
 0x241   :  { %v2937_v34 = vpop.permute.xlu1 %928  ;;  %3680 = vst [vmem:[#allocation42_spill] sm:$0xff] %v2958_v16  ;;  %v876_v16 = vmul.f32 %v2852_v60, %v2528_v32  ;;  %v535_v60 = vmul.f32 %v2489_v18, %v2625_v45  ;;  %v879_v45 = vmul.f32 %v2532_v33, %v2881_v7  ;;  %v944_v7 = vmul.f32 %v2742_v13, %v2538_v35 }
 0x242   :  { %2313 = vset.pattern.permute.xlu1 %v3647_v62 }
 0x243   :  { %1271 = vperm.xlu1 %2313, %v2541_v36   ;;  %v889_v13 = vsel %vm272_vm2, %v879_v45, 0.0 }
 0x244   :  { %v2964_v17 = vpop.permute.xlu0 %646 }
 0x245   :  { %3681 = vst [vmem:[#allocation43_spill] sm:$0xff] %v2964_v17 }
 0x246   :  { %v2943_v43 = vpop.permute.xlu1 %995 }
 0x247   :  { %3675 = vst [vmem:[#allocation37_spill] sm:$0xff] %v2943_v43  ;;  %2314 = vset.pattern.permute.xlu1 %v3649_v5 }
 0x248   :  { %1543 = vperm.xlu1 %2314, %v2645_v49  }
 0x24b   :  { %v2949_v57 = vpop.permute.xlu1 %1062 }
 0x24c   :  { %3677 = vst [vmem:[#allocation39_spill] sm:$0xff] %v2949_v57  ;;  %1737 = vperm.xlu1 %2314, %v2522_v30  }
 0x250   :  { %v2954_v21 = vpop.permute.xlu1 %1129  ;;  %2316 = vset.pattern.permute.xlu1 %v3654_v61  ;;  %v877_v61 = vmul.f32 %v850_v42, %v2538_v35 }
 0x251   :  { %3679 = vst [vmem:[#allocation41_spill] sm:$0xff] %v2954_v21  ;;  %666 = vperm.xlu1 %2316, %v2511_v26   ;;  %v2971_v21 = vpop.permute.xlu0 %1188 }
 0x252   :  { %3683 = vst [vmem:[#allocation45_spill] sm:$0xff] %v2971_v21  ;;  %v885_v26 = vsel %vm272_vm2, %v877_v61, 0.0  ;;  %v884_v21 = vsel %vm272_vm2, %v876_v16, 0.0  ;;  %v603_v61 = vmul.f32 %v2489_v18, %v2631_v46  ;;  %v533_v16 = vmul.f32 %v2642_v48, %v2493_v19 }
 0x253   :  { %v886_v42 = vadd.f32 %v885_v26, %v884_v21  ;;  %v880_v26 = vmul.f32 %v862_v8, %v2545_v37  ;;  %v945_v8 = vmul.f32 %v2524_v31, %v2734_v11  ;;  %v468_v11 = vmul.f32 %v2495_v20, %v2659_v52 }
 0x254   :  { %v3013_v48 = vsel %vm272_vm2, %v603_v61, 0.0  ;;  %v3034_v61 = vsel %vm272_vm2, %v533_v16, 0.0 }
 0x255   :  { %1564 = vperm.xlu1 %2316, %v2561_v40   ;;  %v2961_v5 = vpop.permute.xlu1 %932  ;;  %v2983_v43 = vpop.permute.xlu0 %650  ;;  %v954_v45 = vsel %vm272_vm2, %v945_v8, 0.0  ;;  %v1471_v8 = vmul.f32 %v2791_v12, %v2561_v40 }
 0x256   :  { %3685 = vst [vmem:[#allocation47_spill] sm:$0xff] %v2983_v43 }
 0x259   :  { %1568 = vperm.xlu1 %2316, %v2645_v49  }
 0x25a   :  { %v2966_v57 = vpop.permute.xlu1 %999 }
 0x25b   :  { %3682 = vst [vmem:[#allocation44_spill] sm:$0xff] %v2966_v57  ;;  %v878_v57 = vmul.f32 %v2524_v31, %v2835_v3  ;;  %v1644_v3 = vmul.f32 %v2522_v30, %v2720_v6  ;;  %v466_v6 = vmul.f32 %v2688_v58, %v2501_v22 }
 0x25d   :  { %1766 = vperm.xlu1 %2316, %v2567_v41   ;;  %v3027_v58 = vsel %vm272_vm2, %v1644_v3, 0.0  ;;  %v474_v16 = vsel %vm272_vm2, %v466_v6, 0.0 }
 0x25f   :  { %v2969_v1 = vpop.permute.xlu1 %1066 }
 0x261   :  { %2318 = vset.pattern.permute.xlu1 %v3647_v62  ;;  %v467_v62 = vmul.f32 %v2489_v18, %v2620_v44  ;;  %v887_v44 = vsel %vm272_vm2, %v878_v57, 0.0  ;;  %v669_v57 = vmul.f32 %v2649_v50, %v2493_v19  ;;  %v943_v50 = vmul.f32 %v2859_v29, %v2528_v32 }
 0x262   :  { %1275 = vperm.xlu1 %2318, %v2551_v38   ;;  %v888_v21 = vadd.f32 %v887_v44, %v886_v42  ;;  %v465_v42 = vmul.f32 %v2824_v24, %v2493_v19  ;;  %v3687_v44 = vmov 0   ;;  %v882_v24 = vmul.f32 %v2541_v36, %v2749_v15 }
 0x263   :  { %v476_v46 = vsel %vm272_vm2, %v467_v62, 0.0  ;;  %v3021_v62 = vpop.permute.xlu0 %1192  ;;  %v536_v29 = vmul.f32 %v2495_v20, %v2664_v53  ;;  %v3050_v52 = vsel %vm272_vm2, %v669_v57, 0.0  ;;  %v883_v15 = vmul.f32 %v2551_v38, %v2757_v27 }
 0x264   :  { %v2979_v17 = vpop.permute.xlu1 %1133  ;;  %3688 = vst [vmem:[#allocation49_spill] sm:$0xff] %v3050_v52  ;;  %v473_v53 = vsel %vm272_vm2, %v465_v42, 0.0  ;;  %v951_v6 = vsel %vm272_vm2, %v943_v50, 0.0  ;;  %v604_v57 = vmul.f32 %v2495_v20, %v2669_v54  ;;  %v740_v42 = vmul.f32 %v2495_v20, %v2674_v55 }
 0x265   :  { %3684 = vst [vmem:[#allocation46_spill] sm:$0xff] %v2979_v17  ;;  %v739_v17 = vmul.f32 %v2489_v18, %v2637_v47  ;;  %v3008_v47 = vsel %vm272_vm2, %v535_v60, 0.0  ;;  %v3069_v27 = vsel %vm272_vm2, %v536_v29, 0.0  ;;  %v1010_v50 = vmul.f32 %v2833_v51, %v2528_v32 }
 0x266   :  { %1589 = vperm.xlu1 %2318, %v2561_v40   ;;  %v1011_v55 = vmul.f32 %v2907_v56, %v2538_v35  ;;  %v469_v51 = vmul.f32 %v2857_v0, %v2507_v25 }
 0x267   :  { %v3024_v60 = vsel %vm272_vm2, %v739_v17, 0.0  ;;  %v891_v17 = vsel %vm272_vm2, %v880_v26, 0.0  ;;  %v952_v26 = vsel %vm272_vm2, %v944_v7, 0.0  ;;  %v475_v7 = vadd.f32 %v474_v16, %v473_v53  ;;  %v3065_v52 = vpop.permute.xlu0 %654 }
 0x268   :  { %3689 = vst [vmem:[#allocation50_spill] sm:$0xff] %v3065_v52  ;;  %v3089_v16 = vsel %vm272_vm2, %v604_v57, 0.0 }
 0x269   :  { %v2997_v43 = vpop.permute.xlu1 %658  ;;  %v477_v53 = vadd.f32 %v476_v46, %v475_v7  ;;  %v3691_v46 = vld [vmem:[#allocation6_spill] sm:$0xff] }
 0x26a   :  { %3686 = vst [vmem:[#allocation48_spill] sm:$0xff] %v2997_v43  ;;  %1787 = vperm.xlu1 %2318, %v2522_v30   ;;  %v890_v43 = vadd.f32 %v889_v13, %v888_v21  ;;  %v478_v13 = vsel %vm272_vm2, %v468_v11, 0.0  ;;  %v1645_v11 = vmul.f32 %v2567_v41, %v2762_v4  ;;  %v3095_v4 = vsel %vm272_vm2, %v740_v42, 0.0 }
 0x26b   :  { %3690 = vst [vmem:[#allocation51_spill] sm:$0xff] %v3095_v4 }
 0x26c   :  { %v892_v21 = vadd.f32 %v891_v17, %v890_v43  ;;  %v946_v43 = vmul.f32 %v2532_v33, %v2887_v14  ;;  %v953_v17 = vadd.f32 %v952_v26, %v951_v6  ;;  %v947_v14 = vmul.f32 %v2937_v34, %v2545_v37 }
 0x26d   :  { %v470_v26 = vmul.f32 %v2864_v63, %v2516_v28  ;;  %v948_v34 = vmul.f32 %v2961_v5, %v2556_v39  ;;  %v534_v6 = vmul.f32 %v3691_v46, %v2501_v22  ;;  %v1647_v0 = vsel %vm272_vm2, %v1645_v11, 0.0 }
 0x26e   :  { %2319 = vset.pattern.permute.xlu1 %v3687_v44  ;;  %v3041_v3 = vpop.permute.xlu1 %940  ;;  %v881_v44 = vmul.f32 %v2776_v10, %v2556_v39  ;;  %v895_v10 = vsel %vm272_vm2, %v882_v24, 0.0  ;;  %v897_v24 = vsel %vm272_vm2, %v883_v15, 0.0  ;;  %v956_v56 = vsel %vm272_vm2, %v946_v43, 0.0 }
 0x26f   :  { %226 = vperm.xlu1 %2319, %v2493_v19   ;;  %v1018_v15 = vsel %vm272_vm2, %v1010_v50, 0.0  ;;  %v955_v57 = vadd.f32 %v954_v45, %v953_v17  ;;  %v1019_v63 = vsel %vm272_vm2, %v1011_v55, 0.0  ;;  %v958_v42 = vsel %vm272_vm2, %v947_v14, 0.0 }
 0x270   :  { %v893_v12 = vsel %vm272_vm2, %v881_v44, 0.0  ;;  %v1473_v44 = vsel %vm272_vm2, %v1471_v8, 0.0  ;;  %v1012_v43 = vmul.f32 %v2524_v31, %v2842_v59  ;;  %v480_v50 = vsel %vm272_vm2, %v469_v51, 0.0 }
 0x271   :  { %v894_v29 = vadd.f32 %v893_v12, %v892_v21  ;;  %v3107_v21 = vpop.permute.xlu0 %1196  ;;  %v479_v12 = vadd.f32 %v478_v13, %v477_v53  ;;  %v957_v46 = vadd.f32 %v956_v56, %v955_v57  ;;  %v482_v11 = vsel %vm272_vm2, %v470_v26, 0.0  ;;  %v3692_v56 = vld [vmem:[#allocation13_spill] sm:$0xff] }
 0x272   :  { %v471_v45 = vmul.f32 %v2503_v23, %v2870_v9  ;;  %v960_v17 = vsel %vm272_vm2, %v948_v34, 0.0  ;;  %v1648_v55 = vadd.f32 %v1647_v0, %v3027_v58  ;;  %v949_v51 = vmul.f32 %v2541_v36, %v2925_v2  ;;  %v3694_v0 = vld [vmem:[#allocation17_spill] sm:$0xff] }
 0x273   :  { %775 = vperm.xlu1 %2319, %v2528_v32   ;;  %v3076_v54 = vpop.permute.xlu1 %1200  ;;  %v896_v7 = vadd.f32 %v895_v10, %v894_v29  ;;  %v1020_v29 = vadd.f32 %v1019_v63, %v1018_v15  ;;  %v959_v14 = vadd.f32 %v958_v42, %v957_v46  ;;  %v481_v53 = vadd.f32 %v480_v50, %v479_v12 }
 0x274   :  { %v950_v9 = vmul.f32 %v2551_v38, %v3041_v3  ;;  %v1670_v34 = vmul.f32 %v2567_v41, %v3692_v56  ;;  %v542_v57 = vsel %vm272_vm2, %v534_v6, 0.0  ;;  %v1013_v63 = vmul.f32 %v2532_v33, %v3694_v0 }
 0x275   :  { %v898_v26 = vadd.f32 %v897_v24, %v896_v7  ;;  %v961_v58 = vadd.f32 %v960_v17, %v959_v14  ;;  %v483_v42 = vadd.f32 %v482_v11, %v481_v53  ;;  %v484_v2 = vsel %vm272_vm2, %v471_v45, 0.0  ;;  %v3695_v7 = vld [vmem:[#allocation37_spill] sm:$0xff]  ;;  %v3696_v11 = vld [vmem:[#allocation44_spill] sm:$0xff] }
 0x276   :  { %v1649_v3 = vrot.slane %v1648_v55, 4  ;;  %v962_v12 = vsel %vm272_vm2, %v949_v51, 0.0  ;;  %v964_v46 = vsel %vm272_vm2, %v950_v9, 0.0  ;;  %v3697_v53 = vld [vmem:[#allocation5_spill] sm:$0xff] }
 0x277   :  { %780 = vperm.xlu1 %2319, %v2538_v35   ;;  %v899_v50 = vrot.slane %v898_v26, 4  ;;  %v963_v45 = vadd.f32 %v962_v12, %v961_v58  ;;  %v485_v51 = vadd.f32 %v484_v2, %v483_v42 }
 0x278   :  { %v1469_v8 = vpop.permute.xlu1 %1468 }
 0x279   :  { %v1472_v5 = vmul.f32 %v1469_v8, %v2645_v49  ;;  %v3129_v8 = vpop.permute.xlu0 %662 }
 0x27a   :  { %3693 = vst [vmem:[#allocation6_spill] sm:$0xff] %v3129_v8 }
 0x27b   :  { %v1474_v10 = vsel %vm272_vm2, %v1472_v5, 0.0  ;;  %785 = vperm.xlu1 %2319, %v2524_v31   ;;  %v1014_v5 = vmul.f32 %v3695_v7, %v2545_v37 }
 0x27c   :  { %v1475_v59 = vadd.f32 %v1474_v10, %v1473_v44  ;;  %v1663_v13 = vpop.permute.xlu1 %1662  ;;  %v1021_v44 = vsel %vm272_vm2, %v1012_v43, 0.0  ;;  %v1015_v10 = vmul.f32 %v3696_v11, %v2556_v39 }
 0x27d   :  { %v1022_v24 = vadd.f32 %v1021_v44, %v1020_v29  ;;  %v1669_v43 = vmul.f32 %v2522_v30, %v1663_v13  ;;  %v1672_v29 = vsel %vm272_vm2, %v1670_v34, 0.0  ;;  %v543_v44 = vadd.f32 %v542_v57, %v3034_v61  ;;  %v3148_v9 = vpop.permute.xlu0 %1208  ;;  %v3698_v61 = vld [vmem:[#allocation7_spill] sm:$0xff] }
 0x27e   :  { %v1476_v15 = vrot.slane %v1475_v59, 4  ;;  %v1025_v13 = vsel %vm272_vm2, %v1014_v5, 0.0  ;;  %v900_v34 = vadd.f32 %v899_v50, %v898_v26  ;;  %v602_v57 = vmul.f32 %v3698_v61, %v2501_v22 }
 0x27f   :  { %790 = vperm.xlu1 %2319, %v2532_v33   ;;  %v1671_v12 = vsel %vm272_vm2, %v1669_v43, 0.0  ;;  %v1027_v42 = vsel %vm272_vm2, %v1015_v10, 0.0  ;;  %v545_v5 = vadd.f32 %v3008_v47, %v543_v44  ;;  %v3701_v43 = vld [vmem:[#allocation34_spill] sm:$0xff]  ;;  %v3703_v44 = vld [vmem:[#allocation21_spill] sm:$0xff] }
 0x280   :  { %v1477_v6 = vadd.f32 %v1476_v15, %v1475_v59  ;;  %v1023_v59 = vsel %vm272_vm2, %v1013_v63, 0.0  ;;  %v965_v15 = vadd.f32 %v964_v46, %v963_v45  ;;  %v1650_v63 = vadd.f32 %v1649_v3, %v1648_v55  ;;  %v3702_v3 = vld [vmem:[#allocation9_spill] sm:$0xff] }
 0x281   :  { %v463_v17 = vpop.permute.xlu1 %462  ;;  %v1024_v7 = vadd.f32 %v1023_v59, %v1022_v24  ;;  %v1016_v26 = vmul.f32 %v2541_v36, %v3701_v43  ;;  %v537_v10 = vmul.f32 %v3702_v3, %v2507_v25  ;;  %v3167_v47 = vsel %vm272_vm2, %v602_v57, 0.0 }
 0x282   :  { %v1478_v14 = vrot.slane %v1477_v6, 2  ;;  %v472_v56 = vmul.f32 %v3697_v53, %v463_v17  ;;  %v966_v50 = vrot.slane %v965_v15, 4 }
 0x283   :  { %795 = vperm.xlu1 %2319, %v2545_v37   ;;  %v1026_v45 = vadd.f32 %v1025_v13, %v1024_v7  ;;  %v1496_v13 = vmul.f32 %v3703_v44, %v2561_v40  ;;  %v3171_v7 = vpop.permute.xlu0 %1762 }
 0x284   :  { %v1479_v0 = vadd.f32 %v1478_v14, %v1477_v6  ;;  %v486_v58 = vsel %vm272_vm2, %v472_v56, 0.0  ;;  %v3700_v6 = vld [vmem:[#allocation8_spill] sm:$0xff]  ;;  %v1673_v14 = vadd.f32 %v1672_v29, %v1671_v12  ;;  %3704 = vst [vmem:[#allocation17_spill] sm:$0xff] %v3171_v7  ;;  %v3705_v29 = vld [vmem:[#allocation22_spill] sm:$0xff]  ;;  %v547_v12 = vadd.f32 %v3069_v27, %v545_v5  ;;  %v3706_v27 = vld [vmem:[#allocation23_spill] sm:$0xff] }
 0x285   :  { %v487_v17 = vadd.f32 %v486_v58, %v485_v51  ;;  %v738_v46 = vmul.f32 %v3700_v6, %v2501_v22  ;;  %v1028_v56 = vadd.f32 %v1027_v42, %v1026_v45  ;;  %v901_v51 = vrot.slane %v900_v34, 2 }
 0x286   :  { %v3156_v2 = vpop.permute.xlu1 %726  ;;  %v1480_v11 = vrot.slane %v1479_v0, 1  ;;  %v1651_v58 = vrot.slane %v1650_v63, 2  ;;  %v1029_v42 = vsel %vm272_vm2, %v1016_v26, 0.0  ;;  %v1674_v45 = vrot.slane %v1673_v14, 4  ;;  %v3707_v26 = vld [vmem:[#allocation18_spill] sm:$0xff] }
 0x287   :  { %3699 = vst [vmem:[#allocation13_spill] sm:$0xff] %v3156_v2  ;;  %v488_v24 = vrot.slane %v487_v17, 4  ;;  %800 = vperm.xlu1 %2319, %v2556_v39   ;;  %v3174_v6 = vsel %vm272_vm2, %v738_v46, 0.0  ;;  %v548_v46 = vsel %vm272_vm2, %v537_v10, 0.0  ;;  %v902_v3 = vadd.f32 %v901_v51, %v900_v34  ;;  %v3708_v34 = vld [vmem:[#allocation10_spill] sm:$0xff]  ;;  %v3196_v51 = vpop.permute.xlu0 %706 }
 0x288   :  { %v1481_v55 = vadd.f32 %v1480_v11, %v1479_v0  ;;  %v1695_v0 = vmul.f32 %v2567_v41, %v3705_v29  ;;  %v967_v11 = vadd.f32 %v966_v50, %v965_v15  ;;  %v1498_v44 = vsel %vm272_vm2, %v1496_v13, 0.0 }
 0x289   :  { %v489_v59 = vadd.f32 %v488_v24, %v487_v17  ;;  %v1078_v5 = vmul.f32 %v3706_v27, %v2538_v35  ;;  %v1652_v29 = vadd.f32 %v1651_v58, %v1650_v63  ;;  %v1077_v50 = vmul.f32 %v3707_v26, %v2528_v32 }
 0x28a   :  { %v1482_v61 = vmul.f32 0.0625, %v1481_v55  ;;  %v1030_v55 = vadd.f32 %v1029_v42, %v1028_v56  ;;  %v3189_v15 = vsel %vm272_vm2, %v1695_v0, 0.0  ;;  %v549_v56 = vadd.f32 %v548_v46, %v547_v12  ;;  %v3712_v46 = vld [vmem:[#allocation32_spill] sm:$0xff] }
 0x28b   :  { %v490_v17 = vrot.slane %v489_v59, 2  ;;  %805 = vperm.xlu1 %2319, %v2541_v36   ;;  %v1008_v57 = vpop.permute.xlu1 %1007  ;;  %v968_v13 = vrot.slane %v967_v11, 2  ;;  %v1675_v63 = vadd.f32 %v1674_v45, %v1673_v14  ;;  %v601_v27 = vmul.f32 %v3712_v46, %v2493_v19  ;;  %v3714_v45 = vld [vmem:[#allocation15_spill] sm:$0xff] }
 0x28c   :  { %v1017_v24 = vmul.f32 %v2551_v38, %v1008_v57  ;;  %1484 = vrot.lane.b32.xlu0 %v1482_v61, %s2375_s1  ;;  %v1653_v26 = vrot.slane %v1652_v29, 1 }
 0x28d   :  { %v491_v43 = vadd.f32 %v490_v17, %v489_v59  ;;  %v605_v59 = vmul.f32 %v3708_v34, %v2507_v25  ;;  %v3710_v17 = vld [vmem:[#allocation25_spill] sm:$0xff]  ;;  %v3713_v34 = vld [vmem:[#allocation12_spill] sm:$0xff]  ;;  %v969_v8 = vadd.f32 %v968_v13, %v967_v11  ;;  %v1676_v46 = vrot.slane %v1675_v63, 2  ;;  %v3228_v11 = vpop.permute.xlu0 %1251 }
 0x28e   :  { %v1031_v7 = vsel %vm272_vm2, %v1017_v24, 0.0  ;;  %v539_v0 = vmul.f32 %v2503_v23, %v3710_v17  ;;  %v903_v24 = vrot.slane %v902_v3, 1  ;;  %v538_v14 = vmul.f32 %v3713_v34, %v2516_v28  ;;  %v3716_v34 = vld [vmem:[#allocation11_spill] sm:$0xff]  ;;  %3718 = vst [vmem:[#allocation5_spill] sm:$0xff] %v3228_v11 }
 0x28f   :  { %v1032_v61 = vadd.f32 %v1031_v7, %v1030_v55  ;;  %810 = vperm.xlu1 %2319, %v2551_v38   ;;  %v492_v10 = vrot.slane %v491_v43, 1  ;;  %v1086_v7 = vsel %vm272_vm2, %v1078_v5, 0.0  ;;  %v3711_v55 = vld [vmem:[#allocation27_spill] sm:$0xff]  ;;  %v1085_v17 = vsel %vm272_vm2, %v1077_v50, 0.0 }
 0x290   :  { %v3198_v58 = vpop.permute.xlu1 %1267  ;;  %v1083_v12 = vmul.f32 %v2541_v36, %v3711_v55  ;;  %v3214_v5 = vsel %vm272_vm2, %v605_v59, 0.0  ;;  %v552_v4 = vsel %vm272_vm2, %v539_v0, 0.0  ;;  %v3221_v2 = vmul.f32 %v3716_v34, %v2507_v25 }
 0x291   :  { %3709 = vst [vmem:[#allocation37_spill] sm:$0xff] %v3198_v58  ;;  %v1033_v57 = vrot.slane %v1032_v61, 4  ;;  %v493_v42 = vadd.f32 %v492_v10, %v491_v43  ;;  %v1079_v58 = vmul.f32 %v2524_v31, %v3714_v45  ;;  %v3715_v10 = vld [vmem:[#allocation24_spill] sm:$0xff]  ;;  %v904_v50 = vadd.f32 %v903_v24, %v902_v3 }
 0x292   :  { %v1080_v55 = vmul.f32 %v2532_v33, %v3715_v10  ;;  %3717 = vst [vmem:[#allocation44_spill] sm:$0xff] %v3221_v2  ;;  %v3225_v59 = vsel %vm272_vm2, %v1083_v12, 0.0  ;;  %v1087_v10 = vadd.f32 %v1086_v7, %v1085_v17  ;;  %v550_v0 = vsel %vm272_vm2, %v538_v14, 0.0 }
 0x293   :  { %1422 = vperm.xlu1 %2319, %v2645_v49   ;;  %v494_v43 = vmul.f32 0.015625, %v493_v42  ;;  %v1034_v45 = vadd.f32 %v1033_v57, %v1032_v61  ;;  %v609_v42 = vsel %vm272_vm2, %v601_v27, 0.0  ;;  %v1088_v34 = vsel %vm272_vm2, %v1079_v58, 0.0  ;;  %v3719_v61 = vld [vmem:[#allocation39_spill] sm:$0xff]  ;;  %v3720_v58 = vld [vmem:[#allocation28_spill] sm:$0xff] }
 0x294   :  { %v1081_v57 = vmul.f32 %v3719_v61, %v2545_v37  ;;  %v1654_v3 = vadd.f32 %v1653_v26, %v1652_v29  ;;  %v1090_v24 = vsel %vm272_vm2, %v1080_v55, 0.0  ;;  %v1677_v12 = vadd.f32 %v1676_v46, %v1675_v63 }
 0x295   :  { %v1494_v52 = vpop.permute.xlu1 %1493  ;;  %496 = vrot.lane.b32.xlu0 %v494_v43, %s2376_s13  ;;  %v970_v7 = vrot.slane %v969_v8, 1  ;;  %v1082_v17 = vmul.f32 %v2969_v1, %v2556_v39  ;;  %v905_v11 = vmul.f32 0.015625, %v904_v50  ;;  %v1521_v2 = vmul.f32 %v3720_v58, %v2561_v40  ;;  %v3246_v1 = vpop.permute.xlu0 %1255 }
 0x296   :  { %v1497_v13 = vmul.f32 %v1494_v52, %v2645_v49  ;;  %v1035_v52 = vrot.slane %v1034_v45, 2  ;;  %v611_v61 = vadd.f32 %v3167_v47, %v609_v42  ;;  %v1089_v25 = vadd.f32 %v1088_v34, %v1087_v10 }
 0x297   :  { %1620 = vperm.xlu1 %2319, %v2567_v41   ;;  %v551_v26 = vadd.f32 %v550_v0, %v549_v56  ;;  %v1092_v63 = vsel %vm272_vm2, %v1081_v57, 0.0  ;;  %v1655_v46 = vmul.f32 0.0625, %v1654_v3  ;;  %v1094_v58 = vsel %vm272_vm2, %v1082_v17, 0.0  ;;  %v3721_v56 = vld [vmem:[#allocation30_spill] sm:$0xff] }
 0x298   :  { %v1499_v27 = vsel %vm272_vm2, %v1497_v13, 0.0  ;;  %v971_v13 = vadd.f32 %v970_v7, %v969_v8  ;;  %v1036_v47 = vadd.f32 %v1035_v52, %v1034_v45  ;;  %v1720_v0 = vmul.f32 %v2567_v41, %v3721_v56 }
 0x299   :  { %v1500_v43 = vadd.f32 %v1499_v27, %v1498_v44  ;;  %v1688_v14 = vpop.permute.xlu1 %1687  ;;  %v1091_v44 = vadd.f32 %v1090_v24, %v1089_v25  ;;  %v1678_v27 = vrot.slane %v1677_v12, 1  ;;  %v613_v34 = vadd.f32 %v3013_v48, %v611_v61 }
 0x29a   :  { %v1694_v29 = vmul.f32 %v2522_v30, %v1688_v14  ;;  %v3257_v24 = vsel %vm272_vm2, %v1521_v2, 0.0  ;;  %v553_v17 = vadd.f32 %v552_v4, %v551_v26  ;;  %v972_v52 = vmul.f32 0.015625, %v971_v13  ;;  %v3723_v4 = vld [vmem:[#allocation29_spill] sm:$0xff] }
 0x29b   :  { %v1501_v55 = vrot.slane %v1500_v43, 4  ;;  %907 = vrot.lane.b32.xlu1 %v905_v11, %s2374_s0  ;;  %v3722_v11 = vld [vmem:[#allocation33_spill] sm:$0xff]  ;;  %v1093_v3 = vadd.f32 %v1092_v63, %v1091_v44  ;;  %v1037_v14 = vrot.slane %v1036_v47, 1  ;;  %v3263_v63 = vsel %vm272_vm2, %v1720_v0, 0.0  ;;  %v3269_v44 = vpop.permute.xlu0 %1259 }
 0x29c   :  { %v1696_v50 = vsel %vm272_vm2, %v1694_v29, 0.0  ;;  %v607_v57 = vmul.f32 %v2503_v23, %v3722_v11 }
 0x29d   :  { %v1502_v42 = vadd.f32 %v1501_v55, %v1500_v43  ;;  %v1698_v10 = vadd.f32 %v3189_v15, %v1696_v50  ;;  %v1095_v15 = vadd.f32 %v1094_v58, %v1093_v3  ;;  %v1679_v43 = vadd.f32 %v1678_v27, %v1677_v12  ;;  %v3724_v58 = vld [vmem:[#allocation31_spill] sm:$0xff]  ;;  %v3725_v3 = vld [vmem:[#allocation42_spill] sm:$0xff] }
 0x29e   :  { %v531_v25 = vpop.permute.xlu1 %530  ;;  %v3266_v2 = vsel %vm272_vm2, %v607_v57, 0.0  ;;  %v615_v55 = vadd.f32 %v3089_v16, %v613_v34  ;;  %v1145_v12 = vmul.f32 %v3723_v4, %v2538_v35  ;;  %v1038_v57 = vadd.f32 %v1037_v14, %v1036_v47 }
 0x29f   :  { %v1503_v8 = vrot.slane %v1502_v42, 2  ;;  %v1699_v7 = vrot.slane %v1698_v10, 4  ;;  %v540_v45 = vmul.f32 %v3697_v53, %v531_v25  ;;  %1657 = vrot.lane.b32.xlu1 %v1655_v46, %s2374_s0  ;;  %v1097_v56 = vadd.f32 %v3225_v59, %v1095_v15  ;;  %v3290_v14 = vpop.permute.xlu0 %1263 }
 0x2a0   :  { %v1680_v16 = vmul.f32 0.0625, %v1679_v43  ;;  %v1211_v25 = vmul.f32 %v3725_v3, %v2528_v32 }
 0x2a1   :  { %v1504_v48 = vadd.f32 %v1503_v8, %v1502_v42  ;;  %v1700_v61 = vadd.f32 %v1699_v7, %v1698_v10  ;;  %v554_v29 = vsel %vm272_vm2, %v540_v45, 0.0  ;;  %v1212_v42 = vmul.f32 %v3724_v58, %v2538_v35  ;;  %v3726_v8 = vld [vmem:[#allocation19_spill] sm:$0xff] }
 0x2a2   :  { %v555_v46 = vadd.f32 %v554_v29, %v553_v17  ;;  %v1075_v50 = vpop.permute.xlu1 %1074  ;;  %v1144_v7 = vmul.f32 %v3726_v8, %v2528_v32 }
 0x2a3   :  { %v1505_v26 = vrot.slane %v1504_v48, 1  ;;  %v1701_v13 = vrot.slane %v1700_v61, 2  ;;  %v1084_v27 = vmul.f32 %v2551_v38, %v1075_v50  ;;  %974 = vrot.lane.b32.xlu1 %v972_v52, %s2375_s1  ;;  %v3727_v52 = vld [vmem:[#allocation14_spill] sm:$0xff]  ;;  %v3728_v50 = vld [vmem:[#allocation45_spill] sm:$0xff] }
 0x2a4   :  { %v556_v10 = vrot.slane %v555_v46, 4  ;;  %v606_v29 = vmul.f32 %v3727_v52, %v2516_v28  ;;  %v1213_v59 = vmul.f32 %v2524_v31, %v3728_v50 }
 0x2a5   :  { %v1702_v0 = vadd.f32 %v1701_v13, %v1700_v61  ;;  %v1098_v34 = vsel %vm272_vm2, %v1084_v27, 0.0  ;;  %v1506_v11 = vadd.f32 %v1505_v26, %v1504_v48  ;;  %v1153_v48 = vsel %vm272_vm2, %v1145_v12, 0.0  ;;  %v3729_v26 = vld [vmem:[#allocation35_spill] sm:$0xff]  ;;  %v3730_v27 = vld [vmem:[#allocation16_spill] sm:$0xff] }
 0x2a6   :  { %v557_v45 = vadd.f32 %v556_v10, %v555_v46  ;;  %v1099_v17 = vadd.f32 %v1098_v34, %v1097_v56  ;;  %v1220_v61 = vsel %vm272_vm2, %v1212_v42, 0.0  ;;  %v1150_v13 = vmul.f32 %v2541_v36, %v3729_v26 }
 0x2a7   :  { %v1703_v15 = vrot.slane %v1702_v0, 1  ;;  %v3287_v43 = vpop.permute.xlu1 %1204  ;;  %1682 = vrot.lane.b32.xlu1 %v1680_v16, %s2375_s1  ;;  %v1507_v47 = vmul.f32 0.0625, %v1506_v11  ;;  %v1146_v58 = vmul.f32 %v2524_v31, %v3730_v27  ;;  %v1039_v10 = vmul.f32 0.015625, %v1038_v57 }
 0x2a8   :  { %v558_v46 = vrot.slane %v557_v45, 2  ;;  %v1100_v4 = vrot.slane %v1099_v17, 4  ;;  %v1219_v16 = vsel %vm272_vm2, %v1211_v25, 0.0  ;;  %v1152_v34 = vsel %vm272_vm2, %v1144_v7, 0.0 }
 0x2a9   :  { %1509 = vrot.lane.b32.xlu0 %v1507_v47, %s2376_s13  ;;  %v1704_v56 = vadd.f32 %v1703_v15, %v1702_v0  ;;  %v617_v42 = vadd.f32 %v3214_v5, %v615_v55  ;;  %v618_v3 = vsel %vm272_vm2, %v606_v29, 0.0  ;;  %v1154_v8 = vadd.f32 %v1153_v48, %v1152_v34  ;;  %v3731_v29 = vld [vmem:[#allocation26_spill] sm:$0xff] }
 0x2aa   :  { %v559_v11 = vadd.f32 %v558_v46, %v557_v45  ;;  %v1101_v12 = vadd.f32 %v1100_v4, %v1099_v17  ;;  %v1221_v52 = vadd.f32 %v1220_v61, %v1219_v16  ;;  %v1222_v50 = vsel %vm272_vm2, %v1213_v59, 0.0  ;;  %v3311_v17 = vpop.permute.xlu0 %730  ;;  %v3732_v59 = vld [vmem:[#allocation41_spill] sm:$0xff] }
 0x2ab   :  { %1041 = vrot.lane.b32.xlu1 %v1039_v10, %s2376_s13  ;;  %v1214_v57 = vmul.f32 %v2532_v33, %v3021_v62  ;;  %v1155_v7 = vsel %vm272_vm2, %v1146_v58, 0.0  ;;  %v737_v45 = vmul.f32 %v3196_v51, %v2493_v19  ;;  %v1705_v55 = vmul.f32 0.0625, %v1704_v56  ;;  %v3733_v51 = vld [vmem:[#allocation46_spill] sm:$0xff] }
 0x2ac   :  { %v560_v0 = vrot.slane %v559_v11, 1  ;;  %v1102_v15 = vrot.slane %v1101_v12, 2  ;;  %v1519_v25 = vpop.permute.xlu1 %1518  ;;  %v1147_v47 = vmul.f32 %v2532_v33, %v3731_v29  ;;  %v1148_v48 = vmul.f32 %v3732_v59, %v2545_v37 }
 0x2ad   :  { %v1522_v5 = vmul.f32 %v1519_v25, %v2645_v49  ;;  %v619_v46 = vadd.f32 %v618_v3, %v617_v42  ;;  %v1156_v4 = vadd.f32 %v1155_v7, %v1154_v8  ;;  %v1223_v26 = vadd.f32 %v1222_v50, %v1221_v52 }
 0x2ae   :  { %v1103_v62 = vadd.f32 %v1102_v15, %v1101_v12  ;;  %v561_v61 = vadd.f32 %v560_v0, %v559_v11  ;;  %v1149_v58 = vmul.f32 %v3733_v51, %v2556_v39  ;;  %v1224_v25 = vsel %vm272_vm2, %v1214_v57, 0.0  ;;  %v3333_v15 = vpop.permute.xlu0 %734 }
 0x2af   :  { %v1524_v27 = vsel %vm272_vm2, %v1522_v5, 0.0  ;;  %1707 = vrot.lane.b32.xlu1 %v1705_v55, %s2376_s13  ;;  %v1215_v11 = vmul.f32 %v3107_v21, %v2545_v37  ;;  %v745_v12 = vsel %vm272_vm2, %v737_v45, 0.0  ;;  %v1157_v3 = vsel %vm272_vm2, %v1147_v47, 0.0  ;;  %v3734_v47 = vld [vmem:[#allocation40_spill] sm:$0xff] }
 0x2b0   :  { %v1104_v10 = vrot.slane %v1103_v62, 1  ;;  %v1525_v56 = vadd.f32 %v1524_v27, %v3257_v24  ;;  %v1713_v16 = vpop.permute.xlu1 %1712  ;;  %v562_v34 = vmul.f32 0.015625, %v561_v61  ;;  %v1159_v8 = vsel %vm272_vm2, %v1148_v48, 0.0 }
 0x2b1   :  { %v1719_v42 = vmul.f32 %v2522_v30, %v1713_v16  ;;  %v1158_v50 = vadd.f32 %v1157_v3, %v1156_v4  ;;  %v1216_v57 = vmul.f32 %v3076_v54, %v2556_v39  ;;  %v1225_v0 = vadd.f32 %v1224_v25, %v1223_v26  ;;  %v3735_v25 = vld [vmem:[#allocation43_spill] sm:$0xff] }
 0x2b2   :  { %v1526_v52 = vrot.slane %v1525_v56, 4  ;;  %564 = vrot.lane.b32.xlu0 %v562_v34, %s2377_s14  ;;  %v1105_v24 = vadd.f32 %v1104_v10, %v1103_v62  ;;  %v1161_v7 = vsel %vm272_vm2, %v1149_v58, 0.0  ;;  %v1163_v29 = vsel %vm272_vm2, %v1150_v13, 0.0 }
 0x2b3   :  { %v1721_v21 = vsel %vm272_vm2, %v1719_v42, 0.0  ;;  %v670_v59 = vmul.f32 %v3734_v47, %v2501_v22  ;;  %v1160_v48 = vadd.f32 %v1159_v8, %v1158_v50  ;;  %v1217_v54 = vmul.f32 %v2541_v36, %v3287_v43  ;;  %v3736_v47 = vld [vmem:[#allocation47_spill] sm:$0xff] }
 0x2b4   :  { %v1527_v45 = vadd.f32 %v1526_v52, %v1525_v56  ;;  %v1723_v5 = vadd.f32 %v3263_v63, %v1721_v21  ;;  %v1106_v55 = vmul.f32 0.015625, %v1105_v24  ;;  %v621_v27 = vadd.f32 %v3266_v2, %v619_v46 }
 0x2b5   :  { %v599_v62 = vpop.permute.xlu1 %598  ;;  %v1226_v63 = vsel %vm272_vm2, %v1215_v11, 0.0  ;;  %v747_v13 = vadd.f32 %v3174_v6, %v745_v12  ;;  %v1162_v51 = vadd.f32 %v1161_v7, %v1160_v48  ;;  %v1228_v58 = vsel %vm272_vm2, %v1216_v57, 0.0  ;;  %v3353_v11 = vpop.permute.xlu0 %1593 }
 0x2b6   :  { %v1528_v61 = vrot.slane %v1527_v45, 2  ;;  %v1724_v4 = vrot.slane %v1723_v5, 4  ;;  %v608_v26 = vmul.f32 %v3697_v53, %v599_v62  ;;  %1108 = vrot.lane.b32.xlu1 %v1106_v55, %s2377_s14  ;;  %v1227_v10 = vadd.f32 %v1226_v63, %v1225_v0  ;;  %v3737_v62 = vld [vmem:[#allocation4_spill] sm:$0xff] }
 0x2b7   :  { %v678_v34 = vsel %vm272_vm2, %v670_v59, 0.0  ;;  %v671_v42 = vmul.f32 %v2489_v18, %v3735_v25  ;;  %v1230_v2 = vsel %vm272_vm2, %v1217_v54, 0.0  ;;  %v1218_v24 = vmul.f32 %v2551_v38, %v3148_v9  ;;  %v3739_v9 = vld [vmem:[#allocation13_spill] sm:$0xff] }
 0x2b8   :  { %v1529_v56 = vadd.f32 %v1528_v61, %v1527_v45  ;;  %v1725_v16 = vadd.f32 %v1724_v4, %v1723_v5  ;;  %v622_v43 = vsel %vm272_vm2, %v608_v26, 0.0  ;;  %v1229_v6 = vadd.f32 %v1228_v58, %v1227_v10  ;;  %v3738_v61 = vld [vmem:[#allocation50_spill] sm:$0xff] }
 0x2b9   :  { %v623_v46 = vadd.f32 %v622_v43, %v621_v27  ;;  %v1142_v3 = vpop.permute.xlu1 %1141  ;;  %v749_v50 = vadd.f32 %v3024_v60, %v747_v13  ;;  %v1164_v0 = vadd.f32 %v1163_v29, %v1162_v51  ;;  %v680_v55 = vsel %vm272_vm2, %v671_v42, 0.0  ;;  %v3740_v13 = vld [vmem:[#allocation51_spill] sm:$0xff]  ;;  %v3742_v43 = vld [vmem:[#allocation49_spill] sm:$0xff]  ;;  %v3374_v42 = vpop.permute.xlu0 %1791 }
 0x2ba   :  { %v1530_v12 = vrot.slane %v1529_v56, 1  ;;  %v1726_v8 = vrot.slane %v1725_v16, 2  ;;  %v1151_v52 = vmul.f32 %v2551_v38, %v1142_v3  ;;  %v1231_v21 = vadd.f32 %v1230_v2, %v1229_v6  ;;  %v3743_v3 = vld [vmem:[#allocation36_spill] sm:$0xff] }
 0x2bb   :  { %v624_v57 = vrot.slane %v623_v46, 4  ;;  %v672_v59 = vmul.f32 %v2495_v20, %v3736_v47  ;;  %v673_v4 = vmul.f32 %v3738_v61, %v3737_v62  ;;  %v742_v60 = vmul.f32 %v3739_v9, %v2516_v28 }
 0x2bc   :  { %v1727_v7 = vadd.f32 %v1726_v8, %v1725_v16  ;;  %v1165_v45 = vsel %vm272_vm2, %v1151_v52, 0.0  ;;  %v1531_v5 = vadd.f32 %v1530_v12, %v1529_v56  ;;  %v1232_v63 = vsel %vm272_vm2, %v1218_v24, 0.0  ;;  %v3741_v56 = vld [vmem:[#allocation44_spill] sm:$0xff] }
 0x2bd   :  { %v625_v48 = vadd.f32 %v624_v57, %v623_v46  ;;  %v1166_v54 = vadd.f32 %v1165_v45, %v1164_v0  ;;  %v751_v51 = vadd.f32 %v3740_v13, %v749_v50  ;;  %v752_v16 = vsel %vm272_vm2, %v3741_v56, 0.0  ;;  %v3746_v13 = vld [vmem:[#allocation6_spill] sm:$0xff] }
 0x2be   :  { %v1728_v26 = vrot.slane %v1727_v7, 1  ;;  %v3367_v29 = vpop.permute.xlu1 %1271  ;;  %v1532_v27 = vmul.f32 0.0625, %v1531_v5  ;;  %v679_v25 = vadd.f32 %v678_v34, %v3742_v43  ;;  %v1233_v2 = vadd.f32 %v1232_v63, %v1231_v21  ;;  %v3744_v34 = vld [vmem:[#allocation48_spill] sm:$0xff] }
 0x2bf   :  { %v626_v58 = vrot.slane %v625_v48, 2  ;;  %v1167_v10 = vrot.slane %v1166_v54, 4  ;;  %v1546_v6 = vmul.f32 %v3743_v3, %v2561_v40  ;;  %v682_v12 = vsel %vm272_vm2, %v672_v59, 0.0 }
 0x2c0   :  { %1534 = vrot.lane.b32.xlu0 %v1532_v27, %s2377_s14  ;;  %v1729_v46 = vadd.f32 %v1728_v26, %v1727_v7  ;;  %v681_v24 = vadd.f32 %v680_v55, %v679_v25  ;;  %v684_v50 = vsel %vm272_vm2, %v673_v4, 0.0  ;;  %v754_v57 = vsel %vm272_vm2, %v742_v60, 0.0  ;;  %v3745_v55 = vld [vmem:[#allocation38_spill] sm:$0xff] }
 0x2c1   :  { %v627_v8 = vadd.f32 %v626_v58, %v625_v48  ;;  %v1168_v52 = vadd.f32 %v1167_v10, %v1166_v54  ;;  %v674_v45 = vmul.f32 %v3744_v34, %v2516_v28  ;;  %v753_v21 = vadd.f32 %v752_v16, %v751_v51  ;;  %v3393_v58 = vpop.permute.xlu0 %231  ;;  %v3748_v34 = vld [vmem:[#allocation5_spill] sm:$0xff] }
 0x2c2   :  { %v1730_v0 = vmul.f32 0.0625, %v1729_v46  ;;  %v683_v61 = vadd.f32 %v682_v12, %v681_v24  ;;  %v743_v9 = vmul.f32 %v2503_v23, %v3311_v17  ;;  %v1234_v59 = vrot.slane %v1233_v2, 4 }
 0x2c3   :  { %v628_v5 = vrot.slane %v627_v8, 1  ;;  %v1169_v47 = vrot.slane %v1168_v52, 2  ;;  %v1544_v7 = vpop.permute.xlu1 %1543  ;;  %v1745_v54 = vmul.f32 %v2567_v41, %v3745_v55  ;;  %v755_v4 = vadd.f32 %v754_v57, %v753_v21  ;;  %v3747_v57 = vld [vmem:[#allocation20_spill] sm:$0xff] }
 0x2c4   :  { %v1547_v48 = vmul.f32 %v1544_v7, %v2645_v49  ;;  %1732 = vrot.lane.b32.xlu1 %v1730_v0, %s2377_s14  ;;  %v1548_v27 = vsel %vm272_vm2, %v1546_v6, 0.0  ;;  %v685_v63 = vadd.f32 %v684_v50, %v683_v61  ;;  %v675_v51 = vmul.f32 %v2503_v23, %v3746_v13 }
 0x2c5   :  { %v1170_v60 = vadd.f32 %v1169_v47, %v1168_v52  ;;  %v629_v26 = vadd.f32 %v628_v5, %v627_v8  ;;  %v686_v10 = vsel %vm272_vm2, %v674_v45, 0.0  ;;  %v756_v46 = vsel %vm272_vm2, %v743_v9, 0.0 }
 0x2c6   :  { %v1549_v17 = vsel %vm272_vm2, %v1547_v48, 0.0  ;;  %v744_v3 = vmul.f32 %v3697_v53, %v3333_v15  ;;  %v1235_v6 = vadd.f32 %v1234_v59, %v1233_v2  ;;  %v1747_v8 = vsel %vm272_vm2, %v1745_v54, 0.0  ;;  %v3412_v59 = vpop.permute.xlu0 %236 }
 0x2c7   :  { %v1171_v56 = vrot.slane %v1170_v60, 1  ;;  %v1550_v16 = vadd.f32 %v1549_v17, %v1548_v27  ;;  %v1738_v43 = vpop.permute.xlu1 %1737  ;;  %v630_v25 = vmul.f32 0.015625, %v629_v26  ;;  %v757_v52 = vadd.f32 %v756_v46, %v755_v4 }
 0x2c8   :  { %v1744_v12 = vmul.f32 %v2522_v30, %v1738_v43  ;;  %v1278_v0 = vmul.f32 %v3747_v57, %v2528_v32  ;;  %v1279_v45 = vmul.f32 %v3748_v34, %v2538_v35  ;;  %v687_v21 = vadd.f32 %v686_v10, %v685_v63 }
 0x2c9   :  { %v1551_v24 = vrot.slane %v1550_v16, 4  ;;  %632 = vrot.lane.b32.xlu0 %v630_v25, %s2378_s15  ;;  %v1172_v50 = vadd.f32 %v1171_v56, %v1170_v60  ;;  %v688_v7 = vsel %vm272_vm2, %v675_v51, 0.0  ;;  %v1280_v61 = vmul.f32 %v2524_v31, %v3246_v1 }
 0x2ca   :  { %v1746_v15 = vsel %vm272_vm2, %v1744_v12, 0.0  ;;  %v758_v9 = vsel %vm272_vm2, %v744_v3, 0.0  ;;  %v1236_v48 = vrot.slane %v1235_v6, 2  ;;  %v1286_v27 = vsel %vm272_vm2, %v1278_v0, 0.0 }
 0x2cb   :  { %v1552_v2 = vadd.f32 %v1551_v24, %v1550_v16  ;;  %v1748_v5 = vadd.f32 %v1747_v8, %v1746_v15  ;;  %v1173_v47 = vmul.f32 0.015625, %v1172_v50  ;;  %v759_v54 = vadd.f32 %v758_v9, %v757_v52  ;;  %v3422_v52 = vpop.permute.xlu0 %241  ;;  %v2340_v9 = vld [vmem:[%s3614_s4 + $0x34] ss:$8 sps:$4 sm:$0xff]  }
 0x2cc   :  { %v667_v55 = vpop.permute.xlu1 %666  ;;  %v1287_v63 = vsel %vm272_vm2, %v1279_v45, 0.0  ;;  %v689_v13 = vadd.f32 %v688_v7, %v687_v21  ;;  %v1289_v10 = vsel %vm272_vm2, %v1280_v61, 0.0  ;;  %v1281_v56 = vmul.f32 %v2532_v33, %v3269_v44  ;;  %1930 = vmatprep.subr.bf16.mxu0 %v2340_v9  ;;  %1886 = vmatprep.subr.bf16.mxu1 %v2340_v9 }
 0x2cd   :  { %v1553_v4 = vrot.slane %v1552_v2, 2  ;;  %v1749_v60 = vrot.slane %v1748_v5, 4  ;;  %v676_v26 = vmul.f32 %v3697_v53, %v667_v55  ;;  %1175 = vrot.lane.b32.xlu1 %v1173_v47, %s2378_s15  ;;  %v1237_v16 = vadd.f32 %v1236_v48, %v1235_v6  ;;  %v3749_v48 = vld [vmem:[#allocation17_spill] sm:$0xff] }
 0x2ce   :  { %v1288_v46 = vadd.f32 %v1287_v63, %v1286_v27  ;;  %v760_v3 = vrot.slane %v759_v54, 4  ;;  %v1291_v45 = vsel %vm272_vm2, %v1281_v56, 0.0  ;;  %v1282_v44 = vmul.f32 %v3290_v14, %v2545_v37  ;;  %v3750_v14 = vld [vmem:[#allocation37_spill] sm:$0xff] }
 0x2cf   :  { %v1554_v51 = vadd.f32 %v1553_v4, %v1552_v2  ;;  %v1750_v1 = vadd.f32 %v1749_v60, %v1748_v5  ;;  %v690_v17 = vsel %vm272_vm2, %v676_v26, 0.0  ;;  %v1238_v15 = vrot.slane %v1237_v16, 1  ;;  %v2338_v2 = vld [vmem:[%s3614_s4 + $0x30] ss:$8 sps:$4 sm:$0xff]  }
 0x2d0   :  { %v691_v43 = vadd.f32 %v690_v17, %v689_v13  ;;  %v1565_v25 = vpop.permute.xlu1 %1564  ;;  %v1290_v50 = vadd.f32 %v1289_v10, %v1288_v46  ;;  %v761_v5 = vadd.f32 %v760_v3, %v759_v54  ;;  %v1769_v55 = vmul.f32 %v2522_v30, %v3749_v48  ;;  %1931 = vmatpush1.bf16.msra.mxu0 %v2338_v2 }
 0x2d1   :  { %v1555_v12 = vrot.slane %v1554_v51, 1  ;;  %v1751_v8 = vrot.slane %v1750_v1, 2  ;;  %v1571_v0 = vmul.f32 %v1565_v25, %v2561_v40  ;;  %v1283_v4 = vmul.f32 %v3750_v14, %v2556_v39  ;;  %1887 = vmatpush1.bf16.msra.mxu1 %v2338_v2 }
 0x2d2   :  { %v692_v24 = vrot.slane %v691_v43, 4  ;;  %v1292_v26 = vadd.f32 %v1291_v45, %v1290_v50  ;;  %v1293_v13 = vsel %vm272_vm2, %v1282_v44, 0.0  ;;  %v1239_v3 = vadd.f32 %v1238_v15, %v1237_v16  ;;  %v2343_v16 = vld [vmem:[%s3614_s4 + $0x24] ss:$8 sps:$4 sm:$0xff]  }
 0x2d3   :  { %v1752_v57 = vadd.f32 %v1751_v8, %v1750_v1  ;;  %v1556_v34 = vadd.f32 %v1555_v12, %v1554_v51  ;;  %v1573_v27 = vsel %vm272_vm2, %v1571_v0, 0.0  ;;  %v3443_v51 = vpop.permute.xlu0 %246  ;;  %v1284_v1 = vmul.f32 %v2541_v36, %v3367_v29  ;;  %v2341_v0 = vld [vmem:[%s3614_s4 + $0x20] ss:$8 sps:$4 sm:$0xff]   ;;  %1932 = vmatprep.subr.bf16.mxu0 %v2343_v16  ;;  %1888 = vmatprep.subr.bf16.mxu1 %v2343_v16 }
 0x2d4   :  { %v693_v6 = vadd.f32 %v692_v24, %v691_v43  ;;  %v1569_v21 = vpop.permute.xlu1 %1568  ;;  %v762_v43 = vrot.slane %v761_v5, 2  ;;  %v1295_v12 = vsel %vm272_vm2, %v1283_v4, 0.0  ;;  %v1771_v50 = vsel %vm272_vm2, %v1769_v55, 0.0  ;;  %1933 = vmatpush1.bf16.msra.mxu0 %v2341_v0 }
 0x2d5   :  { %v1753_v47 = vrot.slane %v1752_v57, 1  ;;  %v1572_v7 = vmul.f32 %v1569_v21, %v2645_v49  ;;  %v1557_v61 = vmul.f32 0.0625, %v1556_v34  ;;  %v1297_v34 = vsel %vm272_vm2, %v1284_v1, 0.0  ;;  %1889 = vmatpush1.bf16.msra.mxu1 %v2341_v0 }
 0x2d6   :  { %v694_v60 = vrot.slane %v693_v6, 2  ;;  %v1240_v2 = vmul.f32 0.015625, %v1239_v3  ;;  %v1597_v14 = vmul.f32 %v3353_v11, %v2645_v49 }
 0x2d7   :  { %v1574_v54 = vsel %vm272_vm2, %v1572_v7, 0.0  ;;  %1559 = vrot.lane.b32.xlu0 %v1557_v61, %s2378_s15  ;;  %v1754_v63 = vadd.f32 %v1753_v47, %v1752_v57  ;;  %v1294_v57 = vadd.f32 %v1293_v13, %v1292_v26  ;;  %v763_v47 = vadd.f32 %v762_v43, %v761_v5  ;;  %v3459_v7 = vpop.permute.xlu0 %251 }
 0x2d8   :  { %v695_v17 = vadd.f32 %v694_v60, %v693_v6  ;;  %v1575_v10 = vadd.f32 %v1574_v54, %v1573_v27  ;;  %v1767_v56 = vpop.permute.xlu1 %1766 }
 0x2d9   :  { %v1770_v25 = vmul.f32 %v2567_v41, %v1767_v56  ;;  %v1755_v46 = vmul.f32 0.0625, %v1754_v63  ;;  %v1296_v21 = vadd.f32 %v1295_v12, %v1294_v57  ;;  %v1795_v56 = vmul.f32 %v2567_v41, %v3374_v42  ;;  %v2344_v12 = vld [vmem:[%s3614_s4 + $0x10] ss:$8 sps:$4 sm:$0xff]  }
 0x2da   :  { %v696_v8 = vrot.slane %v695_v17, 1  ;;  %v1576_v24 = vrot.slane %v1575_v10, 4 }
 0x2db   :  { %v1772_v29 = vsel %vm272_vm2, %v1770_v25, 0.0  ;;  %1757 = vrot.lane.b32.xlu1 %v1755_v46, %s2378_s15  ;;  %v1298_v4 = vadd.f32 %v1297_v34, %v1296_v21  ;;  %v3471_v43 = vpop.permute.xlu0 %256 }
 0x2dc   :  { %v1577_v45 = vadd.f32 %v1576_v24, %v1575_v10  ;;  %v1773_v44 = vadd.f32 %v1772_v29, %v1771_v50  ;;  %v697_v6 = vadd.f32 %v696_v8, %v695_v17  ;;  %v764_v17 = vrot.slane %v763_v47, 1  ;;  %v2346_v8 = vld [vmem:[%s3614_s4 + $0x14] ss:$8 sps:$4 sm:$0xff]  }
 0x2dd   :  { %v1276_v15 = vpop.permute.xlu1 %1275  ;;  %v1599_v10 = vsel %vm272_vm2, %v1597_v14, 0.0  ;;  %1934 = vmatprep.subr.bf16.mxu0 %v2346_v8  ;;  %1890 = vmatprep.subr.bf16.mxu1 %v2346_v8 }
 0x2de   :  { %v1578_v61 = vrot.slane %v1577_v45, 2  ;;  %v1774_v9 = vrot.slane %v1773_v44, 4  ;;  %v1285_v48 = vmul.f32 %v2551_v38, %v1276_v15  ;;  %v698_v55 = vmul.f32 0.015625, %v697_v6  ;;  %1935 = vmatpush1.bf16.msra.mxu0 %v2344_v12  ;;  %1891 = vmatpush1.bf16.msra.mxu1 %v2344_v12 }
 0x2df   :  { %1242 = vrot.lane.b32.xlu1 %v1240_v2, %s2379_s23  ;;  %v765_v16 = vadd.f32 %v764_v17, %v763_v47  ;;  %v265_v6 = vmul.f32 %v3393_v58, %v2501_v22  ;;  %v2347_v2 = vld [vmem:[%s3614_s4] ss:$8 sps:$4 sm:$0xff]   ;;  %v2349_v47 = vld [vmem:[%s3614_s4 + $0x4] ss:$8 sps:$4 sm:$0xff]   ;;  %v262_v22 = vpop.permute.xlu0 %261  ;;  %s2380_s4 = smov 56   ;;  %v269_v12 = vmul.f32 %v3459_v7, %v2516_v28 }
 0x2e0   :  { %v1579_v60 = vadd.f32 %v1578_v61, %v1577_v45  ;;  %v1775_v5 = vadd.f32 %v1774_v9, %v1773_v44  ;;  %v1299_v26 = vsel %vm272_vm2, %v1285_v48, 0.0  ;;  %700 = vrot.lane.b32.xlu0 %v698_v55, %s2379_s23  ;;  %v1797_v44 = vsel %vm272_vm2, %v1795_v56, 0.0  ;;  %1892 = vmatprep.subr.bf16.mxu1 %v2349_v47 }
 0x2e1   :  { %v1300_v27 = vadd.f32 %v1299_v26, %v1298_v4  ;;  %v1590_v54 = vpop.permute.xlu1 %1589  ;;  %v266_v55 = vmul.f32 %v2489_v18, %v3412_v59  ;;  %v766_v4 = vmul.f32 0.015625, %v765_v16  ;;  %1936 = vmatprep.subr.bf16.mxu0 %v2349_v47  ;;  %v282_v16 = vsel %vm272_vm2, %v269_v12, 0.0 }
 0x2e2   :  { %v1580_v63 = vrot.slane %v1579_v60, 1  ;;  %v1776_v13 = vrot.slane %v1775_v5, 2  ;;  %v1596_v1 = vmul.f32 %v1590_v54, %v2561_v40  ;;  %1893 = vmatpush1.bf16.msra.mxu1 %v2347_v2  ;;  %1937 = vmatpush1.bf16.msra.mxu0 %v2347_v2  ;;  %v274_v54 = vsel %vm272_vm2, %v265_v6, 0.0 }
 0x2e3   :  { %v1301_v11 = vrot.slane %v1300_v27, 4  ;;  %v276_v17 = vsel %vm272_vm2, %v266_v55, 0.0 }
 0x2e4   :  { %v1777_v25 = vadd.f32 %v1776_v13, %v1775_v5  ;;  %v1598_v46 = vsel %vm272_vm2, %v1596_v1, 0.0  ;;  %v1581_v3 = vadd.f32 %v1580_v63, %v1579_v60  ;;  %v267_v63 = vmul.f32 %v2495_v20, %v3422_v52  ;;  %v3504_v52 = vpop.permute.xlu0 %1417 }
 0x2e5   :  { %v1302_v24 = vadd.f32 %v1301_v11, %v1300_v27  ;;  %v1600_v50 = vadd.f32 %v1599_v10, %v1598_v46  ;;  %v1788_v57 = vpop.permute.xlu1 %1787  ;;  %v268_v11 = vmul.f32 %v3443_v51, %v3737_v62  ;;  %v270_v62 = vmul.f32 %v2503_v23, %v3471_v43 }
 0x2e6   :  { %v1778_v29 = vrot.slane %v1777_v25, 1  ;;  %v1794_v42 = vmul.f32 %v2522_v30, %v1788_v57  ;;  %v1582_v0 = vmul.f32 0.0625, %v1581_v3  ;;  %v278_v3 = vsel %vm272_vm2, %v267_v63, 0.0 }
 0x2e7   :  { %v1303_v34 = vrot.slane %v1302_v24, 2  ;;  %v1601_v45 = vrot.slane %v1600_v50, 4  ;;  %v284_v6 = vsel %vm272_vm2, %v270_v62, 0.0 }
 0x2e8   :  { %v1796_v21 = vsel %vm272_vm2, %v1794_v42, 0.0  ;;  %1584 = vrot.lane.b32.xlu0 %v1582_v0, %s2379_s23  ;;  %v1779_v15 = vadd.f32 %v1778_v29, %v1777_v25  ;;  %v280_v29 = vsel %vm272_vm2, %v268_v11, 0.0  ;;  %v1616_v7 = vpop.permute.xlu0 %1615 }
 0x2e9   :  { %v1304_v61 = vadd.f32 %v1303_v34, %v1302_v24  ;;  %v1602_v9 = vadd.f32 %v1601_v45, %v1600_v50  ;;  %v1798_v48 = vadd.f32 %v1797_v44, %v1796_v21  ;;  %v271_v34 = vmul.f32 %v3697_v53, %v262_v22 }
 0x2ea   :  { %v227_v58 = vpop.permute.xlu1 %226  ;;  %v1780_v14 = vmul.f32 0.0625, %v1779_v15 }
 0x2eb   :  { %v1305_v60 = vrot.slane %v1304_v61, 1  ;;  %v1603_v5 = vrot.slane %v1602_v9, 2  ;;  %v1799_v26 = vrot.slane %v1798_v48, 4  ;;  %v264_v27 = vmul.f32 %v227_v58, %v2493_v19 }
 0x2ec   :  { %1782 = vrot.lane.b32.xlu1 %v1780_v14, %s2379_s23  ;;  %768 = vrot.lane.b32.xlu0 %v766_v4, %s2380_s4  ;;  %v286_v2 = vsel %vm272_vm2, %v271_v34, 0.0  ;;  %v361_v23 = vpop.permute.xlu0 %360 }
 0x2ed   :  { %v1604_v18 = vadd.f32 %v1603_v5, %v1602_v9  ;;  %v1800_v59 = vadd.f32 %v1799_v26, %v1798_v48  ;;  %v273_v13 = vsel %vm272_vm2, %v264_v27, 0.0  ;;  %v1306_v1 = vadd.f32 %v1305_v60, %v1304_v61 }
 0x2ee   :  { %v275_v19 = vadd.f32 %v274_v54, %v273_v13  ;;  %v776_v10 = vpop.permute.xlu1 %775 }
 0x2ef   :  { %v1605_v56 = vrot.slane %v1604_v18, 1  ;;  %v1801_v25 = vrot.slane %v1800_v59, 2  ;;  %v1307_v20 = vmul.f32 0.015625, %v1306_v1  ;;  %v813_v9 = vmul.f32 %v776_v10, %v2528_v32 }
 0x2f0   :  { %v277_v46 = vadd.f32 %v276_v17, %v275_v19  ;;  %v3522_v55 = vpop.permute.xlu0 %1459 }
 0x2f1   :  { %v1802_v8 = vadd.f32 %v1801_v25, %v1800_v59  ;;  %1309 = vrot.lane.b32.xlu1 %v1307_v20, %s2380_s4  ;;  %v1606_v24 = vadd.f32 %v1605_v56, %v1604_v18  ;;  %v821_v5 = vsel %vm272_vm2, %v813_v9, 0.0 }
 0x2f2   :  { %v279_v50 = vadd.f32 %v278_v3, %v277_v46  ;;  %v781_v57 = vpop.permute.xlu1 %780 }
 0x2f3   :  { %v1803_v51 = vrot.slane %v1802_v8, 1  ;;  %v1607_v42 = vmul.f32 0.0625, %v1606_v24  ;;  %v814_v61 = vmul.f32 %v781_v57, %v2538_v35 }
 0x2f4   :  { %v281_v0 = vadd.f32 %v280_v29, %v279_v50  ;;  %v429_v18 = vpop.permute.xlu0 %428 }
 0x2f5   :  { %1609 = vrot.lane.b32.xlu0 %v1607_v42, %s2380_s4  ;;  %v1804_v28 = vadd.f32 %v1803_v51, %v1802_v8  ;;  %v822_v14 = vsel %vm272_vm2, %v814_v61, 0.0  ;;  %v1425_v8 = vmul.f32 %v3504_v52, %v2561_v40 }
 0x2f6   :  { %v283_v45 = vadd.f32 %v282_v16, %v281_v0  ;;  %v786_v44 = vpop.permute.xlu1 %785  ;;  %v823_v27 = vadd.f32 %v822_v14, %v821_v5 }
 0x2f7   :  { %v1805_v21 = vmul.f32 0.0625, %v1804_v28  ;;  %v815_v48 = vmul.f32 %v2524_v31, %v786_v44  ;;  %v1427_v51 = vsel %vm272_vm2, %v1425_v8, 0.0 }
 0x2f8   :  { %v285_v15 = vadd.f32 %v284_v6, %v283_v45 }
 0x2f9   :  { %1807 = vrot.lane.b32.xlu1 %v1805_v21, %s2380_s4  ;;  %v824_v26 = vsel %vm272_vm2, %v815_v48, 0.0 }
 0x2fa   :  { %v287_v43 = vadd.f32 %v286_v2, %v285_v15  ;;  %v791_v47 = vpop.permute.xlu1 %790  ;;  %v825_v59 = vadd.f32 %v824_v26, %v823_v27 }
 0x2fb   :  { %v816_v4 = vmul.f32 %v2532_v33, %v791_v47 }
 0x2fc   :  { %v288_v53 = vrot.slane %v287_v43, 4 }
 0x2fd   :  { %v826_v31 = vsel %vm272_vm2, %v816_v4, 0.0 }
 0x2fe   :  { %v796_v22 = vpop.permute.xlu1 %795  ;;  %v289_v58 = vadd.f32 %v288_v53, %v287_v43  ;;  %v827_v33 = vadd.f32 %v826_v31, %v825_v59  ;;  %v1485_v56 = vpop.permute.xlu0 %1484 }
 0x2ff   :  { %v817_v35 = vmul.f32 %v796_v22, %v2545_v37 }
 0x300   :  { %v290_v60 = vrot.slane %v289_v58, 2 }
 0x301   :  { %v828_v1 = vsel %vm272_vm2, %v817_v35, 0.0 }
 0x302   :  { %v801_v54 = vpop.permute.xlu1 %800  ;;  %v291_v32 = vadd.f32 %v290_v60, %v289_v58  ;;  %v829_v37 = vadd.f32 %v828_v1, %v827_v33 }
 0x303   :  { %v818_v63 = vmul.f32 %v801_v54, %v2556_v39 }
 0x304   :  { %v292_v13 = vrot.slane %v291_v32, 1 }
 0x305   :  { %v830_v10 = vsel %vm272_vm2, %v818_v63, 0.0 }
 0x306   :  { %v806_v17 = vpop.permute.xlu1 %805  ;;  %v293_v19 = vadd.f32 %v292_v13, %v291_v32  ;;  %v831_v39 = vadd.f32 %v830_v10, %v829_v37 }
 0x307   :  { %v819_v11 = vmul.f32 %v2541_v36, %v806_v17  ;;  %v497_v36 = vpop.permute.xlu0 %496 }
 0x308   :  { %v294_v25 = vmul.f32 0.015625, %v293_v19 }
 0x309   :  { %v832_v20 = vsel %vm272_vm2, %v819_v11, 0.0 }
 0x30a   :  { %296 = vst.msk [vmem:[#allocation2] sm:$0x1] %vm295_vm3, %v294_v25  ;;  %v811_v46 = vpop.permute.xlu1 %810  ;;  %v833_v12 = vadd.f32 %v832_v20, %v831_v39 }
 0x30b   :  { %364 = vst.msk [vmem:[#allocation2] sm:$0x1] %vm363_vm4, %v361_v23  ;;  %v820_v3 = vmul.f32 %v2551_v38, %v811_v46  ;;  %v1623_v38 = vmul.f32 %v2522_v30, %v1616_v7 }
 0x30c   :  { %432 = vst.msk [vmem:[#allocation2] sm:$0x1] %vm431_vm5, %v429_v18 }
 0x30d   :  { %500 = vst.msk [vmem:[#allocation2] sm:$0x1] %vm499_vm6, %v497_v36  ;;  %v834_v24 = vsel %vm272_vm2, %v820_v3, 0.0  ;;  %v1625_v45 = vsel %vm272_vm2, %v1623_v38, 0.0 }
 0x30e   :  { %v835_v50 = vadd.f32 %v834_v24, %v833_v12  ;;  %v1423_v57 = vpop.permute.xlu1 %1422  ;;  %v1825_v12 = vlaneseq  ;;  %v3575_v24 = vld [vmem:[%s3615_s5] sm:$0x3] }
 0x30f   :  { %v1426_v29 = vmul.f32 %v1423_v57, %v2645_v49 }
 0x310   :  { %v836_v62 = vrot.slane %v835_v50, 4  ;;  %v3569_v36 = vshrl.u32 %v1825_v12, 7 }
 0x311   :  { %v1428_v42 = vsel %vm272_vm2, %v1426_v29, 0.0 }
 0x312   :  { %v837_v0 = vadd.f32 %v836_v62, %v835_v50  ;;  %v1429_v16 = vadd.f32 %v1428_v42, %v1427_v51  ;;  %v1621_v34 = vpop.permute.xlu1 %1620  ;;  %v1827_v8 = vsub.s32 0, %v3569_v36 }
 0x313   :  { %v1624_v40 = vmul.f32 %v2567_v41, %v1621_v34 }
 0x314   :  { %v838_v52 = vrot.slane %v837_v0, 2  ;;  %v1430_v28 = vrot.slane %v1429_v16, 4  ;;  %v1828_v50 = vrot.slane %v3575_v24, %v1827_v8 }
 0x315   :  { %v1626_v44 = vsel %vm272_vm2, %v1624_v40, 0.0 }
 0x316   :  { %v839_v6 = vadd.f32 %v838_v52, %v837_v0  ;;  %v1431_v49 = vadd.f32 %v1430_v28, %v1429_v16  ;;  %v1627_v21 = vadd.f32 %v1626_v44, %v1625_v45  ;;  %v908_v15 = vpop.permute.xlu1 %907 }
 0x318   :  { %v1432_v2 = vrot.slane %v1431_v49, 2  ;;  %v1628_v23 = vrot.slane %v1627_v21, 4  ;;  %v840_v30 = vrot.slane %v839_v6, 1 }
 0x31a   :  { %v1433_v7 = vadd.f32 %v1432_v2, %v1431_v49  ;;  %v1629_v43 = vadd.f32 %v1628_v23, %v1627_v21  ;;  %v841_v47 = vadd.f32 %v840_v30, %v839_v6  ;;  %v1658_v61 = vpop.permute.xlu1 %1657  ;;  %v2350_v30 = vld [vmem:[%s3616_s6 + $0x18] sm:$0xff]  }
 0x31b   :  { %v1510_v60 = vpop.permute.xlu0 %1509 }
 0x31c   :  { %v1434_v53 = vrot.slane %v1433_v7, 1  ;;  %v1630_v9 = vrot.slane %v1629_v43, 2  ;;  %v842_v41 = vmul.f32 0.015625, %v841_v47  ;;  %v2352_v47 = vld [vmem:[%s3616_s6 + $0x8] sm:$0xff]  }
 0x31e   :  { %v1435_v48 = vadd.f32 %v1434_v53, %v1433_v7  ;;  %v1631_v22 = vadd.f32 %v1630_v9, %v1629_v43  ;;  %843 = vst.msk [vmem:[#allocation2 + $0x1] sm:$0x1] %vm295_vm3, %v842_v41  ;;  %v975_v58 = vpop.permute.xlu1 %974  ;;  %v2382_v7 = vmov 0.0   ;;  %v2351_v43 = vld [vmem:[%s3616_s6 + $0x10] sm:$0xff]  }
 0x31f   :  { %910 = vst.msk [vmem:[#allocation2 + $0x1] sm:$0x1] %vm363_vm4, %v908_v15  ;;  %2205 = vmatprep.subr.bf16.mxu1 %v2382_v7 }
 0x320   :  { %v1436_v14 = vmul.f32 0.0625, %v1435_v48  ;;  %v1632_v4 = vrot.slane %v1631_v22, 1  ;;  %977 = vst.msk [vmem:[#allocation2 + $0x1] sm:$0x1] %vm431_vm5, %v975_v58 }
 0x322   :  { %1437 = vst.msk [vmem:[#allocation3] sm:$0x1] %vm295_vm3, %v1436_v14  ;;  %v1633_v5 = vadd.f32 %v1632_v4, %v1631_v22  ;;  %v1683_v26 = vpop.permute.xlu1 %1682 }
 0x323   :  { %1462 = vst.msk [vmem:[#allocation3] sm:$0x1] %vm363_vm4, %v3522_v55 }
 0x324   :  { %1487 = vst.msk [vmem:[#allocation3] sm:$0x1] %vm431_vm5, %v1485_v56  ;;  %v1634_v35 = vmul.f32 0.0625, %v1633_v5  ;;  %v565_v27 = vpop.permute.xlu0 %564 }
 0x325   :  { %1512 = vst.msk [vmem:[#allocation3] sm:$0x1] %vm499_vm6, %v1510_v60 }
 0x326   :  { %568 = vst.msk [vmem:[#allocation2] sm:$0x1] %vm567_vm7, %v565_v27  ;;  %v1042_v54 = vpop.permute.xlu1 %1041 }
 0x327   :  { %1635 = vst.msk [vmem:[#allocation3 + $0x1] sm:$0x1] %vm295_vm3, %v1634_v35 }
 0x328   :  { %1660 = vst.msk [vmem:[#allocation3 + $0x1] sm:$0x1] %vm363_vm4, %v1658_v61  ;;  %v2353_v61 = vld [vmem:[%s3616_s6] sm:$0xff]  }
 0x329   :  { %1044 = vst.msk [vmem:[#allocation2 + $0x1] sm:$0x1] %vm499_vm6, %v1042_v54 }
 0x32a   :  { %1685 = vst.msk [vmem:[#allocation3 + $0x1] sm:$0x1] %vm431_vm5, %v1683_v26  ;;  %v1708_v32 = vpop.permute.xlu1 %1707 }
 0x32b   :  { %1710 = vst.msk [vmem:[#allocation3 + $0x1] sm:$0x1] %vm499_vm6, %v1708_v32 }
 0x32e   :  { %v1109_v55 = vpop.permute.xlu1 %1108 }
 0x32f   :  { %1111 = vst.msk [vmem:[#allocation2 + $0x1] sm:$0x1] %vm567_vm7, %v1109_v55 }
 0x332   :  { %v1535_v31 = vpop.permute.xlu0 %1534 }
 0x333   :  { %1537 = vst.msk [vmem:[#allocation3] sm:$0x1] %vm567_vm7, %v1535_v31 }
 0x336   :  { %v1733_v63 = vpop.permute.xlu1 %1732 }
 0x337   :  { %1735 = vst.msk [vmem:[#allocation3 + $0x1] sm:$0x1] %vm567_vm7, %v1733_v63 }
 0x33b   :  { %v633_v18 = vpop.permute.xlu0 %632 }
 0x33c   :  { %636 = vst.msk [vmem:[#allocation2] sm:$0x1] %vm635_vm8, %v633_v18 }
 0x33f   :  { %v1176_v59 = vpop.permute.xlu1 %1175 }
 0x340   :  { %1178 = vst.msk [vmem:[#allocation2 + $0x1] sm:$0x1] %vm635_vm8, %v1176_v59 }
 0x349   :  { %v1560_v13 = vpop.permute.xlu0 %1559 }
 0x34a   :  { %1562 = vst.msk [vmem:[#allocation3] sm:$0x1] %vm635_vm8, %v1560_v13 }
 0x34d   :  { %v1758_v1 = vpop.permute.xlu1 %1757 }
 0x34e   :  { %1760 = vst.msk [vmem:[#allocation3 + $0x1] sm:$0x1] %vm635_vm8, %v1758_v1 }
 0x351   :  { %v1243_v33 = vpop.permute.xlu1 %1242 }
 0x352   :  { %1245 = vst.msk [vmem:[#allocation2 + $0x1] sm:$0x1] %vm703_vm9, %v1243_v33  ;;  %v701_v17 = vpop.permute.xlu0 %700 }
 0x353   :  { %704 = vst.msk [vmem:[#allocation2] sm:$0x1] %vm703_vm9, %v701_v17 }
 0x35a   :  { %v1585_v19 = vpop.permute.xlu0 %1584 }
 0x35b   :  { %1587 = vst.msk [vmem:[#allocation3] sm:$0x1] %vm703_vm9, %v1585_v19  ;;  %v1831_v19 = vsub.s32 1, %v3569_v36 }
 0x35e   :  { %v1783_v10 = vpop.permute.xlu1 %1782  ;;  %v769_v11 = vpop.permute.xlu0 %768 }
 0x35f   :  { %1785 = vst.msk [vmem:[#allocation3 + $0x1] sm:$0x1] %vm703_vm9, %v1783_v10  ;;  %v1832_v10 = vrot.slane %v3575_v24, %v1831_v19  ;;  %v2146_v24 = vld [vmem:[%s3617_s7] ss:$0 sm:$0xff] }
 0x360   :  { %772 = vst.msk [vmem:[#allocation2] sm:$0x1] %vm771_vm10, %v769_v11 }
 0x363   :  { %v1310_v37 = vpop.permute.xlu1 %1309 }
 0x364   :  { %1312 = vst.msk [vmem:[#allocation2 + $0x1] sm:$0x1] %vm771_vm10, %v1310_v37 }
 0x367   :  { %v1610_v56 = vpop.permute.xlu0 %1609 }
 0x368   :  { %1612 = vst.msk [vmem:[#allocation3] sm:$0x1] %vm771_vm10, %v1610_v56 }
 0x36b   :  { %v1808_v25 = vpop.permute.xlu1 %1807  ;;  %v1811_v20 = vld [vmem:[#allocation2] sm:$0x3] }
 0x36c   :  { %1810 = vst.msk [vmem:[#allocation3 + $0x1] sm:$0x1] %vm771_vm10, %v1808_v25  ;;  %v1812_v39 = vpack.c.bf16 %v1811_v20, %v1811_v20 }
 0x36e   :  { %2144 = vmatmul.mubr.msk.bf16.vlgmr.msra.gmra.mxu1 %vm1359_vm1, %v1812_v39 }
 0x36f   :  { %2206 = vmatpush3.bf16.msra.mxu1 %v2350_v30  ;;  %2213 = vmatprep.mubr.msk.bf16.mxu1 %vm2383_vm12, %v2382_v7 }
 0x370   :  { %2207 = vmatprep.subr.bf16.mxu1 %v2382_v7 }
 0x373   :  { %v1813_v46 = vld [vmem:[#allocation3] sm:$0x3]  ;;  %2208 = vmatpush3.bf16.msra.mxu1 %v2351_v43 }
 0x374   :  { %v1814_v3 = vpack.c.bf16 %v1813_v46, %v1813_v46  ;;  %2209 = vmatprep.subr.bf16.mxu1 %v2382_v7 }
 0x376   :  { %2145 = vmatmul.mubr.msk.bf16.vlgmr.msra.gmra.mxu0 %vm1359_vm1, %v1814_v3 }
 0x377   :  { %2210 = vmatpush3.bf16.msra.mxu1 %v2352_v47 }
 0x378   :  { %2211 = vmatprep.subr.bf16.mxu1 %v2382_v7 }
 0x37b   :  { %2212 = vmatpush3.bf16.msra.mxu1 %v2353_v61 }
 0x42e   :  { %v1912_v57 = vpop.f32.mrf.mxu1 }
 0x42f   :  { %v1913_v29 = vadd.f32 %v1912_v57, %v1828_v50 }
 0x430   :  { %v3578_v62 = vpop.f32.mrf.mxu1 }
 0x431   :  { %1964 = vrot.lane.b32.xlu0 %v1913_v29, %s2381_s11  ;;  %v1915_v37 = vadd.f32 %v3578_v62, %v1832_v10 }
 0x432   :  { %v1916_v51 = vpop.f32.mrf.mxu1 }
 0x434   :  { %v1917_v38 = vpop.f32.mrf.mxu1 }
 0x436   :  { %v1956_v42 = vpop.f32.mrf.mxu0 }
 0x437   :  { %v1957_v0 = vadd.f32 %v1956_v42, %v1828_v50 }
 0x438   :  { %v3580_v16 = vpop.f32.mrf.mxu0 }
 0x439   :  { %1974 = vrot.lane.b32.xlu1 %v1957_v0, %s2381_s11  ;;  %v1959_v56 = vadd.f32 %v3580_v16, %v1832_v10 }
 0x43a   :  { %v1960_v34 = vpop.f32.mrf.mxu0 }
 0x43c   :  { %v1961_v40 = vpop.f32.mrf.mxu0 }
 0x4a3   :  { %v1965_v52 = vpop.permute.xlu0 %1964 }
 0x4a4   :  { %v1967_v28 = vmul.f32 %v1965_v52, %v1913_v29  ;;  %v1996_v45 = vmul.f32 %v1965_v52, %v1957_v0 }
 0x4a6   :  { %v1969_v44 = vsel %vm1968_vm11, %v1967_v28, 0.0  ;;  %v1997_v6 = vsel %vm1968_vm11, %v1996_v45, 0.0 }
 0x4a7   :  { %1970 = vadd.xlane.f32.xlu0 %v1969_v44 }
 0x4ab   :  { %v1975_v49 = vpop.permute.xlu1 %1974  ;;  %1998 = vadd.xlane.f32.xlu0 %v1997_v6 }
 0x4ac   :  { %v1977_v21 = vmul.f32 %v1975_v49, %v1913_v29  ;;  %v2001_v15 = vmul.f32 %v1975_v49, %v1957_v0 }
 0x4ae   :  { %v1978_v2 = vsel %vm1968_vm11, %v1977_v21, 0.0  ;;  %v2002_v23 = vsel %vm1968_vm11, %v2001_v15, 0.0 }
 0x4af   :  { %1979 = vadd.xlane.f32.xlu1 %v1978_v2  ;;  %2003 = vadd.xlane.f32.xlu0 %v2002_v23 }
 0x530   :  { %v1971_v53 = vpop.xlane.xlu0 %1970 }
 0x531   :  { %v1972_v22 = vmul.f32 0.125, %v1971_v53 }
 0x534   :  { %v1999_v9 = vpop.xlane.xlu0 %1998 }
 0x535   :  { %v2000_v58 = vmul.f32 0.125, %v1999_v9 }
 0x538   :  { %v1980_v41 = vpop.xlane.xlu1 %1979  ;;  %v2004_v48 = vpop.xlane.xlu0 %2003 }
 0x539   :  { %v1981_v14 = vmul.f32 0.125, %v1980_v41  ;;  %v2005_v4 = vmul.f32 0.125, %v2004_v48 }
 0x53b   :  { %v1982_v60 = vmax.f32 %v1972_v22, %v1981_v14  ;;  %v2006_v5 = vmax.f32 %v2000_v58, %v2005_v4 }
 0x53d   :  { %v1983_v26 = vsub.f32 %v1972_v22, %v1982_v60  ;;  %v1986_v35 = vsub.f32 %v1981_v14, %v1982_v60  ;;  %v2007_v27 = vsub.f32 %v2000_v58, %v2006_v5  ;;  %v2010_v54 = vsub.f32 %v2005_v4, %v2006_v5 }
 0x53f   :  { %v1984_v32 = vmul.f32 1.442695, %v1983_v26  ;;  %v1987_v55 = vmul.f32 1.442695, %v1986_v35  ;;  %v2008_v31 = vmul.f32 1.442695, %v2007_v27 }
 0x540   :  { %v2011_v63 = vmul.f32 1.442695, %v2010_v54 }
 0x541   :  { %2354 = vpow2.f32 %v1984_v32 }
 0x542   :  { %2356 = vpow2.f32 %v1987_v55 }
 0x543   :  { %2358 = vpow2.f32 %v2008_v31 }
 0x544   :  { %2360 = vpow2.f32 %v2011_v63 }
 0x54e   :  { %v2355_v18 = vpop.eup %2354 }
 0x54f   :  { %v2357_v59 = vpop.eup %2356 }
 0x550   :  { %v2359_v13 = vpop.eup %2358  ;;  %v1989_v1 = vadd.f32 %v2357_v59, %v2355_v18 }
 0x551   :  { %v2361_v33 = vpop.eup %2360 }
 0x552   :  { %2362 = vrcp.f32 %v1989_v1  ;;  %v2013_v17 = vadd.f32 %v2361_v33, %v2359_v13 }
 0x554   :  { %2364 = vrcp.f32 %v2013_v17 }
 0x55f   :  { %v2363_v11 = vpop.eup %2362 }
 0x560   :  { %v1991_v25 = vmul.f32 %v2363_v11, %v2355_v18  ;;  %v1993_v20 = vmul.f32 %v2363_v11, %v2357_v59 }
 0x561   :  { %v2365_v39 = vpop.eup %2364 }
 0x562   :  { %v2015_v46 = vmul.f32 %v2365_v39, %v2359_v13  ;;  %v2017_v3 = vmul.f32 %v2365_v39, %v2361_v33  ;;  %v1992_v12 = vmul.f32 %v1991_v25, %v1915_v37  ;;  %v1994_v8 = vmul.f32 %v1993_v20, %v1959_v56 }
 0x564   :  { %v1995_v50 = vadd.f32 %v1994_v8, %v1992_v12  ;;  %v2016_v57 = vmul.f32 %v2015_v46, %v1915_v37  ;;  %v2018_v29 = vmul.f32 %v2017_v3, %v1959_v56 }
 0x566   :  { %v2019_v51 = vadd.f32 %v2018_v29, %v2016_v57 }
 0x568   :  { %v2020_v38 = vadd.f32 %v2019_v51, %v1995_v50 }
 0x56a   :  { %v2021_v36 = vmul.f32 0.5, %v2020_v38 }
 0x56c   :  { %v2022_v42 = vpack.c.bf16 %v2021_v36, %v2021_v36 }
 0x56e   :  { %2214 = vmatmul.mubr.msk.bf16.vlgmr.msra.gmra.mxu1 %vm1359_vm1, %v2022_v42 }
 0x62e   :  { %v2099_v62 = vpop.f32.mrf.mxu1 }
 0x62f   :  { %v2100_v0 = vadd.f32 %v2146_v24, %v2099_v62 }
 0x630   :  { %v2215_v16 = vpop.f32.mrf.mxu1 }
 0x631   :  { %2105 = vst.msk [vmem:[%s3618_s8] sm:$0x3] %vm1968_vm11, %v2100_v0 }
 0x632   :  { %v2102_v34 = vpop.f32.mrf.mxu1 }
 0x634   :  { %v2216_v40 = vpop.f32.mrf.mxu1 }

</bundles_post_ra>
